<compile_context>
chip_gen: v5e
topology: v5e:2x2
jax: 0.10.0
libtpu: 0.0.40
codegen_flags: <defaults>
</compile_context>

<pallas_src>
import functools

import jax
import jax.numpy as jnp
from jax.experimental import pallas as pl
from jax.experimental.pallas import tpu as pltpu

F32 = jnp.float32
BF16 = jnp.bfloat16
BN_EPS = 1e-5
TK = 256                      # K tile for the im2col matmul (feeds 256-wide MXU)
TM = 256                      # M tile (rows of the im2col matrix)
VMEM_LIMIT = 32 * 1024 * 1024  # portable across v5e/v6e/v7x scoped defaults


def _rup(x, m):
    return (x + m - 1) // m * m


# --------------------------------------------------------------------------
# Pallas kernels
# --------------------------------------------------------------------------

def _conv_stats_kernel(x_ref, w_ref, o_ref, s_ref, acc_ref):
    """Tiled matmul (bf16 operands, f32 accumulation).  On the last K step,
    write the f32 conv tile and this M-tile's per-column partial BN sums
    (row 0 = sum, row 1 = sum of squares of an (8, cp) stats block)."""
    k = pl.program_id(1)

    @pl.when(k == 0)
    def _():
        acc_ref[...] = jnp.zeros_like(acc_ref)

    acc_ref[...] += jnp.dot(x_ref[...], w_ref[...],
                            preferred_element_type=jnp.float32)

    @pl.when(k == pl.num_programs(1) - 1)
    def _():
        acc = acc_ref[...]
        o_ref[...] = acc
        ssum = jnp.sum(acc, axis=0, keepdims=True)          # (1, cp)
        ssq = jnp.sum(acc * acc, axis=0, keepdims=True)      # (1, cp)
        rows = jax.lax.broadcasted_iota(jnp.int32, (8, acc.shape[1]), 0)
        s_ref[...] = jnp.where(rows == 0, ssum,
                               jnp.where(rows == 1, ssq, 0.0))


def _make_bn_apply_kernel(apply_relu, has_res):
    """y = [relu]( conv*scale + shift [+ residual] ), per M tile."""

    def kernel(*refs):
        if has_res:
            x_ref, sc_ref, sh_ref, r_ref, o_ref = refs
        else:
            x_ref, sc_ref, sh_ref, o_ref = refs
            r_ref = None
        y = x_ref[...] * sc_ref[...] + sh_ref[...]
        if has_res:
            y = y + r_ref[...]
        if apply_relu:
            y = jnp.maximum(y, 0.0)
        o_ref[...] = y.astype(o_ref.dtype)

    return kernel


def _maxpool_kernel(x_ref, o_ref):
    # x_ref: [9, TM, C] (the 9 shifted 3x3 window taps) -> max over taps.
    o_ref[...] = jnp.max(x_ref[...], axis=0)


def _gap_kernel(x_ref, o_ref):
    # x_ref: [N, H*W, C] -> mean over spatial -> [N, C]
    o_ref[...] = jnp.mean(x_ref[...], axis=1)


# --------------------------------------------------------------------------
# Conv / pool wrappers (padding, im2col, pallas_call plumbing)
# --------------------------------------------------------------------------

def _im2col(x, kh, kw, stride, pad):
    # stride/pad are static Python ints (NOT traced) -> static slicing.
    n, h, w, c = x.shape
    xp = jnp.pad(x, ((0, 0), (pad, pad), (pad, pad), (0, 0)))
    ho = (h + 2 * pad - kh) // stride + 1
    wo = (w + 2 * pad - kw) // stride + 1
    cols = []
    for i in range(kh):
        for j in range(kw):
            cols.append(xp[:, i:i + (ho - 1) * stride + 1:stride,
                           j:j + (wo - 1) * stride + 1:stride, :])
    patches = jnp.concatenate(cols, axis=-1)        # [n, ho, wo, kh*kw*c]
    return patches.reshape(n * ho * wo, kh * kw * c), (n, ho, wo)


def conv_bn(x, w_hwio, gamma, beta, *, stride, pad, relu=True, residual=None):
    """y = [relu]( BN_batchstats(conv(x, w)) [+ residual] ).

    NHWC in / out; the channel axis of both input and output is kept padded
    to a multiple of 128 lanes (padded channels are identically zero)."""
    kh, kw, cin_w, cout = w_hwio.shape
    cin_x = x.shape[-1]
    if cin_x != cin_w:  # activation channels are lane-padded; pad weight cin.
        w_hwio = jnp.zeros((kh, kw, cin_x, cout), F32).at[:, :, :cin_w, :].set(
            w_hwio)

    patches, (n, ho, wo) = _im2col(x, kh, kw, stride, pad)
    m, kdim = patches.shape
    tm = min(_rup(m, 8), TM)
    mp = _rup(m, tm)
    kp = _rup(kdim, TK)
    cp = _rup(cout, 128)
    nm, nk = mp // tm, kp // TK

    # bf16 matmul operands (f32 accumulation happens in the kernel).
    xpad = jnp.zeros((mp, kp), BF16).at[:m, :kdim].set(patches.astype(BF16))
    wpad = jnp.zeros((kp, cp), BF16).at[:kdim, :cout].set(
        w_hwio.reshape(kdim, cout).astype(BF16))

    conv, stats = pl.pallas_call(
        _conv_stats_kernel,
        out_shape=(jax.ShapeDtypeStruct((mp, cp), F32),
                   jax.ShapeDtypeStruct((8 * nm, cp), F32)),
        grid_spec=pltpu.PrefetchScalarGridSpec(
            num_scalar_prefetch=0,
            grid=(nm, nk),
            in_specs=[pl.BlockSpec((tm, TK), lambda i, k: (i, k)),
                      pl.BlockSpec((TK, cp), lambda i, k: (k, 0))],
            out_specs=(pl.BlockSpec((tm, cp), lambda i, k: (i, 0)),
                       pl.BlockSpec((8, cp), lambda i, k: (i, 0))),
            scratch_shapes=[pltpu.VMEM((tm, cp), jnp.float32)]),
        compiler_params=pltpu.CompilerParams(
            dimension_semantics=("parallel", "arbitrary"),
            vmem_limit_bytes=VMEM_LIMIT),
    )(xpad, wpad)

    # Finalize batch statistics over the true m rows (padded rows are zero and
    # contribute nothing); fold gamma/beta into per-channel scale/shift.
    st = stats.reshape(nm, 8, cp)
    total = jnp.sum(st[:, 0, :], axis=0)
    total_sq = jnp.sum(st[:, 1, :], axis=0)
    inv_m = 1.0 / float(m)
    mean = total * inv_m
    var = jnp.maximum(total_sq * inv_m - mean * mean, 0.0)   # clamp E[x^2]-m^2
    gpad = jnp.zeros((cp,), F32).at[:cout].set(gamma)
    bpad = jnp.zeros((cp,), F32).at[:cout].set(beta)
    scale_v = gpad * jax.lax.rsqrt(var + BN_EPS)
    shift_v = bpad - mean * scale_v
    scale = scale_v.reshape(1, cp)
    shift = shift_v.reshape(1, cp)

    has_res = residual is not None
    operands = [conv, scale, shift]
    in_specs = [pl.BlockSpec((tm, cp), lambda i: (i, 0)),
                pl.BlockSpec((1, cp), lambda i: (0, 0)),
                pl.BlockSpec((1, cp), lambda i: (0, 0))]
    if has_res:
        assert residual.shape[-1] == cp
        r2 = residual.reshape(m, cp)
        if mp != m:
            r2 = jnp.zeros((mp, cp), F32).at[:m, :].set(r2)
        operands.append(r2)
        in_specs.append(pl.BlockSpec((tm, cp), lambda i: (i, 0)))

    out = pl.pallas_call(
        _make_bn_apply_kernel(relu, has_res),
        out_shape=jax.ShapeDtypeStruct((mp, cp), F32),
        grid_spec=pltpu.PrefetchScalarGridSpec(
            num_scalar_prefetch=0,
            grid=(nm,),
            in_specs=in_specs,
            out_specs=pl.BlockSpec((tm, cp), lambda i: (i, 0))),
        compiler_params=pltpu.CompilerParams(
            dimension_semantics=("parallel",),
            vmem_limit_bytes=VMEM_LIMIT),
    )(*operands)
    return out[:m].reshape(n, ho, wo, cp)


def max_pool_3x3_s2(x):
    """nn.MaxPool2d(kernel_size=3, stride=2, padding=1) in NHWC, tiled over M."""
    n, h, w, c = x.shape
    pad, k, s = 1, 3, 2
    ho = (h + 2 * pad - k) // s + 1
    wo = (w + 2 * pad - k) // s + 1
    xp = jnp.pad(x, ((0, 0), (pad, pad), (pad, pad), (0, 0)),
                 constant_values=-jnp.inf)
    wins = [xp[:, i:i + (ho - 1) * s + 1:s, j:j + (wo - 1) * s + 1:s, :]
            for i in range(k) for j in range(k)]
    wins = jnp.stack(wins, axis=0).reshape(k * k, n * ho * wo, c)
    m = n * ho * wo
    tm = min(_rup(m, 8), 512)
    mp = _rup(m, tm)
    if mp != m:
        wins = jnp.pad(wins, ((0, 0), (0, mp - m), (0, 0)))
    out = pl.pallas_call(
        _maxpool_kernel,
        out_shape=jax.ShapeDtypeStruct((mp, c), x.dtype),
        grid_spec=pltpu.PrefetchScalarGridSpec(
            num_scalar_prefetch=0,
            grid=(mp // tm,),
            in_specs=[pl.BlockSpec((k * k, tm, c), lambda i: (0, i, 0))],
            out_specs=pl.BlockSpec((tm, c), lambda i: (i, 0))),
        compiler_params=pltpu.CompilerParams(
            dimension_semantics=("parallel",),
            vmem_limit_bytes=VMEM_LIMIT),
    )(wins)
    return out[:m].reshape(n, ho, wo, c)


def global_avg_pool(x):
    """AdaptiveAvgPool2d(1) + Flatten -> [N, C] (tiny final reduction)."""
    n, h, w, c = x.shape
    x3 = x.reshape(n, h * w, c)
    return pl.pallas_call(
        _gap_kernel,
        out_shape=jax.ShapeDtypeStruct((n, c), x.dtype),
        grid=(1,),
        in_specs=[pl.BlockSpec((n, h * w, c), lambda i: (0, 0, 0))],
        out_specs=pl.BlockSpec((n, c), lambda i: (0, 0)),
    )(x3)


# --------------------------------------------------------------------------
# ResNet backbone (resnet18 / resnet50 / resnet101), parameters + forward
# --------------------------------------------------------------------------

CONFIGS = {
    "resnet18": dict(block="basic", layers=(2, 2, 2, 2), expansion=1),
    "resnet50": dict(block="bottleneck", layers=(3, 4, 6, 3), expansion=4),
    "resnet101": dict(block="bottleneck", layers=(3, 4, 23, 3), expansion=4),
}


def _kaiming_conv(key, kh, kw, cin, cout):
    # kaiming_normal_(mode='fan_out', nonlinearity='relu')
    fan_out = kh * kw * cout
    std = (2.0 / fan_out) ** 0.5
    return std * jax.random.normal(key, (kh, kw, cin, cout), F32)  # HWIO


def _bn_params(c):
    return dict(gamma=jnp.ones((c,), F32), beta=jnp.zeros((c,), F32))


def init_resnet(name, in_channels, key):
    """Params pytree contains ONLY arrays (strides are recomputed statically
    in the forward pass so jit never traces them)."""
    cfg = CONFIGS[name]
    keys = iter(jax.random.split(key, 256))
    params = {"conv1": _kaiming_conv(next(keys), 7, 7, in_channels, 64),
              "bn1": _bn_params(64)}
    exp = cfg["expansion"]
    cin = 64
    widths = (64, 128, 256, 512)
    for li, (width, nblocks) in enumerate(zip(widths, cfg["layers"])):
        layer_stride = 1 if li == 0 else 2
        blocks = []
        for bi in range(nblocks):
            s = layer_stride if bi == 0 else 1
            cout = width * exp
            blk = {}
            if cfg["block"] == "basic":
                blk["conv1"] = _kaiming_conv(next(keys), 3, 3, cin, width)
                blk["bn1"] = _bn_params(width)
                blk["conv2"] = _kaiming_conv(next(keys), 3, 3, width, width)
                blk["bn2"] = _bn_params(width)
            else:
                blk["conv1"] = _kaiming_conv(next(keys), 1, 1, cin, width)
                blk["bn1"] = _bn_params(width)
                blk["conv2"] = _kaiming_conv(next(keys), 3, 3, width, width)
                blk["bn2"] = _bn_params(width)
                blk["conv3"] = _kaiming_conv(next(keys), 1, 1, width, cout)
                blk["bn3"] = _bn_params(cout)
            if s != 1 or cin != cout:
                blk["down_conv"] = _kaiming_conv(next(keys), 1, 1, cin, cout)
                blk["down_bn"] = _bn_params(cout)
            blocks.append(blk)
            cin = cout
        params[f"layer{li + 1}"] = blocks
    return params


def _basic_block(x, blk, stride):
    identity = x
    out = conv_bn(x, blk["conv1"], blk["bn1"]["gamma"], blk["bn1"]["beta"],
                  stride=stride, pad=1, relu=True)
    if "down_conv" in blk:
        identity = conv_bn(x, blk["down_conv"], blk["down_bn"]["gamma"],
                           blk["down_bn"]["beta"], stride=stride, pad=0,
                           relu=False)
    return conv_bn(out, blk["conv2"], blk["bn2"]["gamma"], blk["bn2"]["beta"],
                   stride=1, pad=1, relu=True, residual=identity)


def _bottleneck_block(x, blk, stride):
    identity = x
    out = conv_bn(x, blk["conv1"], blk["bn1"]["gamma"], blk["bn1"]["beta"],
                  stride=1, pad=0, relu=True)
    out = conv_bn(out, blk["conv2"], blk["bn2"]["gamma"], blk["bn2"]["beta"],
                  stride=stride, pad=1, relu=True)
    if "down_conv" in blk:
        identity = conv_bn(x, blk["down_conv"], blk["down_bn"]["gamma"],
                           blk["down_bn"]["beta"], stride=stride, pad=0,
                           relu=False)
    return conv_bn(out, blk["conv3"], blk["bn3"]["gamma"], blk["bn3"]["beta"],
                   stride=1, pad=0, relu=True, residual=identity)


def resnet_backbone_forward(params, x_nchw, name):
    """conv1 -> bn1 -> relu -> maxpool -> layer1..4 -> GAP -> flatten."""
    cfg = CONFIGS[name]
    out_c = 512 * cfg["expansion"]
    x = jnp.transpose(x_nchw, (0, 2, 3, 1)).astype(F32)   # NCHW -> NHWC
    x = conv_bn(x, params["conv1"], params["bn1"]["gamma"],
                params["bn1"]["beta"], stride=2, pad=3, relu=True)
    x = max_pool_3x3_s2(x)
    block_fn = _basic_block if cfg["block"] == "basic" else _bottleneck_block
    for li in range(4):
        for bi, blk in enumerate(params[f"layer{li + 1}"]):
            stride = 2 if (li > 0 and bi == 0) else 1     # static Python int
            x = block_fn(x, blk, stride)
    feats = global_avg_pool(x)                            # [N, padded C]
    return feats[:, :out_c]                               # [N, out_channels]


if __name__ == "__main__":
    # Demo uses name='resnet18' to keep the number of compiled kernels small;
    # 'resnet50' / 'resnet101' (bottleneck) use the same kernels and also run.
    name = "resnet18"
    key = jax.random.PRNGKey(0)
    pkey, xkey = jax.random.split(key)
    params = init_resnet(name, in_channels=3, key=pkey)
    x = jax.random.normal(xkey, (2, 3, 32, 32), F32)      # NCHW, like torch
    fwd = jax.jit(functools.partial(resnet_backbone_forward, name=name))
    out = jax.block_until_ready(fwd(params, x))
    assert out.shape == (2, 512)                          # resnet18 out_features
    assert bool(jnp.all(jnp.isfinite(out)))
    print("KERNEL_OK")
</pallas_src>

<mosaic_0001>
module attributes {stable_mosaic.version = 11 : i64} {
  func.func @kernel(%arg0: i32, %arg1: memref<256x128xf32, #tpu.memory_space<vmem>>, %arg2: memref<1x128xf32, #tpu.memory_space<vmem>>, %arg3: memref<1x128xf32, #tpu.memory_space<vmem>>, %arg4: memref<256x128xf32, #tpu.memory_space<vmem>>) attributes {dimension_semantics = [#tpu.dimension_semantics<parallel>], iteration_bounds = array<i64: 2>, scalar_prefetch = 0 : i64, scratch_operands = 0 : i64, tpu.core_type = #tpu.core_type<tc>, window_params = [{transform_indices = @transform_0, window_bounds = array<i64: 256, 128>}, {pipeline_mode = #tpu.pipeline_mode<synchronous>, transform_indices = @transform_1, window_bounds = array<i64: 1, 128>}, {pipeline_mode = #tpu.pipeline_mode<synchronous>, transform_indices = @transform_2, window_bounds = array<i64: 1, 128>}, {transform_indices = @transform_3, window_bounds = array<i64: 256, 128>}]} {
    %c0 = arith.constant 0 : index
    %c0_0 = arith.constant 0 : index
    %0 = vector.load %arg1[%c0, %c0_0] : memref<256x128xf32, #tpu.memory_space<vmem>>, vector<256x128xf32>
    %c0_1 = arith.constant 0 : index
    %c0_2 = arith.constant 0 : index
    %1 = vector.load %arg2[%c0_1, %c0_2] : memref<1x128xf32, #tpu.memory_space<vmem>>, vector<1x128xf32>
    %2 = vector.broadcast %1 : vector<1x128xf32> to vector<256x128xf32>
    %3 = arith.mulf %0, %2 : vector<256x128xf32>
    %c0_3 = arith.constant 0 : index
    %c0_4 = arith.constant 0 : index
    %4 = vector.load %arg3[%c0_3, %c0_4] : memref<1x128xf32, #tpu.memory_space<vmem>>, vector<1x128xf32>
    %5 = vector.broadcast %4 : vector<1x128xf32> to vector<256x128xf32>
    %6 = arith.addf %3, %5 : vector<256x128xf32>
    %cst = arith.constant 0.000000e+00 : f32
    %7 = vector.broadcast %cst : f32 to vector<256x128xf32>
    %8 = arith.maximumf %6, %7 : vector<256x128xf32>
    %c0_5 = arith.constant 0 : index
    %c0_6 = arith.constant 0 : index
    %9 = vector.load %arg4[%c0_5, %c0_6] : memref<256x128xf32, #tpu.memory_space<vmem>>, vector<256x128xf32>
    tpu.vector_store %arg4[%c0_5, %c0_6], %8 {strides = array<i32>} : memref<256x128xf32, #tpu.memory_space<vmem>>, vector<256x128xf32>,
    return
  }
  func.func @transform_0(%arg0: i32) -> (i32, i32) {
    %c0_i32 = arith.constant 0 : i32
    %c0_i32_0 = arith.constant 0 : i32
    return %arg0, %c0_i32 : i32, i32
  }
  func.func @transform_1(%arg0: i32) -> (i32, i32) {
    %c0_i32 = arith.constant 0 : i32
    %c0_i32_0 = arith.constant 0 : i32
    %c0_i32_1 = arith.constant 0 : i32
    return %c0_i32, %c0_i32_0 : i32, i32
  }
  func.func @transform_2(%arg0: i32) -> (i32, i32) {
    %c0_i32 = arith.constant 0 : i32
    %c0_i32_0 = arith.constant 0 : i32
    %c0_i32_1 = arith.constant 0 : i32
    return %c0_i32, %c0_i32_0 : i32, i32
  }
  func.func @transform_3(%arg0: i32) -> (i32, i32) {
    %c0_i32 = arith.constant 0 : i32
    %c0_i32_0 = arith.constant 0 : i32
    return %arg0, %c0_i32 : i32, i32
  }
}

module attributes {stable_mosaic.version = 11 : i64} {
  func.func @_conv_stats_kernel(%arg0: i32, %arg1: i32, %arg2: memref<256x256xbf16, #tpu.memory_space<vmem>>, %arg3: memref<256x128xbf16, #tpu.memory_space<vmem>>, %arg4: memref<256x128xf32, #tpu.memory_space<vmem>>, %arg5: memref<8x128xf32, #tpu.memory_space<vmem>>, %arg6: memref<256x128xf32, #tpu.memory_space<vmem>>) attributes {dimension_semantics = [#tpu.dimension_semantics<parallel>, #tpu.dimension_semantics<arbitrary>], iteration_bounds = array<i64: 2, 1>, scalar_prefetch = 0 : i64, scratch_operands = 1 : i64, tpu.core_type = #tpu.core_type<tc>, window_params = [{transform_indices = @transform_0, window_bounds = array<i64: 256, 256>}, {transform_indices = @transform_1, window_bounds = array<i64: 256, 128>}, {transform_indices = @transform_2, window_bounds = array<i64: 256, 128>}, {transform_indices = @transform_3, window_bounds = array<i64: 8, 128>}]} {
    %c0_i32 = arith.constant 0 : i32
    %0 = arith.cmpi eq, %arg1, %c0_i32 : i32
    %1 = arith.extui %0 : i1 to i32
    %c0_i32_0 = arith.constant 0 : i32
    %2 = arith.cmpi ne, %1, %c0_i32_0 : i32
    scf.if %2 {
      %cst_10 = arith.constant 0.000000e+00 : f32
      %12 = vector.broadcast %cst_10 : f32 to vector<256x128xf32>
      %c0_11 = arith.constant 0 : index
      %c0_12 = arith.constant 0 : index
      %13 = vector.load %arg6[%c0_11, %c0_12] : memref<256x128xf32, #tpu.memory_space<vmem>>, vector<256x128xf32>
      tpu.vector_store %arg6[%c0_11, %c0_12], %12 {strides = array<i32>} : memref<256x128xf32, #tpu.memory_space<vmem>>, vector<256x128xf32>,
    } else {
    }
    %c0 = arith.constant 0 : index
    %c0_1 = arith.constant 0 : index
    %3 = vector.load %arg6[%c0, %c0_1] : memref<256x128xf32, #tpu.memory_space<vmem>>, vector<256x128xf32>
    %c0_2 = arith.constant 0 : index
    %c0_3 = arith.constant 0 : index
    %4 = vector.load %arg2[%c0_2, %c0_3] : memref<256x256xbf16, #tpu.memory_space<vmem>>, vector<256x256xbf16>
    %c0_4 = arith.constant 0 : index
    %c0_5 = arith.constant 0 : index
    %5 = vector.load %arg3[%c0_4, %c0_5] : memref<256x128xbf16, #tpu.memory_space<vmem>>, vector<256x128xbf16>
    %cst = arith.constant dense<0.000000e+00> : vector<256x128xf32>
    %6 = tpu.matmul %4, %5, %cst {dimension_numbers = #tpu.dot_dimension_numbers<[1], [0], [0], [1], [0, 0, 1, 1], [], []>} : vector<256x256xbf16>, vector<256x128xbf16>, vector<256x128xf32> -> vector<256x128xf32>
    %7 = arith.addf %3, %6 : vector<256x128xf32>
    %c0_6 = arith.constant 0 : index
    %c0_7 = arith.constant 0 : index
    %8 = vector.load %arg6[%c0_6, %c0_7] : memref<256x128xf32, #tpu.memory_space<vmem>>, vector<256x128xf32>
    tpu.vector_store %arg6[%c0_6, %c0_7], %7 {strides = array<i32>} : memref<256x128xf32, #tpu.memory_space<vmem>>, vector<256x128xf32>,
    %c0_i32_8 = arith.constant 0 : i32
    %9 = arith.cmpi eq, %arg1, %c0_i32_8 : i32
    %10 = arith.extui %9 : i1 to i32
    %c0_i32_9 = arith.constant 0 : i32
    %11 = arith.cmpi ne, %10, %c0_i32_9 : i32
    scf.if %11 {
      %c0_10 = arith.constant 0 : index
      %c0_11 = arith.constant 0 : index
      %12 = vector.load %arg6[%c0_10, %c0_11] : memref<256x128xf32, #tpu.memory_space<vmem>>, vector<256x128xf32>
      %c0_12 = arith.constant 0 : index
      %c0_13 = arith.constant 0 : index
      %13 = vector.load %arg4[%c0_12, %c0_13] : memref<256x128xf32, #tpu.memory_space<vmem>>, vector<256x128xf32>
      tpu.vector_store %arg4[%c0_12, %c0_13], %12 {strides = array<i32>} : memref<256x128xf32, #tpu.memory_space<vmem>>, vector<256x128xf32>,
      %cst_14 = arith.constant dense<0.000000e+00> : vector<128xf32>
      %14 = vector.multi_reduction <add>, %12, %cst_14 [0] : vector<256x128xf32> to vector<128xf32>
      %15 = vector.shape_cast %14 : vector<128xf32> to vector<1x128xf32>
      %16 = arith.mulf %12, %12 : vector<256x128xf32>
      %cst_15 = arith.constant dense<0.000000e+00> : vector<128xf32>
      %17 = vector.multi_reduction <add>, %16, %cst_15 [0] : vector<256x128xf32> to vector<128xf32>
      %18 = vector.shape_cast %17 : vector<128xf32> to vector<1x128xf32>
      %19 = tpu.iota {dimensions = array<i32: 0>} : vector<8x128xi32>
      %c0_i32_16 = arith.constant 0 : i32
      %20 = vector.broadcast %c0_i32_16 : i32 to vector<8x128xi32>
      %21 = arith.cmpi eq, %19, %20 : vector<8x128xi32>
      %c1_i32 = arith.constant 1 : i32
      %22 = vector.broadcast %c1_i32 : i32 to vector<8x128xi32>
      %23 = arith.cmpi eq, %19, %22 : vector<8x128xi32>
      %cst_17 = arith.constant 0.000000e+00 : f32
      %24 = vector.shape_cast %18 : vector<1x128xf32> to vector<1x128xf32>
      %25 = vector.broadcast %24 : vector<1x128xf32> to vector<8x128xf32>
      %26 = vector.broadcast %cst_17 : f32 to vector<8x128xf32>
      %27 = arith.select %23, %25, %26 : vector<8x128xi1>, vector<8x128xf32>
      %28 = vector.shape_cast %15 : vector<1x128xf32> to vector<1x128xf32>
      %29 = vector.broadcast %28 : vector<1x128xf32> to vector<8x128xf32>
      %30 = arith.select %21, %29, %27 : vector<8x128xi1>, vector<8x128xf32>
      %c0_18 = arith.constant 0 : index
      %c0_19 = arith.constant 0 : index
      %31 = vector.load %arg5[%c0_18, %c0_19] : memref<8x128xf32, #tpu.memory_space<vmem>>, vector<8x128xf32>
      tpu.vector_store %arg5[%c0_18, %c0_19], %30 {strides = array<i32>} : memref<8x128xf32, #tpu.memory_space<vmem>>, vector<8x128xf32>,
    } else {
    }
    return
  }
  func.func @transform_0(%arg0: i32, %arg1: i32) -> (i32, i32) {
    %c0_i32 = arith.constant 0 : i32
    return %arg0, %arg1 : i32, i32
  }
  func.func @transform_1(%arg0: i32, %arg1: i32) -> (i32, i32) {
    %c0_i32 = arith.constant 0 : i32
    %c0_i32_0 = arith.constant 0 : i32
    return %arg1, %c0_i32 : i32, i32
  }
  func.func @transform_2(%arg0: i32, %arg1: i32) -> (i32, i32) {
    %c0_i32 = arith.constant 0 : i32
    %c0_i32_0 = arith.constant 0 : i32
    return %arg0, %c0_i32 : i32, i32
  }
  func.func @transform_3(%arg0: i32, %arg1: i32) -> (i32, i32) {
    %c0_i32 = arith.constant 0 : i32
    %c0_i32_0 = arith.constant 0 : i32
    return %arg0, %c0_i32 : i32, i32
  }
}

module attributes {stable_mosaic.version = 11 : i64} {
  func.func @_maxpool_kernel(%arg0: i32, %arg1: memref<9x128x128xf32, #tpu.memory_space<vmem>>, %arg2: memref<128x128xf32, #tpu.memory_space<vmem>>) attributes {dimension_semantics = [#tpu.dimension_semantics<parallel>], iteration_bounds = array<i64: 1>, scalar_prefetch = 0 : i64, scratch_operands = 0 : i64, tpu.core_type = #tpu.core_type<tc>, window_params = [{transform_indices = @transform_0, window_bounds = array<i64: 9, 128, 128>}, {transform_indices = @transform_1, window_bounds = array<i64: 128, 128>}]} {
    %c0 = arith.constant 0 : index
    %c0_0 = arith.constant 0 : index
    %c0_1 = arith.constant 0 : index
    %0 = vector.load %arg1[%c0, %c0_0, %c0_1] : memref<9x128x128xf32, #tpu.memory_space<vmem>>, vector<9x128x128xf32>
    %cst = arith.constant dense<0xFF800000> : vector<128x128xf32>
    %1 = vector.multi_reduction <maximumf>, %0, %cst [0] : vector<9x128x128xf32> to vector<128x128xf32>
    %c0_2 = arith.constant 0 : index
    %c0_3 = arith.constant 0 : index
    %2 = vector.load %arg2[%c0_2, %c0_3] : memref<128x128xf32, #tpu.memory_space<vmem>>, vector<128x128xf32>
    tpu.vector_store %arg2[%c0_2, %c0_3], %1 {strides = array<i32>} : memref<128x128xf32, #tpu.memory_space<vmem>>, vector<128x128xf32>,
    return
  }
  func.func @transform_0(%arg0: i32) -> (i32, i32, i32) {
    %c0_i32 = arith.constant 0 : i32
    %c0_i32_0 = arith.constant 0 : i32
    %c0_i32_1 = arith.constant 0 : i32
    return %c0_i32, %arg0, %c0_i32_0 : i32, i32, i32
  }
  func.func @transform_1(%arg0: i32) -> (i32, i32) {
    %c0_i32 = arith.constant 0 : i32
    %c0_i32_0 = arith.constant 0 : i32
    return %arg0, %c0_i32 : i32, i32
  }
}

module attributes {stable_mosaic.version = 11 : i64} {
  func.func @kernel(%arg0: i32, %arg1: memref<128x128xf32, #tpu.memory_space<vmem>>, %arg2: memref<1x128xf32, #tpu.memory_space<vmem>>, %arg3: memref<1x128xf32, #tpu.memory_space<vmem>>, %arg4: memref<128x128xf32, #tpu.memory_space<vmem>>) attributes {dimension_semantics = [#tpu.dimension_semantics<parallel>], iteration_bounds = array<i64: 1>, scalar_prefetch = 0 : i64, scratch_operands = 0 : i64, tpu.core_type = #tpu.core_type<tc>, window_params = [{transform_indices = @transform_0, window_bounds = array<i64: 128, 128>}, {pipeline_mode = #tpu.pipeline_mode<synchronous>, transform_indices = @transform_1, window_bounds = array<i64: 1, 128>}, {pipeline_mode = #tpu.pipeline_mode<synchronous>, transform_indices = @transform_2, window_bounds = array<i64: 1, 128>}, {transform_indices = @transform_3, window_bounds = array<i64: 128, 128>}]} {
    %c0 = arith.constant 0 : index
    %c0_0 = arith.constant 0 : index
    %0 = vector.load %arg1[%c0, %c0_0] : memref<128x128xf32, #tpu.memory_space<vmem>>, vector<128x128xf32>
    %c0_1 = arith.constant 0 : index
    %c0_2 = arith.constant 0 : index
    %1 = vector.load %arg2[%c0_1, %c0_2] : memref<1x128xf32, #tpu.memory_space<vmem>>, vector<1x128xf32>
    %2 = vector.broadcast %1 : vector<1x128xf32> to vector<128x128xf32>
    %3 = arith.mulf %0, %2 : vector<128x128xf32>
    %c0_3 = arith.constant 0 : index
    %c0_4 = arith.constant 0 : index
    %4 = vector.load %arg3[%c0_3, %c0_4] : memref<1x128xf32, #tpu.memory_space<vmem>>, vector<1x128xf32>
    %5 = vector.broadcast %4 : vector<1x128xf32> to vector<128x128xf32>
    %6 = arith.addf %3, %5 : vector<128x128xf32>
    %cst = arith.constant 0.000000e+00 : f32
    %7 = vector.broadcast %cst : f32 to vector<128x128xf32>
    %8 = arith.maximumf %6, %7 : vector<128x128xf32>
    %c0_5 = arith.constant 0 : index
    %c0_6 = arith.constant 0 : index
    %9 = vector.load %arg4[%c0_5, %c0_6] : memref<128x128xf32, #tpu.memory_space<vmem>>, vector<128x128xf32>
    tpu.vector_store %arg4[%c0_5, %c0_6], %8 {strides = array<i32>} : memref<128x128xf32, #tpu.memory_space<vmem>>, vector<128x128xf32>,
    return
  }
  func.func @transform_0(%arg0: i32) -> (i32, i32) {
    %c0_i32 = arith.constant 0 : i32
    %c0_i32_0 = arith.constant 0 : i32
    return %arg0, %c0_i32 : i32, i32
  }
  func.func @transform_1(%arg0: i32) -> (i32, i32) {
    %c0_i32 = arith.constant 0 : i32
    %c0_i32_0 = arith.constant 0 : i32
    %c0_i32_1 = arith.constant 0 : i32
    return %c0_i32, %c0_i32_0 : i32, i32
  }
  func.func @transform_2(%arg0: i32) -> (i32, i32) {
    %c0_i32 = arith.constant 0 : i32
    %c0_i32_0 = arith.constant 0 : i32
    %c0_i32_1 = arith.constant 0 : i32
    return %c0_i32, %c0_i32_0 : i32, i32
  }
  func.func @transform_3(%arg0: i32) -> (i32, i32) {
    %c0_i32 = arith.constant 0 : i32
    %c0_i32_0 = arith.constant 0 : i32
    return %arg0, %c0_i32 : i32, i32
  }
}

module attributes {stable_mosaic.version = 11 : i64} {
  func.func @_conv_stats_kernel(%arg0: i32, %arg1: i32, %arg2: memref<128x256xbf16, #tpu.memory_space<vmem>>, %arg3: memref<256x128xbf16, #tpu.memory_space<vmem>>, %arg4: memref<128x128xf32, #tpu.memory_space<vmem>>, %arg5: memref<8x128xf32, #tpu.memory_space<vmem>>, %arg6: memref<128x128xf32, #tpu.memory_space<vmem>>) attributes {dimension_semantics = [#tpu.dimension_semantics<parallel>, #tpu.dimension_semantics<arbitrary>], iteration_bounds = array<i64: 1, 5>, scalar_prefetch = 0 : i64, scratch_operands = 1 : i64, tpu.core_type = #tpu.core_type<tc>, window_params = [{transform_indices = @transform_0, window_bounds = array<i64: 128, 256>}, {transform_indices = @transform_1, window_bounds = array<i64: 256, 128>}, {transform_indices = @transform_2, window_bounds = array<i64: 128, 128>}, {transform_indices = @transform_3, window_bounds = array<i64: 8, 128>}]} {
    %c0_i32 = arith.constant 0 : i32
    %0 = arith.cmpi eq, %arg1, %c0_i32 : i32
    %1 = arith.extui %0 : i1 to i32
    %c0_i32_0 = arith.constant 0 : i32
    %2 = arith.cmpi ne, %1, %c0_i32_0 : i32
    scf.if %2 {
      %cst_9 = arith.constant 0.000000e+00 : f32
      %12 = vector.broadcast %cst_9 : f32 to vector<128x128xf32>
      %c0_10 = arith.constant 0 : index
      %c0_11 = arith.constant 0 : index
      %13 = vector.load %arg6[%c0_10, %c0_11] : memref<128x128xf32, #tpu.memory_space<vmem>>, vector<128x128xf32>
      tpu.vector_store %arg6[%c0_10, %c0_11], %12 {strides = array<i32>} : memref<128x128xf32, #tpu.memory_space<vmem>>, vector<128x128xf32>,
    } else {
    }
    %c0 = arith.constant 0 : index
    %c0_1 = arith.constant 0 : index
    %3 = vector.load %arg6[%c0, %c0_1] : memref<128x128xf32, #tpu.memory_space<vmem>>, vector<128x128xf32>
    %c0_2 = arith.constant 0 : index
    %c0_3 = arith.constant 0 : index
    %4 = vector.load %arg2[%c0_2, %c0_3] : memref<128x256xbf16, #tpu.memory_space<vmem>>, vector<128x256xbf16>
    %c0_4 = arith.constant 0 : index
    %c0_5 = arith.constant 0 : index
    %5 = vector.load %arg3[%c0_4, %c0_5] : memref<256x128xbf16, #tpu.memory_space<vmem>>, vector<256x128xbf16>
    %cst = arith.constant dense<0.000000e+00> : vector<128x128xf32>
    %6 = tpu.matmul %4, %5, %cst {dimension_numbers = #tpu.dot_dimension_numbers<[1], [0], [0], [1], [0, 0, 1, 1], [], []>} : vector<128x256xbf16>, vector<256x128xbf16>, vector<128x128xf32> -> vector<128x128xf32>
    %7 = arith.addf %3, %6 : vector<128x128xf32>
    %c0_6 = arith.constant 0 : index
    %c0_7 = arith.constant 0 : index
    %8 = vector.load %arg6[%c0_6, %c0_7] : memref<128x128xf32, #tpu.memory_space<vmem>>, vector<128x128xf32>
    tpu.vector_store %arg6[%c0_6, %c0_7], %7 {strides = array<i32>} : memref<128x128xf32, #tpu.memory_space<vmem>>, vector<128x128xf32>,
    %c4_i32 = arith.constant 4 : i32
    %9 = arith.cmpi eq, %arg1, %c4_i32 : i32
    %10 = arith.extui %9 : i1 to i32
    %c0_i32_8 = arith.constant 0 : i32
    %11 = arith.cmpi ne, %10, %c0_i32_8 : i32
    scf.if %11 {
      %c0_9 = arith.constant 0 : index
      %c0_10 = arith.constant 0 : index
      %12 = vector.load %arg6[%c0_9, %c0_10] : memref<128x128xf32, #tpu.memory_space<vmem>>, vector<128x128xf32>
      %c0_11 = arith.constant 0 : index
      %c0_12 = arith.constant 0 : index
      %13 = vector.load %arg4[%c0_11, %c0_12] : memref<128x128xf32, #tpu.memory_space<vmem>>, vector<128x128xf32>
      tpu.vector_store %arg4[%c0_11, %c0_12], %12 {strides = array<i32>} : memref<128x128xf32, #tpu.memory_space<vmem>>, vector<128x128xf32>,
      %cst_13 = arith.constant dense<0.000000e+00> : vector<128xf32>
      %14 = vector.multi_reduction <add>, %12, %cst_13 [0] : vector<128x128xf32> to vector<128xf32>
      %15 = vector.shape_cast %14 : vector<128xf32> to vector<1x128xf32>
      %16 = arith.mulf %12, %12 : vector<128x128xf32>
      %cst_14 = arith.constant dense<0.000000e+00> : vector<128xf32>
      %17 = vector.multi_reduction <add>, %16, %cst_14 [0] : vector<128x128xf32> to vector<128xf32>
      %18 = vector.shape_cast %17 : vector<128xf32> to vector<1x128xf32>
      %19 = tpu.iota {dimensions = array<i32: 0>} : vector<8x128xi32>
      %c0_i32_15 = arith.constant 0 : i32
      %20 = vector.broadcast %c0_i32_15 : i32 to vector<8x128xi32>
      %21 = arith.cmpi eq, %19, %20 : vector<8x128xi32>
      %c1_i32 = arith.constant 1 : i32
      %22 = vector.broadcast %c1_i32 : i32 to vector<8x128xi32>
      %23 = arith.cmpi eq, %19, %22 : vector<8x128xi32>
      %cst_16 = arith.constant 0.000000e+00 : f32
      %24 = vector.shape_cast %18 : vector<1x128xf32> to vector<1x128xf32>
      %25 = vector.broadcast %24 : vector<1x128xf32> to vector<8x128xf32>
      %26 = vector.broadcast %cst_16 : f32 to vector<8x128xf32>
      %27 = arith.select %23, %25, %26 : vector<8x128xi1>, vector<8x128xf32>
      %28 = vector.shape_cast %15 : vector<1x128xf32> to vector<1x128xf32>
      %29 = vector.broadcast %28 : vector<1x128xf32> to vector<8x128xf32>
      %30 = arith.select %21, %29, %27 : vector<8x128xi1>, vector<8x128xf32>
      %c0_17 = arith.constant 0 : index
      %c0_18 = arith.constant 0 : index
      %31 = vector.load %arg5[%c0_17, %c0_18] : memref<8x128xf32, #tpu.memory_space<vmem>>, vector<8x128xf32>
      tpu.vector_store %arg5[%c0_17, %c0_18], %30 {strides = array<i32>} : memref<8x128xf32, #tpu.memory_space<vmem>>, vector<8x128xf32>,
    } else {
    }
    return
  }
  func.func @transform_0(%arg0: i32, %arg1: i32) -> (i32, i32) {
    %c0_i32 = arith.constant 0 : i32
    return %arg0, %arg1 : i32, i32
  }
  func.func @transform_1(%arg0: i32, %arg1: i32) -> (i32, i32) {
    %c0_i32 = arith.constant 0 : i32
    %c0_i32_0 = arith.constant 0 : i32
    return %arg1, %c0_i32 : i32, i32
  }
  func.func @transform_2(%arg0: i32, %arg1: i32) -> (i32, i32) {
    %c0_i32 = arith.constant 0 : i32
    %c0_i32_0 = arith.constant 0 : i32
    return %arg0, %c0_i32 : i32, i32
  }
  func.func @transform_3(%arg0: i32, %arg1: i32) -> (i32, i32) {
    %c0_i32 = arith.constant 0 : i32
    %c0_i32_0 = arith.constant 0 : i32
    return %arg0, %c0_i32 : i32, i32
  }
}

module attributes {stable_mosaic.version = 11 : i64} {
  func.func @kernel(%arg0: i32, %arg1: memref<128x128xf32, #tpu.memory_space<vmem>>, %arg2: memref<1x128xf32, #tpu.memory_space<vmem>>, %arg3: memref<1x128xf32, #tpu.memory_space<vmem>>, %arg4: memref<128x128xf32, #tpu.memory_space<vmem>>, %arg5: memref<128x128xf32, #tpu.memory_space<vmem>>) attributes {dimension_semantics = [#tpu.dimension_semantics<parallel>], iteration_bounds = array<i64: 1>, scalar_prefetch = 0 : i64, scratch_operands = 0 : i64, tpu.core_type = #tpu.core_type<tc>, window_params = [{transform_indices = @transform_0, window_bounds = array<i64: 128, 128>}, {pipeline_mode = #tpu.pipeline_mode<synchronous>, transform_indices = @transform_1, window_bounds = array<i64: 1, 128>}, {pipeline_mode = #tpu.pipeline_mode<synchronous>, transform_indices = @transform_2, window_bounds = array<i64: 1, 128>}, {transform_indices = @transform_3, window_bounds = array<i64: 128, 128>}, {transform_indices = @transform_4, window_bounds = array<i64: 128, 128>}]} {
    %c0 = arith.constant 0 : index
    %c0_0 = arith.constant 0 : index
    %0 = vector.load %arg1[%c0, %c0_0] : memref<128x128xf32, #tpu.memory_space<vmem>>, vector<128x128xf32>
    %c0_1 = arith.constant 0 : index
    %c0_2 = arith.constant 0 : index
    %1 = vector.load %arg2[%c0_1, %c0_2] : memref<1x128xf32, #tpu.memory_space<vmem>>, vector<1x128xf32>
    %2 = vector.broadcast %1 : vector<1x128xf32> to vector<128x128xf32>
    %3 = arith.mulf %0, %2 : vector<128x128xf32>
    %c0_3 = arith.constant 0 : index
    %c0_4 = arith.constant 0 : index
    %4 = vector.load %arg3[%c0_3, %c0_4] : memref<1x128xf32, #tpu.memory_space<vmem>>, vector<1x128xf32>
    %5 = vector.broadcast %4 : vector<1x128xf32> to vector<128x128xf32>
    %6 = arith.addf %3, %5 : vector<128x128xf32>
    %c0_5 = arith.constant 0 : index
    %c0_6 = arith.constant 0 : index
    %7 = vector.load %arg4[%c0_5, %c0_6] : memref<128x128xf32, #tpu.memory_space<vmem>>, vector<128x128xf32>
    %8 = arith.addf %6, %7 : vector<128x128xf32>
    %cst = arith.constant 0.000000e+00 : f32
    %9 = vector.broadcast %cst : f32 to vector<128x128xf32>
    %10 = arith.maximumf %8, %9 : vector<128x128xf32>
    %c0_7 = arith.constant 0 : index
    %c0_8 = arith.constant 0 : index
    %11 = vector.load %arg5[%c0_7, %c0_8] : memref<128x128xf32, #tpu.memory_space<vmem>>, vector<128x128xf32>
    tpu.vector_store %arg5[%c0_7, %c0_8], %10 {strides = array<i32>} : memref<128x128xf32, #tpu.memory_space<vmem>>, vector<128x128xf32>,
    return
  }
  func.func @transform_0(%arg0: i32) -> (i32, i32) {
    %c0_i32 = arith.constant 0 : i32
    %c0_i32_0 = arith.constant 0 : i32
    return %arg0, %c0_i32 : i32, i32
  }
  func.func @transform_1(%arg0: i32) -> (i32, i32) {
    %c0_i32 = arith.constant 0 : i32
    %c0_i32_0 = arith.constant 0 : i32
    %c0_i32_1 = arith.constant 0 : i32
    return %c0_i32, %c0_i32_0 : i32, i32
  }
  func.func @transform_2(%arg0: i32) -> (i32, i32) {
    %c0_i32 = arith.constant 0 : i32
    %c0_i32_0 = arith.constant 0 : i32
    %c0_i32_1 = arith.constant 0 : i32
    return %c0_i32, %c0_i32_0 : i32, i32
  }
  func.func @transform_3(%arg0: i32) -> (i32, i32) {
    %c0_i32 = arith.constant 0 : i32
    %c0_i32_0 = arith.constant 0 : i32
    return %arg0, %c0_i32 : i32, i32
  }
  func.func @transform_4(%arg0: i32) -> (i32, i32) {
    %c0_i32 = arith.constant 0 : i32
    %c0_i32_0 = arith.constant 0 : i32
    return %arg0, %c0_i32 : i32, i32
  }
}

module attributes {stable_mosaic.version = 11 : i64} {
  func.func @_conv_stats_kernel(%arg0: i32, %arg1: i32, %arg2: memref<32x256xbf16, #tpu.memory_space<vmem>>, %arg3: memref<256x128xbf16, #tpu.memory_space<vmem>>, %arg4: memref<32x128xf32, #tpu.memory_space<vmem>>, %arg5: memref<8x128xf32, #tpu.memory_space<vmem>>, %arg6: memref<32x128xf32, #tpu.memory_space<vmem>>) attributes {dimension_semantics = [#tpu.dimension_semantics<parallel>, #tpu.dimension_semantics<arbitrary>], iteration_bounds = array<i64: 1, 1>, scalar_prefetch = 0 : i64, scratch_operands = 1 : i64, tpu.core_type = #tpu.core_type<tc>, window_params = [{transform_indices = @transform_0, window_bounds = array<i64: 32, 256>}, {transform_indices = @transform_1, window_bounds = array<i64: 256, 128>}, {transform_indices = @transform_2, window_bounds = array<i64: 32, 128>}, {transform_indices = @transform_3, window_bounds = array<i64: 8, 128>}]} {
    %c0_i32 = arith.constant 0 : i32
    %0 = arith.cmpi eq, %arg1, %c0_i32 : i32
    %1 = arith.extui %0 : i1 to i32
    %c0_i32_0 = arith.constant 0 : i32
    %2 = arith.cmpi ne, %1, %c0_i32_0 : i32
    scf.if %2 {
      %cst_10 = arith.constant 0.000000e+00 : f32
      %12 = vector.broadcast %cst_10 : f32 to vector<32x128xf32>
      %c0_11 = arith.constant 0 : index
      %c0_12 = arith.constant 0 : index
      %13 = vector.load %arg6[%c0_11, %c0_12] : memref<32x128xf32, #tpu.memory_space<vmem>>, vector<32x128xf32>
      tpu.vector_store %arg6[%c0_11, %c0_12], %12 {strides = array<i32>} : memref<32x128xf32, #tpu.memory_space<vmem>>, vector<32x128xf32>,
    } else {
    }
    %c0 = arith.constant 0 : index
    %c0_1 = arith.constant 0 : index
    %3 = vector.load %arg6[%c0, %c0_1] : memref<32x128xf32, #tpu.memory_space<vmem>>, vector<32x128xf32>
    %c0_2 = arith.constant 0 : index
    %c0_3 = arith.constant 0 : index
    %4 = vector.load %arg2[%c0_2, %c0_3] : memref<32x256xbf16, #tpu.memory_space<vmem>>, vector<32x256xbf16>
    %c0_4 = arith.constant 0 : index
    %c0_5 = arith.constant 0 : index
    %5 = vector.load %arg3[%c0_4, %c0_5] : memref<256x128xbf16, #tpu.memory_space<vmem>>, vector<256x128xbf16>
    %cst = arith.constant dense<0.000000e+00> : vector<32x128xf32>
    %6 = tpu.matmul %4, %5, %cst {dimension_numbers = #tpu.dot_dimension_numbers<[1], [0], [0], [1], [0, 0, 1, 1], [], []>} : vector<32x256xbf16>, vector<256x128xbf16>, vector<32x128xf32> -> vector<32x128xf32>
    %7 = arith.addf %3, %6 : vector<32x128xf32>
    %c0_6 = arith.constant 0 : index
    %c0_7 = arith.constant 0 : index
    %8 = vector.load %arg6[%c0_6, %c0_7] : memref<32x128xf32, #tpu.memory_space<vmem>>, vector<32x128xf32>
    tpu.vector_store %arg6[%c0_6, %c0_7], %7 {strides = array<i32>} : memref<32x128xf32, #tpu.memory_space<vmem>>, vector<32x128xf32>,
    %c0_i32_8 = arith.constant 0 : i32
    %9 = arith.cmpi eq, %arg1, %c0_i32_8 : i32
    %10 = arith.extui %9 : i1 to i32
    %c0_i32_9 = arith.constant 0 : i32
    %11 = arith.cmpi ne, %10, %c0_i32_9 : i32
    scf.if %11 {
      %c0_10 = arith.constant 0 : index
      %c0_11 = arith.constant 0 : index
      %12 = vector.load %arg6[%c0_10, %c0_11] : memref<32x128xf32, #tpu.memory_space<vmem>>, vector<32x128xf32>
      %c0_12 = arith.constant 0 : index
      %c0_13 = arith.constant 0 : index
      %13 = vector.load %arg4[%c0_12, %c0_13] : memref<32x128xf32, #tpu.memory_space<vmem>>, vector<32x128xf32>
      tpu.vector_store %arg4[%c0_12, %c0_13], %12 {strides = array<i32>} : memref<32x128xf32, #tpu.memory_space<vmem>>, vector<32x128xf32>,
      %cst_14 = arith.constant dense<0.000000e+00> : vector<128xf32>
      %14 = vector.multi_reduction <add>, %12, %cst_14 [0] : vector<32x128xf32> to vector<128xf32>
      %15 = vector.shape_cast %14 : vector<128xf32> to vector<1x128xf32>
      %16 = arith.mulf %12, %12 : vector<32x128xf32>
      %cst_15 = arith.constant dense<0.000000e+00> : vector<128xf32>
      %17 = vector.multi_reduction <add>, %16, %cst_15 [0] : vector<32x128xf32> to vector<128xf32>
      %18 = vector.shape_cast %17 : vector<128xf32> to vector<1x128xf32>
      %19 = tpu.iota {dimensions = array<i32: 0>} : vector<8x128xi32>
      %c0_i32_16 = arith.constant 0 : i32
      %20 = vector.broadcast %c0_i32_16 : i32 to vector<8x128xi32>
      %21 = arith.cmpi eq, %19, %20 : vector<8x128xi32>
      %c1_i32 = arith.constant 1 : i32
      %22 = vector.broadcast %c1_i32 : i32 to vector<8x128xi32>
      %23 = arith.cmpi eq, %19, %22 : vector<8x128xi32>
      %cst_17 = arith.constant 0.000000e+00 : f32
      %24 = vector.shape_cast %18 : vector<1x128xf32> to vector<1x128xf32>
      %25 = vector.broadcast %24 : vector<1x128xf32> to vector<8x128xf32>
      %26 = vector.broadcast %cst_17 : f32 to vector<8x128xf32>
      %27 = arith.select %23, %25, %26 : vector<8x128xi1>, vector<8x128xf32>
      %28 = vector.shape_cast %15 : vector<1x128xf32> to vector<1x128xf32>
      %29 = vector.broadcast %28 : vector<1x128xf32> to vector<8x128xf32>
      %30 = arith.select %21, %29, %27 : vector<8x128xi1>, vector<8x128xf32>
      %c0_18 = arith.constant 0 : index
      %c0_19 = arith.constant 0 : index
      %31 = vector.load %arg5[%c0_18, %c0_19] : memref<8x128xf32, #tpu.memory_space<vmem>>, vector<8x128xf32>
      tpu.vector_store %arg5[%c0_18, %c0_19], %30 {strides = array<i32>} : memref<8x128xf32, #tpu.memory_space<vmem>>, vector<8x128xf32>,
    } else {
    }
    return
  }
  func.func @transform_0(%arg0: i32, %arg1: i32) -> (i32, i32) {
    %c0_i32 = arith.constant 0 : i32
    return %arg0, %arg1 : i32, i32
  }
  func.func @transform_1(%arg0: i32, %arg1: i32) -> (i32, i32) {
    %c0_i32 = arith.constant 0 : i32
    %c0_i32_0 = arith.constant 0 : i32
    return %arg1, %c0_i32 : i32, i32
  }
  func.func @transform_2(%arg0: i32, %arg1: i32) -> (i32, i32) {
    %c0_i32 = arith.constant 0 : i32
    %c0_i32_0 = arith.constant 0 : i32
    return %arg0, %c0_i32 : i32, i32
  }
  func.func @transform_3(%arg0: i32, %arg1: i32) -> (i32, i32) {
    %c0_i32 = arith.constant 0 : i32
    %c0_i32_0 = arith.constant 0 : i32
    return %arg0, %c0_i32 : i32, i32
  }
}

module attributes {stable_mosaic.version = 11 : i64} {
  func.func @kernel(%arg0: i32, %arg1: memref<32x128xf32, #tpu.memory_space<vmem>>, %arg2: memref<1x128xf32, #tpu.memory_space<vmem>>, %arg3: memref<1x128xf32, #tpu.memory_space<vmem>>, %arg4: memref<32x128xf32, #tpu.memory_space<vmem>>) attributes {dimension_semantics = [#tpu.dimension_semantics<parallel>], iteration_bounds = array<i64: 1>, scalar_prefetch = 0 : i64, scratch_operands = 0 : i64, tpu.core_type = #tpu.core_type<tc>, window_params = [{transform_indices = @transform_0, window_bounds = array<i64: 32, 128>}, {pipeline_mode = #tpu.pipeline_mode<synchronous>, transform_indices = @transform_1, window_bounds = array<i64: 1, 128>}, {pipeline_mode = #tpu.pipeline_mode<synchronous>, transform_indices = @transform_2, window_bounds = array<i64: 1, 128>}, {transform_indices = @transform_3, window_bounds = array<i64: 32, 128>}]} {
    %c0 = arith.constant 0 : index
    %c0_0 = arith.constant 0 : index
    %0 = vector.load %arg1[%c0, %c0_0] : memref<32x128xf32, #tpu.memory_space<vmem>>, vector<32x128xf32>
    %c0_1 = arith.constant 0 : index
    %c0_2 = arith.constant 0 : index
    %1 = vector.load %arg2[%c0_1, %c0_2] : memref<1x128xf32, #tpu.memory_space<vmem>>, vector<1x128xf32>
    %2 = vector.broadcast %1 : vector<1x128xf32> to vector<32x128xf32>
    %3 = arith.mulf %0, %2 : vector<32x128xf32>
    %c0_3 = arith.constant 0 : index
    %c0_4 = arith.constant 0 : index
    %4 = vector.load %arg3[%c0_3, %c0_4] : memref<1x128xf32, #tpu.memory_space<vmem>>, vector<1x128xf32>
    %5 = vector.broadcast %4 : vector<1x128xf32> to vector<32x128xf32>
    %6 = arith.addf %3, %5 : vector<32x128xf32>
    %c0_5 = arith.constant 0 : index
    %c0_6 = arith.constant 0 : index
    %7 = vector.load %arg4[%c0_5, %c0_6] : memref<32x128xf32, #tpu.memory_space<vmem>>, vector<32x128xf32>
    tpu.vector_store %arg4[%c0_5, %c0_6], %6 {strides = array<i32>} : memref<32x128xf32, #tpu.memory_space<vmem>>, vector<32x128xf32>,
    return
  }
  func.func @transform_0(%arg0: i32) -> (i32, i32) {
    %c0_i32 = arith.constant 0 : i32
    %c0_i32_0 = arith.constant 0 : i32
    return %arg0, %c0_i32 : i32, i32
  }
  func.func @transform_1(%arg0: i32) -> (i32, i32) {
    %c0_i32 = arith.constant 0 : i32
    %c0_i32_0 = arith.constant 0 : i32
    %c0_i32_1 = arith.constant 0 : i32
    return %c0_i32, %c0_i32_0 : i32, i32
  }
  func.func @transform_2(%arg0: i32) -> (i32, i32) {
    %c0_i32 = arith.constant 0 : i32
    %c0_i32_0 = arith.constant 0 : i32
    %c0_i32_1 = arith.constant 0 : i32
    return %c0_i32, %c0_i32_0 : i32, i32
  }
  func.func @transform_3(%arg0: i32) -> (i32, i32) {
    %c0_i32 = arith.constant 0 : i32
    %c0_i32_0 = arith.constant 0 : i32
    return %arg0, %c0_i32 : i32, i32
  }
}

module attributes {stable_mosaic.version = 11 : i64} {
  func.func @_conv_stats_kernel(%arg0: i32, %arg1: i32, %arg2: memref<32x256xbf16, #tpu.memory_space<vmem>>, %arg3: memref<256x128xbf16, #tpu.memory_space<vmem>>, %arg4: memref<32x128xf32, #tpu.memory_space<vmem>>, %arg5: memref<8x128xf32, #tpu.memory_space<vmem>>, %arg6: memref<32x128xf32, #tpu.memory_space<vmem>>) attributes {dimension_semantics = [#tpu.dimension_semantics<parallel>, #tpu.dimension_semantics<arbitrary>], iteration_bounds = array<i64: 1, 5>, scalar_prefetch = 0 : i64, scratch_operands = 1 : i64, tpu.core_type = #tpu.core_type<tc>, window_params = [{transform_indices = @transform_0, window_bounds = array<i64: 32, 256>}, {transform_indices = @transform_1, window_bounds = array<i64: 256, 128>}, {transform_indices = @transform_2, window_bounds = array<i64: 32, 128>}, {transform_indices = @transform_3, window_bounds = array<i64: 8, 128>}]} {
    %c0_i32 = arith.constant 0 : i32
    %0 = arith.cmpi eq, %arg1, %c0_i32 : i32
    %1 = arith.extui %0 : i1 to i32
    %c0_i32_0 = arith.constant 0 : i32
    %2 = arith.cmpi ne, %1, %c0_i32_0 : i32
    scf.if %2 {
      %cst_9 = arith.constant 0.000000e+00 : f32
      %12 = vector.broadcast %cst_9 : f32 to vector<32x128xf32>
      %c0_10 = arith.constant 0 : index
      %c0_11 = arith.constant 0 : index
      %13 = vector.load %arg6[%c0_10, %c0_11] : memref<32x128xf32, #tpu.memory_space<vmem>>, vector<32x128xf32>
      tpu.vector_store %arg6[%c0_10, %c0_11], %12 {strides = array<i32>} : memref<32x128xf32, #tpu.memory_space<vmem>>, vector<32x128xf32>,
    } else {
    }
    %c0 = arith.constant 0 : index
    %c0_1 = arith.constant 0 : index
    %3 = vector.load %arg6[%c0, %c0_1] : memref<32x128xf32, #tpu.memory_space<vmem>>, vector<32x128xf32>
    %c0_2 = arith.constant 0 : index
    %c0_3 = arith.constant 0 : index
    %4 = vector.load %arg2[%c0_2, %c0_3] : memref<32x256xbf16, #tpu.memory_space<vmem>>, vector<32x256xbf16>
    %c0_4 = arith.constant 0 : index
    %c0_5 = arith.constant 0 : index
    %5 = vector.load %arg3[%c0_4, %c0_5] : memref<256x128xbf16, #tpu.memory_space<vmem>>, vector<256x128xbf16>
    %cst = arith.constant dense<0.000000e+00> : vector<32x128xf32>
    %6 = tpu.matmul %4, %5, %cst {dimension_numbers = #tpu.dot_dimension_numbers<[1], [0], [0], [1], [0, 0, 1, 1], [], []>} : vector<32x256xbf16>, vector<256x128xbf16>, vector<32x128xf32> -> vector<32x128xf32>
    %7 = arith.addf %3, %6 : vector<32x128xf32>
    %c0_6 = arith.constant 0 : index
    %c0_7 = arith.constant 0 : index
    %8 = vector.load %arg6[%c0_6, %c0_7] : memref<32x128xf32, #tpu.memory_space<vmem>>, vector<32x128xf32>
    tpu.vector_store %arg6[%c0_6, %c0_7], %7 {strides = array<i32>} : memref<32x128xf32, #tpu.memory_space<vmem>>, vector<32x128xf32>,
    %c4_i32 = arith.constant 4 : i32
    %9 = arith.cmpi eq, %arg1, %c4_i32 : i32
    %10 = arith.extui %9 : i1 to i32
    %c0_i32_8 = arith.constant 0 : i32
    %11 = arith.cmpi ne, %10, %c0_i32_8 : i32
    scf.if %11 {
      %c0_9 = arith.constant 0 : index
      %c0_10 = arith.constant 0 : index
      %12 = vector.load %arg6[%c0_9, %c0_10] : memref<32x128xf32, #tpu.memory_space<vmem>>, vector<32x128xf32>
      %c0_11 = arith.constant 0 : index
      %c0_12 = arith.constant 0 : index
      %13 = vector.load %arg4[%c0_11, %c0_12] : memref<32x128xf32, #tpu.memory_space<vmem>>, vector<32x128xf32>
      tpu.vector_store %arg4[%c0_11, %c0_12], %12 {strides = array<i32>} : memref<32x128xf32, #tpu.memory_space<vmem>>, vector<32x128xf32>,
      %cst_13 = arith.constant dense<0.000000e+00> : vector<128xf32>
      %14 = vector.multi_reduction <add>, %12, %cst_13 [0] : vector<32x128xf32> to vector<128xf32>
      %15 = vector.shape_cast %14 : vector<128xf32> to vector<1x128xf32>
      %16 = arith.mulf %12, %12 : vector<32x128xf32>
      %cst_14 = arith.constant dense<0.000000e+00> : vector<128xf32>
      %17 = vector.multi_reduction <add>, %16, %cst_14 [0] : vector<32x128xf32> to vector<128xf32>
      %18 = vector.shape_cast %17 : vector<128xf32> to vector<1x128xf32>
      %19 = tpu.iota {dimensions = array<i32: 0>} : vector<8x128xi32>
      %c0_i32_15 = arith.constant 0 : i32
      %20 = vector.broadcast %c0_i32_15 : i32 to vector<8x128xi32>
      %21 = arith.cmpi eq, %19, %20 : vector<8x128xi32>
      %c1_i32 = arith.constant 1 : i32
      %22 = vector.broadcast %c1_i32 : i32 to vector<8x128xi32>
      %23 = arith.cmpi eq, %19, %22 : vector<8x128xi32>
      %cst_16 = arith.constant 0.000000e+00 : f32
      %24 = vector.shape_cast %18 : vector<1x128xf32> to vector<1x128xf32>
      %25 = vector.broadcast %24 : vector<1x128xf32> to vector<8x128xf32>
      %26 = vector.broadcast %cst_16 : f32 to vector<8x128xf32>
      %27 = arith.select %23, %25, %26 : vector<8x128xi1>, vector<8x128xf32>
      %28 = vector.shape_cast %15 : vector<1x128xf32> to vector<1x128xf32>
      %29 = vector.broadcast %28 : vector<1x128xf32> to vector<8x128xf32>
      %30 = arith.select %21, %29, %27 : vector<8x128xi1>, vector<8x128xf32>
      %c0_17 = arith.constant 0 : index
      %c0_18 = arith.constant 0 : index
      %31 = vector.load %arg5[%c0_17, %c0_18] : memref<8x128xf32, #tpu.memory_space<vmem>>, vector<8x128xf32>
      tpu.vector_store %arg5[%c0_17, %c0_18], %30 {strides = array<i32>} : memref<8x128xf32, #tpu.memory_space<vmem>>, vector<8x128xf32>,
    } else {
    }
    return
  }
  func.func @transform_0(%arg0: i32, %arg1: i32) -> (i32, i32) {
    %c0_i32 = arith.constant 0 : i32
    return %arg0, %arg1 : i32, i32
  }
  func.func @transform_1(%arg0: i32, %arg1: i32) -> (i32, i32) {
    %c0_i32 = arith.constant 0 : i32
    %c0_i32_0 = arith.constant 0 : i32
    return %arg1, %c0_i32 : i32, i32
  }
  func.func @transform_2(%arg0: i32, %arg1: i32) -> (i32, i32) {
    %c0_i32 = arith.constant 0 : i32
    %c0_i32_0 = arith.constant 0 : i32
    return %arg0, %c0_i32 : i32, i32
  }
  func.func @transform_3(%arg0: i32, %arg1: i32) -> (i32, i32) {
    %c0_i32 = arith.constant 0 : i32
    %c0_i32_0 = arith.constant 0 : i32
    return %arg0, %c0_i32 : i32, i32
  }
}

module attributes {stable_mosaic.version = 11 : i64} {
  func.func @kernel(%arg0: i32, %arg1: memref<32x128xf32, #tpu.memory_space<vmem>>, %arg2: memref<1x128xf32, #tpu.memory_space<vmem>>, %arg3: memref<1x128xf32, #tpu.memory_space<vmem>>, %arg4: memref<32x128xf32, #tpu.memory_space<vmem>>) attributes {dimension_semantics = [#tpu.dimension_semantics<parallel>], iteration_bounds = array<i64: 1>, scalar_prefetch = 0 : i64, scratch_operands = 0 : i64, tpu.core_type = #tpu.core_type<tc>, window_params = [{transform_indices = @transform_0, window_bounds = array<i64: 32, 128>}, {pipeline_mode = #tpu.pipeline_mode<synchronous>, transform_indices = @transform_1, window_bounds = array<i64: 1, 128>}, {pipeline_mode = #tpu.pipeline_mode<synchronous>, transform_indices = @transform_2, window_bounds = array<i64: 1, 128>}, {transform_indices = @transform_3, window_bounds = array<i64: 32, 128>}]} {
    %c0 = arith.constant 0 : index
    %c0_0 = arith.constant 0 : index
    %0 = vector.load %arg1[%c0, %c0_0] : memref<32x128xf32, #tpu.memory_space<vmem>>, vector<32x128xf32>
    %c0_1 = arith.constant 0 : index
    %c0_2 = arith.constant 0 : index
    %1 = vector.load %arg2[%c0_1, %c0_2] : memref<1x128xf32, #tpu.memory_space<vmem>>, vector<1x128xf32>
    %2 = vector.broadcast %1 : vector<1x128xf32> to vector<32x128xf32>
    %3 = arith.mulf %0, %2 : vector<32x128xf32>
    %c0_3 = arith.constant 0 : index
    %c0_4 = arith.constant 0 : index
    %4 = vector.load %arg3[%c0_3, %c0_4] : memref<1x128xf32, #tpu.memory_space<vmem>>, vector<1x128xf32>
    %5 = vector.broadcast %4 : vector<1x128xf32> to vector<32x128xf32>
    %6 = arith.addf %3, %5 : vector<32x128xf32>
    %cst = arith.constant 0.000000e+00 : f32
    %7 = vector.broadcast %cst : f32 to vector<32x128xf32>
    %8 = arith.maximumf %6, %7 : vector<32x128xf32>
    %c0_5 = arith.constant 0 : index
    %c0_6 = arith.constant 0 : index
    %9 = vector.load %arg4[%c0_5, %c0_6] : memref<32x128xf32, #tpu.memory_space<vmem>>, vector<32x128xf32>
    tpu.vector_store %arg4[%c0_5, %c0_6], %8 {strides = array<i32>} : memref<32x128xf32, #tpu.memory_space<vmem>>, vector<32x128xf32>,
    return
  }
  func.func @transform_0(%arg0: i32) -> (i32, i32) {
    %c0_i32 = arith.constant 0 : i32
    %c0_i32_0 = arith.constant 0 : i32
    return %arg0, %c0_i32 : i32, i32
  }
  func.func @transform_1(%arg0: i32) -> (i32, i32) {
    %c0_i32 = arith.constant 0 : i32
    %c0_i32_0 = arith.constant 0 : i32
    %c0_i32_1 = arith.constant 0 : i32
    return %c0_i32, %c0_i32_0 : i32, i32
  }
  func.func @transform_2(%arg0: i32) -> (i32, i32) {
    %c0_i32 = arith.constant 0 : i32
    %c0_i32_0 = arith.constant 0 : i32
    %c0_i32_1 = arith.constant 0 : i32
    return %c0_i32, %c0_i32_0 : i32, i32
  }
  func.func @transform_3(%arg0: i32) -> (i32, i32) {
    %c0_i32 = arith.constant 0 : i32
    %c0_i32_0 = arith.constant 0 : i32
    return %arg0, %c0_i32 : i32, i32
  }
}

module attributes {stable_mosaic.version = 11 : i64} {
  func.func @kernel(%arg0: i32, %arg1: memref<32x128xf32, #tpu.memory_space<vmem>>, %arg2: memref<1x128xf32, #tpu.memory_space<vmem>>, %arg3: memref<1x128xf32, #tpu.memory_space<vmem>>, %arg4: memref<32x128xf32, #tpu.memory_space<vmem>>, %arg5: memref<32x128xf32, #tpu.memory_space<vmem>>) attributes {dimension_semantics = [#tpu.dimension_semantics<parallel>], iteration_bounds = array<i64: 1>, scalar_prefetch = 0 : i64, scratch_operands = 0 : i64, tpu.core_type = #tpu.core_type<tc>, window_params = [{transform_indices = @transform_0, window_bounds = array<i64: 32, 128>}, {pipeline_mode = #tpu.pipeline_mode<synchronous>, transform_indices = @transform_1, window_bounds = array<i64: 1, 128>}, {pipeline_mode = #tpu.pipeline_mode<synchronous>, transform_indices = @transform_2, window_bounds = array<i64: 1, 128>}, {transform_indices = @transform_3, window_bounds = array<i64: 32, 128>}, {transform_indices = @transform_4, window_bounds = array<i64: 32, 128>}]} {
    %c0 = arith.constant 0 : index
    %c0_0 = arith.constant 0 : index
    %0 = vector.load %arg1[%c0, %c0_0] : memref<32x128xf32, #tpu.memory_space<vmem>>, vector<32x128xf32>
    %c0_1 = arith.constant 0 : index
    %c0_2 = arith.constant 0 : index
    %1 = vector.load %arg2[%c0_1, %c0_2] : memref<1x128xf32, #tpu.memory_space<vmem>>, vector<1x128xf32>
    %2 = vector.broadcast %1 : vector<1x128xf32> to vector<32x128xf32>
    %3 = arith.mulf %0, %2 : vector<32x128xf32>
    %c0_3 = arith.constant 0 : index
    %c0_4 = arith.constant 0 : index
    %4 = vector.load %arg3[%c0_3, %c0_4] : memref<1x128xf32, #tpu.memory_space<vmem>>, vector<1x128xf32>
    %5 = vector.broadcast %4 : vector<1x128xf32> to vector<32x128xf32>
    %6 = arith.addf %3, %5 : vector<32x128xf32>
    %c0_5 = arith.constant 0 : index
    %c0_6 = arith.constant 0 : index
    %7 = vector.load %arg4[%c0_5, %c0_6] : memref<32x128xf32, #tpu.memory_space<vmem>>, vector<32x128xf32>
    %8 = arith.addf %6, %7 : vector<32x128xf32>
    %cst = arith.constant 0.000000e+00 : f32
    %9 = vector.broadcast %cst : f32 to vector<32x128xf32>
    %10 = arith.maximumf %8, %9 : vector<32x128xf32>
    %c0_7 = arith.constant 0 : index
    %c0_8 = arith.constant 0 : index
    %11 = vector.load %arg5[%c0_7, %c0_8] : memref<32x128xf32, #tpu.memory_space<vmem>>, vector<32x128xf32>
    tpu.vector_store %arg5[%c0_7, %c0_8], %10 {strides = array<i32>} : memref<32x128xf32, #tpu.memory_space<vmem>>, vector<32x128xf32>,
    return
  }
  func.func @transform_0(%arg0: i32) -> (i32, i32) {
    %c0_i32 = arith.constant 0 : i32
    %c0_i32_0 = arith.constant 0 : i32
    return %arg0, %c0_i32 : i32, i32
  }
  func.func @transform_1(%arg0: i32) -> (i32, i32) {
    %c0_i32 = arith.constant 0 : i32
    %c0_i32_0 = arith.constant 0 : i32
    %c0_i32_1 = arith.constant 0 : i32
    return %c0_i32, %c0_i32_0 : i32, i32
  }
  func.func @transform_2(%arg0: i32) -> (i32, i32) {
    %c0_i32 = arith.constant 0 : i32
    %c0_i32_0 = arith.constant 0 : i32
    %c0_i32_1 = arith.constant 0 : i32
    return %c0_i32, %c0_i32_0 : i32, i32
  }
  func.func @transform_3(%arg0: i32) -> (i32, i32) {
    %c0_i32 = arith.constant 0 : i32
    %c0_i32_0 = arith.constant 0 : i32
    return %arg0, %c0_i32 : i32, i32
  }
  func.func @transform_4(%arg0: i32) -> (i32, i32) {
    %c0_i32 = arith.constant 0 : i32
    %c0_i32_0 = arith.constant 0 : i32
    return %arg0, %c0_i32 : i32, i32
  }
}

module attributes {stable_mosaic.version = 11 : i64} {
  func.func @_conv_stats_kernel(%arg0: i32, %arg1: i32, %arg2: memref<8x256xbf16, #tpu.memory_space<vmem>>, %arg3: memref<256x256xbf16, #tpu.memory_space<vmem>>, %arg4: memref<8x256xf32, #tpu.memory_space<vmem>>, %arg5: memref<8x256xf32, #tpu.memory_space<vmem>>, %arg6: memref<8x256xf32, #tpu.memory_space<vmem>>) attributes {dimension_semantics = [#tpu.dimension_semantics<parallel>, #tpu.dimension_semantics<arbitrary>], iteration_bounds = array<i64: 1, 1>, scalar_prefetch = 0 : i64, scratch_operands = 1 : i64, tpu.core_type = #tpu.core_type<tc>, window_params = [{transform_indices = @transform_0, window_bounds = array<i64: 8, 256>}, {transform_indices = @transform_1, window_bounds = array<i64: 256, 256>}, {transform_indices = @transform_2, window_bounds = array<i64: 8, 256>}, {transform_indices = @transform_3, window_bounds = array<i64: 8, 256>}]} {
    %c0_i32 = arith.constant 0 : i32
    %0 = arith.cmpi eq, %arg1, %c0_i32 : i32
    %1 = arith.extui %0 : i1 to i32
    %c0_i32_0 = arith.constant 0 : i32
    %2 = arith.cmpi ne, %1, %c0_i32_0 : i32
    scf.if %2 {
      %cst_10 = arith.constant 0.000000e+00 : f32
      %12 = vector.broadcast %cst_10 : f32 to vector<8x256xf32>
      %c0_11 = arith.constant 0 : index
      %c0_12 = arith.constant 0 : index
      %13 = vector.load %arg6[%c0_11, %c0_12] : memref<8x256xf32, #tpu.memory_space<vmem>>, vector<8x256xf32>
      tpu.vector_store %arg6[%c0_11, %c0_12], %12 {strides = array<i32>} : memref<8x256xf32, #tpu.memory_space<vmem>>, vector<8x256xf32>,
    } else {
    }
    %c0 = arith.constant 0 : index
    %c0_1 = arith.constant 0 : index
    %3 = vector.load %arg6[%c0, %c0_1] : memref<8x256xf32, #tpu.memory_space<vmem>>, vector<8x256xf32>
    %c0_2 = arith.constant 0 : index
    %c0_3 = arith.constant 0 : index
    %4 = vector.load %arg2[%c0_2, %c0_3] : memref<8x256xbf16, #tpu.memory_space<vmem>>, vector<8x256xbf16>
    %c0_4 = arith.constant 0 : index
    %c0_5 = arith.constant 0 : index
    %5 = vector.load %arg3[%c0_4, %c0_5] : memref<256x256xbf16, #tpu.memory_space<vmem>>, vector<256x256xbf16>
    %cst = arith.constant dense<0.000000e+00> : vector<8x256xf32>
    %6 = tpu.matmul %4, %5, %cst {dimension_numbers = #tpu.dot_dimension_numbers<[1], [0], [0], [1], [0, 0, 1, 1], [], []>} : vector<8x256xbf16>, vector<256x256xbf16>, vector<8x256xf32> -> vector<8x256xf32>
    %7 = arith.addf %3, %6 : vector<8x256xf32>
    %c0_6 = arith.constant 0 : index
    %c0_7 = arith.constant 0 : index
    %8 = vector.load %arg6[%c0_6, %c0_7] : memref<8x256xf32, #tpu.memory_space<vmem>>, vector<8x256xf32>
    tpu.vector_store %arg6[%c0_6, %c0_7], %7 {strides = array<i32>} : memref<8x256xf32, #tpu.memory_space<vmem>>, vector<8x256xf32>,
    %c0_i32_8 = arith.constant 0 : i32
    %9 = arith.cmpi eq, %arg1, %c0_i32_8 : i32
    %10 = arith.extui %9 : i1 to i32
    %c0_i32_9 = arith.constant 0 : i32
    %11 = arith.cmpi ne, %10, %c0_i32_9 : i32
    scf.if %11 {
      %c0_10 = arith.constant 0 : index
      %c0_11 = arith.constant 0 : index
      %12 = vector.load %arg6[%c0_10, %c0_11] : memref<8x256xf32, #tpu.memory_space<vmem>>, vector<8x256xf32>
      %c0_12 = arith.constant 0 : index
      %c0_13 = arith.constant 0 : index
      %13 = vector.load %arg4[%c0_12, %c0_13] : memref<8x256xf32, #tpu.memory_space<vmem>>, vector<8x256xf32>
      tpu.vector_store %arg4[%c0_12, %c0_13], %12 {strides = array<i32>} : memref<8x256xf32, #tpu.memory_space<vmem>>, vector<8x256xf32>,
      %cst_14 = arith.constant dense<0.000000e+00> : vector<256xf32>
      %14 = vector.multi_reduction <add>, %12, %cst_14 [0] : vector<8x256xf32> to vector<256xf32>
      %15 = vector.shape_cast %14 : vector<256xf32> to vector<1x256xf32>
      %16 = arith.mulf %12, %12 : vector<8x256xf32>
      %cst_15 = arith.constant dense<0.000000e+00> : vector<256xf32>
      %17 = vector.multi_reduction <add>, %16, %cst_15 [0] : vector<8x256xf32> to vector<256xf32>
      %18 = vector.shape_cast %17 : vector<256xf32> to vector<1x256xf32>
      %19 = tpu.iota {dimensions = array<i32: 0>} : vector<8x256xi32>
      %c0_i32_16 = arith.constant 0 : i32
      %20 = vector.broadcast %c0_i32_16 : i32 to vector<8x256xi32>
      %21 = arith.cmpi eq, %19, %20 : vector<8x256xi32>
      %c1_i32 = arith.constant 1 : i32
      %22 = vector.broadcast %c1_i32 : i32 to vector<8x256xi32>
      %23 = arith.cmpi eq, %19, %22 : vector<8x256xi32>
      %cst_17 = arith.constant 0.000000e+00 : f32
      %24 = vector.shape_cast %18 : vector<1x256xf32> to vector<1x256xf32>
      %25 = vector.broadcast %24 : vector<1x256xf32> to vector<8x256xf32>
      %26 = vector.broadcast %cst_17 : f32 to vector<8x256xf32>
      %27 = arith.select %23, %25, %26 : vector<8x256xi1>, vector<8x256xf32>
      %28 = vector.shape_cast %15 : vector<1x256xf32> to vector<1x256xf32>
      %29 = vector.broadcast %28 : vector<1x256xf32> to vector<8x256xf32>
      %30 = arith.select %21, %29, %27 : vector<8x256xi1>, vector<8x256xf32>
      %c0_18 = arith.constant 0 : index
      %c0_19 = arith.constant 0 : index
      %31 = vector.load %arg5[%c0_18, %c0_19] : memref<8x256xf32, #tpu.memory_space<vmem>>, vector<8x256xf32>
      tpu.vector_store %arg5[%c0_18, %c0_19], %30 {strides = array<i32>} : memref<8x256xf32, #tpu.memory_space<vmem>>, vector<8x256xf32>,
    } else {
    }
    return
  }
  func.func @transform_0(%arg0: i32, %arg1: i32) -> (i32, i32) {
    %c0_i32 = arith.constant 0 : i32
    return %arg0, %arg1 : i32, i32
  }
  func.func @transform_1(%arg0: i32, %arg1: i32) -> (i32, i32) {
    %c0_i32 = arith.constant 0 : i32
    %c0_i32_0 = arith.constant 0 : i32
    return %arg1, %c0_i32 : i32, i32
  }
  func.func @transform_2(%arg0: i32, %arg1: i32) -> (i32, i32) {
    %c0_i32 = arith.constant 0 : i32
    %c0_i32_0 = arith.constant 0 : i32
    return %arg0, %c0_i32 : i32, i32
  }
  func.func @transform_3(%arg0: i32, %arg1: i32) -> (i32, i32) {
    %c0_i32 = arith.constant 0 : i32
    %c0_i32_0 = arith.constant 0 : i32
    return %arg0, %c0_i32 : i32, i32
  }
}

module attributes {stable_mosaic.version = 11 : i64} {
  func.func @kernel(%arg0: i32, %arg1: memref<8x256xf32, #tpu.memory_space<vmem>>, %arg2: memref<1x256xf32, #tpu.memory_space<vmem>>, %arg3: memref<1x256xf32, #tpu.memory_space<vmem>>, %arg4: memref<8x256xf32, #tpu.memory_space<vmem>>) attributes {dimension_semantics = [#tpu.dimension_semantics<parallel>], iteration_bounds = array<i64: 1>, scalar_prefetch = 0 : i64, scratch_operands = 0 : i64, tpu.core_type = #tpu.core_type<tc>, window_params = [{transform_indices = @transform_0, window_bounds = array<i64: 8, 256>}, {pipeline_mode = #tpu.pipeline_mode<synchronous>, transform_indices = @transform_1, window_bounds = array<i64: 1, 256>}, {pipeline_mode = #tpu.pipeline_mode<synchronous>, transform_indices = @transform_2, window_bounds = array<i64: 1, 256>}, {transform_indices = @transform_3, window_bounds = array<i64: 8, 256>}]} {
    %c0 = arith.constant 0 : index
    %c0_0 = arith.constant 0 : index
    %0 = vector.load %arg1[%c0, %c0_0] : memref<8x256xf32, #tpu.memory_space<vmem>>, vector<8x256xf32>
    %c0_1 = arith.constant 0 : index
    %c0_2 = arith.constant 0 : index
    %1 = vector.load %arg2[%c0_1, %c0_2] : memref<1x256xf32, #tpu.memory_space<vmem>>, vector<1x256xf32>
    %2 = vector.broadcast %1 : vector<1x256xf32> to vector<8x256xf32>
    %3 = arith.mulf %0, %2 : vector<8x256xf32>
    %c0_3 = arith.constant 0 : index
    %c0_4 = arith.constant 0 : index
    %4 = vector.load %arg3[%c0_3, %c0_4] : memref<1x256xf32, #tpu.memory_space<vmem>>, vector<1x256xf32>
    %5 = vector.broadcast %4 : vector<1x256xf32> to vector<8x256xf32>
    %6 = arith.addf %3, %5 : vector<8x256xf32>
    %c0_5 = arith.constant 0 : index
    %c0_6 = arith.constant 0 : index
    %7 = vector.load %arg4[%c0_5, %c0_6] : memref<8x256xf32, #tpu.memory_space<vmem>>, vector<8x256xf32>
    tpu.vector_store %arg4[%c0_5, %c0_6], %6 {strides = array<i32>} : memref<8x256xf32, #tpu.memory_space<vmem>>, vector<8x256xf32>,
    return
  }
  func.func @transform_0(%arg0: i32) -> (i32, i32) {
    %c0_i32 = arith.constant 0 : i32
    %c0_i32_0 = arith.constant 0 : i32
    return %arg0, %c0_i32 : i32, i32
  }
  func.func @transform_1(%arg0: i32) -> (i32, i32) {
    %c0_i32 = arith.constant 0 : i32
    %c0_i32_0 = arith.constant 0 : i32
    %c0_i32_1 = arith.constant 0 : i32
    return %c0_i32, %c0_i32_0 : i32, i32
  }
  func.func @transform_2(%arg0: i32) -> (i32, i32) {
    %c0_i32 = arith.constant 0 : i32
    %c0_i32_0 = arith.constant 0 : i32
    %c0_i32_1 = arith.constant 0 : i32
    return %c0_i32, %c0_i32_0 : i32, i32
  }
  func.func @transform_3(%arg0: i32) -> (i32, i32) {
    %c0_i32 = arith.constant 0 : i32
    %c0_i32_0 = arith.constant 0 : i32
    return %arg0, %c0_i32 : i32, i32
  }
}

module attributes {stable_mosaic.version = 11 : i64} {
  func.func @_conv_stats_kernel(%arg0: i32, %arg1: i32, %arg2: memref<8x256xbf16, #tpu.memory_space<vmem>>, %arg3: memref<256x256xbf16, #tpu.memory_space<vmem>>, %arg4: memref<8x256xf32, #tpu.memory_space<vmem>>, %arg5: memref<8x256xf32, #tpu.memory_space<vmem>>, %arg6: memref<8x256xf32, #tpu.memory_space<vmem>>) attributes {dimension_semantics = [#tpu.dimension_semantics<parallel>, #tpu.dimension_semantics<arbitrary>], iteration_bounds = array<i64: 1, 5>, scalar_prefetch = 0 : i64, scratch_operands = 1 : i64, tpu.core_type = #tpu.core_type<tc>, window_params = [{transform_indices = @transform_0, window_bounds = array<i64: 8, 256>}, {transform_indices = @transform_1, window_bounds = array<i64: 256, 256>}, {transform_indices = @transform_2, window_bounds = array<i64: 8, 256>}, {transform_indices = @transform_3, window_bounds = array<i64: 8, 256>}]} {
    %c0_i32 = arith.constant 0 : i32
    %0 = arith.cmpi eq, %arg1, %c0_i32 : i32
    %1 = arith.extui %0 : i1 to i32
    %c0_i32_0 = arith.constant 0 : i32
    %2 = arith.cmpi ne, %1, %c0_i32_0 : i32
    scf.if %2 {
      %cst_9 = arith.constant 0.000000e+00 : f32
      %12 = vector.broadcast %cst_9 : f32 to vector<8x256xf32>
      %c0_10 = arith.constant 0 : index
      %c0_11 = arith.constant 0 : index
      %13 = vector.load %arg6[%c0_10, %c0_11] : memref<8x256xf32, #tpu.memory_space<vmem>>, vector<8x256xf32>
      tpu.vector_store %arg6[%c0_10, %c0_11], %12 {strides = array<i32>} : memref<8x256xf32, #tpu.memory_space<vmem>>, vector<8x256xf32>,
    } else {
    }
    %c0 = arith.constant 0 : index
    %c0_1 = arith.constant 0 : index
    %3 = vector.load %arg6[%c0, %c0_1] : memref<8x256xf32, #tpu.memory_space<vmem>>, vector<8x256xf32>
    %c0_2 = arith.constant 0 : index
    %c0_3 = arith.constant 0 : index
    %4 = vector.load %arg2[%c0_2, %c0_3] : memref<8x256xbf16, #tpu.memory_space<vmem>>, vector<8x256xbf16>
    %c0_4 = arith.constant 0 : index
    %c0_5 = arith.constant 0 : index
    %5 = vector.load %arg3[%c0_4, %c0_5] : memref<256x256xbf16, #tpu.memory_space<vmem>>, vector<256x256xbf16>
    %cst = arith.constant dense<0.000000e+00> : vector<8x256xf32>
    %6 = tpu.matmul %4, %5, %cst {dimension_numbers = #tpu.dot_dimension_numbers<[1], [0], [0], [1], [0, 0, 1, 1], [], []>} : vector<8x256xbf16>, vector<256x256xbf16>, vector<8x256xf32> -> vector<8x256xf32>
    %7 = arith.addf %3, %6 : vector<8x256xf32>
    %c0_6 = arith.constant 0 : index
    %c0_7 = arith.constant 0 : index
    %8 = vector.load %arg6[%c0_6, %c0_7] : memref<8x256xf32, #tpu.memory_space<vmem>>, vector<8x256xf32>
    tpu.vector_store %arg6[%c0_6, %c0_7], %7 {strides = array<i32>} : memref<8x256xf32, #tpu.memory_space<vmem>>, vector<8x256xf32>,
    %c4_i32 = arith.constant 4 : i32
    %9 = arith.cmpi eq, %arg1, %c4_i32 : i32
    %10 = arith.extui %9 : i1 to i32
    %c0_i32_8 = arith.constant 0 : i32
    %11 = arith.cmpi ne, %10, %c0_i32_8 : i32
    scf.if %11 {
      %c0_9 = arith.constant 0 : index
      %c0_10 = arith.constant 0 : index
      %12 = vector.load %arg6[%c0_9, %c0_10] : memref<8x256xf32, #tpu.memory_space<vmem>>, vector<8x256xf32>
      %c0_11 = arith.constant 0 : index
      %c0_12 = arith.constant 0 : index
      %13 = vector.load %arg4[%c0_11, %c0_12] : memref<8x256xf32, #tpu.memory_space<vmem>>, vector<8x256xf32>
      tpu.vector_store %arg4[%c0_11, %c0_12], %12 {strides = array<i32>} : memref<8x256xf32, #tpu.memory_space<vmem>>, vector<8x256xf32>,
      %cst_13 = arith.constant dense<0.000000e+00> : vector<256xf32>
      %14 = vector.multi_reduction <add>, %12, %cst_13 [0] : vector<8x256xf32> to vector<256xf32>
      %15 = vector.shape_cast %14 : vector<256xf32> to vector<1x256xf32>
      %16 = arith.mulf %12, %12 : vector<8x256xf32>
      %cst_14 = arith.constant dense<0.000000e+00> : vector<256xf32>
      %17 = vector.multi_reduction <add>, %16, %cst_14 [0] : vector<8x256xf32> to vector<256xf32>
      %18 = vector.shape_cast %17 : vector<256xf32> to vector<1x256xf32>
      %19 = tpu.iota {dimensions = array<i32: 0>} : vector<8x256xi32>
      %c0_i32_15 = arith.constant 0 : i32
      %20 = vector.broadcast %c0_i32_15 : i32 to vector<8x256xi32>
      %21 = arith.cmpi eq, %19, %20 : vector<8x256xi32>
      %c1_i32 = arith.constant 1 : i32
      %22 = vector.broadcast %c1_i32 : i32 to vector<8x256xi32>
      %23 = arith.cmpi eq, %19, %22 : vector<8x256xi32>
      %cst_16 = arith.constant 0.000000e+00 : f32
      %24 = vector.shape_cast %18 : vector<1x256xf32> to vector<1x256xf32>
      %25 = vector.broadcast %24 : vector<1x256xf32> to vector<8x256xf32>
      %26 = vector.broadcast %cst_16 : f32 to vector<8x256xf32>
      %27 = arith.select %23, %25, %26 : vector<8x256xi1>, vector<8x256xf32>
      %28 = vector.shape_cast %15 : vector<1x256xf32> to vector<1x256xf32>
      %29 = vector.broadcast %28 : vector<1x256xf32> to vector<8x256xf32>
      %30 = arith.select %21, %29, %27 : vector<8x256xi1>, vector<8x256xf32>
      %c0_17 = arith.constant 0 : index
      %c0_18 = arith.constant 0 : index
      %31 = vector.load %arg5[%c0_17, %c0_18] : memref<8x256xf32, #tpu.memory_space<vmem>>, vector<8x256xf32>
      tpu.vector_store %arg5[%c0_17, %c0_18], %30 {strides = array<i32>} : memref<8x256xf32, #tpu.memory_space<vmem>>, vector<8x256xf32>,
    } else {
    }
    return
  }
  func.func @transform_0(%arg0: i32, %arg1: i32) -> (i32, i32) {
    %c0_i32 = arith.constant 0 : i32
    return %arg0, %arg1 : i32, i32
  }
  func.func @transform_1(%arg0: i32, %arg1: i32) -> (i32, i32) {
    %c0_i32 = arith.constant 0 : i32
    %c0_i32_0 = arith.constant 0 : i32
    return %arg1, %c0_i32 : i32, i32
  }
  func.func @transform_2(%arg0: i32, %arg1: i32) -> (i32, i32) {
    %c0_i32 = arith.constant 0 : i32
    %c0_i32_0 = arith.constant 0 : i32
    return %arg0, %c0_i32 : i32, i32
  }
  func.func @transform_3(%arg0: i32, %arg1: i32) -> (i32, i32) {
    %c0_i32 = arith.constant 0 : i32
    %c0_i32_0 = arith.constant 0 : i32
    return %arg0, %c0_i32 : i32, i32
  }
}

module attributes {stable_mosaic.version = 11 : i64} {
  func.func @kernel(%arg0: i32, %arg1: memref<8x256xf32, #tpu.memory_space<vmem>>, %arg2: memref<1x256xf32, #tpu.memory_space<vmem>>, %arg3: memref<1x256xf32, #tpu.memory_space<vmem>>, %arg4: memref<8x256xf32, #tpu.memory_space<vmem>>) attributes {dimension_semantics = [#tpu.dimension_semantics<parallel>], iteration_bounds = array<i64: 1>, scalar_prefetch = 0 : i64, scratch_operands = 0 : i64, tpu.core_type = #tpu.core_type<tc>, window_params = [{transform_indices = @transform_0, window_bounds = array<i64: 8, 256>}, {pipeline_mode = #tpu.pipeline_mode<synchronous>, transform_indices = @transform_1, window_bounds = array<i64: 1, 256>}, {pipeline_mode = #tpu.pipeline_mode<synchronous>, transform_indices = @transform_2, window_bounds = array<i64: 1, 256>}, {transform_indices = @transform_3, window_bounds = array<i64: 8, 256>}]} {
    %c0 = arith.constant 0 : index
    %c0_0 = arith.constant 0 : index
    %0 = vector.load %arg1[%c0, %c0_0] : memref<8x256xf32, #tpu.memory_space<vmem>>, vector<8x256xf32>
    %c0_1 = arith.constant 0 : index
    %c0_2 = arith.constant 0 : index
    %1 = vector.load %arg2[%c0_1, %c0_2] : memref<1x256xf32, #tpu.memory_space<vmem>>, vector<1x256xf32>
    %2 = vector.broadcast %1 : vector<1x256xf32> to vector<8x256xf32>
    %3 = arith.mulf %0, %2 : vector<8x256xf32>
    %c0_3 = arith.constant 0 : index
    %c0_4 = arith.constant 0 : index
    %4 = vector.load %arg3[%c0_3, %c0_4] : memref<1x256xf32, #tpu.memory_space<vmem>>, vector<1x256xf32>
    %5 = vector.broadcast %4 : vector<1x256xf32> to vector<8x256xf32>
    %6 = arith.addf %3, %5 : vector<8x256xf32>
    %cst = arith.constant 0.000000e+00 : f32
    %7 = vector.broadcast %cst : f32 to vector<8x256xf32>
    %8 = arith.maximumf %6, %7 : vector<8x256xf32>
    %c0_5 = arith.constant 0 : index
    %c0_6 = arith.constant 0 : index
    %9 = vector.load %arg4[%c0_5, %c0_6] : memref<8x256xf32, #tpu.memory_space<vmem>>, vector<8x256xf32>
    tpu.vector_store %arg4[%c0_5, %c0_6], %8 {strides = array<i32>} : memref<8x256xf32, #tpu.memory_space<vmem>>, vector<8x256xf32>,
    return
  }
  func.func @transform_0(%arg0: i32) -> (i32, i32) {
    %c0_i32 = arith.constant 0 : i32
    %c0_i32_0 = arith.constant 0 : i32
    return %arg0, %c0_i32 : i32, i32
  }
  func.func @transform_1(%arg0: i32) -> (i32, i32) {
    %c0_i32 = arith.constant 0 : i32
    %c0_i32_0 = arith.constant 0 : i32
    %c0_i32_1 = arith.constant 0 : i32
    return %c0_i32, %c0_i32_0 : i32, i32
  }
  func.func @transform_2(%arg0: i32) -> (i32, i32) {
    %c0_i32 = arith.constant 0 : i32
    %c0_i32_0 = arith.constant 0 : i32
    %c0_i32_1 = arith.constant 0 : i32
    return %c0_i32, %c0_i32_0 : i32, i32
  }
  func.func @transform_3(%arg0: i32) -> (i32, i32) {
    %c0_i32 = arith.constant 0 : i32
    %c0_i32_0 = arith.constant 0 : i32
    return %arg0, %c0_i32 : i32, i32
  }
}

module attributes {stable_mosaic.version = 11 : i64} {
  func.func @kernel(%arg0: i32, %arg1: memref<8x256xf32, #tpu.memory_space<vmem>>, %arg2: memref<1x256xf32, #tpu.memory_space<vmem>>, %arg3: memref<1x256xf32, #tpu.memory_space<vmem>>, %arg4: memref<8x256xf32, #tpu.memory_space<vmem>>, %arg5: memref<8x256xf32, #tpu.memory_space<vmem>>) attributes {dimension_semantics = [#tpu.dimension_semantics<parallel>], iteration_bounds = array<i64: 1>, scalar_prefetch = 0 : i64, scratch_operands = 0 : i64, tpu.core_type = #tpu.core_type<tc>, window_params = [{transform_indices = @transform_0, window_bounds = array<i64: 8, 256>}, {pipeline_mode = #tpu.pipeline_mode<synchronous>, transform_indices = @transform_1, window_bounds = array<i64: 1, 256>}, {pipeline_mode = #tpu.pipeline_mode<synchronous>, transform_indices = @transform_2, window_bounds = array<i64: 1, 256>}, {transform_indices = @transform_3, window_bounds = array<i64: 8, 256>}, {transform_indices = @transform_4, window_bounds = array<i64: 8, 256>}]} {
    %c0 = arith.constant 0 : index
    %c0_0 = arith.constant 0 : index
    %0 = vector.load %arg1[%c0, %c0_0] : memref<8x256xf32, #tpu.memory_space<vmem>>, vector<8x256xf32>
    %c0_1 = arith.constant 0 : index
    %c0_2 = arith.constant 0 : index
    %1 = vector.load %arg2[%c0_1, %c0_2] : memref<1x256xf32, #tpu.memory_space<vmem>>, vector<1x256xf32>
    %2 = vector.broadcast %1 : vector<1x256xf32> to vector<8x256xf32>
    %3 = arith.mulf %0, %2 : vector<8x256xf32>
    %c0_3 = arith.constant 0 : index
    %c0_4 = arith.constant 0 : index
    %4 = vector.load %arg3[%c0_3, %c0_4] : memref<1x256xf32, #tpu.memory_space<vmem>>, vector<1x256xf32>
    %5 = vector.broadcast %4 : vector<1x256xf32> to vector<8x256xf32>
    %6 = arith.addf %3, %5 : vector<8x256xf32>
    %c0_5 = arith.constant 0 : index
    %c0_6 = arith.constant 0 : index
    %7 = vector.load %arg4[%c0_5, %c0_6] : memref<8x256xf32, #tpu.memory_space<vmem>>, vector<8x256xf32>
    %8 = arith.addf %6, %7 : vector<8x256xf32>
    %cst = arith.constant 0.000000e+00 : f32
    %9 = vector.broadcast %cst : f32 to vector<8x256xf32>
    %10 = arith.maximumf %8, %9 : vector<8x256xf32>
    %c0_7 = arith.constant 0 : index
    %c0_8 = arith.constant 0 : index
    %11 = vector.load %arg5[%c0_7, %c0_8] : memref<8x256xf32, #tpu.memory_space<vmem>>, vector<8x256xf32>
    tpu.vector_store %arg5[%c0_7, %c0_8], %10 {strides = array<i32>} : memref<8x256xf32, #tpu.memory_space<vmem>>, vector<8x256xf32>,
    return
  }
  func.func @transform_0(%arg0: i32) -> (i32, i32) {
    %c0_i32 = arith.constant 0 : i32
    %c0_i32_0 = arith.constant 0 : i32
    return %arg0, %c0_i32 : i32, i32
  }
  func.func @transform_1(%arg0: i32) -> (i32, i32) {
    %c0_i32 = arith.constant 0 : i32
    %c0_i32_0 = arith.constant 0 : i32
    %c0_i32_1 = arith.constant 0 : i32
    return %c0_i32, %c0_i32_0 : i32, i32
  }
  func.func @transform_2(%arg0: i32) -> (i32, i32) {
    %c0_i32 = arith.constant 0 : i32
    %c0_i32_0 = arith.constant 0 : i32
    %c0_i32_1 = arith.constant 0 : i32
    return %c0_i32, %c0_i32_0 : i32, i32
  }
  func.func @transform_3(%arg0: i32) -> (i32, i32) {
    %c0_i32 = arith.constant 0 : i32
    %c0_i32_0 = arith.constant 0 : i32
    return %arg0, %c0_i32 : i32, i32
  }
  func.func @transform_4(%arg0: i32) -> (i32, i32) {
    %c0_i32 = arith.constant 0 : i32
    %c0_i32_0 = arith.constant 0 : i32
    return %arg0, %c0_i32 : i32, i32
  }
}

module attributes {stable_mosaic.version = 11 : i64} {
  func.func @_conv_stats_kernel(%arg0: i32, %arg1: i32, %arg2: memref<8x256xbf16, #tpu.memory_space<vmem>>, %arg3: memref<256x256xbf16, #tpu.memory_space<vmem>>, %arg4: memref<8x256xf32, #tpu.memory_space<vmem>>, %arg5: memref<8x256xf32, #tpu.memory_space<vmem>>, %arg6: memref<8x256xf32, #tpu.memory_space<vmem>>) attributes {dimension_semantics = [#tpu.dimension_semantics<parallel>, #tpu.dimension_semantics<arbitrary>], iteration_bounds = array<i64: 1, 9>, scalar_prefetch = 0 : i64, scratch_operands = 1 : i64, tpu.core_type = #tpu.core_type<tc>, window_params = [{transform_indices = @transform_0, window_bounds = array<i64: 8, 256>}, {transform_indices = @transform_1, window_bounds = array<i64: 256, 256>}, {transform_indices = @transform_2, window_bounds = array<i64: 8, 256>}, {transform_indices = @transform_3, window_bounds = array<i64: 8, 256>}]} {
    %c0_i32 = arith.constant 0 : i32
    %0 = arith.cmpi eq, %arg1, %c0_i32 : i32
    %1 = arith.extui %0 : i1 to i32
    %c0_i32_0 = arith.constant 0 : i32
    %2 = arith.cmpi ne, %1, %c0_i32_0 : i32
    scf.if %2 {
      %cst_9 = arith.constant 0.000000e+00 : f32
      %12 = vector.broadcast %cst_9 : f32 to vector<8x256xf32>
      %c0_10 = arith.constant 0 : index
      %c0_11 = arith.constant 0 : index
      %13 = vector.load %arg6[%c0_10, %c0_11] : memref<8x256xf32, #tpu.memory_space<vmem>>, vector<8x256xf32>
      tpu.vector_store %arg6[%c0_10, %c0_11], %12 {strides = array<i32>} : memref<8x256xf32, #tpu.memory_space<vmem>>, vector<8x256xf32>,
    } else {
    }
    %c0 = arith.constant 0 : index
    %c0_1 = arith.constant 0 : index
    %3 = vector.load %arg6[%c0, %c0_1] : memref<8x256xf32, #tpu.memory_space<vmem>>, vector<8x256xf32>
    %c0_2 = arith.constant 0 : index
    %c0_3 = arith.constant 0 : index
    %4 = vector.load %arg2[%c0_2, %c0_3] : memref<8x256xbf16, #tpu.memory_space<vmem>>, vector<8x256xbf16>
    %c0_4 = arith.constant 0 : index
    %c0_5 = arith.constant 0 : index
    %5 = vector.load %arg3[%c0_4, %c0_5] : memref<256x256xbf16, #tpu.memory_space<vmem>>, vector<256x256xbf16>
    %cst = arith.constant dense<0.000000e+00> : vector<8x256xf32>
    %6 = tpu.matmul %4, %5, %cst {dimension_numbers = #tpu.dot_dimension_numbers<[1], [0], [0], [1], [0, 0, 1, 1], [], []>} : vector<8x256xbf16>, vector<256x256xbf16>, vector<8x256xf32> -> vector<8x256xf32>
    %7 = arith.addf %3, %6 : vector<8x256xf32>
    %c0_6 = arith.constant 0 : index
    %c0_7 = arith.constant 0 : index
    %8 = vector.load %arg6[%c0_6, %c0_7] : memref<8x256xf32, #tpu.memory_space<vmem>>, vector<8x256xf32>
    tpu.vector_store %arg6[%c0_6, %c0_7], %7 {strides = array<i32>} : memref<8x256xf32, #tpu.memory_space<vmem>>, vector<8x256xf32>,
    %c8_i32 = arith.constant 8 : i32
    %9 = arith.cmpi eq, %arg1, %c8_i32 : i32
    %10 = arith.extui %9 : i1 to i32
    %c0_i32_8 = arith.constant 0 : i32
    %11 = arith.cmpi ne, %10, %c0_i32_8 : i32
    scf.if %11 {
      %c0_9 = arith.constant 0 : index
      %c0_10 = arith.constant 0 : index
      %12 = vector.load %arg6[%c0_9, %c0_10] : memref<8x256xf32, #tpu.memory_space<vmem>>, vector<8x256xf32>
      %c0_11 = arith.constant 0 : index
      %c0_12 = arith.constant 0 : index
      %13 = vector.load %arg4[%c0_11, %c0_12] : memref<8x256xf32, #tpu.memory_space<vmem>>, vector<8x256xf32>
      tpu.vector_store %arg4[%c0_11, %c0_12], %12 {strides = array<i32>} : memref<8x256xf32, #tpu.memory_space<vmem>>, vector<8x256xf32>,
      %cst_13 = arith.constant dense<0.000000e+00> : vector<256xf32>
      %14 = vector.multi_reduction <add>, %12, %cst_13 [0] : vector<8x256xf32> to vector<256xf32>
      %15 = vector.shape_cast %14 : vector<256xf32> to vector<1x256xf32>
      %16 = arith.mulf %12, %12 : vector<8x256xf32>
      %cst_14 = arith.constant dense<0.000000e+00> : vector<256xf32>
      %17 = vector.multi_reduction <add>, %16, %cst_14 [0] : vector<8x256xf32> to vector<256xf32>
      %18 = vector.shape_cast %17 : vector<256xf32> to vector<1x256xf32>
      %19 = tpu.iota {dimensions = array<i32: 0>} : vector<8x256xi32>
      %c0_i32_15 = arith.constant 0 : i32
      %20 = vector.broadcast %c0_i32_15 : i32 to vector<8x256xi32>
      %21 = arith.cmpi eq, %19, %20 : vector<8x256xi32>
      %c1_i32 = arith.constant 1 : i32
      %22 = vector.broadcast %c1_i32 : i32 to vector<8x256xi32>
      %23 = arith.cmpi eq, %19, %22 : vector<8x256xi32>
      %cst_16 = arith.constant 0.000000e+00 : f32
      %24 = vector.shape_cast %18 : vector<1x256xf32> to vector<1x256xf32>
      %25 = vector.broadcast %24 : vector<1x256xf32> to vector<8x256xf32>
      %26 = vector.broadcast %cst_16 : f32 to vector<8x256xf32>
      %27 = arith.select %23, %25, %26 : vector<8x256xi1>, vector<8x256xf32>
      %28 = vector.shape_cast %15 : vector<1x256xf32> to vector<1x256xf32>
      %29 = vector.broadcast %28 : vector<1x256xf32> to vector<8x256xf32>
      %30 = arith.select %21, %29, %27 : vector<8x256xi1>, vector<8x256xf32>
      %c0_17 = arith.constant 0 : index
      %c0_18 = arith.constant 0 : index
      %31 = vector.load %arg5[%c0_17, %c0_18] : memref<8x256xf32, #tpu.memory_space<vmem>>, vector<8x256xf32>
      tpu.vector_store %arg5[%c0_17, %c0_18], %30 {strides = array<i32>} : memref<8x256xf32, #tpu.memory_space<vmem>>, vector<8x256xf32>,
    } else {
    }
    return
  }
  func.func @transform_0(%arg0: i32, %arg1: i32) -> (i32, i32) {
    %c0_i32 = arith.constant 0 : i32
    return %arg0, %arg1 : i32, i32
  }
  func.func @transform_1(%arg0: i32, %arg1: i32) -> (i32, i32) {
    %c0_i32 = arith.constant 0 : i32
    %c0_i32_0 = arith.constant 0 : i32
    return %arg1, %c0_i32 : i32, i32
  }
  func.func @transform_2(%arg0: i32, %arg1: i32) -> (i32, i32) {
    %c0_i32 = arith.constant 0 : i32
    %c0_i32_0 = arith.constant 0 : i32
    return %arg0, %c0_i32 : i32, i32
  }
  func.func @transform_3(%arg0: i32, %arg1: i32) -> (i32, i32) {
    %c0_i32 = arith.constant 0 : i32
    %c0_i32_0 = arith.constant 0 : i32
    return %arg0, %c0_i32 : i32, i32
  }
}

module attributes {stable_mosaic.version = 11 : i64} {
  func.func @_conv_stats_kernel(%arg0: i32, %arg1: i32, %arg2: memref<8x256xbf16, #tpu.memory_space<vmem>>, %arg3: memref<256x512xbf16, #tpu.memory_space<vmem>>, %arg4: memref<8x512xf32, #tpu.memory_space<vmem>>, %arg5: memref<8x512xf32, #tpu.memory_space<vmem>>, %arg6: memref<8x512xf32, #tpu.memory_space<vmem>>) attributes {dimension_semantics = [#tpu.dimension_semantics<parallel>, #tpu.dimension_semantics<arbitrary>], iteration_bounds = array<i64: 1, 1>, scalar_prefetch = 0 : i64, scratch_operands = 1 : i64, tpu.core_type = #tpu.core_type<tc>, window_params = [{transform_indices = @transform_0, window_bounds = array<i64: 8, 256>}, {transform_indices = @transform_1, window_bounds = array<i64: 256, 512>}, {transform_indices = @transform_2, window_bounds = array<i64: 8, 512>}, {transform_indices = @transform_3, window_bounds = array<i64: 8, 512>}]} {
    %c0_i32 = arith.constant 0 : i32
    %0 = arith.cmpi eq, %arg1, %c0_i32 : i32
    %1 = arith.extui %0 : i1 to i32
    %c0_i32_0 = arith.constant 0 : i32
    %2 = arith.cmpi ne, %1, %c0_i32_0 : i32
    scf.if %2 {
      %cst_10 = arith.constant 0.000000e+00 : f32
      %12 = vector.broadcast %cst_10 : f32 to vector<8x512xf32>
      %c0_11 = arith.constant 0 : index
      %c0_12 = arith.constant 0 : index
      %13 = vector.load %arg6[%c0_11, %c0_12] : memref<8x512xf32, #tpu.memory_space<vmem>>, vector<8x512xf32>
      tpu.vector_store %arg6[%c0_11, %c0_12], %12 {strides = array<i32>} : memref<8x512xf32, #tpu.memory_space<vmem>>, vector<8x512xf32>,
    } else {
    }
    %c0 = arith.constant 0 : index
    %c0_1 = arith.constant 0 : index
    %3 = vector.load %arg6[%c0, %c0_1] : memref<8x512xf32, #tpu.memory_space<vmem>>, vector<8x512xf32>
    %c0_2 = arith.constant 0 : index
    %c0_3 = arith.constant 0 : index
    %4 = vector.load %arg2[%c0_2, %c0_3] : memref<8x256xbf16, #tpu.memory_space<vmem>>, vector<8x256xbf16>
    %c0_4 = arith.constant 0 : index
    %c0_5 = arith.constant 0 : index
    %5 = vector.load %arg3[%c0_4, %c0_5] : memref<256x512xbf16, #tpu.memory_space<vmem>>, vector<256x512xbf16>
    %cst = arith.constant dense<0.000000e+00> : vector<8x512xf32>
    %6 = tpu.matmul %4, %5, %cst {dimension_numbers = #tpu.dot_dimension_numbers<[1], [0], [0], [1], [0, 0, 1, 1], [], []>} : vector<8x256xbf16>, vector<256x512xbf16>, vector<8x512xf32> -> vector<8x512xf32>
    %7 = arith.addf %3, %6 : vector<8x512xf32>
    %c0_6 = arith.constant 0 : index
    %c0_7 = arith.constant 0 : index
    %8 = vector.load %arg6[%c0_6, %c0_7] : memref<8x512xf32, #tpu.memory_space<vmem>>, vector<8x512xf32>
    tpu.vector_store %arg6[%c0_6, %c0_7], %7 {strides = array<i32>} : memref<8x512xf32, #tpu.memory_space<vmem>>, vector<8x512xf32>,
    %c0_i32_8 = arith.constant 0 : i32
    %9 = arith.cmpi eq, %arg1, %c0_i32_8 : i32
    %10 = arith.extui %9 : i1 to i32
    %c0_i32_9 = arith.constant 0 : i32
    %11 = arith.cmpi ne, %10, %c0_i32_9 : i32
    scf.if %11 {
      %c0_10 = arith.constant 0 : index
      %c0_11 = arith.constant 0 : index
      %12 = vector.load %arg6[%c0_10, %c0_11] : memref<8x512xf32, #tpu.memory_space<vmem>>, vector<8x512xf32>
      %c0_12 = arith.constant 0 : index
      %c0_13 = arith.constant 0 : index
      %13 = vector.load %arg4[%c0_12, %c0_13] : memref<8x512xf32, #tpu.memory_space<vmem>>, vector<8x512xf32>
      tpu.vector_store %arg4[%c0_12, %c0_13], %12 {strides = array<i32>} : memref<8x512xf32, #tpu.memory_space<vmem>>, vector<8x512xf32>,
      %cst_14 = arith.constant dense<0.000000e+00> : vector<512xf32>
      %14 = vector.multi_reduction <add>, %12, %cst_14 [0] : vector<8x512xf32> to vector<512xf32>
      %15 = vector.shape_cast %14 : vector<512xf32> to vector<1x512xf32>
      %16 = arith.mulf %12, %12 : vector<8x512xf32>
      %cst_15 = arith.constant dense<0.000000e+00> : vector<512xf32>
      %17 = vector.multi_reduction <add>, %16, %cst_15 [0] : vector<8x512xf32> to vector<512xf32>
      %18 = vector.shape_cast %17 : vector<512xf32> to vector<1x512xf32>
      %19 = tpu.iota {dimensions = array<i32: 0>} : vector<8x512xi32>
      %c0_i32_16 = arith.constant 0 : i32
      %20 = vector.broadcast %c0_i32_16 : i32 to vector<8x512xi32>
      %21 = arith.cmpi eq, %19, %20 : vector<8x512xi32>
      %c1_i32 = arith.constant 1 : i32
      %22 = vector.broadcast %c1_i32 : i32 to vector<8x512xi32>
      %23 = arith.cmpi eq, %19, %22 : vector<8x512xi32>
      %cst_17 = arith.constant 0.000000e+00 : f32
      %24 = vector.shape_cast %18 : vector<1x512xf32> to vector<1x512xf32>
      %25 = vector.broadcast %24 : vector<1x512xf32> to vector<8x512xf32>
      %26 = vector.broadcast %cst_17 : f32 to vector<8x512xf32>
      %27 = arith.select %23, %25, %26 : vector<8x512xi1>, vector<8x512xf32>
      %28 = vector.shape_cast %15 : vector<1x512xf32> to vector<1x512xf32>
      %29 = vector.broadcast %28 : vector<1x512xf32> to vector<8x512xf32>
      %30 = arith.select %21, %29, %27 : vector<8x512xi1>, vector<8x512xf32>
      %c0_18 = arith.constant 0 : index
      %c0_19 = arith.constant 0 : index
      %31 = vector.load %arg5[%c0_18, %c0_19] : memref<8x512xf32, #tpu.memory_space<vmem>>, vector<8x512xf32>
      tpu.vector_store %arg5[%c0_18, %c0_19], %30 {strides = array<i32>} : memref<8x512xf32, #tpu.memory_space<vmem>>, vector<8x512xf32>,
    } else {
    }
    return
  }
  func.func @transform_0(%arg0: i32, %arg1: i32) -> (i32, i32) {
    %c0_i32 = arith.constant 0 : i32
    return %arg0, %arg1 : i32, i32
  }
  func.func @transform_1(%arg0: i32, %arg1: i32) -> (i32, i32) {
    %c0_i32 = arith.constant 0 : i32
    %c0_i32_0 = arith.constant 0 : i32
    return %arg1, %c0_i32 : i32, i32
  }
  func.func @transform_2(%arg0: i32, %arg1: i32) -> (i32, i32) {
    %c0_i32 = arith.constant 0 : i32
    %c0_i32_0 = arith.constant 0 : i32
    return %arg0, %c0_i32 : i32, i32
  }
  func.func @transform_3(%arg0: i32, %arg1: i32) -> (i32, i32) {
    %c0_i32 = arith.constant 0 : i32
    %c0_i32_0 = arith.constant 0 : i32
    return %arg0, %c0_i32 : i32, i32
  }
}

module attributes {stable_mosaic.version = 11 : i64} {
  func.func @kernel(%arg0: i32, %arg1: memref<8x512xf32, #tpu.memory_space<vmem>>, %arg2: memref<1x512xf32, #tpu.memory_space<vmem>>, %arg3: memref<1x512xf32, #tpu.memory_space<vmem>>, %arg4: memref<8x512xf32, #tpu.memory_space<vmem>>) attributes {dimension_semantics = [#tpu.dimension_semantics<parallel>], iteration_bounds = array<i64: 1>, scalar_prefetch = 0 : i64, scratch_operands = 0 : i64, tpu.core_type = #tpu.core_type<tc>, window_params = [{transform_indices = @transform_0, window_bounds = array<i64: 8, 512>}, {pipeline_mode = #tpu.pipeline_mode<synchronous>, transform_indices = @transform_1, window_bounds = array<i64: 1, 512>}, {pipeline_mode = #tpu.pipeline_mode<synchronous>, transform_indices = @transform_2, window_bounds = array<i64: 1, 512>}, {transform_indices = @transform_3, window_bounds = array<i64: 8, 512>}]} {
    %c0 = arith.constant 0 : index
    %c0_0 = arith.constant 0 : index
    %0 = vector.load %arg1[%c0, %c0_0] : memref<8x512xf32, #tpu.memory_space<vmem>>, vector<8x512xf32>
    %c0_1 = arith.constant 0 : index
    %c0_2 = arith.constant 0 : index
    %1 = vector.load %arg2[%c0_1, %c0_2] : memref<1x512xf32, #tpu.memory_space<vmem>>, vector<1x512xf32>
    %2 = vector.broadcast %1 : vector<1x512xf32> to vector<8x512xf32>
    %3 = arith.mulf %0, %2 : vector<8x512xf32>
    %c0_3 = arith.constant 0 : index
    %c0_4 = arith.constant 0 : index
    %4 = vector.load %arg3[%c0_3, %c0_4] : memref<1x512xf32, #tpu.memory_space<vmem>>, vector<1x512xf32>
    %5 = vector.broadcast %4 : vector<1x512xf32> to vector<8x512xf32>
    %6 = arith.addf %3, %5 : vector<8x512xf32>
    %c0_5 = arith.constant 0 : index
    %c0_6 = arith.constant 0 : index
    %7 = vector.load %arg4[%c0_5, %c0_6] : memref<8x512xf32, #tpu.memory_space<vmem>>, vector<8x512xf32>
    tpu.vector_store %arg4[%c0_5, %c0_6], %6 {strides = array<i32>} : memref<8x512xf32, #tpu.memory_space<vmem>>, vector<8x512xf32>,
    return
  }
  func.func @transform_0(%arg0: i32) -> (i32, i32) {
    %c0_i32 = arith.constant 0 : i32
    %c0_i32_0 = arith.constant 0 : i32
    return %arg0, %c0_i32 : i32, i32
  }
  func.func @transform_1(%arg0: i32) -> (i32, i32) {
    %c0_i32 = arith.constant 0 : i32
    %c0_i32_0 = arith.constant 0 : i32
    %c0_i32_1 = arith.constant 0 : i32
    return %c0_i32, %c0_i32_0 : i32, i32
  }
  func.func @transform_2(%arg0: i32) -> (i32, i32) {
    %c0_i32 = arith.constant 0 : i32
    %c0_i32_0 = arith.constant 0 : i32
    %c0_i32_1 = arith.constant 0 : i32
    return %c0_i32, %c0_i32_0 : i32, i32
  }
  func.func @transform_3(%arg0: i32) -> (i32, i32) {
    %c0_i32 = arith.constant 0 : i32
    %c0_i32_0 = arith.constant 0 : i32
    return %arg0, %c0_i32 : i32, i32
  }
}

module attributes {stable_mosaic.version = 11 : i64} {
  func.func @_conv_stats_kernel(%arg0: i32, %arg1: i32, %arg2: memref<8x256xbf16, #tpu.memory_space<vmem>>, %arg3: memref<256x512xbf16, #tpu.memory_space<vmem>>, %arg4: memref<8x512xf32, #tpu.memory_space<vmem>>, %arg5: memref<8x512xf32, #tpu.memory_space<vmem>>, %arg6: memref<8x512xf32, #tpu.memory_space<vmem>>) attributes {dimension_semantics = [#tpu.dimension_semantics<parallel>, #tpu.dimension_semantics<arbitrary>], iteration_bounds = array<i64: 1, 9>, scalar_prefetch = 0 : i64, scratch_operands = 1 : i64, tpu.core_type = #tpu.core_type<tc>, window_params = [{transform_indices = @transform_0, window_bounds = array<i64: 8, 256>}, {transform_indices = @transform_1, window_bounds = array<i64: 256, 512>}, {transform_indices = @transform_2, window_bounds = array<i64: 8, 512>}, {transform_indices = @transform_3, window_bounds = array<i64: 8, 512>}]} {
    %c0_i32 = arith.constant 0 : i32
    %0 = arith.cmpi eq, %arg1, %c0_i32 : i32
    %1 = arith.extui %0 : i1 to i32
    %c0_i32_0 = arith.constant 0 : i32
    %2 = arith.cmpi ne, %1, %c0_i32_0 : i32
    scf.if %2 {
      %cst_9 = arith.constant 0.000000e+00 : f32
      %12 = vector.broadcast %cst_9 : f32 to vector<8x512xf32>
      %c0_10 = arith.constant 0 : index
      %c0_11 = arith.constant 0 : index
      %13 = vector.load %arg6[%c0_10, %c0_11] : memref<8x512xf32, #tpu.memory_space<vmem>>, vector<8x512xf32>
      tpu.vector_store %arg6[%c0_10, %c0_11], %12 {strides = array<i32>} : memref<8x512xf32, #tpu.memory_space<vmem>>, vector<8x512xf32>,
    } else {
    }
    %c0 = arith.constant 0 : index
    %c0_1 = arith.constant 0 : index
    %3 = vector.load %arg6[%c0, %c0_1] : memref<8x512xf32, #tpu.memory_space<vmem>>, vector<8x512xf32>
    %c0_2 = arith.constant 0 : index
    %c0_3 = arith.constant 0 : index
    %4 = vector.load %arg2[%c0_2, %c0_3] : memref<8x256xbf16, #tpu.memory_space<vmem>>, vector<8x256xbf16>
    %c0_4 = arith.constant 0 : index
    %c0_5 = arith.constant 0 : index
    %5 = vector.load %arg3[%c0_4, %c0_5] : memref<256x512xbf16, #tpu.memory_space<vmem>>, vector<256x512xbf16>
    %cst = arith.constant dense<0.000000e+00> : vector<8x512xf32>
    %6 = tpu.matmul %4, %5, %cst {dimension_numbers = #tpu.dot_dimension_numbers<[1], [0], [0], [1], [0, 0, 1, 1], [], []>} : vector<8x256xbf16>, vector<256x512xbf16>, vector<8x512xf32> -> vector<8x512xf32>
    %7 = arith.addf %3, %6 : vector<8x512xf32>
    %c0_6 = arith.constant 0 : index
    %c0_7 = arith.constant 0 : index
    %8 = vector.load %arg6[%c0_6, %c0_7] : memref<8x512xf32, #tpu.memory_space<vmem>>, vector<8x512xf32>
    tpu.vector_store %arg6[%c0_6, %c0_7], %7 {strides = array<i32>} : memref<8x512xf32, #tpu.memory_space<vmem>>, vector<8x512xf32>,
    %c8_i32 = arith.constant 8 : i32
    %9 = arith.cmpi eq, %arg1, %c8_i32 : i32
    %10 = arith.extui %9 : i1 to i32
    %c0_i32_8 = arith.constant 0 : i32
    %11 = arith.cmpi ne, %10, %c0_i32_8 : i32
    scf.if %11 {
      %c0_9 = arith.constant 0 : index
      %c0_10 = arith.constant 0 : index
      %12 = vector.load %arg6[%c0_9, %c0_10] : memref<8x512xf32, #tpu.memory_space<vmem>>, vector<8x512xf32>
      %c0_11 = arith.constant 0 : index
      %c0_12 = arith.constant 0 : index
      %13 = vector.load %arg4[%c0_11, %c0_12] : memref<8x512xf32, #tpu.memory_space<vmem>>, vector<8x512xf32>
      tpu.vector_store %arg4[%c0_11, %c0_12], %12 {strides = array<i32>} : memref<8x512xf32, #tpu.memory_space<vmem>>, vector<8x512xf32>,
      %cst_13 = arith.constant dense<0.000000e+00> : vector<512xf32>
      %14 = vector.multi_reduction <add>, %12, %cst_13 [0] : vector<8x512xf32> to vector<512xf32>
      %15 = vector.shape_cast %14 : vector<512xf32> to vector<1x512xf32>
      %16 = arith.mulf %12, %12 : vector<8x512xf32>
      %cst_14 = arith.constant dense<0.000000e+00> : vector<512xf32>
      %17 = vector.multi_reduction <add>, %16, %cst_14 [0] : vector<8x512xf32> to vector<512xf32>
      %18 = vector.shape_cast %17 : vector<512xf32> to vector<1x512xf32>
      %19 = tpu.iota {dimensions = array<i32: 0>} : vector<8x512xi32>
      %c0_i32_15 = arith.constant 0 : i32
      %20 = vector.broadcast %c0_i32_15 : i32 to vector<8x512xi32>
      %21 = arith.cmpi eq, %19, %20 : vector<8x512xi32>
      %c1_i32 = arith.constant 1 : i32
      %22 = vector.broadcast %c1_i32 : i32 to vector<8x512xi32>
      %23 = arith.cmpi eq, %19, %22 : vector<8x512xi32>
      %cst_16 = arith.constant 0.000000e+00 : f32
      %24 = vector.shape_cast %18 : vector<1x512xf32> to vector<1x512xf32>
      %25 = vector.broadcast %24 : vector<1x512xf32> to vector<8x512xf32>
      %26 = vector.broadcast %cst_16 : f32 to vector<8x512xf32>
      %27 = arith.select %23, %25, %26 : vector<8x512xi1>, vector<8x512xf32>
      %28 = vector.shape_cast %15 : vector<1x512xf32> to vector<1x512xf32>
      %29 = vector.broadcast %28 : vector<1x512xf32> to vector<8x512xf32>
      %30 = arith.select %21, %29, %27 : vector<8x512xi1>, vector<8x512xf32>
      %c0_17 = arith.constant 0 : index
      %c0_18 = arith.constant 0 : index
      %31 = vector.load %arg5[%c0_17, %c0_18] : memref<8x512xf32, #tpu.memory_space<vmem>>, vector<8x512xf32>
      tpu.vector_store %arg5[%c0_17, %c0_18], %30 {strides = array<i32>} : memref<8x512xf32, #tpu.memory_space<vmem>>, vector<8x512xf32>,
    } else {
    }
    return
  }
  func.func @transform_0(%arg0: i32, %arg1: i32) -> (i32, i32) {
    %c0_i32 = arith.constant 0 : i32
    return %arg0, %arg1 : i32, i32
  }
  func.func @transform_1(%arg0: i32, %arg1: i32) -> (i32, i32) {
    %c0_i32 = arith.constant 0 : i32
    %c0_i32_0 = arith.constant 0 : i32
    return %arg1, %c0_i32 : i32, i32
  }
  func.func @transform_2(%arg0: i32, %arg1: i32) -> (i32, i32) {
    %c0_i32 = arith.constant 0 : i32
    %c0_i32_0 = arith.constant 0 : i32
    return %arg0, %c0_i32 : i32, i32
  }
  func.func @transform_3(%arg0: i32, %arg1: i32) -> (i32, i32) {
    %c0_i32 = arith.constant 0 : i32
    %c0_i32_0 = arith.constant 0 : i32
    return %arg0, %c0_i32 : i32, i32
  }
}

module attributes {stable_mosaic.version = 11 : i64} {
  func.func @kernel(%arg0: i32, %arg1: memref<8x512xf32, #tpu.memory_space<vmem>>, %arg2: memref<1x512xf32, #tpu.memory_space<vmem>>, %arg3: memref<1x512xf32, #tpu.memory_space<vmem>>, %arg4: memref<8x512xf32, #tpu.memory_space<vmem>>) attributes {dimension_semantics = [#tpu.dimension_semantics<parallel>], iteration_bounds = array<i64: 1>, scalar_prefetch = 0 : i64, scratch_operands = 0 : i64, tpu.core_type = #tpu.core_type<tc>, window_params = [{transform_indices = @transform_0, window_bounds = array<i64: 8, 512>}, {pipeline_mode = #tpu.pipeline_mode<synchronous>, transform_indices = @transform_1, window_bounds = array<i64: 1, 512>}, {pipeline_mode = #tpu.pipeline_mode<synchronous>, transform_indices = @transform_2, window_bounds = array<i64: 1, 512>}, {transform_indices = @transform_3, window_bounds = array<i64: 8, 512>}]} {
    %c0 = arith.constant 0 : index
    %c0_0 = arith.constant 0 : index
    %0 = vector.load %arg1[%c0, %c0_0] : memref<8x512xf32, #tpu.memory_space<vmem>>, vector<8x512xf32>
    %c0_1 = arith.constant 0 : index
    %c0_2 = arith.constant 0 : index
    %1 = vector.load %arg2[%c0_1, %c0_2] : memref<1x512xf32, #tpu.memory_space<vmem>>, vector<1x512xf32>
    %2 = vector.broadcast %1 : vector<1x512xf32> to vector<8x512xf32>
    %3 = arith.mulf %0, %2 : vector<8x512xf32>
    %c0_3 = arith.constant 0 : index
    %c0_4 = arith.constant 0 : index
    %4 = vector.load %arg3[%c0_3, %c0_4] : memref<1x512xf32, #tpu.memory_space<vmem>>, vector<1x512xf32>
    %5 = vector.broadcast %4 : vector<1x512xf32> to vector<8x512xf32>
    %6 = arith.addf %3, %5 : vector<8x512xf32>
    %cst = arith.constant 0.000000e+00 : f32
    %7 = vector.broadcast %cst : f32 to vector<8x512xf32>
    %8 = arith.maximumf %6, %7 : vector<8x512xf32>
    %c0_5 = arith.constant 0 : index
    %c0_6 = arith.constant 0 : index
    %9 = vector.load %arg4[%c0_5, %c0_6] : memref<8x512xf32, #tpu.memory_space<vmem>>, vector<8x512xf32>
    tpu.vector_store %arg4[%c0_5, %c0_6], %8 {strides = array<i32>} : memref<8x512xf32, #tpu.memory_space<vmem>>, vector<8x512xf32>,
    return
  }
  func.func @transform_0(%arg0: i32) -> (i32, i32) {
    %c0_i32 = arith.constant 0 : i32
    %c0_i32_0 = arith.constant 0 : i32
    return %arg0, %c0_i32 : i32, i32
  }
  func.func @transform_1(%arg0: i32) -> (i32, i32) {
    %c0_i32 = arith.constant 0 : i32
    %c0_i32_0 = arith.constant 0 : i32
    %c0_i32_1 = arith.constant 0 : i32
    return %c0_i32, %c0_i32_0 : i32, i32
  }
  func.func @transform_2(%arg0: i32) -> (i32, i32) {
    %c0_i32 = arith.constant 0 : i32
    %c0_i32_0 = arith.constant 0 : i32
    %c0_i32_1 = arith.constant 0 : i32
    return %c0_i32, %c0_i32_0 : i32, i32
  }
  func.func @transform_3(%arg0: i32) -> (i32, i32) {
    %c0_i32 = arith.constant 0 : i32
    %c0_i32_0 = arith.constant 0 : i32
    return %arg0, %c0_i32 : i32, i32
  }
}

module attributes {stable_mosaic.version = 11 : i64} {
  func.func @kernel(%arg0: i32, %arg1: memref<8x512xf32, #tpu.memory_space<vmem>>, %arg2: memref<1x512xf32, #tpu.memory_space<vmem>>, %arg3: memref<1x512xf32, #tpu.memory_space<vmem>>, %arg4: memref<8x512xf32, #tpu.memory_space<vmem>>, %arg5: memref<8x512xf32, #tpu.memory_space<vmem>>) attributes {dimension_semantics = [#tpu.dimension_semantics<parallel>], iteration_bounds = array<i64: 1>, scalar_prefetch = 0 : i64, scratch_operands = 0 : i64, tpu.core_type = #tpu.core_type<tc>, window_params = [{transform_indices = @transform_0, window_bounds = array<i64: 8, 512>}, {pipeline_mode = #tpu.pipeline_mode<synchronous>, transform_indices = @transform_1, window_bounds = array<i64: 1, 512>}, {pipeline_mode = #tpu.pipeline_mode<synchronous>, transform_indices = @transform_2, window_bounds = array<i64: 1, 512>}, {transform_indices = @transform_3, window_bounds = array<i64: 8, 512>}, {transform_indices = @transform_4, window_bounds = array<i64: 8, 512>}]} {
    %c0 = arith.constant 0 : index
    %c0_0 = arith.constant 0 : index
    %0 = vector.load %arg1[%c0, %c0_0] : memref<8x512xf32, #tpu.memory_space<vmem>>, vector<8x512xf32>
    %c0_1 = arith.constant 0 : index
    %c0_2 = arith.constant 0 : index
    %1 = vector.load %arg2[%c0_1, %c0_2] : memref<1x512xf32, #tpu.memory_space<vmem>>, vector<1x512xf32>
    %2 = vector.broadcast %1 : vector<1x512xf32> to vector<8x512xf32>
    %3 = arith.mulf %0, %2 : vector<8x512xf32>
    %c0_3 = arith.constant 0 : index
    %c0_4 = arith.constant 0 : index
    %4 = vector.load %arg3[%c0_3, %c0_4] : memref<1x512xf32, #tpu.memory_space<vmem>>, vector<1x512xf32>
    %5 = vector.broadcast %4 : vector<1x512xf32> to vector<8x512xf32>
    %6 = arith.addf %3, %5 : vector<8x512xf32>
    %c0_5 = arith.constant 0 : index
    %c0_6 = arith.constant 0 : index
    %7 = vector.load %arg4[%c0_5, %c0_6] : memref<8x512xf32, #tpu.memory_space<vmem>>, vector<8x512xf32>
    %8 = arith.addf %6, %7 : vector<8x512xf32>
    %cst = arith.constant 0.000000e+00 : f32
    %9 = vector.broadcast %cst : f32 to vector<8x512xf32>
    %10 = arith.maximumf %8, %9 : vector<8x512xf32>
    %c0_7 = arith.constant 0 : index
    %c0_8 = arith.constant 0 : index
    %11 = vector.load %arg5[%c0_7, %c0_8] : memref<8x512xf32, #tpu.memory_space<vmem>>, vector<8x512xf32>
    tpu.vector_store %arg5[%c0_7, %c0_8], %10 {strides = array<i32>} : memref<8x512xf32, #tpu.memory_space<vmem>>, vector<8x512xf32>,
    return
  }
  func.func @transform_0(%arg0: i32) -> (i32, i32) {
    %c0_i32 = arith.constant 0 : i32
    %c0_i32_0 = arith.constant 0 : i32
    return %arg0, %c0_i32 : i32, i32
  }
  func.func @transform_1(%arg0: i32) -> (i32, i32) {
    %c0_i32 = arith.constant 0 : i32
    %c0_i32_0 = arith.constant 0 : i32
    %c0_i32_1 = arith.constant 0 : i32
    return %c0_i32, %c0_i32_0 : i32, i32
  }
  func.func @transform_2(%arg0: i32) -> (i32, i32) {
    %c0_i32 = arith.constant 0 : i32
    %c0_i32_0 = arith.constant 0 : i32
    %c0_i32_1 = arith.constant 0 : i32
    return %c0_i32, %c0_i32_0 : i32, i32
  }
  func.func @transform_3(%arg0: i32) -> (i32, i32) {
    %c0_i32 = arith.constant 0 : i32
    %c0_i32_0 = arith.constant 0 : i32
    return %arg0, %c0_i32 : i32, i32
  }
  func.func @transform_4(%arg0: i32) -> (i32, i32) {
    %c0_i32 = arith.constant 0 : i32
    %c0_i32_0 = arith.constant 0 : i32
    return %arg0, %c0_i32 : i32, i32
  }
}

module attributes {stable_mosaic.version = 11 : i64} {
  func.func @_conv_stats_kernel(%arg0: i32, %arg1: i32, %arg2: memref<8x256xbf16, #tpu.memory_space<vmem>>, %arg3: memref<256x512xbf16, #tpu.memory_space<vmem>>, %arg4: memref<8x512xf32, #tpu.memory_space<vmem>>, %arg5: memref<8x512xf32, #tpu.memory_space<vmem>>, %arg6: memref<8x512xf32, #tpu.memory_space<vmem>>) attributes {dimension_semantics = [#tpu.dimension_semantics<parallel>, #tpu.dimension_semantics<arbitrary>], iteration_bounds = array<i64: 1, 18>, scalar_prefetch = 0 : i64, scratch_operands = 1 : i64, tpu.core_type = #tpu.core_type<tc>, window_params = [{transform_indices = @transform_0, window_bounds = array<i64: 8, 256>}, {transform_indices = @transform_1, window_bounds = array<i64: 256, 512>}, {transform_indices = @transform_2, window_bounds = array<i64: 8, 512>}, {transform_indices = @transform_3, window_bounds = array<i64: 8, 512>}]} {
    %c0_i32 = arith.constant 0 : i32
    %0 = arith.cmpi eq, %arg1, %c0_i32 : i32
    %1 = arith.extui %0 : i1 to i32
    %c0_i32_0 = arith.constant 0 : i32
    %2 = arith.cmpi ne, %1, %c0_i32_0 : i32
    scf.if %2 {
      %cst_9 = arith.constant 0.000000e+00 : f32
      %12 = vector.broadcast %cst_9 : f32 to vector<8x512xf32>
      %c0_10 = arith.constant 0 : index
      %c0_11 = arith.constant 0 : index
      %13 = vector.load %arg6[%c0_10, %c0_11] : memref<8x512xf32, #tpu.memory_space<vmem>>, vector<8x512xf32>
      tpu.vector_store %arg6[%c0_10, %c0_11], %12 {strides = array<i32>} : memref<8x512xf32, #tpu.memory_space<vmem>>, vector<8x512xf32>,
    } else {
    }
    %c0 = arith.constant 0 : index
    %c0_1 = arith.constant 0 : index
    %3 = vector.load %arg6[%c0, %c0_1] : memref<8x512xf32, #tpu.memory_space<vmem>>, vector<8x512xf32>
    %c0_2 = arith.constant 0 : index
    %c0_3 = arith.constant 0 : index
    %4 = vector.load %arg2[%c0_2, %c0_3] : memref<8x256xbf16, #tpu.memory_space<vmem>>, vector<8x256xbf16>
    %c0_4 = arith.constant 0 : index
    %c0_5 = arith.constant 0 : index
    %5 = vector.load %arg3[%c0_4, %c0_5] : memref<256x512xbf16, #tpu.memory_space<vmem>>, vector<256x512xbf16>
    %cst = arith.constant dense<0.000000e+00> : vector<8x512xf32>
    %6 = tpu.matmul %4, %5, %cst {dimension_numbers = #tpu.dot_dimension_numbers<[1], [0], [0], [1], [0, 0, 1, 1], [], []>} : vector<8x256xbf16>, vector<256x512xbf16>, vector<8x512xf32> -> vector<8x512xf32>
    %7 = arith.addf %3, %6 : vector<8x512xf32>
    %c0_6 = arith.constant 0 : index
    %c0_7 = arith.constant 0 : index
    %8 = vector.load %arg6[%c0_6, %c0_7] : memref<8x512xf32, #tpu.memory_space<vmem>>, vector<8x512xf32>
    tpu.vector_store %arg6[%c0_6, %c0_7], %7 {strides = array<i32>} : memref<8x512xf32, #tpu.memory_space<vmem>>, vector<8x512xf32>,
    %c17_i32 = arith.constant 17 : i32
    %9 = arith.cmpi eq, %arg1, %c17_i32 : i32
    %10 = arith.extui %9 : i1 to i32
    %c0_i32_8 = arith.constant 0 : i32
    %11 = arith.cmpi ne, %10, %c0_i32_8 : i32
    scf.if %11 {
      %c0_9 = arith.constant 0 : index
      %c0_10 = arith.constant 0 : index
      %12 = vector.load %arg6[%c0_9, %c0_10] : memref<8x512xf32, #tpu.memory_space<vmem>>, vector<8x512xf32>
      %c0_11 = arith.constant 0 : index
      %c0_12 = arith.constant 0 : index
      %13 = vector.load %arg4[%c0_11, %c0_12] : memref<8x512xf32, #tpu.memory_space<vmem>>, vector<8x512xf32>
      tpu.vector_store %arg4[%c0_11, %c0_12], %12 {strides = array<i32>} : memref<8x512xf32, #tpu.memory_space<vmem>>, vector<8x512xf32>,
      %cst_13 = arith.constant dense<0.000000e+00> : vector<512xf32>
      %14 = vector.multi_reduction <add>, %12, %cst_13 [0] : vector<8x512xf32> to vector<512xf32>
      %15 = vector.shape_cast %14 : vector<512xf32> to vector<1x512xf32>
      %16 = arith.mulf %12, %12 : vector<8x512xf32>
      %cst_14 = arith.constant dense<0.000000e+00> : vector<512xf32>
      %17 = vector.multi_reduction <add>, %16, %cst_14 [0] : vector<8x512xf32> to vector<512xf32>
      %18 = vector.shape_cast %17 : vector<512xf32> to vector<1x512xf32>
      %19 = tpu.iota {dimensions = array<i32: 0>} : vector<8x512xi32>
      %c0_i32_15 = arith.constant 0 : i32
      %20 = vector.broadcast %c0_i32_15 : i32 to vector<8x512xi32>
      %21 = arith.cmpi eq, %19, %20 : vector<8x512xi32>
      %c1_i32 = arith.constant 1 : i32
      %22 = vector.broadcast %c1_i32 : i32 to vector<8x512xi32>
      %23 = arith.cmpi eq, %19, %22 : vector<8x512xi32>
      %cst_16 = arith.constant 0.000000e+00 : f32
      %24 = vector.shape_cast %18 : vector<1x512xf32> to vector<1x512xf32>
      %25 = vector.broadcast %24 : vector<1x512xf32> to vector<8x512xf32>
      %26 = vector.broadcast %cst_16 : f32 to vector<8x512xf32>
      %27 = arith.select %23, %25, %26 : vector<8x512xi1>, vector<8x512xf32>
      %28 = vector.shape_cast %15 : vector<1x512xf32> to vector<1x512xf32>
      %29 = vector.broadcast %28 : vector<1x512xf32> to vector<8x512xf32>
      %30 = arith.select %21, %29, %27 : vector<8x512xi1>, vector<8x512xf32>
      %c0_17 = arith.constant 0 : index
      %c0_18 = arith.constant 0 : index
      %31 = vector.load %arg5[%c0_17, %c0_18] : memref<8x512xf32, #tpu.memory_space<vmem>>, vector<8x512xf32>
      tpu.vector_store %arg5[%c0_17, %c0_18], %30 {strides = array<i32>} : memref<8x512xf32, #tpu.memory_space<vmem>>, vector<8x512xf32>,
    } else {
    }
    return
  }
  func.func @transform_0(%arg0: i32, %arg1: i32) -> (i32, i32) {
    %c0_i32 = arith.constant 0 : i32
    return %arg0, %arg1 : i32, i32
  }
  func.func @transform_1(%arg0: i32, %arg1: i32) -> (i32, i32) {
    %c0_i32 = arith.constant 0 : i32
    %c0_i32_0 = arith.constant 0 : i32
    return %arg1, %c0_i32 : i32, i32
  }
  func.func @transform_2(%arg0: i32, %arg1: i32) -> (i32, i32) {
    %c0_i32 = arith.constant 0 : i32
    %c0_i32_0 = arith.constant 0 : i32
    return %arg0, %c0_i32 : i32, i32
  }
  func.func @transform_3(%arg0: i32, %arg1: i32) -> (i32, i32) {
    %c0_i32 = arith.constant 0 : i32
    %c0_i32_0 = arith.constant 0 : i32
    return %arg0, %c0_i32 : i32, i32
  }
}

module attributes {stable_mosaic.version = 11 : i64} {
  func.func @_gap_kernel(%arg0: i32, %arg1: memref<2x1x512xf32, #tpu.memory_space<vmem>>, %arg2: memref<2x512xf32, #tpu.memory_space<vmem>>) attributes {dimension_semantics = [#tpu.dimension_semantics<arbitrary>], iteration_bounds = array<i64: 1>, scalar_prefetch = 0 : i64, scratch_operands = 0 : i64, tpu.core_type = #tpu.core_type<tc>, window_params = [{pipeline_mode = #tpu.pipeline_mode<synchronous>, transform_indices = @transform_0, window_bounds = array<i64: 2, 1, 512>}, {pipeline_mode = #tpu.pipeline_mode<synchronous>, transform_indices = @transform_1, window_bounds = array<i64: 2, 512>}]} {
    %c0 = arith.constant 0 : index
    %c0_0 = arith.constant 0 : index
    %c0_1 = arith.constant 0 : index
    %0 = vector.load %arg1[%c0, %c0_0, %c0_1] : memref<2x1x512xf32, #tpu.memory_space<vmem>>, vector<2x1x512xf32>
    %cst = arith.constant dense<0.000000e+00> : vector<2x512xf32>
    %1 = vector.multi_reduction <add>, %0, %cst [1] : vector<2x1x512xf32> to vector<2x512xf32>
    %cst_2 = arith.constant 1.000000e+00 : f32
    %2 = vector.broadcast %cst_2 : f32 to vector<2x512xf32>
    %3 = arith.divf %1, %2 : vector<2x512xf32>
    %c0_3 = arith.constant 0 : index
    %c0_4 = arith.constant 0 : index
    %4 = vector.load %arg2[%c0_3, %c0_4] : memref<2x512xf32, #tpu.memory_space<vmem>>, vector<2x512xf32>
    tpu.vector_store %arg2[%c0_3, %c0_4], %3 {strides = array<i32>} : memref<2x512xf32, #tpu.memory_space<vmem>>, vector<2x512xf32>,
    return
  }
  func.func @transform_0(%arg0: i32) -> (i32, i32, i32) {
    %c0_i32 = arith.constant 0 : i32
    %c0_i32_0 = arith.constant 0 : i32
    %c0_i32_1 = arith.constant 0 : i32
    %c0_i32_2 = arith.constant 0 : i32
    return %c0_i32, %c0_i32_0, %c0_i32_1 : i32, i32, i32
  }
  func.func @transform_1(%arg0: i32) -> (i32, i32) {
    %c0_i32 = arith.constant 0 : i32
    %c0_i32_0 = arith.constant 0 : i32
    %c0_i32_1 = arith.constant 0 : i32
    return %c0_i32, %c0_i32_0 : i32, i32
  }
}

</mosaic_0001>

<bundles_post_ra>
// kernel: resnet_backbone_forward.43
= control target key start
LH: loop header
LB: loop body
LE: loop exit
PB: predicated region body
PF: predicated region fallthrough
CT: control target
= control target key end

     0   :  { %s447_s12 = smov 0   ;;  %s606_s0 = inlined_call_operand.vmem [shape: f32[512,128], index: 0, kind: input, shape index: {}]   ;;  %s607_s1 = inlined_call_operand.vmem [shape: f32[1,128], index: 1, kind: input, shape index: {}]   ;;  %s608_s2 = inlined_call_operand.vmem [shape: f32[1,128], index: 2, kind: input, shape index: {}]   ;;  %s609_s3 = inlined_call_operand.vmem [shape: f32[512,128], index: 3, kind: output, shape index: {}]  }
   0x1 LB: > { %s398_s13 = sadd.s32 4294967295, %s425_s12   ;;  %p402_p0 = scmp.ge.s32.totalorder %s425_s12, 1  ;;  %s425_s12 = sphi %s447_s12, %s13_s12  }
   0x2   : > { %p138_p1 = scmp.lt.s32.totalorder %s425_s12, 3 }
   0x4   : > { %p139_p2 = pnand %p402_p0, %p138_p1 }
   0x5   : > { %s403_s14 = sshll.u32 (!%p139_p2), %s398_s13, 5 }
   0x6   : > { %142 = sbr.rel (%p139_p2) target bundleno = 53 (0x35), region = 32  ;;  %p163_p3 = scmp.lt.s32.totalorder (!%p139_p2), %s403_s14, 63 }
   0xb   : > { %s611_s14 = smov (!%p163_p3, %s403_s14), 63  ;;  %v458_v0 = vld [vmem:[%s607_s1] ss:$0 sm:$0xff] }
   0xc   : > { %s404_s17 = sshll.u32 %s611_s14, 3  ;;  %v468_v1 = vld [vmem:[%s608_s2] ss:$0 sm:$0xff] }
   0xd   : > { %s463_s20 = scalar_lea.vmem %s606_s0, %s404_s17  ;;  %s491_s25 = scalar_lea.vmem %s609_s3, %s404_s17 }
   0xe   : > { %v174_v2 = vld [vmem:[%s463_s20] sm:$0xff]  ;;  %v175_v3 = vld [vmem:[%s463_s20 + $0x8] sm:$0xff]  ;;  %v176_v4 = vld [vmem:[%s463_s20 + $0x10] sm:$0xff] }
   0xf   : > { %v210_v5 = vmul.f32 %v458_v0, %v174_v2  ;;  %v211_v6 = vmul.f32 %v458_v0, %v175_v3  ;;  %v212_v7 = vmul.f32 %v458_v0, %v176_v4  ;;  %v177_v8 = vld [vmem:[%s463_s20 + $0x18] sm:$0xff]  ;;  %v178_v9 = vld [vmem:[%s463_s20 + $0x20] sm:$0xff]  ;;  %v179_v10 = vld [vmem:[%s463_s20 + $0x28] sm:$0xff] }
  0x10   : > { %v213_v11 = vmul.f32 %v458_v0, %v177_v8  ;;  %v214_v12 = vmul.f32 %v458_v0, %v178_v9  ;;  %v215_v13 = vmul.f32 %v458_v0, %v179_v10  ;;  %v180_v14 = vld [vmem:[%s463_s20 + $0x30] sm:$0xff]  ;;  %v181_v15 = vld [vmem:[%s463_s20 + $0x38] sm:$0xff]  ;;  %v182_v24 = vld [vmem:[%s463_s20 + $0x40] sm:$0xff] }
  0x11   : > { %v246_v16 = vadd.f32 %v468_v1, %v210_v5  ;;  %v247_v17 = vadd.f32 %v468_v1, %v211_v6  ;;  %v248_v18 = vadd.f32 %v468_v1, %v212_v7  ;;  %v216_v19 = vmul.f32 %v458_v0, %v180_v14  ;;  %v183_v25 = vld [vmem:[%s463_s20 + $0x48] sm:$0xff]  ;;  %v184_v26 = vld [vmem:[%s463_s20 + $0x50] sm:$0xff]  ;;  %v185_v31 = vld [vmem:[%s463_s20 + $0x58] sm:$0xff] }
  0x12   : > { %v249_v20 = vadd.f32 %v468_v1, %v213_v11  ;;  %v250_v21 = vadd.f32 %v468_v1, %v214_v12  ;;  %v251_v22 = vadd.f32 %v468_v1, %v215_v13  ;;  %v217_v23 = vmul.f32 %v458_v0, %v181_v15  ;;  %v186_v32 = vld [vmem:[%s463_s20 + $0x60] sm:$0xff]  ;;  %v187_v33 = vld [vmem:[%s463_s20 + $0x68] sm:$0xff]  ;;  %v188_v37 = vld [vmem:[%s463_s20 + $0x70] sm:$0xff] }
  0x13   : > { %v278_v27 = vmax.f32 %v246_v16, 0.0  ;;  %v279_v28 = vmax.f32 %v247_v17, 0.0  ;;  %v280_v29 = vmax.f32 %v248_v18, 0.0  ;;  %v252_v30 = vadd.f32 %v468_v1, %v216_v19  ;;  %v189_v42 = vld [vmem:[%s463_s20 + $0x78] sm:$0xff]  ;;  %v190_v54 = vld [vmem:[%s463_s20 + $0x80] sm:$0xff]  ;;  %v191_v55 = vld [vmem:[%s463_s20 + $0x88] sm:$0xff] }
  0x14   : > { %v281_v34 = vmax.f32 %v249_v20, 0.0  ;;  %v282_v35 = vmax.f32 %v250_v21, 0.0  ;;  %v253_v36 = vadd.f32 %v468_v1, %v217_v23  ;;  %v283_v38 = vmax.f32 %v251_v22, 0.0  ;;  %v192_v56 = vld [vmem:[%s463_s20 + $0x90] sm:$0xff]  ;;  %v193_v59 = vld [vmem:[%s463_s20 + $0x98] sm:$0xff]  ;;  %v194_v63 = vld [vmem:[%s463_s20 + $0xa0] sm:$0xff] }
  0x15   : > { %310 = vst [vmem:[%s491_s25] sm:$0xff] %v278_v27  ;;  %v218_v39 = vmul.f32 %v458_v0, %v182_v24  ;;  %v219_v40 = vmul.f32 %v458_v0, %v183_v25  ;;  %v220_v41 = vmul.f32 %v458_v0, %v184_v26  ;;  %v284_v43 = vmax.f32 %v252_v30, 0.0  ;;  %v195_v6 = vld [vmem:[%s463_s20 + $0xa8] sm:$0xff]  ;;  %v196_v10 = vld [vmem:[%s463_s20 + $0xb0] sm:$0xff]  ;;  %v197_v14 = vld [vmem:[%s463_s20 + $0xb8] sm:$0xff] }
  0x16   : > { %311 = vst [vmem:[%s491_s25 + $0x8] sm:$0xff] %v279_v28  ;;  %v221_v44 = vmul.f32 %v458_v0, %v185_v31  ;;  %v222_v45 = vmul.f32 %v458_v0, %v186_v32  ;;  %v223_v46 = vmul.f32 %v458_v0, %v187_v33  ;;  %v224_v50 = vmul.f32 %v458_v0, %v188_v37  ;;  %v198_v18 = vld [vmem:[%s463_s20 + $0xc0] sm:$0xff]  ;;  %v199_v22 = vld [vmem:[%s463_s20 + $0xc8] sm:$0xff]  ;;  %v200_v26 = vld [vmem:[%s463_s20 + $0xd0] sm:$0xff] }
  0x17   : > { %312 = vst [vmem:[%s491_s25 + $0x10] sm:$0xff] %v280_v29  ;;  %v254_v47 = vadd.f32 %v468_v1, %v218_v39  ;;  %v255_v48 = vadd.f32 %v468_v1, %v219_v40  ;;  %v256_v49 = vadd.f32 %v468_v1, %v220_v41  ;;  %v285_v51 = vmax.f32 %v253_v36, 0.0  ;;  %v201_v30 = vld [vmem:[%s463_s20 + $0xd8] sm:$0xff] }
  0x18   : > { %313 = vst [vmem:[%s491_s25 + $0x18] sm:$0xff] %v281_v34  ;;  %v257_v52 = vadd.f32 %v468_v1, %v221_v44  ;;  %v225_v53 = vmul.f32 %v458_v0, %v189_v42  ;;  %v258_v58 = vadd.f32 %v468_v1, %v222_v45  ;;  %v259_v62 = vadd.f32 %v468_v1, %v223_v46  ;;  %v202_v34 = vld [vmem:[%s463_s20 + $0xe0] sm:$0xff]  ;;  %v204_v42 = vld [vmem:[%s463_s20 + $0xf0] sm:$0xff]  ;;  %v205_v46 = vld [vmem:[%s463_s20 + $0xf8] sm:$0xff] }
  0x19   : > { %314 = vst [vmem:[%s491_s25 + $0x20] sm:$0xff] %v282_v35  ;;  %v286_v57 = vmax.f32 %v254_v47, 0.0  ;;  %v287_v60 = vmax.f32 %v255_v48, 0.0  ;;  %v288_v61 = vmax.f32 %v256_v49, 0.0  ;;  %v260_v2 = vadd.f32 %v468_v1, %v224_v50 }
  0x1a   : > { %315 = vst [vmem:[%s491_s25 + $0x28] sm:$0xff] %v283_v38  ;;  %v226_v3 = vmul.f32 %v458_v0, %v190_v54  ;;  %v227_v4 = vmul.f32 %v458_v0, %v191_v55  ;;  %v228_v5 = vmul.f32 %v458_v0, %v192_v56  ;;  %v289_v7 = vmax.f32 %v257_v52, 0.0  ;;  %v203_v38 = vld [vmem:[%s463_s20 + $0xe8] sm:$0xff] }
  0x1b   : > { %316 = vst [vmem:[%s491_s25 + $0x30] sm:$0xff] %v284_v43  ;;  %v261_v8 = vadd.f32 %v468_v1, %v225_v53  ;;  %v229_v9 = vmul.f32 %v458_v0, %v193_v59  ;;  %v290_v11 = vmax.f32 %v258_v58, 0.0  ;;  %v230_v13 = vmul.f32 %v458_v0, %v194_v63 }
  0x1c   : > { %317 = vst [vmem:[%s491_s25 + $0x38] sm:$0xff] %v285_v51  ;;  %v262_v12 = vadd.f32 %v468_v1, %v226_v3  ;;  %v291_v15 = vmax.f32 %v259_v62, 0.0  ;;  %v263_v16 = vadd.f32 %v468_v1, %v227_v4  ;;  %v231_v17 = vmul.f32 %v458_v0, %v195_v6 }
  0x1d   : > { %318 = vst [vmem:[%s491_s25 + $0x40] sm:$0xff] %v286_v57  ;;  %v292_v19 = vmax.f32 %v260_v2, 0.0  ;;  %v264_v20 = vadd.f32 %v468_v1, %v228_v5  ;;  %v232_v21 = vmul.f32 %v458_v0, %v196_v10  ;;  %v293_v23 = vmax.f32 %v261_v8, 0.0 }
  0x1e   : > { %319 = vst [vmem:[%s491_s25 + $0x48] sm:$0xff] %v287_v60  ;;  %v265_v24 = vadd.f32 %v468_v1, %v229_v9  ;;  %v233_v25 = vmul.f32 %v458_v0, %v197_v14  ;;  %v294_v27 = vmax.f32 %v262_v12, 0.0  ;;  %v266_v28 = vadd.f32 %v468_v1, %v230_v13 }
  0x1f   : > { %320 = vst [vmem:[%s491_s25 + $0x50] sm:$0xff] %v288_v61  ;;  %v234_v29 = vmul.f32 %v458_v0, %v198_v18  ;;  %v295_v31 = vmax.f32 %v263_v16, 0.0  ;;  %v267_v32 = vadd.f32 %v468_v1, %v231_v17  ;;  %v235_v33 = vmul.f32 %v458_v0, %v199_v22 }
  0x20   : > { %321 = vst [vmem:[%s491_s25 + $0x58] sm:$0xff] %v289_v7  ;;  %v296_v35 = vmax.f32 %v264_v20, 0.0  ;;  %v268_v36 = vadd.f32 %v468_v1, %v232_v21  ;;  %v236_v37 = vmul.f32 %v458_v0, %v200_v26  ;;  %v297_v39 = vmax.f32 %v265_v24, 0.0 }
  0x21   : > { %322 = vst [vmem:[%s491_s25 + $0x60] sm:$0xff] %v290_v11  ;;  %v269_v40 = vadd.f32 %v468_v1, %v233_v25  ;;  %v237_v41 = vmul.f32 %v458_v0, %v201_v30  ;;  %v298_v43 = vmax.f32 %v266_v28, 0.0  ;;  %v270_v44 = vadd.f32 %v468_v1, %v234_v29 }
  0x22   : > { %323 = vst [vmem:[%s491_s25 + $0x68] sm:$0xff] %v291_v15  ;;  %v238_v45 = vmul.f32 %v458_v0, %v202_v34  ;;  %v299_v47 = vmax.f32 %v267_v32, 0.0  ;;  %v271_v48 = vadd.f32 %v468_v1, %v235_v33  ;;  %v239_v49 = vmul.f32 %v458_v0, %v203_v38 }
  0x23   : > { %324 = vst [vmem:[%s491_s25 + $0x70] sm:$0xff] %v292_v19  ;;  %v300_v50 = vmax.f32 %v268_v36, 0.0  ;;  %v272_v51 = vadd.f32 %v468_v1, %v236_v37  ;;  %v240_v52 = vmul.f32 %v458_v0, %v204_v42  ;;  %v301_v53 = vmax.f32 %v269_v40, 0.0 }
  0x24   : > { %325 = vst [vmem:[%s491_s25 + $0x78] sm:$0xff] %v293_v23  ;;  %v273_v54 = vadd.f32 %v468_v1, %v237_v41  ;;  %v241_v55 = vmul.f32 %v458_v0, %v205_v46  ;;  %v302_v56 = vmax.f32 %v270_v44, 0.0  ;;  %v274_v57 = vadd.f32 %v468_v1, %v238_v45 }
  0x25   : > { %326 = vst [vmem:[%s491_s25 + $0x80] sm:$0xff] %v294_v27  ;;  %v303_v58 = vmax.f32 %v271_v48, 0.0  ;;  %v275_v59 = vadd.f32 %v468_v1, %v239_v49  ;;  %v304_v60 = vmax.f32 %v272_v51, 0.0  ;;  %v276_v61 = vadd.f32 %v468_v1, %v240_v52 }
  0x26   : > { %327 = vst [vmem:[%s491_s25 + $0x88] sm:$0xff] %v295_v31  ;;  %v305_v0 = vmax.f32 %v273_v54, 0.0  ;;  %v277_v62 = vadd.f32 %v468_v1, %v241_v55  ;;  %v306_v63 = vmax.f32 %v274_v57, 0.0 }
  0x27   : > { %328 = vst [vmem:[%s491_s25 + $0x90] sm:$0xff] %v296_v35  ;;  %v307_v2 = vmax.f32 %v275_v59, 0.0  ;;  %v308_v3 = vmax.f32 %v276_v61, 0.0 }
  0x28   : > { %329 = vst [vmem:[%s491_s25 + $0x98] sm:$0xff] %v297_v39  ;;  %v309_v4 = vmax.f32 %v277_v62, 0.0 }
  0x29   : > { %330 = vst [vmem:[%s491_s25 + $0xa0] sm:$0xff] %v298_v43 }
  0x2a   : > { %331 = vst [vmem:[%s491_s25 + $0xa8] sm:$0xff] %v299_v47 }
  0x2b   : > { %332 = vst [vmem:[%s491_s25 + $0xb0] sm:$0xff] %v300_v50 }
  0x2c   : > { %333 = vst [vmem:[%s491_s25 + $0xb8] sm:$0xff] %v301_v53 }
  0x2d   : > { %334 = vst [vmem:[%s491_s25 + $0xc0] sm:$0xff] %v302_v56 }
  0x2e   : > { %335 = vst [vmem:[%s491_s25 + $0xc8] sm:$0xff] %v303_v58 }
  0x2f   : > { %336 = vst [vmem:[%s491_s25 + $0xd0] sm:$0xff] %v304_v60 }
  0x30   : > { %337 = vst [vmem:[%s491_s25 + $0xd8] sm:$0xff] %v305_v0 }
  0x31   : > { %338 = vst [vmem:[%s491_s25 + $0xe0] sm:$0xff] %v306_v63 }
  0x32   : > { %339 = vst [vmem:[%s491_s25 + $0xe8] sm:$0xff] %v307_v2 }
  0x33   : > { %340 = vst [vmem:[%s491_s25 + $0xf0] sm:$0xff] %v308_v3 }
  0x34   : > { %341 = vst [vmem:[%s491_s25 + $0xf8] sm:$0xff] %v309_v4 }
  0x35 PF: > { %s13_s12 = sadd.s32 1, %s425_s12  }
  0x36   : > { %p10_p4 = scmp.ge.s32.totalorder %s13_s12, 4  }
  0x38   :  { %12 = sbr.rel (!%p10_p4) target bundleno = 1 (0x1), region = 62 }

// kernel: resnet_backbone_forward.42
= control target key start
LH: loop header
LB: loop body
LE: loop exit
PB: predicated region body
PF: predicated region fallthrough
CT: control target
= control target key end

     0   :  { %s1504_s12 = smov 0   ;;  %s1506_s13 = smov 0   ;;  %s1790_s0 = inlined_call_operand.vmem [shape: bf16[512,256], index: 0, kind: input, shape index: {}]   ;;  %s1791_s1 = inlined_call_operand.vmem [shape: bf16[256,128], index: 1, kind: input, shape index: {}]   ;;  %s1792_s2 = inlined_call_operand.vmem [shape: f32[512,128], index: 2, kind: output, shape index: {0}]   ;;  %s1793_s3 = inlined_call_operand.vmem [shape: f32[16,128], index: 3, kind: output, shape index: {1}]  }
   0x1   :  { %s1508_s14 = smov 0  }
   0x2 LB: > { %s26_s15 = sadd.s32 1, %s1478_s13  ;;  %p1170_p0 = scmp.ge.s32.totalorder %s1482_s14, 1  ;;  %s1482_s14 = sphi %s1508_s14, %s14_s14   ;;  %s1478_s13 = sphi %s1506_s13, %s1795_s13   ;;  %s1474_s12 = sphi %s1504_s12, %s1794_s12  }
   0x3   : > { %p28_p1 = scmp.ge.s32.totalorder %s26_s15, 2  ;;  %p172_p2 = scmp.lt.s32.totalorder %s1482_s14, 3 }
   0x5   : > { %s1797_s15 = smov (%p28_p1, %s26_s15), 0  ;;  %p173_p3 = pnand %p1170_p0, %p172_p2 }
   0x6   : > { %s1171_s28 = sshll.u32 (!%p173_p3), %s1474_s12, 5  ;;  %p234_p5 = scmp.lt.s32.totalorder (!%p173_p3), %s1474_s12, 1 }
   0x7   : > { %176 = sbr.rel (%p173_p3) target bundleno = 344 (0x158), region = 28  ;;  %p212_p4 = scmp.lt.s32.totalorder (!%p173_p3), %s1171_s28, 63 }
   0xc   : > { %v1411_v0 = vld [vmem:[%s1791_s1 + $0x38] sm:$0xff]  ;;  %v1410_v2 = vld [vmem:[%s1791_s1 + $0x30] sm:$0xff]  ;;  %v1409_v4 = vld [vmem:[%s1791_s1 + $0x28] sm:$0xff]  ;;  %s1799_s28 = smov (!%p212_p4, %s1171_s28), 63  ;;  %s1801_s12 = smov (!%p234_p5, %s1474_s12), 1 }
   0xd   : > { %v1419_v1 = vld [vmem:[%s1791_s1 + $0x78] sm:$0xff]  ;;  %626 = vmatpush.bf16.msra.mxu0 %v1411_v0  ;;  %v1418_v3 = vld [vmem:[%s1791_s1 + $0x70] sm:$0xff]  ;;  %1420 = vmatpush.bf16.msra.mxu2 %v1411_v0  ;;  %v1417_v5 = vld [vmem:[%s1791_s1 + $0x68] sm:$0xff]  ;;  %s1371_s18 = sshll.u32 %s1799_s28, 3  ;;  %s1176_s28 = sshll.u32 %s1801_s12, 3 }
   0xe   : > { %715 = vmatpush.bf16.msra.mxu1 %v1419_v1  ;;  %1428 = vmatpush.bf16.msra.mxu3 %v1419_v1  ;;  %v1408_v6 = vld [vmem:[%s1791_s1 + $0x20] sm:$0xff]  ;;  %v1407_v8 = vld [vmem:[%s1791_s1 + $0x18] sm:$0xff]  ;;  %v1406_v10 = vld [vmem:[%s1791_s1 + $0x10] sm:$0xff]  ;;  %s1575_s25 = scalar_lea.vmem %s1790_s0, %s1371_s18  ;;  %s1652_s6 = scalar_lea.vmem %s1792_s2, %s1371_s18 }
   0xf   : > { %v1416_v7 = vld [vmem:[%s1791_s1 + $0x60] sm:$0xff]  ;;  %v1415_v9 = vld [vmem:[%s1791_s1 + $0x58] sm:$0xff]  ;;  %v1414_v11 = vld [vmem:[%s1791_s1 + $0x50] sm:$0xff]  ;;  %s237_s9 = scalar_lea.vmem %s1793_s3, %s1176_s28 }
  0x10   : > { %v1405_v12 = vld [vmem:[%s1791_s1 + $0x8] sm:$0xff]  ;;  %v1404_v14 = vld [vmem:[%s1791_s1] sm:$0xff]  ;;  %v1187_v28 = vld [vmem:[%s1575_s25 + $0x10] sm:$0xf] }
  0x11   : > { %627 = vmatpush.bf16.msra.mxu0 %v1410_v2  ;;  %1421 = vmatpush.bf16.msra.mxu2 %v1410_v2  ;;  %v1413_v13 = vld [vmem:[%s1791_s1 + $0x48] sm:$0xff]  ;;  %v1412_v15 = vld [vmem:[%s1791_s1 + $0x40] sm:$0xff]  ;;  %v1375_v29 = vld [vmem:[%s1575_s25 + $0x14] sm:$0xf0] }
  0x12   : > { %716 = vmatpush.bf16.msra.mxu1 %v1418_v3  ;;  %1429 = vmatpush.bf16.msra.mxu3 %v1418_v3  ;;  %v1179_v16 = vld [vmem:[%s1575_s25] sm:$0xf]  ;;  %v1373_v17 = vld [vmem:[%s1575_s25 + $0x4] sm:$0xf0]  ;;  %v1372_v18 = vld [vmem:[%s1575_s25 + $0x4] sm:$0xf]  ;;  %v1188_v36 = vor.u32 %v1375_v29, %v1187_v28 }
  0x13   : > { %v1181_v19 = vld [vmem:[%s1575_s25 + $0x8] sm:$0xf0]  ;;  %v1243_v20 = vld [vmem:[%s1575_s25 + $0x80] sm:$0xf]  ;;  %v1389_v21 = vld [vmem:[%s1575_s25 + $0x84] sm:$0xf0]  ;;  %v1180_v24 = vor.u32 %v1373_v17, %v1179_v16 }
  0x14   : > { %v1388_v22 = vld [vmem:[%s1575_s25 + $0x84] sm:$0xf]  ;;  %v1245_v23 = vld [vmem:[%s1575_s25 + $0x88] sm:$0xf0]  ;;  %v1184_v25 = vor.u32 %v1372_v18, %v1181_v19  ;;  %v1244_v26 = vor.u32 %v1389_v21, %v1243_v20  ;;  %v1374_v30 = vld [vmem:[%s1575_s25 + $0x14] sm:$0xf] }
  0x15   : > { %628 = vmatpush.bf16.msra.mxu0 %v1409_v4  ;;  %1422 = vmatpush.bf16.msra.mxu2 %v1409_v4  ;;  %v1248_v27 = vor.u32 %v1388_v22, %v1245_v23  ;;  %v1189_v31 = vld [vmem:[%s1575_s25 + $0x18] sm:$0xf0]  ;;  %v1251_v32 = vld [vmem:[%s1575_s25 + $0x90] sm:$0xf]  ;;  %v1391_v33 = vld [vmem:[%s1575_s25 + $0x94] sm:$0xf0] }
  0x16   : > { %717 = vmatpush.bf16.msra.mxu1 %v1417_v5  ;;  %1430 = vmatpush.bf16.msra.mxu3 %v1417_v5  ;;  %v1390_v34 = vld [vmem:[%s1575_s25 + $0x94] sm:$0xf]  ;;  %v1253_v35 = vld [vmem:[%s1575_s25 + $0x98] sm:$0xf0]  ;;  %v1192_v37 = vor.u32 %v1374_v30, %v1189_v31  ;;  %v1252_v38 = vor.u32 %v1391_v33, %v1251_v32  ;;  %v1195_v40 = vld [vmem:[%s1575_s25 + $0x20] sm:$0xf] }
  0x17   : > { %v1256_v39 = vor.u32 %v1390_v34, %v1253_v35  ;;  %v1377_v41 = vld [vmem:[%s1575_s25 + $0x24] sm:$0xf0]  ;;  %v1376_v42 = vld [vmem:[%s1575_s25 + $0x24] sm:$0xf]  ;;  %v1197_v43 = vld [vmem:[%s1575_s25 + $0x28] sm:$0xf0] }
  0x18   : > { %v1259_v44 = vld [vmem:[%s1575_s25 + $0xa0] sm:$0xf]  ;;  %v1393_v45 = vld [vmem:[%s1575_s25 + $0xa4] sm:$0xf0]  ;;  %v1392_v46 = vld [vmem:[%s1575_s25 + $0xa4] sm:$0xf]  ;;  %v1196_v48 = vor.u32 %v1377_v41, %v1195_v40  ;;  %v1200_v49 = vor.u32 %v1376_v42, %v1197_v43 }
  0x19   : > { %629 = vmatpush.bf16.msra.mxu0 %v1408_v6  ;;  %1423 = vmatpush.bf16.msra.mxu2 %v1408_v6  ;;  %v1261_v47 = vld [vmem:[%s1575_s25 + $0xa8] sm:$0xf0]  ;;  %v1260_v50 = vor.u32 %v1393_v45, %v1259_v44  ;;  %v1203_v52 = vld [vmem:[%s1575_s25 + $0x30] sm:$0xf]  ;;  %v1379_v53 = vld [vmem:[%s1575_s25 + $0x34] sm:$0xf0] }
  0x1a   : > { %718 = vmatpush.bf16.msra.mxu1 %v1416_v7  ;;  %1431 = vmatpush.bf16.msra.mxu3 %v1416_v7  ;;  %v1264_v51 = vor.u32 %v1392_v46, %v1261_v47  ;;  %v1378_v54 = vld [vmem:[%s1575_s25 + $0x34] sm:$0xf]  ;;  %v1205_v55 = vld [vmem:[%s1575_s25 + $0x38] sm:$0xf0]  ;;  %v1267_v56 = vld [vmem:[%s1575_s25 + $0xb0] sm:$0xf]  ;;  %v1204_v60 = vor.u32 %v1379_v53, %v1203_v52 }
  0x1b   : > { %v1395_v57 = vld [vmem:[%s1575_s25 + $0xb4] sm:$0xf0]  ;;  %v1394_v58 = vld [vmem:[%s1575_s25 + $0xb4] sm:$0xf]  ;;  %v1269_v59 = vld [vmem:[%s1575_s25 + $0xb8] sm:$0xf0]  ;;  %v1208_v61 = vor.u32 %v1378_v54, %v1205_v55 }
  0x1c   : > { %v1268_v62 = vor.u32 %v1395_v57, %v1267_v56  ;;  %v1272_v63 = vor.u32 %v1394_v58, %v1269_v59  ;;  %v1211_v0 = vld [vmem:[%s1575_s25 + $0x40] sm:$0xf]  ;;  %v1381_v1 = vld [vmem:[%s1575_s25 + $0x44] sm:$0xf0]  ;;  %v1380_v2 = vld [vmem:[%s1575_s25 + $0x44] sm:$0xf] }
  0x1d   : > { %630 = vmatpush.bf16.msra.mxu0 %v1407_v8  ;;  %1424 = vmatpush.bf16.msra.mxu2 %v1407_v8  ;;  %v1213_v3 = vld [vmem:[%s1575_s25 + $0x48] sm:$0xf0]  ;;  %v1275_v4 = vld [vmem:[%s1575_s25 + $0xc0] sm:$0xf]  ;;  %v1397_v5 = vld [vmem:[%s1575_s25 + $0xc4] sm:$0xf0]  ;;  %v1212_v8 = vor.u32 %v1381_v1, %v1211_v0 }
  0x1e   : > { %719 = vmatpush.bf16.msra.mxu1 %v1415_v9  ;;  %1432 = vmatpush.bf16.msra.mxu3 %v1415_v9  ;;  %v1396_v6 = vld [vmem:[%s1575_s25 + $0xc4] sm:$0xf]  ;;  %v1277_v7 = vld [vmem:[%s1575_s25 + $0xc8] sm:$0xf0]  ;;  %v1216_v9 = vor.u32 %v1380_v2, %v1213_v3  ;;  %v1283_v16 = vld [vmem:[%s1575_s25 + $0xd0] sm:$0xf] }
  0x1f   : > { %v1399_v17 = vld [vmem:[%s1575_s25 + $0xd4] sm:$0xf0]  ;;  %v1398_v18 = vld [vmem:[%s1575_s25 + $0xd4] sm:$0xf]  ;;  %v1285_v19 = vld [vmem:[%s1575_s25 + $0xd8] sm:$0xf0] }
  0x20   : > { %v1284_v22 = vor.u32 %v1399_v17, %v1283_v16  ;;  %v1288_v23 = vor.u32 %v1398_v18, %v1285_v19  ;;  %v1291_v28 = vld [vmem:[%s1575_s25 + $0xe0] sm:$0xf]  ;;  %v1401_v29 = vld [vmem:[%s1575_s25 + $0xe4] sm:$0xf0]  ;;  %v1400_v30 = vld [vmem:[%s1575_s25 + $0xe4] sm:$0xf] }
  0x21   : > { %631 = vmatpush.bf16.msra.mxu0 %v1406_v10  ;;  %1425 = vmatpush.bf16.msra.mxu2 %v1406_v10  ;;  %v1276_v10 = vor.u32 %v1397_v5, %v1275_v4  ;;  %v1293_v31 = vld [vmem:[%s1575_s25 + $0xe8] sm:$0xf0]  ;;  %v1292_v34 = vor.u32 %v1401_v29, %v1291_v28  ;;  %v1299_v40 = vld [vmem:[%s1575_s25 + $0xf0] sm:$0xf]  ;;  %v1403_v41 = vld [vmem:[%s1575_s25 + $0xf4] sm:$0xf0] }
  0x22   : > { %720 = vmatpush.bf16.msra.mxu1 %v1414_v11  ;;  %1433 = vmatpush.bf16.msra.mxu3 %v1414_v11  ;;  %v1280_v11 = vor.u32 %v1396_v6, %v1277_v7  ;;  %v1296_v35 = vor.u32 %v1400_v30, %v1293_v31  ;;  %v1402_v42 = vld [vmem:[%s1575_s25 + $0xf4] sm:$0xf]  ;;  %v1301_v43 = vld [vmem:[%s1575_s25 + $0xf8] sm:$0xf0]  ;;  %v1300_v46 = vor.u32 %v1403_v41, %v1299_v40 }
  0x23   : > { %v1304_v47 = vor.u32 %v1402_v42, %v1301_v43 }
  0x25   : > { %632 = vmatpush.bf16.msra.mxu0 %v1405_v12  ;;  %1426 = vmatpush.bf16.msra.mxu2 %v1405_v12  ;;  %v1219_v12 = vld [vmem:[%s1575_s25 + $0x50] sm:$0xf] }
  0x26   : > { %721 = vmatpush.bf16.msra.mxu1 %v1413_v13  ;;  %1434 = vmatpush.bf16.msra.mxu3 %v1413_v13  ;;  %v1383_v13 = vld [vmem:[%s1575_s25 + $0x54] sm:$0xf0] }
  0x27   : > { %v1220_v20 = vor.u32 %v1383_v13, %v1219_v12 }
  0x29   : > { %633 = vmatpush.bf16.msra.mxu0 %v1404_v14  ;;  %1427 = vmatpush.bf16.msra.mxu2 %v1404_v14  ;;  %v1382_v14 = vld [vmem:[%s1575_s25 + $0x54] sm:$0xf] }
  0x2a   : > { %722 = vmatpush.bf16.msra.mxu1 %v1412_v15  ;;  %1435 = vmatpush.bf16.msra.mxu3 %v1412_v15  ;;  %v1221_v15 = vld [vmem:[%s1575_s25 + $0x58] sm:$0xf0] }
  0x2b   : > { %v1224_v21 = vor.u32 %v1382_v14, %v1221_v15 }
  0x2c   : > { %634 = vmatmul.bf16.vlgmr.msra.gmra.mxu0 %v1180_v24  ;;  %674 = vmatmul.bf16.vlgmr.msra.gmra.mxu2 %v1244_v26  ;;  %v1227_v24 = vld [vmem:[%s1575_s25 + $0x60] sm:$0xf]  ;;  %v1384_v26 = vld [vmem:[%s1575_s25 + $0x64] sm:$0xf] }
  0x2d   : > { %723 = vmatmul.bf16.vlgmr.msra.gmra.mxu1 %v1184_v25  ;;  %763 = vmatmul.bf16.vlgmr.msra.gmra.mxu3 %v1248_v27  ;;  %v1385_v25 = vld [vmem:[%s1575_s25 + $0x64] sm:$0xf0]  ;;  %v1229_v27 = vld [vmem:[%s1575_s25 + $0x68] sm:$0xf0] }
  0x2e   : > { %v1228_v32 = vor.u32 %v1385_v25, %v1227_v24  ;;  %v1232_v33 = vor.u32 %v1384_v26, %v1229_v27 }
  0x3c   : > { %639 = vmatmul.bf16.gmra.mxu0 %v1188_v36  ;;  %679 = vmatmul.bf16.gmra.mxu2 %v1252_v38  ;;  %v1235_v36 = vld [vmem:[%s1575_s25 + $0x70] sm:$0xf]  ;;  %v1386_v38 = vld [vmem:[%s1575_s25 + $0x74] sm:$0xf] }
  0x3d   : > { %728 = vmatmul.bf16.gmra.mxu1 %v1192_v37  ;;  %768 = vmatmul.bf16.gmra.mxu3 %v1256_v39  ;;  %v1387_v37 = vld [vmem:[%s1575_s25 + $0x74] sm:$0xf0]  ;;  %v1237_v39 = vld [vmem:[%s1575_s25 + $0x78] sm:$0xf0] }
  0x3e   : > { %v1236_v44 = vor.u32 %v1387_v37, %v1235_v36  ;;  %v1240_v45 = vor.u32 %v1386_v38, %v1237_v39 }
  0x4c   : > { %644 = vmatmul.bf16.gmra.mxu0 %v1196_v48  ;;  %684 = vmatmul.bf16.gmra.mxu2 %v1260_v50 }
  0x4d   : > { %733 = vmatmul.bf16.gmra.mxu1 %v1200_v49  ;;  %773 = vmatmul.bf16.gmra.mxu3 %v1264_v51 }
  0x5c   : > { %649 = vmatmul.bf16.gmra.mxu0 %v1204_v60  ;;  %689 = vmatmul.bf16.gmra.mxu2 %v1268_v62 }
  0x5d   : > { %738 = vmatmul.bf16.gmra.mxu1 %v1208_v61  ;;  %778 = vmatmul.bf16.gmra.mxu3 %v1272_v63 }
  0x6c   : > { %654 = vmatmul.bf16.gmra.mxu0 %v1212_v8  ;;  %694 = vmatmul.bf16.gmra.mxu2 %v1276_v10 }
  0x6d   : > { %743 = vmatmul.bf16.gmra.mxu1 %v1216_v9  ;;  %783 = vmatmul.bf16.gmra.mxu3 %v1280_v11 }
  0x7c   : > { %659 = vmatmul.bf16.gmra.mxu0 %v1220_v20  ;;  %699 = vmatmul.bf16.gmra.mxu2 %v1284_v22 }
  0x7d   : > { %748 = vmatmul.bf16.gmra.mxu1 %v1224_v21  ;;  %788 = vmatmul.bf16.gmra.mxu3 %v1288_v23 }
  0x8c   : > { %664 = vmatmul.bf16.gmra.mxu0 %v1228_v32  ;;  %704 = vmatmul.bf16.gmra.mxu2 %v1292_v34 }
  0x8d   : > { %753 = vmatmul.bf16.gmra.mxu1 %v1232_v33  ;;  %793 = vmatmul.bf16.gmra.mxu3 %v1296_v35 }
  0x9c   : > { %669 = vmatmul.bf16.gmra.mxu0 %v1236_v44  ;;  %709 = vmatmul.bf16.gmra.mxu2 %v1300_v46 }
  0x9d   : > { %758 = vmatmul.bf16.gmra.mxu1 %v1240_v45  ;;  %798 = vmatmul.bf16.gmra.mxu3 %v1304_v47 }
  0xa9   : > { %v635_v48 = vpop.f32.mrf.mxu0 }
  0xaa   : > { %v724_v49 = vpop.f32.mrf.mxu1 }
  0xab   : > { %v725_v50 = vadd.f32 %v724_v49, %v635_v48 }
  0xad   : > { %903 = vst [vmem:[%s1652_s6] sm:$0xff] %v725_v50  ;;  %v972_v57 = vmul.f32 %v725_v50, %v725_v50 }
  0xaf   : > { %v675_v51 = vpop.f32.mrf.mxu2 }
  0xb0   : > { %v764_v52 = vpop.f32.mrf.mxu3 }
  0xb1   : > { %v637_v53 = vpop.f32.mrf.mxu0  ;;  %v1655_v55 = vadd.f32 %v764_v52, %v675_v51 }
  0xb2   : > { %v726_v54 = vpop.f32.mrf.mxu1 }
  0xb3   : > { %v727_v56 = vadd.f32 %v726_v54, %v637_v53  ;;  %919 = vst [vmem:[%s1652_s6 + $0x80] sm:$0xff] %v1655_v55 }
  0xb5   : > { %904 = vst [vmem:[%s1652_s6 + $0x8] sm:$0xff] %v727_v56  ;;  %v935_v58 = vadd.f32 %v727_v56, %v725_v50  ;;  %v973_v59 = vmul.f32 %v727_v56, %v727_v56 }
  0xb7   : > { %v1004_v60 = vadd.f32 %v973_v59, %v972_v57  ;;  %v677_v61 = vpop.f32.mrf.mxu2 }
  0xb8   : > { %v766_v62 = vpop.f32.mrf.mxu3 }
  0xb9   : > { %v640_v63 = vpop.f32.mrf.mxu0  ;;  %v1660_v1 = vadd.f32 %v766_v62, %v677_v61 }
  0xba   : > { %v729_v0 = vpop.f32.mrf.mxu1 }
  0xbb   : > { %v730_v2 = vadd.f32 %v729_v0, %v640_v63  ;;  %920 = vst [vmem:[%s1652_s6 + $0x88] sm:$0xff] %v1660_v1 }
  0xbd   : > { %905 = vst [vmem:[%s1652_s6 + $0x10] sm:$0xff] %v730_v2  ;;  %v936_v3 = vadd.f32 %v935_v58, %v730_v2  ;;  %v974_v4 = vmul.f32 %v730_v2, %v730_v2 }
  0xbf   : > { %v1005_v5 = vadd.f32 %v1004_v60, %v974_v4  ;;  %v680_v6 = vpop.f32.mrf.mxu2 }
  0xc0   : > { %v769_v7 = vpop.f32.mrf.mxu3 }
  0xc1   : > { %v642_v8 = vpop.f32.mrf.mxu0  ;;  %v1665_v10 = vadd.f32 %v769_v7, %v680_v6 }
  0xc2   : > { %v731_v9 = vpop.f32.mrf.mxu1 }
  0xc3   : > { %v732_v11 = vadd.f32 %v731_v9, %v642_v8  ;;  %921 = vst [vmem:[%s1652_s6 + $0x90] sm:$0xff] %v1665_v10 }
  0xc5   : > { %906 = vst [vmem:[%s1652_s6 + $0x18] sm:$0xff] %v732_v11  ;;  %v937_v12 = vadd.f32 %v936_v3, %v732_v11  ;;  %v975_v13 = vmul.f32 %v732_v11, %v732_v11 }
  0xc7   : > { %v1006_v14 = vadd.f32 %v1005_v5, %v975_v13  ;;  %v682_v15 = vpop.f32.mrf.mxu2 }
  0xc8   : > { %v771_v16 = vpop.f32.mrf.mxu3 }
  0xc9   : > { %v645_v17 = vpop.f32.mrf.mxu0  ;;  %v1670_v19 = vadd.f32 %v771_v16, %v682_v15 }
  0xca   : > { %v734_v18 = vpop.f32.mrf.mxu1 }
  0xcb   : > { %v735_v20 = vadd.f32 %v734_v18, %v645_v17  ;;  %922 = vst [vmem:[%s1652_s6 + $0x98] sm:$0xff] %v1670_v19 }
  0xcd   : > { %907 = vst [vmem:[%s1652_s6 + $0x20] sm:$0xff] %v735_v20  ;;  %v938_v21 = vadd.f32 %v937_v12, %v735_v20  ;;  %v976_v22 = vmul.f32 %v735_v20, %v735_v20 }
  0xcf   : > { %v1675_v23 = vadd.f32 %v1006_v14, %v976_v22  ;;  %v685_v24 = vpop.f32.mrf.mxu2 }
  0xd0   : > { %v774_v25 = vpop.f32.mrf.mxu3 }
  0xd1   : > { %v647_v26 = vpop.f32.mrf.mxu0  ;;  %v1677_v28 = vadd.f32 %v774_v25, %v685_v24 }
  0xd2   : > { %v736_v27 = vpop.f32.mrf.mxu1 }
  0xd3   : > { %v737_v29 = vadd.f32 %v736_v27, %v647_v26  ;;  %923 = vst [vmem:[%s1652_s6 + $0xa0] sm:$0xff] %v1677_v28 }
  0xd5   : > { %908 = vst [vmem:[%s1652_s6 + $0x28] sm:$0xff] %v737_v29  ;;  %v1682_v30 = vadd.f32 %v938_v21, %v737_v29  ;;  %v977_v12 = vmul.f32 %v737_v29, %v737_v29 }
  0xd7   : > { %v687_v31 = vpop.f32.mrf.mxu2  ;;  %v1008_v20 = vadd.f32 %v1675_v23, %v977_v12  ;;  %v989_v12 = vmul.f32 %v1660_v1, %v1660_v1 }
  0xd8   : > { %v776_v32 = vpop.f32.mrf.mxu3 }
  0xd9   : > { %v650_v33 = vpop.f32.mrf.mxu0  ;;  %v1684_v35 = vadd.f32 %v776_v32, %v687_v31 }
  0xda   : > { %v739_v34 = vpop.f32.mrf.mxu1 }
  0xdb   : > { %v740_v36 = vadd.f32 %v739_v34, %v650_v33  ;;  %924 = vst [vmem:[%s1652_s6 + $0xa8] sm:$0xff] %v1684_v35 }
  0xdd   : > { %909 = vst [vmem:[%s1652_s6 + $0x30] sm:$0xff] %v740_v36  ;;  %v978_v13 = vmul.f32 %v740_v36, %v740_v36  ;;  %v940_v21 = vadd.f32 %v1682_v30, %v740_v36 }
  0xdf   : > { %v690_v37 = vpop.f32.mrf.mxu2  ;;  %v1009_v25 = vadd.f32 %v1008_v20, %v978_v13  ;;  %v990_v20 = vmul.f32 %v1665_v10, %v1665_v10 }
  0xe0   : > { %v779_v38 = vpop.f32.mrf.mxu3 }
  0xe1   : > { %v652_v39 = vpop.f32.mrf.mxu0  ;;  %v1689_v41 = vadd.f32 %v779_v38, %v690_v37 }
  0xe2   : > { %v741_v40 = vpop.f32.mrf.mxu1 }
  0xe3   : > { %v742_v42 = vadd.f32 %v741_v40, %v652_v39  ;;  %925 = vst [vmem:[%s1652_s6 + $0xb0] sm:$0xff] %v1689_v41 }
  0xe5   : > { %910 = vst [vmem:[%s1652_s6 + $0x38] sm:$0xff] %v742_v42  ;;  %v979_v22 = vmul.f32 %v742_v42, %v742_v42  ;;  %v941_v26 = vadd.f32 %v940_v21, %v742_v42 }
  0xe7   : > { %v692_v43 = vpop.f32.mrf.mxu2  ;;  %v1010_v29 = vadd.f32 %v1009_v25, %v979_v22 }
  0xe8   : > { %v781_v44 = vpop.f32.mrf.mxu3 }
  0xe9   : > { %v655_v45 = vpop.f32.mrf.mxu0  ;;  %v1694_v47 = vadd.f32 %v781_v44, %v692_v43 }
  0xea   : > { %v744_v46 = vpop.f32.mrf.mxu1 }
  0xeb   : > { %v745_v48 = vadd.f32 %v744_v46, %v655_v45  ;;  %926 = vst [vmem:[%s1652_s6 + $0xb8] sm:$0xff] %v1694_v47 }
  0xed   : > { %911 = vst [vmem:[%s1652_s6 + $0x40] sm:$0xff] %v745_v48  ;;  %v980_v27 = vmul.f32 %v745_v48, %v745_v48  ;;  %v942_v31 = vadd.f32 %v941_v26, %v745_v48 }
  0xef   : > { %v695_v49 = vpop.f32.mrf.mxu2  ;;  %v1011_v33 = vadd.f32 %v1010_v29, %v980_v27  ;;  %v993_v29 = vmul.f32 %v1684_v35, %v1684_v35 }
  0xf0   : > { %v784_v50 = vpop.f32.mrf.mxu3 }
  0xf1   : > { %v657_v51 = vpop.f32.mrf.mxu0  ;;  %v1699_v53 = vadd.f32 %v784_v50, %v695_v49 }
  0xf2   : > { %v746_v52 = vpop.f32.mrf.mxu1 }
  0xf3   : > { %v747_v54 = vadd.f32 %v746_v52, %v657_v51  ;;  %927 = vst [vmem:[%s1652_s6 + $0xc0] sm:$0xff] %v1699_v53 }
  0xf5   : > { %912 = vst [vmem:[%s1652_s6 + $0x48] sm:$0xff] %v747_v54  ;;  %v981_v32 = vmul.f32 %v747_v54, %v747_v54  ;;  %v943_v34 = vadd.f32 %v942_v31, %v747_v54 }
  0xf7   : > { %v697_v56 = vpop.f32.mrf.mxu2  ;;  %v1012_v40 = vadd.f32 %v1011_v33, %v981_v32  ;;  %v994_v32 = vmul.f32 %v1689_v41, %v1689_v41 }
  0xf8   : > { %v786_v57 = vpop.f32.mrf.mxu3 }
  0xf9   : > { %v660_v58 = vpop.f32.mrf.mxu0  ;;  %v1704_v60 = vadd.f32 %v786_v57, %v697_v56 }
  0xfa   : > { %v749_v59 = vpop.f32.mrf.mxu1 }
  0xfb   : > { %v750_v61 = vadd.f32 %v749_v59, %v660_v58  ;;  %928 = vst [vmem:[%s1652_s6 + $0xc8] sm:$0xff] %v1704_v60 }
  0xfd   : > { %913 = vst [vmem:[%s1652_s6 + $0x50] sm:$0xff] %v750_v61  ;;  %v982_v37 = vmul.f32 %v750_v61, %v750_v61  ;;  %v944_v43 = vadd.f32 %v943_v34, %v750_v61 }
  0xff   : > { %v700_v62 = vpop.f32.mrf.mxu2  ;;  %v1013_v45 = vadd.f32 %v1012_v40, %v982_v37 }
 0x100   : > { %v789_v63 = vpop.f32.mrf.mxu3 }
 0x101   : > { %v662_v0 = vpop.f32.mrf.mxu0  ;;  %v1709_v3 = vadd.f32 %v789_v63, %v700_v62 }
 0x102   : > { %v751_v2 = vpop.f32.mrf.mxu1 }
 0x103   : > { %v752_v4 = vadd.f32 %v751_v2, %v662_v0  ;;  %929 = vst [vmem:[%s1652_s6 + $0xd0] sm:$0xff] %v1709_v3 }
 0x105   : > { %914 = vst [vmem:[%s1652_s6 + $0x58] sm:$0xff] %v752_v4  ;;  %v983_v44 = vmul.f32 %v752_v4, %v752_v4  ;;  %v945_v46 = vadd.f32 %v944_v43, %v752_v4 }
 0x107   : > { %v702_v5 = vpop.f32.mrf.mxu2  ;;  %v1014_v49 = vadd.f32 %v1013_v45, %v983_v44 }
 0x108   : > { %v791_v6 = vpop.f32.mrf.mxu3 }
 0x109   : > { %v665_v7 = vpop.f32.mrf.mxu0  ;;  %v1714_v9 = vadd.f32 %v791_v6, %v702_v5 }
 0x10a   : > { %v754_v8 = vpop.f32.mrf.mxu1 }
 0x10b   : > { %v755_v11 = vadd.f32 %v754_v8, %v665_v7  ;;  %930 = vst [vmem:[%s1652_s6 + $0xd8] sm:$0xff] %v1714_v9  ;;  %v988_v7 = vmul.f32 %v1655_v55, %v1655_v55 }
 0x10d   : > { %915 = vst [vmem:[%s1652_s6 + $0x60] sm:$0xff] %v755_v11  ;;  %v984_v48 = vmul.f32 %v755_v11, %v755_v11  ;;  %v946_v50 = vadd.f32 %v945_v46, %v755_v11 }
 0x10f   : > { %v705_v14 = vpop.f32.mrf.mxu2  ;;  %v1015_v52 = vadd.f32 %v1014_v49, %v984_v48 }
 0x110   : > { %v794_v15 = vpop.f32.mrf.mxu3 }
 0x111   : > { %v667_v16 = vpop.f32.mrf.mxu0  ;;  %v1719_v18 = vadd.f32 %v794_v15, %v705_v14 }
 0x112   : > { %v756_v17 = vpop.f32.mrf.mxu1 }
 0x113   : > { %v757_v24 = vadd.f32 %v756_v17, %v667_v16  ;;  %931 = vst [vmem:[%s1652_s6 + $0xe0] sm:$0xff] %v1719_v18  ;;  %v1000_v46 = vmul.f32 %v1719_v18, %v1719_v18 }
 0x115   : > { %916 = vst [vmem:[%s1652_s6 + $0x68] sm:$0xff] %v757_v24  ;;  %v985_v51 = vmul.f32 %v757_v24, %v757_v24  ;;  %v947_v54 = vadd.f32 %v946_v50, %v757_v24 }
 0x117   : > { %v707_v38 = vpop.f32.mrf.mxu2  ;;  %v1016_v63 = vadd.f32 %v1015_v52, %v985_v51 }
 0x118   : > { %v796_v23 = vpop.f32.mrf.mxu3 }
 0x119   : > { %v670_v39 = vpop.f32.mrf.mxu0  ;;  %v1726_v36 = vadd.f32 %v796_v23, %v707_v38 }
 0x11a   : > { %v759_v30 = vpop.f32.mrf.mxu1 }
 0x11b   : > { %v760_v42 = vadd.f32 %v759_v30, %v670_v39  ;;  %932 = vst [vmem:[%s1652_s6 + $0xe8] sm:$0xff] %v1726_v36 }
 0x11d   : > { %917 = vst [vmem:[%s1652_s6 + $0x70] sm:$0xff] %v760_v42  ;;  %v986_v56 = vmul.f32 %v760_v42, %v760_v42  ;;  %v948_v0 = vadd.f32 %v947_v54, %v760_v42 }
 0x11f   : > { %v710_v57 = vpop.f32.mrf.mxu2  ;;  %v1017_v4 = vadd.f32 %v1016_v63, %v986_v56 }
 0x120   : > { %v799_v58 = vpop.f32.mrf.mxu3 }
 0x121   : > { %v672_v59 = vpop.f32.mrf.mxu0  ;;  %v800_v62 = vadd.f32 %v799_v58, %v710_v57 }
 0x122   : > { %v761_v61 = vpop.f32.mrf.mxu1 }
 0x123   : > { %v762_v2 = vadd.f32 %v761_v61, %v672_v59  ;;  %933 = vst [vmem:[%s1652_s6 + $0xf0] sm:$0xff] %v800_v62  ;;  %v1002_v52 = vmul.f32 %v800_v62, %v800_v62 }
 0x125   : > { %918 = vst [vmem:[%s1652_s6 + $0x78] sm:$0xff] %v762_v2  ;;  %v949_v5 = vadd.f32 %v948_v0, %v762_v2  ;;  %v987_v6 = vmul.f32 %v762_v2, %v762_v2 }
 0x127   : > { %v950_v8 = vadd.f32 %v949_v5, %v1655_v55  ;;  %v1018_v11 = vadd.f32 %v1017_v4, %v987_v6  ;;  %v712_v15 = vpop.f32.mrf.mxu2  ;;  %v991_v55 = vmul.f32 %v1670_v19, %v1670_v19 }
 0x128   : > { %v801_v16 = vpop.f32.mrf.mxu3 }
 0x129   : > { %v951_v13 = vadd.f32 %v950_v8, %v1660_v1  ;;  %v1019_v14 = vadd.f32 %v1018_v11, %v988_v7  ;;  %v802_v17 = vadd.f32 %v801_v16, %v712_v15  ;;  %v992_v1 = vmul.f32 %v1677_v28, %v1677_v28 }
 0x12b   : > { %v952_v21 = vadd.f32 %v951_v13, %v1665_v10  ;;  %v1020_v22 = vadd.f32 %v1019_v14, %v989_v12  ;;  %934 = vst [vmem:[%s1652_s6 + $0xf8] sm:$0xff] %v802_v17  ;;  %v1003_v56 = vmul.f32 %v802_v17, %v802_v17 }
 0x12d   : > { %v953_v24 = vadd.f32 %v952_v21, %v1670_v19  ;;  %v1021_v25 = vadd.f32 %v1020_v22, %v990_v20  ;;  %v995_v19 = vmul.f32 %v1694_v47, %v1694_v47 }
 0x12f   : > { %v954_v26 = vadd.f32 %v953_v24, %v1677_v28  ;;  %v1022_v27 = vadd.f32 %v1021_v25, %v991_v55  ;;  %v996_v28 = vmul.f32 %v1699_v53, %v1699_v53 }
 0x131   : > { %v955_v31 = vadd.f32 %v954_v26, %v1684_v35  ;;  %v1023_v10 = vadd.f32 %v1022_v27, %v992_v1  ;;  %v997_v35 = vmul.f32 %v1704_v60, %v1704_v60 }
 0x133   : > { %v1024_v33 = vadd.f32 %v1023_v10, %v993_v29  ;;  %v956_v34 = vadd.f32 %v955_v31, %v1689_v41  ;;  %v998_v41 = vmul.f32 %v1709_v3, %v1709_v3 }
 0x135   : > { %v957_v37 = vadd.f32 %v956_v34, %v1694_v47  ;;  %v1025_v38 = vadd.f32 %v1024_v33, %v994_v32  ;;  %v999_v47 = vmul.f32 %v1714_v9, %v1714_v9 }
 0x137   : > { %v958_v23 = vadd.f32 %v957_v37, %v1699_v53  ;;  %v1026_v39 = vadd.f32 %v1025_v38, %v995_v19 }
 0x139   : > { %v959_v30 = vadd.f32 %v958_v23, %v1704_v60  ;;  %v1027_v40 = vadd.f32 %v1026_v39, %v996_v28 }
 0x13b   : > { %v960_v43 = vadd.f32 %v959_v30, %v1709_v3  ;;  %v1028_v44 = vadd.f32 %v1027_v40, %v997_v35  ;;  %v1001_v3 = vmul.f32 %v1726_v36, %v1726_v36 }
 0x13d   : > { %v961_v42 = vadd.f32 %v960_v43, %v1714_v9  ;;  %v1029_v53 = vadd.f32 %v1028_v44, %v998_v41 }
 0x13f   : > { %v962_v45 = vadd.f32 %v961_v42, %v1719_v18  ;;  %v1030_v60 = vadd.f32 %v1029_v53, %v999_v47  ;;  %v1041_v18 = vlaneseq }
 0x141   : > { %v1031_v48 = vadd.f32 %v1030_v60, %v1000_v46  ;;  %v963_v49 = vadd.f32 %v962_v45, %v1726_v36  ;;  %v1042_v5 = vshrl.u32 %v1041_v18, 7 }
 0x143   : > { %v1032_v50 = vadd.f32 %v1031_v48, %v1001_v3  ;;  %v964_v51 = vadd.f32 %v963_v49, %v800_v62  ;;  %vm1044_vm0 = vcmp.eq.s32.totalorder %v1042_v5, 1  ;;  %vm1043_vm1 = vcmp.eq.s32.totalorder %v1042_v5, 0 }
 0x145   : > { %v1033_v54 = vadd.f32 %v1032_v50, %v1002_v52  ;;  %v965_v9 = vadd.f32 %v964_v51, %v802_v17 }
 0x147   : > { %v966_v57 = vrot.slane %v965_v9, 4  ;;  %v1034_v58 = vadd.f32 %v1033_v54, %v1003_v56 }
 0x149   : > { %v967_v59 = vadd.f32 %v966_v57, %v965_v9  ;;  %v1035_v61 = vrot.slane %v1034_v58, 4 }
 0x14b   : > { %v968_v63 = vrot.slane %v967_v59, 2  ;;  %v1036_v0 = vadd.f32 %v1035_v61, %v1034_v58 }
 0x14d   : > { %v969_v2 = vadd.f32 %v968_v63, %v967_v59  ;;  %v1037_v4 = vrot.slane %v1036_v0, 2 }
 0x14f   : > { %v1038_v6 = vadd.f32 %v1037_v4, %v1036_v0  ;;  %v970_v36 = vrot.slane %v969_v2, 1 }
 0x151   : > { %v1039_v7 = vrot.slane %v1038_v6, 1  ;;  %v971_v8 = vadd.f32 %v970_v36, %v969_v2 }
 0x153   : > { %v1040_v62 = vadd.f32 %v1039_v7, %v1038_v6 }
 0x155   : > { %v1045_v11 = vsel %vm1044_vm0, %v1040_v62, 0.0 }
 0x156   : > { %v1046_v12 = vsel %vm1043_vm1, %v971_v8, %v1045_v11 }
 0x157   : > { %1047 = vst [vmem:[%s237_s9] sm:$0xff] %v1046_v12 }
 0x158 PF: > { %s14_s14 = sadd.s32 1, %s1482_s14   ;;  %s1794_s12 = smov %s1478_s13 }
 0x159   : > { %p11_p6 = scmp.ge.s32.totalorder %s14_s14, 4   ;;  %s1795_s13 = smov %s1797_s15 }
 0x15b   :  { %13 = sbr.rel (!%p11_p6) target bundleno = 2 (0x2), region = 81 }

// kernel: resnet_backbone_forward.44
= control target key start
LH: loop header
LB: loop body
LE: loop exit
PB: predicated region body
PF: predicated region fallthrough
CT: control target
= control target key end

     0   :  { %s790_s0 = inlined_call_operand.vmem [shape: f32[9,128,128], index: 0, kind: input, shape index: {}]   ;;  %s791_s1 = inlined_call_operand.vmem [shape: f32[128,128], index: 1, kind: output, shape index: {}]  }
   0x1   :  { %v8_v0 = vld [vmem:[%s790_s0] sm:$0xff]  ;;  %v9_v6 = vld [vmem:[%s790_s0 + $0x8] sm:$0xff]  ;;  %v10_v15 = vld [vmem:[%s790_s0 + $0x10] sm:$0xff] }
   0x2   :  { %v24_v1 = vld [vmem:[%s790_s0 + $0x80] sm:$0xff]  ;;  %v25_v7 = vld [vmem:[%s790_s0 + $0x88] sm:$0xff]  ;;  %v26_v16 = vld [vmem:[%s790_s0 + $0x90] sm:$0xff] }
   0x3   :  { %v40_v2 = vld [vmem:[%s790_s0 + $0x100] sm:$0xff]  ;;  %v152_v3 = vmax.f32 %v8_v0, %v24_v1  ;;  %v41_v8 = vld [vmem:[%s790_s0 + $0x108] sm:$0xff]  ;;  %v160_v10 = vmax.f32 %v9_v6, %v25_v7  ;;  %v42_v17 = vld [vmem:[%s790_s0 + $0x110] sm:$0xff]  ;;  %v168_v20 = vmax.f32 %v10_v15, %v26_v16 }
   0x4   :  { %v56_v4 = vld [vmem:[%s790_s0 + $0x180] sm:$0xff]  ;;  %v57_v13 = vld [vmem:[%s790_s0 + $0x188] sm:$0xff]  ;;  %v58_v24 = vld [vmem:[%s790_s0 + $0x190] sm:$0xff] }
   0x5   :  { %v153_v5 = vmax.f32 %v152_v3, %v40_v2  ;;  %v72_v9 = vld [vmem:[%s790_s0 + $0x200] sm:$0xff]  ;;  %v161_v14 = vmax.f32 %v160_v10, %v41_v8  ;;  %v73_v19 = vld [vmem:[%s790_s0 + $0x208] sm:$0xff]  ;;  %v169_v26 = vmax.f32 %v168_v20, %v42_v17  ;;  %v11_v27 = vld [vmem:[%s790_s0 + $0x18] sm:$0xff] }
   0x6   :  { %v88_v11 = vld [vmem:[%s790_s0 + $0x280] sm:$0xff]  ;;  %v89_v22 = vld [vmem:[%s790_s0 + $0x288] sm:$0xff]  ;;  %v27_v28 = vld [vmem:[%s790_s0 + $0x98] sm:$0xff] }
   0x7   :  { %v154_v12 = vmax.f32 %v153_v5, %v56_v4  ;;  %v104_v21 = vld [vmem:[%s790_s0 + $0x300] sm:$0xff]  ;;  %v162_v23 = vmax.f32 %v161_v14, %v57_v13  ;;  %v43_v29 = vld [vmem:[%s790_s0 + $0x118] sm:$0xff]  ;;  %v74_v33 = vld [vmem:[%s790_s0 + $0x210] sm:$0xff]  ;;  %v176_v34 = vmax.f32 %v11_v27, %v27_v28  ;;  %v170_v38 = vmax.f32 %v169_v26, %v58_v24 }
   0x8   :  { %v120_v30 = vld [vmem:[%s790_s0 + $0x380] sm:$0xff]  ;;  %v105_v36 = vld [vmem:[%s790_s0 + $0x308] sm:$0xff]  ;;  %v90_v37 = vld [vmem:[%s790_s0 + $0x290] sm:$0xff] }
   0x9   :  { %v155_v18 = vmax.f32 %v154_v12, %v72_v9  ;;  %v136_v31 = vld [vmem:[%s790_s0 + $0x400] sm:$0xff]  ;;  %v163_v32 = vmax.f32 %v162_v23, %v73_v19  ;;  %v59_v39 = vld [vmem:[%s790_s0 + $0x198] sm:$0xff]  ;;  %v177_v41 = vmax.f32 %v176_v34, %v43_v29  ;;  %v121_v46 = vld [vmem:[%s790_s0 + $0x388] sm:$0xff]  ;;  %v171_v48 = vmax.f32 %v170_v38, %v74_v33 }
   0xa   :  { %v12_v42 = vld [vmem:[%s790_s0 + $0x20] sm:$0xff]  ;;  %v137_v47 = vld [vmem:[%s790_s0 + $0x408] sm:$0xff]  ;;  %v75_v49 = vld [vmem:[%s790_s0 + $0x218] sm:$0xff] }
   0xb   :  { %v156_v25 = vmax.f32 %v155_v18, %v88_v11  ;;  %v164_v40 = vmax.f32 %v163_v32, %v89_v22  ;;  %v28_v43 = vld [vmem:[%s790_s0 + $0xa0] sm:$0xff]  ;;  %v106_v52 = vld [vmem:[%s790_s0 + $0x310] sm:$0xff]  ;;  %v91_v53 = vld [vmem:[%s790_s0 + $0x298] sm:$0xff]  ;;  %v178_v54 = vmax.f32 %v177_v41, %v59_v39  ;;  %v172_v57 = vmax.f32 %v171_v48, %v90_v37 }
   0xc   :  { %v44_v44 = vld [vmem:[%s790_s0 + $0x120] sm:$0xff]  ;;  %v184_v50 = vmax.f32 %v12_v42, %v28_v43  ;;  %v13_v59 = vld [vmem:[%s790_s0 + $0x28] sm:$0xff]  ;;  %v122_v63 = vld [vmem:[%s790_s0 + $0x390] sm:$0xff] }
   0xd   :  { %v157_v35 = vmax.f32 %v156_v25, %v104_v21  ;;  %v165_v51 = vmax.f32 %v164_v40, %v105_v36  ;;  %v60_v55 = vld [vmem:[%s790_s0 + $0x1a0] sm:$0xff]  ;;  %v29_v60 = vld [vmem:[%s790_s0 + $0xa8] sm:$0xff]  ;;  %v138_v0 = vld [vmem:[%s790_s0 + $0x410] sm:$0xff]  ;;  %v179_v1 = vmax.f32 %v178_v54, %v75_v49  ;;  %v173_v4 = vmax.f32 %v172_v57, %v106_v52 }
   0xe   :  { %v185_v58 = vmax.f32 %v184_v50, %v44_v44  ;;  %v45_v61 = vld [vmem:[%s790_s0 + $0x128] sm:$0xff]  ;;  %v76_v2 = vld [vmem:[%s790_s0 + $0x220] sm:$0xff]  ;;  %v192_v3 = vmax.f32 %v13_v59, %v29_v60  ;;  %v107_v5 = vld [vmem:[%s790_s0 + $0x318] sm:$0xff] }
   0xf   :  { %v158_v45 = vmax.f32 %v157_v35, %v120_v30  ;;  %v166_v62 = vmax.f32 %v165_v51, %v121_v46  ;;  %v92_v6 = vld [vmem:[%s790_s0 + $0x2a0] sm:$0xff]  ;;  %v61_v8 = vld [vmem:[%s790_s0 + $0x1a8] sm:$0xff]  ;;  %v180_v10 = vmax.f32 %v179_v1, %v91_v53  ;;  %v14_v12 = vld [vmem:[%s790_s0 + $0x30] sm:$0xff]  ;;  %v174_v15 = vmax.f32 %v173_v4, %v122_v63 }
  0x10   :  { %v186_v7 = vmax.f32 %v185_v58, %v60_v55  ;;  %v193_v11 = vmax.f32 %v192_v3, %v45_v61  ;;  %v30_v13 = vld [vmem:[%s790_s0 + $0xb0] sm:$0xff]  ;;  %v123_v16 = vld [vmem:[%s790_s0 + $0x398] sm:$0xff]  ;;  %v77_v19 = vld [vmem:[%s790_s0 + $0x228] sm:$0xff] }
  0x11   :  { %v159_v56 = vmax.f32 %v158_v45, %v136_v31  ;;  %v167_v9 = vmax.f32 %v166_v62, %v137_v47  ;;  %v46_v14 = vld [vmem:[%s790_s0 + $0x130] sm:$0xff]  ;;  %v139_v17 = vld [vmem:[%s790_s0 + $0x418] sm:$0xff]  ;;  %v200_v20 = vmax.f32 %v14_v12, %v30_v13  ;;  %v181_v21 = vmax.f32 %v180_v10, %v107_v5  ;;  %v108_v22 = vld [vmem:[%s790_s0 + $0x320] sm:$0xff] }
  0x12   :  { %v187_v18 = vmax.f32 %v186_v7, %v76_v2  ;;  %v93_v23 = vld [vmem:[%s790_s0 + $0x2a8] sm:$0xff]  ;;  %v194_v24 = vmax.f32 %v193_v11, %v61_v8  ;;  %v62_v25 = vld [vmem:[%s790_s0 + $0x1b0] sm:$0xff]  ;;  %v175_v26 = vmax.f32 %v174_v15, %v138_v0  ;;  %v15_v29 = vld [vmem:[%s790_s0 + $0x38] sm:$0xff] }
  0x13   :  { %280 = vst [vmem:[%s791_s1] sm:$0xff] %v159_v56  ;;  %v201_v28 = vmax.f32 %v200_v20, %v46_v14  ;;  %v31_v30 = vld [vmem:[%s790_s0 + $0xb8] sm:$0xff]  ;;  %v182_v32 = vmax.f32 %v181_v21, %v123_v16  ;;  %v124_v33 = vld [vmem:[%s790_s0 + $0x3a0] sm:$0xff]  ;;  %v78_v36 = vld [vmem:[%s790_s0 + $0x230] sm:$0xff] }
  0x14   :  { %281 = vst [vmem:[%s791_s1 + $0x8] sm:$0xff] %v167_v9  ;;  %v188_v27 = vmax.f32 %v187_v18, %v92_v6  ;;  %v47_v31 = vld [vmem:[%s790_s0 + $0x138] sm:$0xff]  ;;  %v140_v34 = vld [vmem:[%s790_s0 + $0x420] sm:$0xff]  ;;  %v195_v35 = vmax.f32 %v194_v24, %v77_v19  ;;  %v208_v37 = vmax.f32 %v15_v29, %v31_v30  ;;  %v109_v39 = vld [vmem:[%s790_s0 + $0x328] sm:$0xff] }
  0x15   :  { %282 = vst [vmem:[%s791_s1 + $0x10] sm:$0xff] %v175_v26  ;;  %v94_v40 = vld [vmem:[%s790_s0 + $0x2b0] sm:$0xff]  ;;  %v202_v41 = vmax.f32 %v201_v28, %v62_v25  ;;  %v63_v42 = vld [vmem:[%s790_s0 + $0x1b8] sm:$0xff]  ;;  %v183_v43 = vmax.f32 %v182_v32, %v139_v17  ;;  %v16_v46 = vld [vmem:[%s790_s0 + $0x40] sm:$0xff] }
  0x16   :  { %v189_v38 = vmax.f32 %v188_v27, %v108_v22  ;;  %v196_v44 = vmax.f32 %v195_v35, %v93_v23  ;;  %v209_v45 = vmax.f32 %v208_v37, %v47_v31  ;;  %v32_v47 = vld [vmem:[%s790_s0 + $0xc0] sm:$0xff]  ;;  %v125_v50 = vld [vmem:[%s790_s0 + $0x3a8] sm:$0xff]  ;;  %v79_v53 = vld [vmem:[%s790_s0 + $0x238] sm:$0xff] }
  0x17   :  { %v48_v48 = vld [vmem:[%s790_s0 + $0x140] sm:$0xff]  ;;  %v141_v51 = vld [vmem:[%s790_s0 + $0x428] sm:$0xff]  ;;  %v203_v52 = vmax.f32 %v202_v41, %v78_v36  ;;  %v216_v54 = vmax.f32 %v16_v46, %v32_v47  ;;  %283 = vst [vmem:[%s791_s1 + $0x18] sm:$0xff] %v183_v43  ;;  %v110_v56 = vld [vmem:[%s790_s0 + $0x330] sm:$0xff] }
  0x18   :  { %v190_v49 = vmax.f32 %v189_v38, %v124_v33  ;;  %v197_v55 = vmax.f32 %v196_v44, %v109_v39  ;;  %v95_v57 = vld [vmem:[%s790_s0 + $0x2b8] sm:$0xff]  ;;  %v210_v58 = vmax.f32 %v209_v45, %v63_v42  ;;  %v64_v59 = vld [vmem:[%s790_s0 + $0x1c0] sm:$0xff]  ;;  %v17_v63 = vld [vmem:[%s790_s0 + $0x48] sm:$0xff] }
  0x19   :  { %v204_v61 = vmax.f32 %v203_v52, %v94_v40  ;;  %v217_v62 = vmax.f32 %v216_v54, %v48_v48  ;;  %v33_v0 = vld [vmem:[%s790_s0 + $0xc8] sm:$0xff]  ;;  %v126_v3 = vld [vmem:[%s790_s0 + $0x3b0] sm:$0xff]  ;;  %v80_v6 = vld [vmem:[%s790_s0 + $0x240] sm:$0xff] }
  0x1a   :  { %v191_v60 = vmax.f32 %v190_v49, %v140_v34  ;;  %v49_v1 = vld [vmem:[%s790_s0 + $0x148] sm:$0xff]  ;;  %v198_v2 = vmax.f32 %v197_v55, %v125_v50  ;;  %v142_v4 = vld [vmem:[%s790_s0 + $0x430] sm:$0xff]  ;;  %v211_v5 = vmax.f32 %v210_v58, %v79_v53  ;;  %v224_v7 = vmax.f32 %v17_v63, %v33_v0  ;;  %v111_v9 = vld [vmem:[%s790_s0 + $0x338] sm:$0xff] }
  0x1b   :  { %v205_v8 = vmax.f32 %v204_v61, %v110_v56  ;;  %v96_v10 = vld [vmem:[%s790_s0 + $0x2c0] sm:$0xff]  ;;  %v218_v11 = vmax.f32 %v217_v62, %v64_v59  ;;  %v65_v12 = vld [vmem:[%s790_s0 + $0x1c8] sm:$0xff]  ;;  %v18_v16 = vld [vmem:[%s790_s0 + $0x50] sm:$0xff] }
  0x1c   :  { %284 = vst [vmem:[%s791_s1 + $0x20] sm:$0xff] %v191_v60  ;;  %v199_v13 = vmax.f32 %v198_v2, %v141_v51  ;;  %v212_v14 = vmax.f32 %v211_v5, %v95_v57  ;;  %v225_v15 = vmax.f32 %v224_v7, %v49_v1  ;;  %v34_v17 = vld [vmem:[%s790_s0 + $0xd0] sm:$0xff]  ;;  %v127_v20 = vld [vmem:[%s790_s0 + $0x3b8] sm:$0xff]  ;;  %v81_v23 = vld [vmem:[%s790_s0 + $0x248] sm:$0xff] }
  0x1d   :  { %v50_v18 = vld [vmem:[%s790_s0 + $0x150] sm:$0xff]  ;;  %v206_v19 = vmax.f32 %v205_v8, %v126_v3  ;;  %v143_v21 = vld [vmem:[%s790_s0 + $0x438] sm:$0xff]  ;;  %v219_v22 = vmax.f32 %v218_v11, %v80_v6  ;;  %v232_v24 = vmax.f32 %v18_v16, %v34_v17  ;;  %v112_v26 = vld [vmem:[%s790_s0 + $0x340] sm:$0xff] }
  0x1e   :  { %285 = vst [vmem:[%s791_s1 + $0x28] sm:$0xff] %v199_v13  ;;  %v213_v25 = vmax.f32 %v212_v14, %v111_v9  ;;  %v97_v27 = vld [vmem:[%s790_s0 + $0x2c8] sm:$0xff]  ;;  %v226_v28 = vmax.f32 %v225_v15, %v65_v12  ;;  %v66_v29 = vld [vmem:[%s790_s0 + $0x1d0] sm:$0xff]  ;;  %v19_v33 = vld [vmem:[%s790_s0 + $0x58] sm:$0xff] }
  0x1f   :  { %v207_v30 = vmax.f32 %v206_v19, %v142_v4  ;;  %v220_v31 = vmax.f32 %v219_v22, %v96_v10  ;;  %v233_v32 = vmax.f32 %v232_v24, %v50_v18  ;;  %v35_v34 = vld [vmem:[%s790_s0 + $0xd8] sm:$0xff]  ;;  %v128_v37 = vld [vmem:[%s790_s0 + $0x3c0] sm:$0xff]  ;;  %v82_v40 = vld [vmem:[%s790_s0 + $0x250] sm:$0xff] }
  0x20   :  { %v51_v35 = vld [vmem:[%s790_s0 + $0x158] sm:$0xff]  ;;  %v214_v36 = vmax.f32 %v213_v25, %v127_v20  ;;  %v144_v38 = vld [vmem:[%s790_s0 + $0x440] sm:$0xff]  ;;  %v227_v39 = vmax.f32 %v226_v28, %v81_v23  ;;  %v240_v41 = vmax.f32 %v19_v33, %v35_v34  ;;  %v113_v43 = vld [vmem:[%s790_s0 + $0x348] sm:$0xff] }
  0x21   :  { %286 = vst [vmem:[%s791_s1 + $0x30] sm:$0xff] %v207_v30  ;;  %v221_v42 = vmax.f32 %v220_v31, %v112_v26  ;;  %v98_v44 = vld [vmem:[%s790_s0 + $0x2d0] sm:$0xff]  ;;  %v234_v45 = vmax.f32 %v233_v32, %v66_v29  ;;  %v67_v46 = vld [vmem:[%s790_s0 + $0x1d8] sm:$0xff]  ;;  %v20_v50 = vld [vmem:[%s790_s0 + $0x60] sm:$0xff] }
  0x22   :  { %v215_v47 = vmax.f32 %v214_v36, %v143_v21  ;;  %v228_v48 = vmax.f32 %v227_v39, %v97_v27  ;;  %v241_v49 = vmax.f32 %v240_v41, %v51_v35  ;;  %v36_v51 = vld [vmem:[%s790_s0 + $0xe0] sm:$0xff]  ;;  %v129_v54 = vld [vmem:[%s790_s0 + $0x3c8] sm:$0xff]  ;;  %v83_v57 = vld [vmem:[%s790_s0 + $0x258] sm:$0xff] }
  0x23   :  { %v52_v52 = vld [vmem:[%s790_s0 + $0x160] sm:$0xff]  ;;  %v222_v53 = vmax.f32 %v221_v42, %v128_v37  ;;  %v145_v55 = vld [vmem:[%s790_s0 + $0x448] sm:$0xff]  ;;  %v235_v56 = vmax.f32 %v234_v45, %v82_v40  ;;  %v248_v58 = vmax.f32 %v20_v50, %v36_v51  ;;  %v114_v60 = vld [vmem:[%s790_s0 + $0x350] sm:$0xff] }
  0x24   :  { %287 = vst [vmem:[%s791_s1 + $0x38] sm:$0xff] %v215_v47  ;;  %v229_v59 = vmax.f32 %v228_v48, %v113_v43  ;;  %v99_v61 = vld [vmem:[%s790_s0 + $0x2d8] sm:$0xff]  ;;  %v242_v62 = vmax.f32 %v241_v49, %v67_v46  ;;  %v68_v63 = vld [vmem:[%s790_s0 + $0x1e0] sm:$0xff]  ;;  %v21_v3 = vld [vmem:[%s790_s0 + $0x68] sm:$0xff] }
  0x25   :  { %v223_v0 = vmax.f32 %v222_v53, %v144_v38  ;;  %v236_v1 = vmax.f32 %v235_v56, %v98_v44  ;;  %v249_v2 = vmax.f32 %v248_v58, %v52_v52  ;;  %v37_v4 = vld [vmem:[%s790_s0 + $0xe8] sm:$0xff]  ;;  %v130_v7 = vld [vmem:[%s790_s0 + $0x3d0] sm:$0xff]  ;;  %v84_v10 = vld [vmem:[%s790_s0 + $0x260] sm:$0xff] }
  0x26   :  { %v53_v5 = vld [vmem:[%s790_s0 + $0x168] sm:$0xff]  ;;  %v230_v6 = vmax.f32 %v229_v59, %v129_v54  ;;  %v146_v8 = vld [vmem:[%s790_s0 + $0x450] sm:$0xff]  ;;  %v243_v9 = vmax.f32 %v242_v62, %v83_v57  ;;  %v256_v11 = vmax.f32 %v21_v3, %v37_v4  ;;  %v115_v13 = vld [vmem:[%s790_s0 + $0x358] sm:$0xff] }
  0x27   :  { %288 = vst [vmem:[%s791_s1 + $0x40] sm:$0xff] %v223_v0  ;;  %v237_v12 = vmax.f32 %v236_v1, %v114_v60  ;;  %v100_v14 = vld [vmem:[%s790_s0 + $0x2e0] sm:$0xff]  ;;  %v250_v15 = vmax.f32 %v249_v2, %v68_v63  ;;  %v69_v16 = vld [vmem:[%s790_s0 + $0x1e8] sm:$0xff]  ;;  %v22_v20 = vld [vmem:[%s790_s0 + $0x70] sm:$0xff] }
  0x28   :  { %v231_v17 = vmax.f32 %v230_v6, %v145_v55  ;;  %v244_v18 = vmax.f32 %v243_v9, %v99_v61  ;;  %v257_v19 = vmax.f32 %v256_v11, %v53_v5  ;;  %v38_v21 = vld [vmem:[%s790_s0 + $0xf0] sm:$0xff]  ;;  %v131_v24 = vld [vmem:[%s790_s0 + $0x3d8] sm:$0xff]  ;;  %v85_v27 = vld [vmem:[%s790_s0 + $0x268] sm:$0xff] }
  0x29   :  { %v54_v22 = vld [vmem:[%s790_s0 + $0x170] sm:$0xff]  ;;  %v238_v23 = vmax.f32 %v237_v12, %v130_v7  ;;  %v147_v25 = vld [vmem:[%s790_s0 + $0x458] sm:$0xff]  ;;  %v251_v26 = vmax.f32 %v250_v15, %v84_v10  ;;  %v264_v28 = vmax.f32 %v22_v20, %v38_v21  ;;  %v116_v30 = vld [vmem:[%s790_s0 + $0x360] sm:$0xff] }
  0x2a   :  { %289 = vst [vmem:[%s791_s1 + $0x48] sm:$0xff] %v231_v17  ;;  %v245_v29 = vmax.f32 %v244_v18, %v115_v13  ;;  %v101_v31 = vld [vmem:[%s790_s0 + $0x2e8] sm:$0xff]  ;;  %v258_v32 = vmax.f32 %v257_v19, %v69_v16  ;;  %v70_v33 = vld [vmem:[%s790_s0 + $0x1f0] sm:$0xff]  ;;  %v23_v37 = vld [vmem:[%s790_s0 + $0x78] sm:$0xff] }
  0x2b   :  { %v239_v34 = vmax.f32 %v238_v23, %v146_v8  ;;  %v252_v35 = vmax.f32 %v251_v26, %v100_v14  ;;  %v265_v36 = vmax.f32 %v264_v28, %v54_v22  ;;  %v39_v38 = vld [vmem:[%s790_s0 + $0xf8] sm:$0xff]  ;;  %v132_v41 = vld [vmem:[%s790_s0 + $0x3e0] sm:$0xff]  ;;  %v86_v43 = vld [vmem:[%s790_s0 + $0x270] sm:$0xff] }
  0x2c   :  { %v55_v39 = vld [vmem:[%s790_s0 + $0x178] sm:$0xff]  ;;  %v246_v40 = vmax.f32 %v245_v29, %v131_v24  ;;  %v259_v42 = vmax.f32 %v258_v32, %v85_v27  ;;  %v272_v44 = vmax.f32 %v23_v37, %v39_v38  ;;  %v117_v46 = vld [vmem:[%s790_s0 + $0x368] sm:$0xff]  ;;  %v148_v50 = vld [vmem:[%s790_s0 + $0x460] sm:$0xff] }
  0x2d   :  { %290 = vst [vmem:[%s791_s1 + $0x50] sm:$0xff] %v239_v34  ;;  %v253_v45 = vmax.f32 %v252_v35, %v116_v30  ;;  %v266_v47 = vmax.f32 %v265_v36, %v70_v33  ;;  %v71_v48 = vld [vmem:[%s790_s0 + $0x1f8] sm:$0xff]  ;;  %v102_v52 = vld [vmem:[%s790_s0 + $0x2f0] sm:$0xff]  ;;  %v133_v55 = vld [vmem:[%s790_s0 + $0x3e8] sm:$0xff] }
  0x2e   :  { %v247_v49 = vmax.f32 %v246_v40, %v147_v25  ;;  %v260_v51 = vmax.f32 %v259_v42, %v101_v31  ;;  %v273_v53 = vmax.f32 %v272_v44, %v55_v39  ;;  %v87_v57 = vld [vmem:[%s790_s0 + $0x278] sm:$0xff]  ;;  %v118_v59 = vld [vmem:[%s790_s0 + $0x370] sm:$0xff]  ;;  %v149_v62 = vld [vmem:[%s790_s0 + $0x468] sm:$0xff] }
  0x2f   :  { %v254_v54 = vmax.f32 %v253_v45, %v132_v41  ;;  %v267_v56 = vmax.f32 %v266_v47, %v86_v43  ;;  %v103_v0 = vld [vmem:[%s790_s0 + $0x2f8] sm:$0xff]  ;;  %v134_v2 = vld [vmem:[%s790_s0 + $0x3f0] sm:$0xff] }
  0x30   :  { %291 = vst [vmem:[%s791_s1 + $0x58] sm:$0xff] %v247_v49  ;;  %v261_v58 = vmax.f32 %v260_v51, %v117_v46  ;;  %v274_v60 = vmax.f32 %v273_v53, %v71_v48  ;;  %v119_v5 = vld [vmem:[%s790_s0 + $0x378] sm:$0xff]  ;;  %v150_v7 = vld [vmem:[%s790_s0 + $0x470] sm:$0xff] }
  0x31   :  { %v255_v61 = vmax.f32 %v254_v54, %v148_v50  ;;  %v268_v63 = vmax.f32 %v267_v56, %v102_v52  ;;  %v135_v10 = vld [vmem:[%s790_s0 + $0x3f8] sm:$0xff] }
  0x32   :  { %v262_v1 = vmax.f32 %v261_v58, %v133_v55  ;;  %v275_v3 = vmax.f32 %v274_v60, %v87_v57  ;;  %v151_v13 = vld [vmem:[%s790_s0 + $0x478] sm:$0xff] }
  0x33   :  { %292 = vst [vmem:[%s791_s1 + $0x60] sm:$0xff] %v255_v61  ;;  %v269_v4 = vmax.f32 %v268_v63, %v118_v59 }
  0x34   :  { %v263_v6 = vmax.f32 %v262_v1, %v149_v62  ;;  %v276_v8 = vmax.f32 %v275_v3, %v103_v0 }
  0x35   :  { %v270_v9 = vmax.f32 %v269_v4, %v134_v2 }
  0x36   :  { %293 = vst [vmem:[%s791_s1 + $0x68] sm:$0xff] %v263_v6  ;;  %v277_v11 = vmax.f32 %v276_v8, %v119_v5 }
  0x37   :  { %v271_v12 = vmax.f32 %v270_v9, %v150_v7 }
  0x38   :  { %v278_v14 = vmax.f32 %v277_v11, %v135_v10 }
  0x39   :  { %294 = vst [vmem:[%s791_s1 + $0x70] sm:$0xff] %v271_v12 }
  0x3a   :  { %v279_v15 = vmax.f32 %v278_v14, %v151_v13 }
  0x3c   :  { %295 = vst [vmem:[%s791_s1 + $0x78] sm:$0xff] %v279_v15 }

// kernel: resnet_backbone_forward.46
= control target key start
LH: loop header
LB: loop body
LE: loop exit
PB: predicated region body
PF: predicated region fallthrough
CT: control target
= control target key end

     0   :  { %s248_s0 = inlined_call_operand.vmem [shape: f32[128,128], index: 0, kind: input, shape index: {}]   ;;  %s249_s1 = inlined_call_operand.vmem [shape: f32[1,128], index: 1, kind: input, shape index: {}]   ;;  %s250_s2 = inlined_call_operand.vmem [shape: f32[1,128], index: 2, kind: input, shape index: {}]   ;;  %s251_s3 = inlined_call_operand.vmem [shape: f32[128,128], index: 3, kind: output, shape index: {}]  }
   0x1   :  { %v14_v0 = vld [vmem:[%s248_s0] sm:$0xff]  ;;  %v15_v3 = vld [vmem:[%s248_s0 + $0x8] sm:$0xff]  ;;  %v16_v6 = vld [vmem:[%s248_s0 + $0x10] sm:$0xff] }
   0x2   :  { %v106_v1 = vld [vmem:[%s249_s1] ss:$0 sm:$0xff]  ;;  %v17_v7 = vld [vmem:[%s248_s0 + $0x18] sm:$0xff]  ;;  %v19_v12 = vld [vmem:[%s248_s0 + $0x28] sm:$0xff] }
   0x3   :  { %v137_v2 = vld [vmem:[%s250_s2] ss:$0 sm:$0xff]  ;;  %v34_v4 = vmul.f32 %v106_v1, %v14_v0  ;;  %v35_v5 = vmul.f32 %v106_v1, %v15_v3  ;;  %v36_v9 = vmul.f32 %v106_v1, %v16_v6  ;;  %v37_v10 = vmul.f32 %v106_v1, %v17_v7  ;;  %v20_v13 = vld [vmem:[%s248_s0 + $0x30] sm:$0xff]  ;;  %v21_v14 = vld [vmem:[%s248_s0 + $0x38] sm:$0xff] }
   0x4   :  { %v18_v8 = vld [vmem:[%s248_s0 + $0x20] sm:$0xff]  ;;  %v39_v17 = vmul.f32 %v106_v1, %v19_v12  ;;  %v40_v18 = vmul.f32 %v106_v1, %v20_v13  ;;  %v41_v22 = vmul.f32 %v106_v1, %v21_v14  ;;  %v23_v24 = vld [vmem:[%s248_s0 + $0x48] sm:$0xff]  ;;  %v24_v29 = vld [vmem:[%s248_s0 + $0x50] sm:$0xff] }
   0x5   :  { %v38_v11 = vmul.f32 %v106_v1, %v18_v8  ;;  %v54_v15 = vadd.f32 %v137_v2, %v34_v4  ;;  %v55_v16 = vadd.f32 %v137_v2, %v35_v5  ;;  %v56_v19 = vadd.f32 %v137_v2, %v36_v9  ;;  %v22_v23 = vld [vmem:[%s248_s0 + $0x40] sm:$0xff]  ;;  %v25_v30 = vld [vmem:[%s248_s0 + $0x58] sm:$0xff]  ;;  %v27_v35 = vld [vmem:[%s248_s0 + $0x68] sm:$0xff] }
   0x6   :  { %v57_v20 = vadd.f32 %v137_v2, %v37_v10  ;;  %v59_v27 = vadd.f32 %v137_v2, %v39_v17  ;;  %v60_v28 = vadd.f32 %v137_v2, %v40_v18  ;;  %v26_v31 = vld [vmem:[%s248_s0 + $0x60] sm:$0xff]  ;;  %v61_v34 = vadd.f32 %v137_v2, %v41_v22  ;;  %v28_v36 = vld [vmem:[%s248_s0 + $0x70] sm:$0xff]  ;;  %v29_v41 = vld [vmem:[%s248_s0 + $0x78] sm:$0xff] }
   0x7   :  { %v58_v21 = vadd.f32 %v137_v2, %v38_v11  ;;  %v70_v25 = vmax.f32 %v54_v15, 0.0  ;;  %v71_v26 = vmax.f32 %v55_v16, 0.0  ;;  %v72_v32 = vmax.f32 %v56_v19, 0.0 }
   0x8   :  { %v73_v33 = vmax.f32 %v57_v20, 0.0  ;;  %v75_v38 = vmax.f32 %v59_v27, 0.0  ;;  %v42_v39 = vmul.f32 %v106_v1, %v22_v23  ;;  %v43_v40 = vmul.f32 %v106_v1, %v23_v24 }
   0x9   :  { %86 = vst [vmem:[%s251_s3] sm:$0xff] %v70_v25  ;;  %v74_v37 = vmax.f32 %v58_v21, 0.0  ;;  %v76_v42 = vmax.f32 %v60_v28, 0.0  ;;  %v44_v43 = vmul.f32 %v106_v1, %v24_v29  ;;  %v45_v44 = vmul.f32 %v106_v1, %v25_v30 }
   0xa   :  { %87 = vst [vmem:[%s251_s3 + $0x8] sm:$0xff] %v71_v26  ;;  %v46_v45 = vmul.f32 %v106_v1, %v26_v31  ;;  %v62_v46 = vadd.f32 %v137_v2, %v42_v39  ;;  %v63_v47 = vadd.f32 %v137_v2, %v43_v40  ;;  %v47_v48 = vmul.f32 %v106_v1, %v27_v35 }
   0xb   :  { %88 = vst [vmem:[%s251_s3 + $0x10] sm:$0xff] %v72_v32  ;;  %v48_v49 = vmul.f32 %v106_v1, %v28_v36  ;;  %v77_v50 = vmax.f32 %v61_v34, 0.0  ;;  %v64_v51 = vadd.f32 %v137_v2, %v44_v43  ;;  %v65_v52 = vadd.f32 %v137_v2, %v45_v44 }
   0xc   :  { %89 = vst [vmem:[%s251_s3 + $0x18] sm:$0xff] %v73_v33  ;;  %v49_v53 = vmul.f32 %v106_v1, %v29_v41  ;;  %v78_v54 = vmax.f32 %v62_v46, 0.0  ;;  %v66_v55 = vadd.f32 %v137_v2, %v46_v45  ;;  %v79_v56 = vmax.f32 %v63_v47, 0.0 }
   0xd   :  { %90 = vst [vmem:[%s251_s3 + $0x20] sm:$0xff] %v74_v37  ;;  %v67_v57 = vadd.f32 %v137_v2, %v47_v48  ;;  %v80_v58 = vmax.f32 %v64_v51, 0.0  ;;  %v68_v59 = vadd.f32 %v137_v2, %v48_v49  ;;  %v81_v60 = vmax.f32 %v65_v52, 0.0 }
   0xe   :  { %91 = vst [vmem:[%s251_s3 + $0x28] sm:$0xff] %v75_v38  ;;  %v69_v61 = vadd.f32 %v137_v2, %v49_v53  ;;  %v82_v62 = vmax.f32 %v66_v55, 0.0 }
   0xf   :  { %92 = vst [vmem:[%s251_s3 + $0x30] sm:$0xff] %v76_v42  ;;  %v83_v63 = vmax.f32 %v67_v57, 0.0  ;;  %v84_v0 = vmax.f32 %v68_v59, 0.0 }
  0x10   :  { %93 = vst [vmem:[%s251_s3 + $0x38] sm:$0xff] %v77_v50  ;;  %v85_v1 = vmax.f32 %v69_v61, 0.0 }
  0x11   :  { %94 = vst [vmem:[%s251_s3 + $0x40] sm:$0xff] %v78_v54 }
  0x12   :  { %95 = vst [vmem:[%s251_s3 + $0x48] sm:$0xff] %v79_v56 }
  0x13   :  { %96 = vst [vmem:[%s251_s3 + $0x50] sm:$0xff] %v80_v58 }
  0x14   :  { %97 = vst [vmem:[%s251_s3 + $0x58] sm:$0xff] %v81_v60 }
  0x15   :  { %98 = vst [vmem:[%s251_s3 + $0x60] sm:$0xff] %v82_v62 }
  0x16   :  { %99 = vst [vmem:[%s251_s3 + $0x68] sm:$0xff] %v83_v63 }
  0x17   :  { %100 = vst [vmem:[%s251_s3 + $0x70] sm:$0xff] %v84_v0 }
  0x18   :  { %101 = vst [vmem:[%s251_s3 + $0x78] sm:$0xff] %v85_v1 }

// kernel: resnet_backbone_forward.48
= control target key start
LH: loop header
LB: loop body
LE: loop exit
PB: predicated region body
PF: predicated region fallthrough
CT: control target
= control target key end

     0   :  { %s354_s0 = inlined_call_operand.vmem [shape: f32[128,128], index: 0, kind: input, shape index: {}]   ;;  %s355_s1 = inlined_call_operand.vmem [shape: f32[1,128], index: 1, kind: input, shape index: {}]   ;;  %s356_s2 = inlined_call_operand.vmem [shape: f32[1,128], index: 2, kind: input, shape index: {}]   ;;  %s357_s3 = inlined_call_operand.vmem [shape: f32[128,128], index: 3, kind: input, shape index: {}]   ;;  %s358_s4 = inlined_call_operand.vmem [shape: f32[128,128], index: 4, kind: output, shape index: {}]  }
   0x1   :  { %v17_v0 = vld [vmem:[%s354_s0] sm:$0xff]  ;;  %v18_v4 = vld [vmem:[%s354_s0 + $0x8] sm:$0xff]  ;;  %v19_v5 = vld [vmem:[%s354_s0 + $0x10] sm:$0xff] }
   0x2   :  { %v174_v1 = vld [vmem:[%s355_s1] ss:$0 sm:$0xff]  ;;  %v74_v8 = vld [vmem:[%s357_s3 + $0x8] sm:$0xff]  ;;  %v20_v10 = vld [vmem:[%s354_s0 + $0x18] sm:$0xff] }
   0x3   :  { %v179_v2 = vld [vmem:[%s356_s2] ss:$0 sm:$0xff]  ;;  %v37_v3 = vmul.f32 %v174_v1, %v17_v0  ;;  %v38_v7 = vmul.f32 %v174_v1, %v18_v4  ;;  %v39_v9 = vmul.f32 %v174_v1, %v19_v5  ;;  %v75_v12 = vld [vmem:[%s357_s3 + $0x10] sm:$0xff]  ;;  %v40_v13 = vmul.f32 %v174_v1, %v20_v10  ;;  %v22_v15 = vld [vmem:[%s354_s0 + $0x28] sm:$0xff] }
   0x4   :  { %v73_v6 = vld [vmem:[%s357_s3] sm:$0xff]  ;;  %v76_v18 = vld [vmem:[%s357_s3 + $0x18] sm:$0xff]  ;;  %v42_v20 = vmul.f32 %v174_v1, %v22_v15  ;;  %v23_v21 = vld [vmem:[%s354_s0 + $0x30] sm:$0xff] }
   0x5   :  { %v57_v11 = vadd.f32 %v179_v2, %v37_v3  ;;  %v21_v14 = vld [vmem:[%s354_s0 + $0x20] sm:$0xff]  ;;  %v58_v16 = vadd.f32 %v179_v2, %v38_v7  ;;  %v59_v17 = vadd.f32 %v179_v2, %v39_v9  ;;  %v60_v23 = vadd.f32 %v179_v2, %v40_v13  ;;  %v78_v25 = vld [vmem:[%s357_s3 + $0x28] sm:$0xff]  ;;  %v24_v27 = vld [vmem:[%s354_s0 + $0x38] sm:$0xff] }
   0x6   :  { %v41_v19 = vmul.f32 %v174_v1, %v21_v14  ;;  %v77_v24 = vld [vmem:[%s357_s3 + $0x20] sm:$0xff]  ;;  %v43_v26 = vmul.f32 %v174_v1, %v23_v21  ;;  %v62_v31 = vadd.f32 %v179_v2, %v42_v20  ;;  %v79_v32 = vld [vmem:[%s357_s3 + $0x30] sm:$0xff]  ;;  %v44_v37 = vmul.f32 %v174_v1, %v24_v27  ;;  %v26_v38 = vld [vmem:[%s354_s0 + $0x48] sm:$0xff] }
   0x7   :  { %v89_v22 = vadd.f32 %v73_v6, %v57_v11  ;;  %v90_v28 = vadd.f32 %v74_v8, %v58_v16  ;;  %v91_v29 = vadd.f32 %v75_v12, %v59_v17  ;;  %v25_v33 = vld [vmem:[%s354_s0 + $0x40] sm:$0xff]  ;;  %v92_v35 = vadd.f32 %v76_v18, %v60_v23  ;;  %v27_v39 = vld [vmem:[%s354_s0 + $0x50] sm:$0xff]  ;;  %v80_v44 = vld [vmem:[%s357_s3 + $0x38] sm:$0xff] }
   0x8   :  { %v61_v30 = vadd.f32 %v179_v2, %v41_v19  ;;  %v63_v36 = vadd.f32 %v179_v2, %v43_v26  ;;  %v94_v43 = vadd.f32 %v78_v25, %v62_v31  ;;  %v28_v45 = vld [vmem:[%s354_s0 + $0x58] sm:$0xff]  ;;  %v64_v48 = vadd.f32 %v179_v2, %v44_v37  ;;  %v29_v50 = vld [vmem:[%s354_s0 + $0x60] sm:$0xff]  ;;  %v30_v51 = vld [vmem:[%s354_s0 + $0x68] sm:$0xff] }
   0x9   :  { %v105_v34 = vmax.f32 %v89_v22, 0.0  ;;  %v106_v40 = vmax.f32 %v90_v28, 0.0  ;;  %v107_v41 = vmax.f32 %v91_v29, 0.0  ;;  %v108_v46 = vmax.f32 %v92_v35, 0.0  ;;  %v81_v54 = vld [vmem:[%s357_s3 + $0x40] sm:$0xff]  ;;  %v31_v57 = vld [vmem:[%s354_s0 + $0x70] sm:$0xff] }
   0xa   :  { %v93_v42 = vadd.f32 %v77_v24, %v61_v30  ;;  %v95_v47 = vadd.f32 %v79_v32, %v63_v36  ;;  %v45_v49 = vmul.f32 %v174_v1, %v25_v33  ;;  %v110_v53 = vmax.f32 %v94_v43, 0.0  ;;  %v82_v61 = vld [vmem:[%s357_s3 + $0x48] sm:$0xff]  ;;  %v83_v62 = vld [vmem:[%s357_s3 + $0x50] sm:$0xff]  ;;  %v84_v4 = vld [vmem:[%s357_s3 + $0x58] sm:$0xff] }
   0xb   :  { %121 = vst [vmem:[%s358_s4] sm:$0xff] %v105_v34  ;;  %v46_v55 = vmul.f32 %v174_v1, %v26_v38  ;;  %v47_v56 = vmul.f32 %v174_v1, %v27_v39  ;;  %v96_v59 = vadd.f32 %v80_v44, %v64_v48  ;;  %v48_v63 = vmul.f32 %v174_v1, %v28_v45  ;;  %v32_v7 = vld [vmem:[%s354_s0 + $0x78] sm:$0xff]  ;;  %v85_v11 = vld [vmem:[%s357_s3 + $0x60] sm:$0xff]  ;;  %v86_v12 = vld [vmem:[%s357_s3 + $0x68] sm:$0xff] }
   0xc   :  { %122 = vst [vmem:[%s358_s4 + $0x8] sm:$0xff] %v106_v40  ;;  %v109_v52 = vmax.f32 %v93_v42, 0.0  ;;  %v111_v58 = vmax.f32 %v95_v47, 0.0  ;;  %v65_v60 = vadd.f32 %v179_v2, %v45_v49  ;;  %v49_v5 = vmul.f32 %v174_v1, %v29_v50  ;;  %v87_v18 = vld [vmem:[%s357_s3 + $0x70] sm:$0xff]  ;;  %v88_v27 = vld [vmem:[%s357_s3 + $0x78] sm:$0xff] }
   0xd   :  { %123 = vst [vmem:[%s358_s4 + $0x10] sm:$0xff] %v107_v41  ;;  %v66_v0 = vadd.f32 %v179_v2, %v46_v55  ;;  %v67_v3 = vadd.f32 %v179_v2, %v47_v56  ;;  %v50_v6 = vmul.f32 %v174_v1, %v30_v51  ;;  %v112_v8 = vmax.f32 %v96_v59, 0.0 }
   0xe   :  { %124 = vst [vmem:[%s358_s4 + $0x18] sm:$0xff] %v108_v46  ;;  %v97_v9 = vadd.f32 %v81_v54, %v65_v60  ;;  %v68_v10 = vadd.f32 %v179_v2, %v48_v63  ;;  %v51_v13 = vmul.f32 %v174_v1, %v31_v57  ;;  %v69_v16 = vadd.f32 %v179_v2, %v49_v5 }
   0xf   :  { %125 = vst [vmem:[%s358_s4 + $0x20] sm:$0xff] %v109_v52  ;;  %v98_v14 = vadd.f32 %v82_v61, %v66_v0  ;;  %v99_v15 = vadd.f32 %v83_v62, %v67_v3  ;;  %v70_v17 = vadd.f32 %v179_v2, %v50_v6  ;;  %v52_v22 = vmul.f32 %v174_v1, %v32_v7 }
  0x10   :  { %126 = vst [vmem:[%s358_s4 + $0x28] sm:$0xff] %v110_v53  ;;  %v113_v19 = vmax.f32 %v97_v9, 0.0  ;;  %v100_v20 = vadd.f32 %v84_v4, %v68_v10  ;;  %v71_v21 = vadd.f32 %v179_v2, %v51_v13  ;;  %v101_v25 = vadd.f32 %v85_v11, %v69_v16 }
  0x11   :  { %127 = vst [vmem:[%s358_s4 + $0x30] sm:$0xff] %v111_v58  ;;  %v114_v23 = vmax.f32 %v98_v14, 0.0  ;;  %v115_v24 = vmax.f32 %v99_v15, 0.0  ;;  %v102_v26 = vadd.f32 %v86_v12, %v70_v17  ;;  %v72_v1 = vadd.f32 %v179_v2, %v52_v22 }
  0x12   :  { %128 = vst [vmem:[%s358_s4 + $0x38] sm:$0xff] %v112_v8  ;;  %v116_v28 = vmax.f32 %v100_v20, 0.0  ;;  %v103_v29 = vadd.f32 %v87_v18, %v71_v21  ;;  %v117_v30 = vmax.f32 %v101_v25, 0.0 }
  0x13   :  { %129 = vst [vmem:[%s358_s4 + $0x40] sm:$0xff] %v113_v19  ;;  %v118_v31 = vmax.f32 %v102_v26, 0.0  ;;  %v104_v33 = vadd.f32 %v88_v27, %v72_v1 }
  0x14   :  { %130 = vst [vmem:[%s358_s4 + $0x48] sm:$0xff] %v114_v23  ;;  %v119_v32 = vmax.f32 %v103_v29, 0.0 }
  0x15   :  { %131 = vst [vmem:[%s358_s4 + $0x50] sm:$0xff] %v115_v24  ;;  %v120_v2 = vmax.f32 %v104_v33, 0.0 }
  0x16   :  { %132 = vst [vmem:[%s358_s4 + $0x58] sm:$0xff] %v116_v28 }
  0x17   :  { %133 = vst [vmem:[%s358_s4 + $0x60] sm:$0xff] %v117_v30 }
  0x18   :  { %134 = vst [vmem:[%s358_s4 + $0x68] sm:$0xff] %v118_v31 }
  0x19   :  { %135 = vst [vmem:[%s358_s4 + $0x70] sm:$0xff] %v119_v32 }
  0x1a   :  { %136 = vst [vmem:[%s358_s4 + $0x78] sm:$0xff] %v120_v2 }

// kernel: resnet_backbone_forward.45
= control target key start
LH: loop header
LB: loop body
LE: loop exit
PB: predicated region body
PF: predicated region fallthrough
CT: control target
= control target key end

     0   :  { %s1218_s12 = smov 0   ;;  %s1220_s13 = smov 0   ;;  %s1406_s0 = inlined_call_operand.vmem [shape: bf16[128,1280], index: 0, kind: input, shape index: {}]   ;;  %s1407_s1 = inlined_call_operand.vmem [shape: bf16[1280,128], index: 1, kind: input, shape index: {}]   ;;  %s1408_s2 = inlined_call_operand.vmem [shape: f32[128,128], index: 2, kind: output, shape index: {0}]   ;;  %s1409_s3 = inlined_call_operand.vmem [shape: f32[8,128], index: 3, kind: output, shape index: {1}]  }
   0x1   :  { %s1222_s14 = smov 0   ;;  %s1224_s15 = smov 0  }
   0x2   :  { %s1226_s16 = smov 0  }
   0x3 LB: > { %s23_s17 = sadd.s32 1, %s1191_s15  ;;  %p42_p1 = scmp.ne.s32.totalorder %s1183_s13, %s1179_s12  ;;  %s1195_s16 = sphi %s1226_s16, %s14_s16   ;;  %s1191_s15 = sphi %s1224_s15, %s1413_s15   ;;  %s1187_s14 = sphi %s1222_s14, %s1412_s14   ;;  %s1183_s13 = sphi %s1220_s13, %s1411_s13   ;;  %s1179_s12 = sphi %s1218_s12, %s1410_s12  }
   0x4   : > { %p24_p0 = scmp.ge.s32.totalorder %s23_s17, 5  ;;  %p43_p2 = scmp.eq.s32.totalorder %s1195_s16, 0 }
   0x5   : > { %s35_s19 = sadd.s32 1, %s1183_s13  ;;  %p924_p5 = scmp.ge.s32.totalorder %s1195_s16, 5 }
   0x6   : > { %s1415_s17 = smov (%p24_p0, %s23_s17), 0  ;;  %p44_p3 = por %p43_p2, %p42_p1 }
   0x7   : > { %s31_s18 = ssub.s32 %s1191_s15, %s1415_s17  ;;  %146 = sbr.rel (%p924_p5) target bundleno = 32 (0x20), region = 16 }
   0x8   : > { %p33_p4 = scmp.eq.s32.totalorder %s31_s18, 0 }
   0xa   : > { %s1253_s20 = scalar_select %p33_p4, %s1183_s13, %s35_s19  }
   0xc   : > { %149 = sbr.rel (!%p44_p3) target bundleno = 32 (0x20), region = 20  ;;  %s151_s21 = sand.u32 (%p44_p3), 1, %s1183_s13  }
   0xd   : > { %s1067_s22 = sshll.u32 (%p44_p3), %s1191_s15, 3  ;;  %s925_s23 = sshll.u32 (%p44_p3), %s151_s21, 7 }
   0xe   : > { %s1261_s26 = scalar_lea.vmem (%p44_p3), %s1406_s0, %s1067_s22  ;;  %s153_s27 = scalar_lea.vmem (%p44_p3), [#allocation3], %s925_s23 }
   0xf   : > { %v218_v0 = vld [vmem:[%s1261_s26] sm:$0xff] (%p44_p3)  ;;  %v220_v1 = vld [vmem:[%s1261_s26 + $0x28] sm:$0xff] (%p44_p3)  ;;  %v222_v2 = vld [vmem:[%s1261_s26 + $0x50] sm:$0xff] (%p44_p3) }
  0x10   : > { %219 = vst [vmem:[%s153_s27] sm:$0xff] (%p44_p3), %v218_v0  ;;  %v224_v3 = vld [vmem:[%s1261_s26 + $0x78] sm:$0xff] (%p44_p3)  ;;  %v226_v4 = vld [vmem:[%s1261_s26 + $0xa0] sm:$0xff] (%p44_p3)  ;;  %v228_v5 = vld [vmem:[%s1261_s26 + $0xc8] sm:$0xff] (%p44_p3) }
  0x11   : > { %221 = vst [vmem:[%s153_s27 + $0x8] sm:$0xff] %v220_v1  ;;  %v230_v6 = vld [vmem:[%s1261_s26 + $0xf0] sm:$0xff]  ;;  %v232_v7 = vld [vmem:[%s1261_s26 + $0x118] sm:$0xff]  ;;  %v234_v8 = vld [vmem:[%s1261_s26 + $0x140] sm:$0xff] }
  0x12   : > { %223 = vst [vmem:[%s153_s27 + $0x10] sm:$0xff] %v222_v2  ;;  %v236_v9 = vld [vmem:[%s1261_s26 + $0x168] sm:$0xff]  ;;  %v238_v10 = vld [vmem:[%s1261_s26 + $0x190] sm:$0xff]  ;;  %v240_v11 = vld [vmem:[%s1261_s26 + $0x1b8] sm:$0xff] }
  0x13   : > { %225 = vst [vmem:[%s153_s27 + $0x18] sm:$0xff] %v224_v3  ;;  %v242_v12 = vld [vmem:[%s1261_s26 + $0x1e0] sm:$0xff]  ;;  %v244_v13 = vld [vmem:[%s1261_s26 + $0x208] sm:$0xff]  ;;  %v246_v14 = vld [vmem:[%s1261_s26 + $0x230] sm:$0xff] }
  0x14   : > { %227 = vst [vmem:[%s153_s27 + $0x20] sm:$0xff] %v226_v4  ;;  %v248_v15 = vld [vmem:[%s1261_s26 + $0x258] sm:$0xff] }
  0x15   : > { %229 = vst [vmem:[%s153_s27 + $0x28] sm:$0xff] %v228_v5 }
  0x16   : > { %231 = vst [vmem:[%s153_s27 + $0x30] sm:$0xff] %v230_v6 }
  0x17   : > { %233 = vst [vmem:[%s153_s27 + $0x38] sm:$0xff] %v232_v7 }
  0x18   : > { %235 = vst [vmem:[%s153_s27 + $0x40] sm:$0xff] %v234_v8 }
  0x19   : > { %237 = vst [vmem:[%s153_s27 + $0x48] sm:$0xff] %v236_v9 }
  0x1a   : > { %239 = vst [vmem:[%s153_s27 + $0x50] sm:$0xff] %v238_v10 }
  0x1b   : > { %241 = vst [vmem:[%s153_s27 + $0x58] sm:$0xff] %v240_v11 }
  0x1c   : > { %243 = vst [vmem:[%s153_s27 + $0x60] sm:$0xff] %v242_v12 }
  0x1d   : > { %245 = vst [vmem:[%s153_s27 + $0x68] sm:$0xff] %v244_v13 }
  0x1e   : > { %247 = vst [vmem:[%s153_s27 + $0x70] sm:$0xff] %v246_v14 }
  0x1f   : > { %249 = vst [vmem:[%s153_s27 + $0x78] sm:$0xff] %v248_v15 }
  0x20 PF: > { %p928_p6 = scmp.ge.s32.totalorder %s1195_s16, 1  ;;  %p263_p7 = scmp.lt.s32.totalorder %s1195_s16, 6 }
  0x22   : > { %p264_p8 = pnand %p928_p6, %p263_p7 }
  0x23   : > { %s270_s28 = sand.u32 (!%p264_p8), 1, %s1179_s12   ;;  %s930_s29 = sshll.u32 (!%p264_p8), %s1187_s14, 5 }
  0x24   : > { %267 = sbr.rel (%p264_p8) target bundleno = 337 (0x151), region = 62  ;;  %s929_s30 = sshll.u32 (!%p264_p8), %s270_s28, 7 }
  0x25   : > { %p305_p9 = scmp.lt.s32.totalorder (!%p264_p8), %s930_s29, 159  ;;  %s1288_s8 = scalar_lea.vmem (!%p264_p8), [#allocation3], %s929_s30 }
  0x26   : > { %p932_p10 = scmp.ne.s32.totalorder (!%p264_p8), %s1187_s14, 0 }
  0x29   : > { %s1417_s29 = smov (!%p305_p9, %s930_s29), 159  ;;  %323 = sbr.rel (%p932_p10) target bundleno = 63 (0x3f), region = 70 }
  0x2a   : > { %s931_s4 = sshll.u32 %s1417_s29, 2 }
  0x2b   : > { %s1286_s7 = scalar_lea.vmem %s1407_s1, %s931_s4 }
  0x2e   : > { %v1197_v16 = vmov 0.0  }
  0x2f   : > { %324 = vst [vmem:[#allocation2 + $0x30] sm:$0xff] %v1197_v16 }
  0x30   : > { %325 = vst [vmem:[#allocation2] sm:$0xff] %v1197_v16 }
  0x31   : > { %326 = vst [vmem:[#allocation2 + $0x58] sm:$0xff] %v1197_v16 }
  0x32   : > { %327 = vst [vmem:[#allocation2 + $0x18] sm:$0xff] %v1197_v16 }
  0x33   : > { %328 = vst [vmem:[#allocation2 + $0x50] sm:$0xff] %v1197_v16 }
  0x34   : > { %329 = vst [vmem:[#allocation2 + $0x68] sm:$0xff] %v1197_v16 }
  0x35   : > { %330 = vst [vmem:[#allocation2 + $0x8] sm:$0xff] %v1197_v16 }
  0x36   : > { %331 = vst [vmem:[#allocation2 + $0x48] sm:$0xff] %v1197_v16 }
  0x37   : > { %332 = vst [vmem:[#allocation2 + $0x40] sm:$0xff] %v1197_v16 }
  0x38   : > { %333 = vst [vmem:[#allocation2 + $0x20] sm:$0xff] %v1197_v16 }
  0x39   : > { %334 = vst [vmem:[#allocation2 + $0x10] sm:$0xff] %v1197_v16 }
  0x3a   : > { %335 = vst [vmem:[#allocation2 + $0x38] sm:$0xff] %v1197_v16 }
  0x3b   : > { %336 = vst [vmem:[#allocation2 + $0x60] sm:$0xff] %v1197_v16 }
  0x3c   : > { %337 = vst [vmem:[#allocation2 + $0x70] sm:$0xff] %v1197_v16 }
  0x3d   : > { %338 = vst [vmem:[#allocation2 + $0x78] sm:$0xff] %v1197_v16 }
  0x3e   : > { %339 = vst [vmem:[#allocation2 + $0x28] sm:$0xff] %v1197_v16 }
  0x3f PF: > { %v1091_v17 = vld [vmem:[%s1286_s7 + $0x38] sm:$0xff]  ;;  %v1090_v19 = vld [vmem:[%s1286_s7 + $0x30] sm:$0xff]  ;;  %v1089_v21 = vld [vmem:[%s1286_s7 + $0x28] sm:$0xff]  ;;  %p1061_p11 = scmp.ne.s32.totalorder %s1187_s14, 4 }
  0x40   : > { %v1099_v18 = vld [vmem:[%s1286_s7 + $0x78] sm:$0xff]  ;;  %580 = vmatpush.bf16.msra.mxu0 %v1091_v17  ;;  %1100 = vmatpush.bf16.msra.mxu2 %v1091_v17  ;;  %v1098_v20 = vld [vmem:[%s1286_s7 + $0x70] sm:$0xff]  ;;  %v1097_v22 = vld [vmem:[%s1286_s7 + $0x68] sm:$0xff] }
  0x41   : > { %629 = vmatpush.bf16.msra.mxu1 %v1099_v18  ;;  %1108 = vmatpush.bf16.msra.mxu3 %v1099_v18  ;;  %v1088_v23 = vld [vmem:[%s1286_s7 + $0x20] sm:$0xff]  ;;  %v1087_v25 = vld [vmem:[%s1286_s7 + $0x18] sm:$0xff]  ;;  %v1086_v27 = vld [vmem:[%s1286_s7 + $0x10] sm:$0xff] }
  0x42   : > { %v1096_v24 = vld [vmem:[%s1286_s7 + $0x60] sm:$0xff]  ;;  %v1095_v26 = vld [vmem:[%s1286_s7 + $0x58] sm:$0xff]  ;;  %v1094_v28 = vld [vmem:[%s1286_s7 + $0x50] sm:$0xff] }
  0x43   : > { %v1085_v29 = vld [vmem:[%s1286_s7 + $0x8] sm:$0xff]  ;;  %v1084_v31 = vld [vmem:[%s1286_s7] sm:$0xff]  ;;  %v943_v45 = vld [vmem:[%s1288_s8 + $0x10] sm:$0xf] }
  0x44   : > { %581 = vmatpush.bf16.msra.mxu0 %v1090_v19  ;;  %1101 = vmatpush.bf16.msra.mxu2 %v1090_v19  ;;  %v1093_v30 = vld [vmem:[%s1286_s7 + $0x48] sm:$0xff]  ;;  %v1092_v32 = vld [vmem:[%s1286_s7 + $0x40] sm:$0xff]  ;;  %v1071_v46 = vld [vmem:[%s1288_s8 + $0x14] sm:$0xf0] }
  0x45   : > { %630 = vmatpush.bf16.msra.mxu1 %v1098_v20  ;;  %1109 = vmatpush.bf16.msra.mxu3 %v1098_v20  ;;  %v935_v33 = vld [vmem:[%s1288_s8] sm:$0xf]  ;;  %v1069_v34 = vld [vmem:[%s1288_s8 + $0x4] sm:$0xf0]  ;;  %v1068_v37 = vld [vmem:[%s1288_s8 + $0x4] sm:$0xf]  ;;  %v944_v53 = vor.u32 %v1071_v46, %v943_v45 }
  0x46   : > { %v967_v35 = vld [vmem:[%s1288_s8 + $0x40] sm:$0xf]  ;;  %v1077_v36 = vld [vmem:[%s1288_s8 + $0x44] sm:$0xf0]  ;;  %v937_v38 = vld [vmem:[%s1288_s8 + $0x8] sm:$0xf0]  ;;  %v936_v41 = vor.u32 %v1069_v34, %v935_v33 }
  0x47   : > { %v1076_v39 = vld [vmem:[%s1288_s8 + $0x44] sm:$0xf]  ;;  %v969_v40 = vld [vmem:[%s1288_s8 + $0x48] sm:$0xf0]  ;;  %v968_v42 = vor.u32 %v1077_v36, %v967_v35  ;;  %v940_v43 = vor.u32 %v1068_v37, %v937_v38  ;;  %v975_v47 = vld [vmem:[%s1288_s8 + $0x50] sm:$0xf] }
  0x48   : > { %582 = vmatpush.bf16.msra.mxu0 %v1089_v21  ;;  %1102 = vmatpush.bf16.msra.mxu2 %v1089_v21  ;;  %v972_v44 = vor.u32 %v1076_v39, %v969_v40  ;;  %v1079_v48 = vld [vmem:[%s1288_s8 + $0x54] sm:$0xf0]  ;;  %v1070_v49 = vld [vmem:[%s1288_s8 + $0x14] sm:$0xf]  ;;  %v945_v50 = vld [vmem:[%s1288_s8 + $0x18] sm:$0xf0] }
  0x49   : > { %631 = vmatpush.bf16.msra.mxu1 %v1097_v22  ;;  %1110 = vmatpush.bf16.msra.mxu3 %v1097_v22  ;;  %v1078_v51 = vld [vmem:[%s1288_s8 + $0x54] sm:$0xf]  ;;  %v977_v52 = vld [vmem:[%s1288_s8 + $0x58] sm:$0xf0]  ;;  %v976_v54 = vor.u32 %v1079_v48, %v975_v47  ;;  %v948_v55 = vor.u32 %v1070_v49, %v945_v50  ;;  %v951_v57 = vld [vmem:[%s1288_s8 + $0x20] sm:$0xf] }
  0x4a   : > { %v980_v56 = vor.u32 %v1078_v51, %v977_v52  ;;  %v1073_v58 = vld [vmem:[%s1288_s8 + $0x24] sm:$0xf0]  ;;  %v983_v59 = vld [vmem:[%s1288_s8 + $0x60] sm:$0xf]  ;;  %v1072_v61 = vld [vmem:[%s1288_s8 + $0x24] sm:$0xf] }
  0x4b   : > { %v1081_v60 = vld [vmem:[%s1288_s8 + $0x64] sm:$0xf0]  ;;  %v953_v62 = vld [vmem:[%s1288_s8 + $0x28] sm:$0xf0]  ;;  %v1080_v63 = vld [vmem:[%s1288_s8 + $0x64] sm:$0xf]  ;;  %v952_v1 = vor.u32 %v1073_v58, %v951_v57 }
  0x4c   : > { %583 = vmatpush.bf16.msra.mxu0 %v1088_v23  ;;  %1103 = vmatpush.bf16.msra.mxu2 %v1088_v23  ;;  %v985_v0 = vld [vmem:[%s1288_s8 + $0x68] sm:$0xf0]  ;;  %v984_v2 = vor.u32 %v1081_v60, %v983_v59  ;;  %v956_v3 = vor.u32 %v1072_v61, %v953_v62  ;;  %v959_v5 = vld [vmem:[%s1288_s8 + $0x30] sm:$0xf]  ;;  %v1075_v6 = vld [vmem:[%s1288_s8 + $0x34] sm:$0xf0] }
  0x4d   : > { %632 = vmatpush.bf16.msra.mxu1 %v1096_v24  ;;  %1111 = vmatpush.bf16.msra.mxu3 %v1096_v24  ;;  %v988_v4 = vor.u32 %v1080_v63, %v985_v0  ;;  %v991_v7 = vld [vmem:[%s1288_s8 + $0x70] sm:$0xf]  ;;  %v1083_v8 = vld [vmem:[%s1288_s8 + $0x74] sm:$0xf0]  ;;  %v1074_v9 = vld [vmem:[%s1288_s8 + $0x34] sm:$0xf]  ;;  %v960_v13 = vor.u32 %v1075_v6, %v959_v5 }
  0x4e   : > { %v961_v10 = vld [vmem:[%s1288_s8 + $0x38] sm:$0xf0]  ;;  %v1082_v11 = vld [vmem:[%s1288_s8 + $0x74] sm:$0xf]  ;;  %v992_v14 = vor.u32 %v1083_v8, %v991_v7  ;;  %v348_v23 = vld [vmem:[#allocation2 + $0x40] sm:$0xff] }
  0x4f   : > { %v993_v12 = vld [vmem:[%s1288_s8 + $0x78] sm:$0xf0]  ;;  %v964_v15 = vor.u32 %v1074_v9, %v961_v10  ;;  %v340_v18 = vld [vmem:[#allocation2 + $0x30] sm:$0xff]  ;;  %v349_v33 = vld [vmem:[#allocation2 + $0x20] sm:$0xff] }
  0x50   : > { %584 = vmatpush.bf16.msra.mxu0 %v1087_v25  ;;  %1104 = vmatpush.bf16.msra.mxu2 %v1087_v25  ;;  %v996_v16 = vor.u32 %v1082_v11, %v993_v12  ;;  %v342_v37 = vld [vmem:[#allocation2 + $0x58] sm:$0xff]  ;;  %v344_v57 = vld [vmem:[#allocation2 + $0x50] sm:$0xff]  ;;  %v352_v63 = vld [vmem:[#allocation2 + $0x60] sm:$0xff] }
  0x51   : > { %633 = vmatpush.bf16.msra.mxu1 %v1095_v26  ;;  %1112 = vmatpush.bf16.msra.mxu3 %v1095_v26  ;;  %v343_v47 = vld [vmem:[#allocation2 + $0x18] sm:$0xff]  ;;  %v353_v9 = vld [vmem:[#allocation2 + $0x70] sm:$0xff] }
  0x54   : > { %585 = vmatpush.bf16.msra.mxu0 %v1086_v27  ;;  %1105 = vmatpush.bf16.msra.mxu2 %v1086_v27  ;;  %v341_v27 = vld [vmem:[#allocation2] sm:$0xff] }
  0x55   : > { %634 = vmatpush.bf16.msra.mxu1 %v1094_v28  ;;  %1113 = vmatpush.bf16.msra.mxu3 %v1094_v28 }
  0x58   : > { %586 = vmatpush.bf16.msra.mxu0 %v1085_v29  ;;  %1106 = vmatpush.bf16.msra.mxu2 %v1085_v29 }
  0x59   : > { %635 = vmatpush.bf16.msra.mxu1 %v1093_v30  ;;  %1114 = vmatpush.bf16.msra.mxu3 %v1093_v30 }
  0x5c   : > { %587 = vmatpush.bf16.msra.mxu0 %v1084_v31  ;;  %1107 = vmatpush.bf16.msra.mxu2 %v1084_v31 }
  0x5d   : > { %636 = vmatpush.bf16.msra.mxu1 %v1092_v32  ;;  %1115 = vmatpush.bf16.msra.mxu3 %v1092_v32 }
  0x5f   : > { %588 = vmatmul.bf16.vlgmr.msra.gmra.mxu0 %v936_v41  ;;  %608 = vmatmul.bf16.vlgmr.msra.gmra.mxu2 %v968_v42 }
  0x60   : > { %637 = vmatmul.bf16.vlgmr.msra.gmra.mxu1 %v940_v43  ;;  %657 = vmatmul.bf16.vlgmr.msra.gmra.mxu3 %v972_v44  ;;  %v350_v43 = vld [vmem:[#allocation2 + $0x10] sm:$0xff] }
  0x6f   : > { %593 = vmatmul.bf16.gmra.mxu0 %v944_v53  ;;  %613 = vmatmul.bf16.gmra.mxu2 %v976_v54  ;;  %v351_v53 = vld [vmem:[#allocation2 + $0x38] sm:$0xff] }
  0x70   : > { %642 = vmatmul.bf16.gmra.mxu1 %v948_v55  ;;  %662 = vmatmul.bf16.gmra.mxu3 %v980_v56 }
  0x7f   : > { %598 = vmatmul.bf16.gmra.mxu0 %v952_v1  ;;  %618 = vmatmul.bf16.gmra.mxu2 %v984_v2 }
  0x80   : > { %647 = vmatmul.bf16.gmra.mxu1 %v956_v3  ;;  %667 = vmatmul.bf16.gmra.mxu3 %v988_v4  ;;  %v345_v3 = vld [vmem:[#allocation2 + $0x68] sm:$0xff] }
  0x8f   : > { %603 = vmatmul.bf16.gmra.mxu0 %v960_v13  ;;  %623 = vmatmul.bf16.gmra.mxu2 %v992_v14  ;;  %v346_v13 = vld [vmem:[#allocation2 + $0x8] sm:$0xff] }
  0x90   : > { %652 = vmatmul.bf16.gmra.mxu1 %v964_v15  ;;  %672 = vmatmul.bf16.gmra.mxu3 %v996_v16 }
  0xdc   : > { %v589_v17 = vpop.f32.mrf.mxu0 }
  0xdd   : > { %v638_v19 = vpop.f32.mrf.mxu1 }
  0xde   : > { %v639_v20 = vadd.f32 %v638_v19, %v589_v17  ;;  %v354_v19 = vld [vmem:[#allocation2 + $0x78] sm:$0xff] }
  0xe0   : > { %v678_v21 = vadd.f32 %v639_v20, %v340_v18 }
  0xe2   : > { %694 = vst [vmem:[#allocation2 + $0x30] sm:$0xff] %v678_v21  ;;  %v609_v22 = vpop.f32.mrf.mxu2 }
  0xe3   : > { %v658_v24 = vpop.f32.mrf.mxu3 }
  0xe4   : > { %v659_v25 = vadd.f32 %v658_v24, %v609_v22  ;;  %v591_v26 = vpop.f32.mrf.mxu0 }
  0xe5   : > { %v640_v28 = vpop.f32.mrf.mxu1 }
  0xe6   : > { %v686_v29 = vadd.f32 %v659_v25, %v348_v23  ;;  %v641_v30 = vadd.f32 %v640_v28, %v591_v26  ;;  %v347_v23 = vld [vmem:[#allocation2 + $0x48] sm:$0xff] }
  0xe8   : > { %702 = vst [vmem:[#allocation2 + $0x40] sm:$0xff] %v686_v29  ;;  %v679_v31 = vadd.f32 %v641_v30, %v341_v27  ;;  %v355_v29 = vld [vmem:[#allocation2 + $0x28] sm:$0xff] }
  0xea   : > { %695 = vst [vmem:[#allocation2] sm:$0xff] %v679_v31  ;;  %v611_v32 = vpop.f32.mrf.mxu2 }
  0xeb   : > { %v660_v34 = vpop.f32.mrf.mxu3 }
  0xec   : > { %v661_v35 = vadd.f32 %v660_v34, %v611_v32  ;;  %v594_v36 = vpop.f32.mrf.mxu0 }
  0xed   : > { %v643_v38 = vpop.f32.mrf.mxu1 }
  0xee   : > { %v687_v39 = vadd.f32 %v661_v35, %v349_v33  ;;  %v644_v40 = vadd.f32 %v643_v38, %v594_v36 }
  0xf0   : > { %703 = vst [vmem:[#allocation2 + $0x20] sm:$0xff] %v687_v39  ;;  %v680_v41 = vadd.f32 %v644_v40, %v342_v37 }
  0xf2   : > { %696 = vst [vmem:[#allocation2 + $0x58] sm:$0xff] %v680_v41  ;;  %v614_v42 = vpop.f32.mrf.mxu2 }
  0xf3   : > { %v663_v44 = vpop.f32.mrf.mxu3 }
  0xf4   : > { %v664_v45 = vadd.f32 %v663_v44, %v614_v42  ;;  %v596_v46 = vpop.f32.mrf.mxu0 }
  0xf5   : > { %v645_v48 = vpop.f32.mrf.mxu1 }
  0xf6   : > { %v688_v49 = vadd.f32 %v664_v45, %v350_v43  ;;  %v646_v50 = vadd.f32 %v645_v48, %v596_v46 }
  0xf8   : > { %704 = vst [vmem:[#allocation2 + $0x10] sm:$0xff] %v688_v49  ;;  %v681_v51 = vadd.f32 %v646_v50, %v343_v47 }
  0xfa   : > { %697 = vst [vmem:[#allocation2 + $0x18] sm:$0xff] %v681_v51  ;;  %v616_v52 = vpop.f32.mrf.mxu2 }
  0xfb   : > { %v665_v54 = vpop.f32.mrf.mxu3 }
  0xfc   : > { %v666_v55 = vadd.f32 %v665_v54, %v616_v52  ;;  %v599_v56 = vpop.f32.mrf.mxu0 }
  0xfd   : > { %v648_v58 = vpop.f32.mrf.mxu1 }
  0xfe   : > { %v689_v59 = vadd.f32 %v666_v55, %v351_v53  ;;  %v649_v60 = vadd.f32 %v648_v58, %v599_v56 }
 0x100   : > { %705 = vst [vmem:[#allocation2 + $0x38] sm:$0xff] %v689_v59  ;;  %v682_v61 = vadd.f32 %v649_v60, %v344_v57 }
 0x102   : > { %698 = vst [vmem:[#allocation2 + $0x50] sm:$0xff] %v682_v61  ;;  %v619_v62 = vpop.f32.mrf.mxu2 }
 0x103   : > { %v668_v0 = vpop.f32.mrf.mxu3 }
 0x104   : > { %v669_v1 = vadd.f32 %v668_v0, %v619_v62  ;;  %v601_v2 = vpop.f32.mrf.mxu0 }
 0x105   : > { %v650_v4 = vpop.f32.mrf.mxu1 }
 0x106   : > { %v690_v5 = vadd.f32 %v669_v1, %v352_v63  ;;  %v651_v6 = vadd.f32 %v650_v4, %v601_v2 }
 0x108   : > { %706 = vst [vmem:[#allocation2 + $0x60] sm:$0xff] %v690_v5  ;;  %v683_v7 = vadd.f32 %v651_v6, %v345_v3 }
 0x10a   : > { %699 = vst [vmem:[#allocation2 + $0x68] sm:$0xff] %v683_v7  ;;  %v621_v8 = vpop.f32.mrf.mxu2 }
 0x10b   : > { %v670_v10 = vpop.f32.mrf.mxu3 }
 0x10c   : > { %v671_v11 = vadd.f32 %v670_v10, %v621_v8  ;;  %v604_v12 = vpop.f32.mrf.mxu0 }
 0x10d   : > { %v653_v14 = vpop.f32.mrf.mxu1 }
 0x10e   : > { %v691_v15 = vadd.f32 %v671_v11, %v353_v9  ;;  %v654_v16 = vadd.f32 %v653_v14, %v604_v12 }
 0x110   : > { %707 = vst [vmem:[#allocation2 + $0x70] sm:$0xff] %v691_v15  ;;  %v684_v17 = vadd.f32 %v654_v16, %v346_v13 }
 0x112   : > { %700 = vst [vmem:[#allocation2 + $0x8] sm:$0xff] %v684_v17  ;;  %v624_v18 = vpop.f32.mrf.mxu2 }
 0x113   : > { %v673_v20 = vpop.f32.mrf.mxu3 }
 0x114   : > { %v674_v21 = vadd.f32 %v673_v20, %v624_v18  ;;  %v606_v22 = vpop.f32.mrf.mxu0 }
 0x115   : > { %v655_v24 = vpop.f32.mrf.mxu1 }
 0x116   : > { %v692_v25 = vadd.f32 %v674_v21, %v354_v19  ;;  %v656_v26 = vadd.f32 %v655_v24, %v606_v22 }
 0x118   : > { %708 = vst [vmem:[#allocation2 + $0x78] sm:$0xff] %v692_v25  ;;  %v685_v27 = vadd.f32 %v656_v26, %v347_v23 }
 0x11a   : > { %701 = vst [vmem:[#allocation2 + $0x48] sm:$0xff] %v685_v27  ;;  %v626_v28 = vpop.f32.mrf.mxu2 }
 0x11b   : > { %v675_v30 = vpop.f32.mrf.mxu3 }
 0x11c   : > { %v676_v31 = vadd.f32 %v675_v30, %v626_v28  ;;  %713 = sbr.rel (%p1061_p11) target bundleno = 337 (0x151), region = 74 }
 0x11e   : > { %v693_v32 = vadd.f32 %v676_v31, %v355_v29 }
 0x120   : > { %709 = vst [vmem:[#allocation2 + $0x28] sm:$0xff] %v693_v32 }
 0x121   : > { %v714_v33 = vld [vmem:[#allocation2 + $0x30] sm:$0xff]  ;;  %v715_v34 = vld [vmem:[#allocation2] sm:$0xff]  ;;  %v716_v35 = vld [vmem:[#allocation2 + $0x58] sm:$0xff] }
 0x122   : > { %730 = vst [vmem:[%s1408_s2] sm:$0xff] %v714_v33  ;;  %v767_v36 = vmul.f32 %v714_v33, %v714_v33  ;;  %v746_v37 = vadd.f32 %v715_v34, %v714_v33  ;;  %v768_v38 = vmul.f32 %v715_v34, %v715_v34  ;;  %v769_v39 = vmul.f32 %v716_v35, %v716_v35  ;;  %v717_v40 = vld [vmem:[#allocation2 + $0x18] sm:$0xff]  ;;  %v718_v41 = vld [vmem:[#allocation2 + $0x50] sm:$0xff]  ;;  %v719_v45 = vld [vmem:[#allocation2 + $0x68] sm:$0xff] }
 0x123   : > { %731 = vst [vmem:[%s1408_s2 + $0x8] sm:$0xff] %v715_v34  ;;  %v770_v44 = vmul.f32 %v717_v40, %v717_v40  ;;  %v771_v48 = vmul.f32 %v718_v41, %v718_v41  ;;  %v720_v49 = vld [vmem:[#allocation2 + $0x8] sm:$0xff]  ;;  %v772_v52 = vmul.f32 %v719_v45, %v719_v45  ;;  %v722_v54 = vld [vmem:[#allocation2 + $0x40] sm:$0xff]  ;;  %v724_v59 = vld [vmem:[#allocation2 + $0x10] sm:$0xff]  ;;  %v804_v34 = vlaneseq }
 0x124   : > { %v783_v42 = vadd.f32 %v768_v38, %v767_v36  ;;  %732 = vst [vmem:[%s1408_s2 + $0x10] sm:$0xff] %v716_v35  ;;  %v747_v43 = vadd.f32 %v746_v37, %v716_v35  ;;  %v721_v53 = vld [vmem:[#allocation2 + $0x48] sm:$0xff]  ;;  %v773_v57 = vmul.f32 %v720_v49, %v720_v49  ;;  %v723_v58 = vld [vmem:[#allocation2 + $0x20] sm:$0xff]  ;;  %v725_v63 = vld [vmem:[#allocation2 + $0x38] sm:$0xff]  ;;  %v775_v3 = vmul.f32 %v722_v54, %v722_v54 }
 0x125   : > { %733 = vst [vmem:[%s1408_s2 + $0x18] sm:$0xff] %v717_v40  ;;  %v774_v62 = vmul.f32 %v721_v53, %v721_v53  ;;  %v726_v0 = vld [vmem:[#allocation2 + $0x60] sm:$0xff]  ;;  %v727_v4 = vld [vmem:[#allocation2 + $0x70] sm:$0xff]  ;;  %v728_v5 = vld [vmem:[#allocation2 + $0x78] sm:$0xff]  ;;  %v776_v8 = vmul.f32 %v723_v58, %v723_v58  ;;  %v777_v12 = vmul.f32 %v724_v59, %v724_v59  ;;  %v778_v15 = vmul.f32 %v725_v63, %v725_v63 }
 0x126   : > { %v784_v46 = vadd.f32 %v783_v42, %v769_v39  ;;  %v748_v47 = vadd.f32 %v747_v43, %v717_v40  ;;  %734 = vst [vmem:[%s1408_s2 + $0x20] sm:$0xff] %v718_v41  ;;  %v779_v18 = vmul.f32 %v726_v0, %v726_v0  ;;  %v780_v21 = vmul.f32 %v727_v4, %v727_v4 }
 0x127   : > { %735 = vst [vmem:[%s1408_s2 + $0x28] sm:$0xff] %v719_v45  ;;  %v729_v9 = vld [vmem:[#allocation2 + $0x28] sm:$0xff]  ;;  %v781_v24 = vmul.f32 %v728_v5, %v728_v5  ;;  %v805_v39 = vshrl.u32 %v804_v34, 7 }
 0x128   : > { %v785_v50 = vadd.f32 %v784_v46, %v770_v44  ;;  %v749_v51 = vadd.f32 %v748_v47, %v718_v41  ;;  %736 = vst [vmem:[%s1408_s2 + $0x30] sm:$0xff] %v720_v49  ;;  %v782_v27 = vmul.f32 %v729_v9, %v729_v9 }
 0x129   : > { %737 = vst [vmem:[%s1408_s2 + $0x38] sm:$0xff] %v721_v53  ;;  %vm807_vm0 = vcmp.eq.s32.totalorder %v805_v39, 1  ;;  %vm806_vm1 = vcmp.eq.s32.totalorder %v805_v39, 0 }
 0x12a   : > { %v786_v55 = vadd.f32 %v785_v50, %v771_v48  ;;  %v750_v56 = vadd.f32 %v749_v51, %v719_v45  ;;  %738 = vst [vmem:[%s1408_s2 + $0x40] sm:$0xff] %v722_v54 }
 0x12b   : > { %739 = vst [vmem:[%s1408_s2 + $0x48] sm:$0xff] %v723_v58 }
 0x12c   : > { %v787_v60 = vadd.f32 %v786_v55, %v772_v52  ;;  %v751_v61 = vadd.f32 %v750_v56, %v720_v49  ;;  %740 = vst [vmem:[%s1408_s2 + $0x50] sm:$0xff] %v724_v59 }
 0x12d   : > { %741 = vst [vmem:[%s1408_s2 + $0x58] sm:$0xff] %v725_v63 }
 0x12e   : > { %v788_v1 = vadd.f32 %v787_v60, %v773_v57  ;;  %v752_v2 = vadd.f32 %v751_v61, %v721_v53  ;;  %742 = vst [vmem:[%s1408_s2 + $0x60] sm:$0xff] %v726_v0 }
 0x12f   : > { %743 = vst [vmem:[%s1408_s2 + $0x68] sm:$0xff] %v727_v4 }
 0x130   : > { %v789_v6 = vadd.f32 %v788_v1, %v774_v62  ;;  %v753_v7 = vadd.f32 %v752_v2, %v722_v54  ;;  %744 = vst [vmem:[%s1408_s2 + $0x70] sm:$0xff] %v728_v5 }
 0x131   : > { %745 = vst [vmem:[%s1408_s2 + $0x78] sm:$0xff] %v729_v9 }
 0x132   : > { %v790_v10 = vadd.f32 %v789_v6, %v775_v3  ;;  %v754_v11 = vadd.f32 %v753_v7, %v723_v58 }
 0x134   : > { %v791_v13 = vadd.f32 %v790_v10, %v776_v8  ;;  %v755_v14 = vadd.f32 %v754_v11, %v724_v59 }
 0x136   : > { %v792_v16 = vadd.f32 %v791_v13, %v777_v12  ;;  %v756_v17 = vadd.f32 %v755_v14, %v725_v63 }
 0x138   : > { %v793_v19 = vadd.f32 %v792_v16, %v778_v15  ;;  %v757_v20 = vadd.f32 %v756_v17, %v726_v0 }
 0x13a   : > { %v794_v22 = vadd.f32 %v793_v19, %v779_v18  ;;  %v758_v23 = vadd.f32 %v757_v20, %v727_v4 }
 0x13c   : > { %v795_v25 = vadd.f32 %v794_v22, %v780_v21  ;;  %v759_v26 = vadd.f32 %v758_v23, %v728_v5 }
 0x13e   : > { %v796_v28 = vadd.f32 %v795_v25, %v781_v24  ;;  %v760_v29 = vadd.f32 %v759_v26, %v729_v9 }
 0x140   : > { %v761_v30 = vrot.slane %v760_v29, 4  ;;  %v797_v31 = vadd.f32 %v796_v28, %v782_v27 }
 0x142   : > { %v762_v32 = vadd.f32 %v761_v30, %v760_v29  ;;  %v798_v33 = vrot.slane %v797_v31, 4 }
 0x144   : > { %v763_v35 = vrot.slane %v762_v32, 2  ;;  %v799_v36 = vadd.f32 %v798_v33, %v797_v31 }
 0x146   : > { %v764_v37 = vadd.f32 %v763_v35, %v762_v32  ;;  %v800_v38 = vrot.slane %v799_v36, 2 }
 0x148   : > { %v765_v40 = vrot.slane %v764_v37, 1  ;;  %v801_v41 = vadd.f32 %v800_v38, %v799_v36 }
 0x14a   : > { %v802_v42 = vrot.slane %v801_v41, 1  ;;  %v766_v43 = vadd.f32 %v765_v40, %v764_v37 }
 0x14c   : > { %v803_v44 = vadd.f32 %v802_v42, %v801_v41 }
 0x14e   : > { %v808_v45 = vsel %vm807_vm0, %v803_v44, 0.0 }
 0x14f   : > { %v809_v46 = vsel %vm806_vm1, %v766_v43, %v808_v45 }
 0x150   : > { %810 = vst [vmem:[%s1409_s3] sm:$0xff] %v809_v46 }
 0x151 PF: > { %s14_s16 = sadd.s32 1, %s1195_s16   ;;  %s1410_s12 = smov %s1183_s13 }
 0x152   : > { %p11_p12 = scmp.ge.s32.totalorder %s14_s16, 7   ;;  %s1411_s13 = smov %s1253_s20 }
 0x153   : > { %s1412_s14 = smov %s1191_s15  ;;  %s1413_s15 = smov %s1415_s17 }
 0x154   :  { %13 = sbr.rel (!%p11_p12) target bundleno = 3 (0x3), region = 124 }

// kernel: resnet_backbone_forward.56
= control target key start
LH: loop header
LB: loop body
LE: loop exit
PB: predicated region body
PF: predicated region fallthrough
CT: control target
= control target key end

     0   :  { %s94_s0 = inlined_call_operand.vmem [shape: f32[32,128], index: 0, kind: input, shape index: {}]   ;;  %s95_s1 = inlined_call_operand.vmem [shape: f32[1,128], index: 1, kind: input, shape index: {}]   ;;  %s96_s2 = inlined_call_operand.vmem [shape: f32[1,128], index: 2, kind: input, shape index: {}]   ;;  %s97_s3 = inlined_call_operand.vmem [shape: f32[32,128], index: 3, kind: output, shape index: {}]  }
   0x1   :  { %v14_v0 = vld [vmem:[%s94_s0] sm:$0xff]  ;;  %v15_v3 = vld [vmem:[%s94_s0 + $0x8] sm:$0xff]  ;;  %v16_v6 = vld [vmem:[%s94_s0 + $0x10] sm:$0xff] }
   0x2   :  { %v42_v1 = vld [vmem:[%s95_s1] ss:$0 sm:$0xff]  ;;  %v17_v7 = vld [vmem:[%s94_s0 + $0x18] sm:$0xff] }
   0x3   :  { %v43_v2 = vld [vmem:[%s96_s2] ss:$0 sm:$0xff]  ;;  %v22_v4 = vmul.f32 %v42_v1, %v14_v0  ;;  %v23_v5 = vmul.f32 %v42_v1, %v15_v3  ;;  %v24_v8 = vmul.f32 %v42_v1, %v16_v6  ;;  %v25_v9 = vmul.f32 %v42_v1, %v17_v7 }
   0x5   :  { %v30_v10 = vadd.f32 %v43_v2, %v22_v4  ;;  %v31_v11 = vadd.f32 %v43_v2, %v23_v5  ;;  %v32_v12 = vadd.f32 %v43_v2, %v24_v8  ;;  %v33_v13 = vadd.f32 %v43_v2, %v25_v9 }
   0x7   :  { %34 = vst [vmem:[%s97_s3] sm:$0xff] %v30_v10 }
   0x8   :  { %35 = vst [vmem:[%s97_s3 + $0x8] sm:$0xff] %v31_v11 }
   0x9   :  { %36 = vst [vmem:[%s97_s3 + $0x10] sm:$0xff] %v32_v12 }
   0xa   :  { %37 = vst [vmem:[%s97_s3 + $0x18] sm:$0xff] %v33_v13 }

// kernel: resnet_backbone_forward.55
= control target key start
LH: loop header
LB: loop body
LE: loop exit
PB: predicated region body
PF: predicated region fallthrough
CT: control target
= control target key end

     0   :  { %v256_v53 = vlaneseq  ;;  %s494_s1 = inlined_call_operand.vmem [shape: bf16[256,128], index: 1, kind: input, shape index: {}]   ;;  %s495_s0 = inlined_call_operand.vmem [shape: bf16[32,256], index: 0, kind: input, shape index: {}]   ;;  %s496_s2 = inlined_call_operand.vmem [shape: f32[32,128], index: 2, kind: output, shape index: {0}]   ;;  %s497_s3 = inlined_call_operand.vmem [shape: f32[8,128], index: 3, kind: output, shape index: {1}]  }
   0x1   :  { %v362_v0 = vld [vmem:[%s494_s1 + $0x38] sm:$0xff]  ;;  %v361_v2 = vld [vmem:[%s494_s1 + $0x30] sm:$0xff]  ;;  %v360_v4 = vld [vmem:[%s494_s1 + $0x28] sm:$0xff] }
   0x2   :  { %v370_v1 = vld [vmem:[%s494_s1 + $0x78] sm:$0xff]  ;;  %177 = vmatpush.bf16.msra.mxu0 %v362_v0  ;;  %371 = vmatpush.bf16.msra.mxu2 %v362_v0  ;;  %v369_v3 = vld [vmem:[%s494_s1 + $0x70] sm:$0xff]  ;;  %v368_v5 = vld [vmem:[%s494_s1 + $0x68] sm:$0xff]  ;;  %v257_v58 = vshrl.u32 %v256_v53, 7 }
   0x3   :  { %196 = vmatpush.bf16.msra.mxu1 %v370_v1  ;;  %379 = vmatpush.bf16.msra.mxu3 %v370_v1  ;;  %v359_v6 = vld [vmem:[%s494_s1 + $0x20] sm:$0xff]  ;;  %v358_v8 = vld [vmem:[%s494_s1 + $0x18] sm:$0xff]  ;;  %v357_v10 = vld [vmem:[%s494_s1 + $0x10] sm:$0xff] }
   0x4   :  { %v367_v7 = vld [vmem:[%s494_s1 + $0x60] sm:$0xff]  ;;  %v366_v9 = vld [vmem:[%s494_s1 + $0x58] sm:$0xff]  ;;  %v365_v11 = vld [vmem:[%s494_s1 + $0x50] sm:$0xff]  ;;  %vm259_vm0 = vcmp.eq.s32.totalorder %v257_v58, 1  ;;  %vm258_vm1 = vcmp.eq.s32.totalorder %v257_v58, 0 }
   0x5   :  { %v356_v12 = vld [vmem:[%s494_s1 + $0x8] sm:$0xff]  ;;  %v355_v14 = vld [vmem:[%s494_s1] sm:$0xff]  ;;  %v281_v18 = vld [vmem:[%s495_s0 + $0x10] sm:$0xf] }
   0x6   :  { %178 = vmatpush.bf16.msra.mxu0 %v361_v2  ;;  %372 = vmatpush.bf16.msra.mxu2 %v361_v2  ;;  %v364_v13 = vld [vmem:[%s494_s1 + $0x48] sm:$0xff]  ;;  %v363_v15 = vld [vmem:[%s494_s1 + $0x40] sm:$0xff]  ;;  %v354_v19 = vld [vmem:[%s495_s0 + $0x14] sm:$0xf0] }
   0x7   :  { %197 = vmatpush.bf16.msra.mxu1 %v369_v3  ;;  %380 = vmatpush.bf16.msra.mxu3 %v369_v3  ;;  %v273_v16 = vld [vmem:[%s495_s0] sm:$0xf]  ;;  %v352_v17 = vld [vmem:[%s495_s0 + $0x4] sm:$0xf0]  ;;  %v351_v20 = vld [vmem:[%s495_s0 + $0x4] sm:$0xf]  ;;  %v282_v25 = vor.u32 %v354_v19, %v281_v18 }
   0x8   :  { %v275_v21 = vld [vmem:[%s495_s0 + $0x8] sm:$0xf0]  ;;  %v353_v22 = vld [vmem:[%s495_s0 + $0x14] sm:$0xf]  ;;  %v283_v23 = vld [vmem:[%s495_s0 + $0x18] sm:$0xf0]  ;;  %v274_v24 = vor.u32 %v352_v17, %v273_v16 }
   0x9   :  { %v278_v26 = vor.u32 %v351_v20, %v275_v21  ;;  %v286_v27 = vor.u32 %v353_v22, %v283_v23 }
   0xa   :  { %179 = vmatpush.bf16.msra.mxu0 %v360_v4  ;;  %373 = vmatpush.bf16.msra.mxu2 %v360_v4 }
   0xb   :  { %198 = vmatpush.bf16.msra.mxu1 %v368_v5  ;;  %381 = vmatpush.bf16.msra.mxu3 %v368_v5 }
   0xe   :  { %180 = vmatpush.bf16.msra.mxu0 %v359_v6  ;;  %374 = vmatpush.bf16.msra.mxu2 %v359_v6 }
   0xf   :  { %199 = vmatpush.bf16.msra.mxu1 %v367_v7  ;;  %382 = vmatpush.bf16.msra.mxu3 %v367_v7 }
  0x12   :  { %181 = vmatpush.bf16.msra.mxu0 %v358_v8  ;;  %375 = vmatpush.bf16.msra.mxu2 %v358_v8 }
  0x13   :  { %200 = vmatpush.bf16.msra.mxu1 %v366_v9  ;;  %383 = vmatpush.bf16.msra.mxu3 %v366_v9 }
  0x16   :  { %182 = vmatpush.bf16.msra.mxu0 %v357_v10  ;;  %376 = vmatpush.bf16.msra.mxu2 %v357_v10 }
  0x17   :  { %201 = vmatpush.bf16.msra.mxu1 %v365_v11  ;;  %384 = vmatpush.bf16.msra.mxu3 %v365_v11 }
  0x1a   :  { %183 = vmatpush.bf16.msra.mxu0 %v356_v12  ;;  %377 = vmatpush.bf16.msra.mxu2 %v356_v12 }
  0x1b   :  { %202 = vmatpush.bf16.msra.mxu1 %v364_v13  ;;  %385 = vmatpush.bf16.msra.mxu3 %v364_v13 }
  0x1e   :  { %184 = vmatpush.bf16.msra.mxu0 %v355_v14  ;;  %378 = vmatpush.bf16.msra.mxu2 %v355_v14 }
  0x1f   :  { %203 = vmatpush.bf16.msra.mxu1 %v363_v15  ;;  %386 = vmatpush.bf16.msra.mxu3 %v363_v15 }
  0x21   :  { %185 = vmatmul.bf16.vlgmr.msra.gmra.mxu0 %v274_v24  ;;  %190 = vmatmul.bf16.vlgmr.msra.gmra.mxu2 %v282_v25 }
  0x22   :  { %204 = vmatmul.bf16.vlgmr.msra.gmra.mxu1 %v278_v26  ;;  %209 = vmatmul.bf16.vlgmr.msra.gmra.mxu3 %v286_v27 }
  0x9e   :  { %v186_v28 = vpop.f32.mrf.mxu0 }
  0x9f   :  { %v205_v29 = vpop.f32.mrf.mxu1 }
  0xa0   :  { %v206_v30 = vadd.f32 %v205_v29, %v186_v28 }
  0xa2   :  { %230 = vst [vmem:[%s496_s2] sm:$0xff] %v206_v30  ;;  %v243_v37 = vmul.f32 %v206_v30, %v206_v30 }
  0xa4   :  { %v191_v31 = vpop.f32.mrf.mxu2 }
  0xa5   :  { %v210_v32 = vpop.f32.mrf.mxu3 }
  0xa6   :  { %v211_v33 = vadd.f32 %v210_v32, %v191_v31  ;;  %v188_v34 = vpop.f32.mrf.mxu0 }
  0xa7   :  { %v207_v35 = vpop.f32.mrf.mxu1 }
  0xa8   :  { %232 = vst [vmem:[%s496_s2 + $0x10] sm:$0xff] %v211_v33  ;;  %v208_v36 = vadd.f32 %v207_v35, %v188_v34  ;;  %v245_v43 = vmul.f32 %v211_v33, %v211_v33 }
  0xaa   :  { %231 = vst [vmem:[%s496_s2 + $0x8] sm:$0xff] %v208_v36  ;;  %v234_v38 = vadd.f32 %v208_v36, %v206_v30  ;;  %v244_v39 = vmul.f32 %v208_v36, %v208_v36 }
  0xac   :  { %v247_v40 = vadd.f32 %v244_v39, %v243_v37  ;;  %v193_v41 = vpop.f32.mrf.mxu2  ;;  %v235_v45 = vadd.f32 %v234_v38, %v211_v33 }
  0xad   :  { %v212_v42 = vpop.f32.mrf.mxu3 }
  0xae   :  { %v213_v44 = vadd.f32 %v212_v42, %v193_v41  ;;  %v248_v48 = vadd.f32 %v247_v40, %v245_v43 }
  0xb0   :  { %233 = vst [vmem:[%s496_s2 + $0x18] sm:$0xff] %v213_v44  ;;  %v236_v46 = vadd.f32 %v235_v45, %v213_v44  ;;  %v246_v47 = vmul.f32 %v213_v44, %v213_v44 }
  0xb2   :  { %v237_v49 = vrot.slane %v236_v46, 4  ;;  %v249_v50 = vadd.f32 %v248_v48, %v246_v47 }
  0xb4   :  { %v238_v51 = vadd.f32 %v237_v49, %v236_v46  ;;  %v250_v52 = vrot.slane %v249_v50, 4 }
  0xb6   :  { %v239_v54 = vrot.slane %v238_v51, 2  ;;  %v251_v55 = vadd.f32 %v250_v52, %v249_v50 }
  0xb8   :  { %v240_v56 = vadd.f32 %v239_v54, %v238_v51  ;;  %v252_v57 = vrot.slane %v251_v55, 2 }
  0xba   :  { %v253_v59 = vadd.f32 %v252_v57, %v251_v55  ;;  %v241_v60 = vrot.slane %v240_v56, 1 }
  0xbc   :  { %v254_v61 = vrot.slane %v253_v59, 1  ;;  %v242_v63 = vadd.f32 %v241_v60, %v240_v56 }
  0xbe   :  { %v255_v62 = vadd.f32 %v254_v61, %v253_v59 }
  0xc0   :  { %v260_v0 = vsel %vm259_vm0, %v255_v62, 0.0 }
  0xc1   :  { %v261_v1 = vsel %vm258_vm1, %v242_v63, %v260_v0 }
  0xc2   :  { %262 = vst [vmem:[%s497_s3] sm:$0xff] %v261_v1 }

// kernel: resnet_backbone_forward.54
= control target key start
LH: loop header
LB: loop body
LE: loop exit
PB: predicated region body
PF: predicated region fallthrough
CT: control target
= control target key end

     0   :  { %s98_s0 = inlined_call_operand.vmem [shape: f32[32,128], index: 0, kind: input, shape index: {}]   ;;  %s99_s1 = inlined_call_operand.vmem [shape: f32[1,128], index: 1, kind: input, shape index: {}]   ;;  %s100_s2 = inlined_call_operand.vmem [shape: f32[1,128], index: 2, kind: input, shape index: {}]   ;;  %s101_s3 = inlined_call_operand.vmem [shape: f32[32,128], index: 3, kind: output, shape index: {}]  }
   0x1   :  { %v14_v0 = vld [vmem:[%s98_s0] sm:$0xff]  ;;  %v15_v3 = vld [vmem:[%s98_s0 + $0x8] sm:$0xff]  ;;  %v16_v6 = vld [vmem:[%s98_s0 + $0x10] sm:$0xff] }
   0x2   :  { %v46_v1 = vld [vmem:[%s99_s1] ss:$0 sm:$0xff]  ;;  %v17_v7 = vld [vmem:[%s98_s0 + $0x18] sm:$0xff] }
   0x3   :  { %v47_v2 = vld [vmem:[%s100_s2] ss:$0 sm:$0xff]  ;;  %v22_v4 = vmul.f32 %v46_v1, %v14_v0  ;;  %v23_v5 = vmul.f32 %v46_v1, %v15_v3  ;;  %v24_v8 = vmul.f32 %v46_v1, %v16_v6  ;;  %v25_v9 = vmul.f32 %v46_v1, %v17_v7 }
   0x5   :  { %v30_v10 = vadd.f32 %v47_v2, %v22_v4  ;;  %v31_v11 = vadd.f32 %v47_v2, %v23_v5  ;;  %v32_v12 = vadd.f32 %v47_v2, %v24_v8  ;;  %v33_v13 = vadd.f32 %v47_v2, %v25_v9 }
   0x7   :  { %v34_v14 = vmax.f32 %v30_v10, 0.0  ;;  %v35_v15 = vmax.f32 %v31_v11, 0.0  ;;  %v36_v16 = vmax.f32 %v32_v12, 0.0  ;;  %v37_v17 = vmax.f32 %v33_v13, 0.0 }
   0x9   :  { %38 = vst [vmem:[%s101_s3] sm:$0xff] %v34_v14 }
   0xa   :  { %39 = vst [vmem:[%s101_s3 + $0x8] sm:$0xff] %v35_v15 }
   0xb   :  { %40 = vst [vmem:[%s101_s3 + $0x10] sm:$0xff] %v36_v16 }
   0xc   :  { %41 = vst [vmem:[%s101_s3 + $0x18] sm:$0xff] %v37_v17 }

// kernel: resnet_backbone_forward.53
= control target key start
LH: loop header
LB: loop body
LE: loop exit
PB: predicated region body
PF: predicated region fallthrough
CT: control target
= control target key end

     0   :  { %s870_s12 = smov 0   ;;  %s872_s13 = smov 0   ;;  %s980_s0 = inlined_call_operand.vmem [shape: bf16[32,1280], index: 0, kind: input, shape index: {}]   ;;  %s981_s1 = inlined_call_operand.vmem [shape: bf16[1280,128], index: 1, kind: input, shape index: {}]   ;;  %s982_s2 = inlined_call_operand.vmem [shape: f32[32,128], index: 2, kind: output, shape index: {0}]   ;;  %s983_s3 = inlined_call_operand.vmem [shape: f32[8,128], index: 3, kind: output, shape index: {1}]  }
   0x1   :  { %s874_s14 = smov 0   ;;  %s876_s15 = smov 0  }
   0x2   :  { %s878_s16 = smov 0  }
   0x3 LB: > { %s23_s17 = sadd.s32 1, %s843_s15  ;;  %p42_p1 = scmp.ne.s32.totalorder %s835_s13, %s831_s12  ;;  %s847_s16 = sphi %s878_s16, %s14_s16   ;;  %s843_s15 = sphi %s876_s15, %s987_s15   ;;  %s839_s14 = sphi %s874_s14, %s986_s14   ;;  %s835_s13 = sphi %s872_s13, %s985_s13   ;;  %s831_s12 = sphi %s870_s12, %s984_s12  }
   0x4   : > { %p24_p0 = scmp.ge.s32.totalorder %s23_s17, 5  ;;  %p43_p2 = scmp.eq.s32.totalorder %s847_s16, 0 }
   0x5   : > { %s35_s19 = sadd.s32 1, %s835_s13  ;;  %p636_p5 = scmp.ge.s32.totalorder %s847_s16, 5 }
   0x6   : > { %s989_s17 = smov (%p24_p0, %s23_s17), 0  ;;  %p44_p3 = por %p43_p2, %p42_p1 }
   0x7   : > { %s31_s18 = ssub.s32 %s843_s15, %s989_s17  ;;  %146 = sbr.rel (%p636_p5) target bundleno = 20 (0x14), region = 16 }
   0x8   : > { %p33_p4 = scmp.eq.s32.totalorder %s31_s18, 0 }
   0xa   : > { %s905_s20 = scalar_select %p33_p4, %s835_s13, %s35_s19  }
   0xc   : > { %149 = sbr.rel (!%p44_p3) target bundleno = 20 (0x14), region = 20  ;;  %s151_s21 = sand.u32 (%p44_p3), 1, %s835_s13  }
   0xd   : > { %s731_s22 = sshll.u32 (%p44_p3), %s843_s15, 3  ;;  %s637_s23 = sshll.u32 (%p44_p3), %s151_s21, 5 }
   0xe   : > { %s159_s26 = scalar_lea.vmem (%p44_p3), %s980_s0, %s731_s22  ;;  %s153_s27 = scalar_lea.vmem (%p44_p3), [#allocation3], %s637_s23 }
   0xf   : > { %v194_v0 = vld [vmem:[%s159_s26] sm:$0xff] (%p44_p3)  ;;  %v196_v1 = vld [vmem:[%s159_s26 + $0x28] sm:$0xff] (%p44_p3)  ;;  %v198_v2 = vld [vmem:[%s159_s26 + $0x50] sm:$0xff] (%p44_p3) }
  0x10   : > { %195 = vst [vmem:[%s153_s27] sm:$0xff] (%p44_p3), %v194_v0  ;;  %v200_v3 = vld [vmem:[%s159_s26 + $0x78] sm:$0xff] (%p44_p3) }
  0x11   : > { %197 = vst [vmem:[%s153_s27 + $0x8] sm:$0xff] %v196_v1 }
  0x12   : > { %199 = vst [vmem:[%s153_s27 + $0x10] sm:$0xff] %v198_v2 }
  0x13   : > { %201 = vst [vmem:[%s153_s27 + $0x18] sm:$0xff] %v200_v3 }
  0x14 PF: > { %p640_p6 = scmp.ge.s32.totalorder %s847_s16, 1  ;;  %p215_p7 = scmp.lt.s32.totalorder %s847_s16, 6 }
  0x16   : > { %p216_p8 = pnand %p640_p6, %p215_p7 }
  0x17   : > { %s222_s28 = sand.u32 (!%p216_p8), 1, %s831_s12   ;;  %s642_s29 = sshll.u32 (!%p216_p8), %s839_s14, 5 }
  0x18   : > { %219 = sbr.rel (%p216_p8) target bundleno = 243 (0xf3), region = 62  ;;  %s641_s30 = sshll.u32 (!%p216_p8), %s222_s28, 5 }
  0x19   : > { %p257_p9 = scmp.lt.s32.totalorder (!%p216_p8), %s642_s29, 159  ;;  %s922_s8 = scalar_lea.vmem (!%p216_p8), [#allocation3], %s641_s30 }
  0x1a   : > { %p644_p10 = scmp.ne.s32.totalorder (!%p216_p8), %s839_s14, 0 }
  0x1d   : > { %s991_s29 = smov (!%p257_p9, %s642_s29), 159  ;;  %275 = sbr.rel (%p644_p10) target bundleno = 39 (0x27), region = 70 }
  0x1e   : > { %s643_s4 = sshll.u32 %s991_s29, 2 }
  0x1f   : > { %s920_s7 = scalar_lea.vmem %s981_s1, %s643_s4 }
  0x22   : > { %v849_v4 = vmov 0.0  }
  0x23   : > { %276 = vst [vmem:[#allocation2 + $0x10] sm:$0xff] %v849_v4 }
  0x24   : > { %277 = vst [vmem:[#allocation2] sm:$0xff] %v849_v4 }
  0x25   : > { %278 = vst [vmem:[#allocation2 + $0x18] sm:$0xff] %v849_v4 }
  0x26   : > { %279 = vst [vmem:[#allocation2 + $0x8] sm:$0xff] %v849_v4 }
  0x27 PF: > { %v743_v5 = vld [vmem:[%s920_s7 + $0x38] sm:$0xff]  ;;  %v742_v7 = vld [vmem:[%s920_s7 + $0x30] sm:$0xff]  ;;  %v741_v9 = vld [vmem:[%s920_s7 + $0x28] sm:$0xff]  ;;  %p725_p11 = scmp.ne.s32.totalorder %s839_s14, 4 }
  0x28   : > { %v751_v6 = vld [vmem:[%s920_s7 + $0x78] sm:$0xff]  ;;  %436 = vmatpush.bf16.msra.mxu0 %v743_v5  ;;  %752 = vmatpush.bf16.msra.mxu2 %v743_v5  ;;  %v750_v8 = vld [vmem:[%s920_s7 + $0x70] sm:$0xff]  ;;  %v749_v10 = vld [vmem:[%s920_s7 + $0x68] sm:$0xff] }
  0x29   : > { %455 = vmatpush.bf16.msra.mxu1 %v751_v6  ;;  %760 = vmatpush.bf16.msra.mxu3 %v751_v6  ;;  %v740_v11 = vld [vmem:[%s920_s7 + $0x20] sm:$0xff]  ;;  %v739_v13 = vld [vmem:[%s920_s7 + $0x18] sm:$0xff]  ;;  %v738_v15 = vld [vmem:[%s920_s7 + $0x10] sm:$0xff] }
  0x2a   : > { %v748_v12 = vld [vmem:[%s920_s7 + $0x60] sm:$0xff]  ;;  %v747_v14 = vld [vmem:[%s920_s7 + $0x58] sm:$0xff]  ;;  %v746_v16 = vld [vmem:[%s920_s7 + $0x50] sm:$0xff] }
  0x2b   : > { %v737_v17 = vld [vmem:[%s920_s7 + $0x8] sm:$0xff]  ;;  %v736_v19 = vld [vmem:[%s920_s7] sm:$0xff]  ;;  %v655_v23 = vld [vmem:[%s922_s8 + $0x10] sm:$0xf] }
  0x2c   : > { %437 = vmatpush.bf16.msra.mxu0 %v742_v7  ;;  %753 = vmatpush.bf16.msra.mxu2 %v742_v7  ;;  %v745_v18 = vld [vmem:[%s920_s7 + $0x48] sm:$0xff]  ;;  %v744_v20 = vld [vmem:[%s920_s7 + $0x40] sm:$0xff]  ;;  %v735_v24 = vld [vmem:[%s922_s8 + $0x14] sm:$0xf0] }
  0x2d   : > { %456 = vmatpush.bf16.msra.mxu1 %v750_v8  ;;  %761 = vmatpush.bf16.msra.mxu3 %v750_v8  ;;  %v647_v21 = vld [vmem:[%s922_s8] sm:$0xf]  ;;  %v733_v22 = vld [vmem:[%s922_s8 + $0x4] sm:$0xf0]  ;;  %v732_v25 = vld [vmem:[%s922_s8 + $0x4] sm:$0xf]  ;;  %v656_v30 = vor.u32 %v735_v24, %v655_v23 }
  0x2e   : > { %v649_v26 = vld [vmem:[%s922_s8 + $0x8] sm:$0xf0]  ;;  %v734_v27 = vld [vmem:[%s922_s8 + $0x14] sm:$0xf]  ;;  %v657_v28 = vld [vmem:[%s922_s8 + $0x18] sm:$0xf0]  ;;  %v648_v29 = vor.u32 %v733_v22, %v647_v21 }
  0x2f   : > { %v652_v31 = vor.u32 %v732_v25, %v649_v26  ;;  %v660_v32 = vor.u32 %v734_v27, %v657_v28  ;;  %v280_v34 = vld [vmem:[#allocation2 + $0x10] sm:$0xff]  ;;  %v282_v39 = vld [vmem:[#allocation2 + $0x18] sm:$0xff]  ;;  %v281_v43 = vld [vmem:[#allocation2] sm:$0xff] }
  0x30   : > { %438 = vmatpush.bf16.msra.mxu0 %v741_v9  ;;  %754 = vmatpush.bf16.msra.mxu2 %v741_v9  ;;  %v283_v49 = vld [vmem:[#allocation2 + $0x8] sm:$0xff] }
  0x31   : > { %457 = vmatpush.bf16.msra.mxu1 %v749_v10  ;;  %762 = vmatpush.bf16.msra.mxu3 %v749_v10 }
  0x34   : > { %439 = vmatpush.bf16.msra.mxu0 %v740_v11  ;;  %755 = vmatpush.bf16.msra.mxu2 %v740_v11 }
  0x35   : > { %458 = vmatpush.bf16.msra.mxu1 %v748_v12  ;;  %763 = vmatpush.bf16.msra.mxu3 %v748_v12 }
  0x38   : > { %440 = vmatpush.bf16.msra.mxu0 %v739_v13  ;;  %756 = vmatpush.bf16.msra.mxu2 %v739_v13 }
  0x39   : > { %459 = vmatpush.bf16.msra.mxu1 %v747_v14  ;;  %764 = vmatpush.bf16.msra.mxu3 %v747_v14 }
  0x3c   : > { %441 = vmatpush.bf16.msra.mxu0 %v738_v15  ;;  %757 = vmatpush.bf16.msra.mxu2 %v738_v15 }
  0x3d   : > { %460 = vmatpush.bf16.msra.mxu1 %v746_v16  ;;  %765 = vmatpush.bf16.msra.mxu3 %v746_v16 }
  0x40   : > { %442 = vmatpush.bf16.msra.mxu0 %v737_v17  ;;  %758 = vmatpush.bf16.msra.mxu2 %v737_v17 }
  0x41   : > { %461 = vmatpush.bf16.msra.mxu1 %v745_v18  ;;  %766 = vmatpush.bf16.msra.mxu3 %v745_v18 }
  0x44   : > { %443 = vmatpush.bf16.msra.mxu0 %v736_v19  ;;  %759 = vmatpush.bf16.msra.mxu2 %v736_v19 }
  0x45   : > { %462 = vmatpush.bf16.msra.mxu1 %v744_v20  ;;  %767 = vmatpush.bf16.msra.mxu3 %v744_v20 }
  0x47   : > { %444 = vmatmul.bf16.vlgmr.msra.gmra.mxu0 %v648_v29  ;;  %449 = vmatmul.bf16.vlgmr.msra.gmra.mxu2 %v656_v30 }
  0x48   : > { %463 = vmatmul.bf16.vlgmr.msra.gmra.mxu1 %v652_v31  ;;  %468 = vmatmul.bf16.vlgmr.msra.gmra.mxu3 %v660_v32 }
  0xc4   : > { %v445_v33 = vpop.f32.mrf.mxu0 }
  0xc5   : > { %v464_v35 = vpop.f32.mrf.mxu1 }
  0xc6   : > { %v465_v36 = vadd.f32 %v464_v35, %v445_v33 }
  0xc8   : > { %v474_v37 = vadd.f32 %v465_v36, %v280_v34 }
  0xca   : > { %478 = vst [vmem:[#allocation2 + $0x10] sm:$0xff] %v474_v37  ;;  %v450_v38 = vpop.f32.mrf.mxu2 }
  0xcb   : > { %v469_v40 = vpop.f32.mrf.mxu3 }
  0xcc   : > { %v470_v41 = vadd.f32 %v469_v40, %v450_v38  ;;  %v447_v42 = vpop.f32.mrf.mxu0 }
  0xcd   : > { %v466_v44 = vpop.f32.mrf.mxu1 }
  0xce   : > { %v476_v45 = vadd.f32 %v470_v41, %v282_v39  ;;  %v467_v46 = vadd.f32 %v466_v44, %v447_v42 }
  0xd0   : > { %480 = vst [vmem:[#allocation2 + $0x18] sm:$0xff] %v476_v45  ;;  %v475_v47 = vadd.f32 %v467_v46, %v281_v43 }
  0xd2   : > { %479 = vst [vmem:[#allocation2] sm:$0xff] %v475_v47  ;;  %v452_v48 = vpop.f32.mrf.mxu2 }
  0xd3   : > { %v471_v50 = vpop.f32.mrf.mxu3 }
  0xd4   : > { %v472_v51 = vadd.f32 %v471_v50, %v452_v48  ;;  %485 = sbr.rel (%p725_p11) target bundleno = 243 (0xf3), region = 74 }
  0xd6   : > { %v477_v52 = vadd.f32 %v472_v51, %v283_v49 }
  0xd8   : > { %481 = vst [vmem:[#allocation2 + $0x8] sm:$0xff] %v477_v52 }
  0xd9   : > { %v486_v53 = vld [vmem:[#allocation2 + $0x10] sm:$0xff]  ;;  %v487_v54 = vld [vmem:[#allocation2] sm:$0xff]  ;;  %v488_v55 = vld [vmem:[#allocation2 + $0x18] sm:$0xff]  ;;  %v516_v6 = vlaneseq }
  0xda   : > { %490 = vst [vmem:[%s982_s2] sm:$0xff] %v486_v53  ;;  %v503_v56 = vmul.f32 %v486_v53, %v486_v53  ;;  %v494_v57 = vadd.f32 %v487_v54, %v486_v53  ;;  %v504_v58 = vmul.f32 %v487_v54, %v487_v54  ;;  %v505_v59 = vmul.f32 %v488_v55, %v488_v55 }
  0xdb   : > { %491 = vst [vmem:[%s982_s2 + $0x8] sm:$0xff] %v487_v54  ;;  %v517_v11 = vshrl.u32 %v516_v6, 7 }
  0xdc   : > { %v507_v61 = vadd.f32 %v504_v58, %v503_v56  ;;  %492 = vst [vmem:[%s982_s2 + $0x10] sm:$0xff] %v488_v55  ;;  %v495_v62 = vadd.f32 %v494_v57, %v488_v55 }
  0xdd   : > { %vm519_vm0 = vcmp.eq.s32.totalorder %v517_v11, 1  ;;  %vm518_vm1 = vcmp.eq.s32.totalorder %v517_v11, 0 }
  0xde   : > { %v508_v0 = vadd.f32 %v507_v61, %v505_v59 }
  0xdf   : > { %v489_v60 = vld [vmem:[#allocation2 + $0x8] sm:$0xff] }
  0xe0   : > { %v506_v63 = vmul.f32 %v489_v60, %v489_v60  ;;  %493 = vst [vmem:[%s982_s2 + $0x18] sm:$0xff] %v489_v60  ;;  %v496_v1 = vadd.f32 %v495_v62, %v489_v60 }
  0xe2   : > { %v497_v2 = vrot.slane %v496_v1, 4  ;;  %v509_v3 = vadd.f32 %v508_v0, %v506_v63 }
  0xe4   : > { %v498_v4 = vadd.f32 %v497_v2, %v496_v1  ;;  %v510_v5 = vrot.slane %v509_v3, 4 }
  0xe6   : > { %v499_v7 = vrot.slane %v498_v4, 2  ;;  %v511_v8 = vadd.f32 %v510_v5, %v509_v3 }
  0xe8   : > { %v500_v9 = vadd.f32 %v499_v7, %v498_v4  ;;  %v512_v10 = vrot.slane %v511_v8, 2 }
  0xea   : > { %v501_v12 = vrot.slane %v500_v9, 1  ;;  %v513_v13 = vadd.f32 %v512_v10, %v511_v8 }
  0xec   : > { %v514_v14 = vrot.slane %v513_v13, 1  ;;  %v502_v15 = vadd.f32 %v501_v12, %v500_v9 }
  0xee   : > { %v515_v16 = vadd.f32 %v514_v14, %v513_v13 }
  0xf0   : > { %v520_v17 = vsel %vm519_vm0, %v515_v16, 0.0 }
  0xf1   : > { %v521_v18 = vsel %vm518_vm1, %v502_v15, %v520_v17 }
  0xf2   : > { %522 = vst [vmem:[%s983_s3] sm:$0xff] %v521_v18 }
  0xf3 PF: > { %s14_s16 = sadd.s32 1, %s847_s16   ;;  %s984_s12 = smov %s835_s13 }
  0xf4   : > { %p11_p12 = scmp.ge.s32.totalorder %s14_s16, 7   ;;  %s985_s13 = smov %s905_s20 }
  0xf5   : > { %s986_s14 = smov %s843_s15  ;;  %s987_s15 = smov %s989_s17 }
  0xf6   :  { %13 = sbr.rel (!%p11_p12) target bundleno = 3 (0x3), region = 124 }

// kernel: resnet_backbone_forward.58
= control target key start
LH: loop header
LB: loop body
LE: loop exit
PB: predicated region body
PF: predicated region fallthrough
CT: control target
= control target key end

     0   :  { %s126_s0 = inlined_call_operand.vmem [shape: f32[32,128], index: 0, kind: input, shape index: {}]   ;;  %s127_s1 = inlined_call_operand.vmem [shape: f32[1,128], index: 1, kind: input, shape index: {}]   ;;  %s128_s2 = inlined_call_operand.vmem [shape: f32[1,128], index: 2, kind: input, shape index: {}]   ;;  %s129_s3 = inlined_call_operand.vmem [shape: f32[32,128], index: 3, kind: input, shape index: {}]   ;;  %s130_s4 = inlined_call_operand.vmem [shape: f32[32,128], index: 4, kind: output, shape index: {}]  }
   0x1   :  { %v17_v0 = vld [vmem:[%s126_s0] sm:$0xff]  ;;  %v18_v4 = vld [vmem:[%s126_s0 + $0x8] sm:$0xff]  ;;  %v19_v5 = vld [vmem:[%s126_s0 + $0x10] sm:$0xff] }
   0x2   :  { %v57_v1 = vld [vmem:[%s127_s1] ss:$0 sm:$0xff]  ;;  %v20_v9 = vld [vmem:[%s126_s0 + $0x18] sm:$0xff]  ;;  %v38_v11 = vld [vmem:[%s129_s3 + $0x8] sm:$0xff] }
   0x3   :  { %v58_v2 = vld [vmem:[%s128_s2] ss:$0 sm:$0xff]  ;;  %v25_v3 = vmul.f32 %v57_v1, %v17_v0  ;;  %v26_v7 = vmul.f32 %v57_v1, %v18_v4  ;;  %v27_v8 = vmul.f32 %v57_v1, %v19_v5  ;;  %v39_v12 = vld [vmem:[%s129_s3 + $0x10] sm:$0xff]  ;;  %v28_v13 = vmul.f32 %v57_v1, %v20_v9  ;;  %v40_v16 = vld [vmem:[%s129_s3 + $0x18] sm:$0xff] }
   0x4   :  { %v37_v6 = vld [vmem:[%s129_s3] sm:$0xff] }
   0x5   :  { %v33_v10 = vadd.f32 %v58_v2, %v25_v3  ;;  %v34_v14 = vadd.f32 %v58_v2, %v26_v7  ;;  %v35_v15 = vadd.f32 %v58_v2, %v27_v8  ;;  %v36_v18 = vadd.f32 %v58_v2, %v28_v13 }
   0x7   :  { %v41_v17 = vadd.f32 %v37_v6, %v33_v10  ;;  %v42_v19 = vadd.f32 %v38_v11, %v34_v14  ;;  %v43_v20 = vadd.f32 %v39_v12, %v35_v15  ;;  %v44_v22 = vadd.f32 %v40_v16, %v36_v18 }
   0x9   :  { %v45_v21 = vmax.f32 %v41_v17, 0.0  ;;  %v46_v23 = vmax.f32 %v42_v19, 0.0  ;;  %v47_v24 = vmax.f32 %v43_v20, 0.0  ;;  %v48_v25 = vmax.f32 %v44_v22, 0.0 }
   0xb   :  { %49 = vst [vmem:[%s130_s4] sm:$0xff] %v45_v21 }
   0xc   :  { %50 = vst [vmem:[%s130_s4 + $0x8] sm:$0xff] %v46_v23 }
   0xd   :  { %51 = vst [vmem:[%s130_s4 + $0x10] sm:$0xff] %v47_v24 }
   0xe   :  { %52 = vst [vmem:[%s130_s4 + $0x18] sm:$0xff] %v48_v25 }

// kernel: resnet_backbone_forward.66
= control target key start
LH: loop header
LB: loop body
LE: loop exit
PB: predicated region body
PF: predicated region fallthrough
CT: control target
= control target key end

     0   :  { %s76_s0 = inlined_call_operand.vmem [shape: f32[8,256], index: 0, kind: input, shape index: {}]   ;;  %s77_s1 = inlined_call_operand.vmem [shape: f32[1,256], index: 1, kind: input, shape index: {}]   ;;  %s78_s2 = inlined_call_operand.vmem [shape: f32[1,256], index: 2, kind: input, shape index: {}]   ;;  %s79_s3 = inlined_call_operand.vmem [shape: f32[8,256], index: 3, kind: output, shape index: {}]  }
   0x1   :  { %v14_v0 = vld [vmem:[%s76_s0] sm:$0xff]  ;;  %v15_v5 = vld [vmem:[%s76_s0 + $0x8] sm:$0xff] }
   0x2   :  { %v16_v1 = vld [vmem:[%s77_s1] sm:$0x3] }
   0x3   :  { %v24_v2 = vld [vmem:[%s78_s2] sm:$0x3]  ;;  %v18_v3 = vperm.slane %v16_v1, 0  ;;  %v19_v6 = vperm.slane %v16_v1, 1 }
   0x4   :  { %v26_v4 = vperm.slane %v24_v2, 0  ;;  %v27_v7 = vperm.slane %v24_v2, 1 }
   0x5   :  { %v22_v8 = vmul.f32 %v18_v3, %v14_v0  ;;  %v23_v9 = vmul.f32 %v19_v6, %v15_v5 }
   0x7   :  { %v30_v10 = vadd.f32 %v26_v4, %v22_v8  ;;  %v31_v11 = vadd.f32 %v27_v7, %v23_v9 }
   0x9   :  { %32 = vst [vmem:[%s79_s3] sm:$0xff] %v30_v10 }
   0xa   :  { %33 = vst [vmem:[%s79_s3 + $0x8] sm:$0xff] %v31_v11 }

// kernel: resnet_backbone_forward.65
= control target key start
LH: loop header
LB: loop body
LE: loop exit
PB: predicated region body
PF: predicated region fallthrough
CT: control target
= control target key end

     0   :  { %s717_s1 = inlined_call_operand.vmem [shape: bf16[256,256], index: 1, kind: input, shape index: {}]   ;;  %s718_s0 = inlined_call_operand.vmem [shape: bf16[8,256], index: 0, kind: input, shape index: {}]   ;;  %s719_s2 = inlined_call_operand.vmem [shape: f32[8,256], index: 2, kind: output, shape index: {0}]   ;;  %s720_s3 = inlined_call_operand.vmem [shape: f32[8,256], index: 3, kind: output, shape index: {1}]  }
   0x1   :  { %v386_v0 = vld [vmem:[%s717_s1 + $0x70] sm:$0xf]  ;;  %v471_v1 = vld [vmem:[%s717_s1 + $0x74] sm:$0xf0]  ;;  %v470_v5 = vld [vmem:[%s717_s1 + $0x74] sm:$0xf] }
   0x2   :  { %v450_v2 = vld [vmem:[%s717_s1 + $0xf0] sm:$0xf]  ;;  %v387_v3 = vor.u32 %v471_v1, %v386_v0  ;;  %v487_v4 = vld [vmem:[%s717_s1 + $0xf4] sm:$0xf0]  ;;  %v388_v6 = vld [vmem:[%s717_s1 + $0x78] sm:$0xf0] }
   0x3   :  { %v451_v7 = vor.u32 %v487_v4, %v450_v2  ;;  %v391_v8 = vor.u32 %v470_v5, %v388_v6  ;;  %v486_v9 = vld [vmem:[%s717_s1 + $0xf4] sm:$0xf]  ;;  %v452_v10 = vld [vmem:[%s717_s1 + $0xf8] sm:$0xf0]  ;;  %v378_v11 = vld [vmem:[%s717_s1 + $0x60] sm:$0xf] }
   0x4   :  { %221 = vmatpush.bf16.msra.mxu0 %v387_v3  ;;  %v455_v12 = vor.u32 %v486_v9, %v452_v10  ;;  %v469_v13 = vld [vmem:[%s717_s1 + $0x64] sm:$0xf0]  ;;  %v442_v14 = vld [vmem:[%s717_s1 + $0xe0] sm:$0xf]  ;;  %v468_v18 = vld [vmem:[%s717_s1 + $0x64] sm:$0xf] }
   0x5   :  { %v485_v15 = vld [vmem:[%s717_s1 + $0xe4] sm:$0xf0]  ;;  %234 = vmatpush.bf16.msra.mxu1 %v451_v7  ;;  %247 = vmatpush.bf16.msra.mxu2 %v391_v8  ;;  %v379_v16 = vor.u32 %v469_v13, %v378_v11  ;;  %v380_v19 = vld [vmem:[%s717_s1 + $0x68] sm:$0xf0]  ;;  %v484_v20 = vld [vmem:[%s717_s1 + $0xe4] sm:$0xf] }
   0x6   :  { %v443_v17 = vor.u32 %v485_v15, %v442_v14  ;;  %260 = vmatpush.bf16.msra.mxu3 %v455_v12  ;;  %v383_v21 = vor.u32 %v468_v18, %v380_v19  ;;  %v444_v22 = vld [vmem:[%s717_s1 + $0xe8] sm:$0xf0]  ;;  %v370_v23 = vld [vmem:[%s717_s1 + $0x50] sm:$0xf]  ;;  %v467_v24 = vld [vmem:[%s717_s1 + $0x54] sm:$0xf0] }
   0x7   :  { %v447_v25 = vor.u32 %v484_v20, %v444_v22  ;;  %v434_v26 = vld [vmem:[%s717_s1 + $0xd0] sm:$0xf]  ;;  %v483_v27 = vld [vmem:[%s717_s1 + $0xd4] sm:$0xf0]  ;;  %v466_v28 = vld [vmem:[%s717_s1 + $0x54] sm:$0xf]  ;;  %v371_v29 = vor.u32 %v467_v24, %v370_v23 }
   0x8   :  { %222 = vmatpush.bf16.msra.mxu0 %v379_v16  ;;  %v372_v30 = vld [vmem:[%s717_s1 + $0x58] sm:$0xf0]  ;;  %v482_v31 = vld [vmem:[%s717_s1 + $0xd4] sm:$0xf]  ;;  %v435_v33 = vor.u32 %v483_v27, %v434_v26  ;;  %v362_v35 = vld [vmem:[%s717_s1 + $0x40] sm:$0xf] }
   0x9   :  { %v436_v32 = vld [vmem:[%s717_s1 + $0xd8] sm:$0xf0]  ;;  %235 = vmatpush.bf16.msra.mxu1 %v443_v17  ;;  %248 = vmatpush.bf16.msra.mxu2 %v383_v21  ;;  %v375_v34 = vor.u32 %v466_v28, %v372_v30  ;;  %v465_v36 = vld [vmem:[%s717_s1 + $0x44] sm:$0xf0]  ;;  %v426_v37 = vld [vmem:[%s717_s1 + $0xc0] sm:$0xf] }
   0xa   :  { %261 = vmatpush.bf16.msra.mxu3 %v447_v25  ;;  %v439_v38 = vor.u32 %v482_v31, %v436_v32  ;;  %v481_v39 = vld [vmem:[%s717_s1 + $0xc4] sm:$0xf0]  ;;  %v464_v40 = vld [vmem:[%s717_s1 + $0x44] sm:$0xf]  ;;  %v364_v41 = vld [vmem:[%s717_s1 + $0x48] sm:$0xf0]  ;;  %v363_v44 = vor.u32 %v465_v36, %v362_v35 }
   0xb   :  { %v480_v42 = vld [vmem:[%s717_s1 + $0xc4] sm:$0xf]  ;;  %v428_v43 = vld [vmem:[%s717_s1 + $0xc8] sm:$0xf0]  ;;  %v427_v45 = vor.u32 %v481_v39, %v426_v37  ;;  %v367_v46 = vor.u32 %v464_v40, %v364_v41  ;;  %v354_v47 = vld [vmem:[%s717_s1 + $0x30] sm:$0xf] }
   0xc   :  { %223 = vmatpush.bf16.msra.mxu0 %v371_v29  ;;  %v463_v48 = vld [vmem:[%s717_s1 + $0x34] sm:$0xf0]  ;;  %v418_v49 = vld [vmem:[%s717_s1 + $0xb0] sm:$0xf]  ;;  %v431_v50 = vor.u32 %v480_v42, %v428_v43  ;;  %v462_v52 = vld [vmem:[%s717_s1 + $0x34] sm:$0xf] }
   0xd   :  { %236 = vmatpush.bf16.msra.mxu1 %v435_v33  ;;  %249 = vmatpush.bf16.msra.mxu2 %v375_v34  ;;  %v479_v51 = vld [vmem:[%s717_s1 + $0xb4] sm:$0xf0]  ;;  %v356_v53 = vld [vmem:[%s717_s1 + $0x38] sm:$0xf0]  ;;  %v478_v54 = vld [vmem:[%s717_s1 + $0xb4] sm:$0xf]  ;;  %v355_v56 = vor.u32 %v463_v48, %v354_v47 }
   0xe   :  { %262 = vmatpush.bf16.msra.mxu3 %v439_v38  ;;  %v420_v55 = vld [vmem:[%s717_s1 + $0xb8] sm:$0xf0]  ;;  %v419_v57 = vor.u32 %v479_v51, %v418_v49  ;;  %v359_v58 = vor.u32 %v462_v52, %v356_v53  ;;  %v346_v59 = vld [vmem:[%s717_s1 + $0x20] sm:$0xf]  ;;  %v461_v60 = vld [vmem:[%s717_s1 + $0x24] sm:$0xf0] }
   0xf   :  { %v410_v61 = vld [vmem:[%s717_s1 + $0xa0] sm:$0xf]  ;;  %v423_v62 = vor.u32 %v478_v54, %v420_v55  ;;  %v477_v63 = vld [vmem:[%s717_s1 + $0xa4] sm:$0xf0]  ;;  %v460_v0 = vld [vmem:[%s717_s1 + $0x24] sm:$0xf]  ;;  %v347_v4 = vor.u32 %v461_v60, %v346_v59 }
  0x10   :  { %224 = vmatpush.bf16.msra.mxu0 %v363_v44  ;;  %v348_v1 = vld [vmem:[%s717_s1 + $0x28] sm:$0xf0]  ;;  %v476_v2 = vld [vmem:[%s717_s1 + $0xa4] sm:$0xf]  ;;  %v411_v5 = vor.u32 %v477_v63, %v410_v61  ;;  %v338_v7 = vld [vmem:[%s717_s1 + $0x10] sm:$0xf]  ;;  %v310_v44 = vlaneseq }
  0x11   :  { %237 = vmatpush.bf16.msra.mxu1 %v427_v45  ;;  %250 = vmatpush.bf16.msra.mxu2 %v367_v46  ;;  %v412_v3 = vld [vmem:[%s717_s1 + $0xa8] sm:$0xf0]  ;;  %v351_v6 = vor.u32 %v460_v0, %v348_v1  ;;  %v459_v8 = vld [vmem:[%s717_s1 + $0x14] sm:$0xf0]  ;;  %v402_v9 = vld [vmem:[%s717_s1 + $0x90] sm:$0xf] }
  0x12   :  { %263 = vmatpush.bf16.msra.mxu3 %v431_v50  ;;  %v415_v10 = vor.u32 %v476_v2, %v412_v3  ;;  %v475_v11 = vld [vmem:[%s717_s1 + $0x94] sm:$0xf0]  ;;  %v458_v12 = vld [vmem:[%s717_s1 + $0x14] sm:$0xf]  ;;  %v340_v13 = vld [vmem:[%s717_s1 + $0x18] sm:$0xf0]  ;;  %v339_v16 = vor.u32 %v459_v8, %v338_v7 }
  0x13   :  { %v474_v14 = vld [vmem:[%s717_s1 + $0x94] sm:$0xf]  ;;  %v404_v15 = vld [vmem:[%s717_s1 + $0x98] sm:$0xf0]  ;;  %v21_v17 = vld [vmem:[%s718_s0] sm:$0xff]  ;;  %v403_v18 = vor.u32 %v475_v11, %v402_v9  ;;  %v343_v19 = vor.u32 %v458_v12, %v340_v13  ;;  %v311_v54 = vshrl.u32 %v310_v44, 7 }
  0x14   :  { %225 = vmatpush.bf16.msra.mxu0 %v355_v56  ;;  %v330_v20 = vld [vmem:[%s717_s1] sm:$0xf]  ;;  %v457_v21 = vld [vmem:[%s717_s1 + $0x4] sm:$0xf0]  ;;  %v407_v23 = vor.u32 %v474_v14, %v404_v15  ;;  %v456_v25 = vld [vmem:[%s717_s1 + $0x4] sm:$0xf]  ;;  %v55_v29 = vunpack.c.l.b16 %v21_v17  ;;  %v56_v31 = vunpack.c.h.b16 %v21_v17 }
  0x15   :  { %238 = vmatpush.bf16.msra.mxu1 %v419_v57  ;;  %251 = vmatpush.bf16.msra.mxu2 %v359_v58  ;;  %v394_v22 = vld [vmem:[%s717_s1 + $0x80] sm:$0xf]  ;;  %v473_v24 = vld [vmem:[%s717_s1 + $0x84] sm:$0xf0]  ;;  %v332_v26 = vld [vmem:[%s717_s1 + $0x8] sm:$0xf0]  ;;  %v331_v30 = vor.u32 %v457_v21, %v330_v20 }
  0x16   :  { %264 = vmatpush.bf16.msra.mxu3 %v423_v62  ;;  %v472_v27 = vld [vmem:[%s717_s1 + $0x84] sm:$0xf]  ;;  %v396_v28 = vld [vmem:[%s717_s1 + $0x88] sm:$0xf0]  ;;  %v395_v32 = vor.u32 %v473_v24, %v394_v22  ;;  %v335_v33 = vor.u32 %v456_v25, %v332_v26  ;;  %v57_v35 = vpack.c.b16 %v55_v29, %v55_v29  ;;  %v58_v36 = vpack.c.b16 %v56_v31, %v56_v31 }
  0x17   :  { %v399_v34 = vor.u32 %v472_v27, %v396_v28  ;;  %vm313_vm0 = vcmp.eq.s32.totalorder %v311_v54, 1  ;;  %vm312_vm1 = vcmp.eq.s32.totalorder %v311_v54, 0 }
  0x18   :  { %226 = vmatpush.bf16.msra.mxu0 %v347_v4 }
  0x19   :  { %239 = vmatpush.bf16.msra.mxu1 %v411_v5  ;;  %252 = vmatpush.bf16.msra.mxu2 %v351_v6 }
  0x1a   :  { %265 = vmatpush.bf16.msra.mxu3 %v415_v10 }
  0x1c   :  { %227 = vmatpush.bf16.msra.mxu0 %v339_v16 }
  0x1d   :  { %240 = vmatpush.bf16.msra.mxu1 %v403_v18  ;;  %253 = vmatpush.bf16.msra.mxu2 %v343_v19 }
  0x1e   :  { %266 = vmatpush.bf16.msra.mxu3 %v407_v23 }
  0x20   :  { %228 = vmatpush.bf16.msra.mxu0 %v331_v30 }
  0x21   :  { %241 = vmatpush.bf16.msra.mxu1 %v395_v32  ;;  %254 = vmatpush.bf16.msra.mxu2 %v335_v33 }
  0x22   :  { %267 = vmatpush.bf16.msra.mxu3 %v399_v34 }
  0x23   :  { %229 = vmatmul.bf16.vlgmr.msra.gmra.mxu0 %v57_v35 }
  0x24   :  { %242 = vmatmul.bf16.vlgmr.msra.gmra.mxu1 %v58_v36  ;;  %255 = vmatmul.bf16.vlgmr.msra.gmra.mxu2 %v57_v35 }
  0x25   :  { %268 = vmatmul.bf16.vlgmr.msra.gmra.mxu3 %v58_v36 }
  0xa0   :  { %v230_v37 = vpop.f32.mrf.mxu0 }
  0xa1   :  { %v243_v38 = vpop.f32.mrf.mxu1 }
  0xa2   :  { %v244_v39 = vadd.f32 %v243_v38, %v230_v37 }
  0xa4   :  { %282 = vst [vmem:[%s719_s2] sm:$0xff] %v244_v39  ;;  %v284_v40 = vrot.slane %v244_v39, 4  ;;  %v296_v41 = vmul.f32 %v244_v39, %v244_v39 }
  0xa6   :  { %v285_v42 = vadd.f32 %v284_v40, %v244_v39  ;;  %v298_v43 = vrot.slane %v296_v41, 4 }
  0xa7   :  { %v256_v45 = vpop.f32.mrf.mxu2 }
  0xa8   :  { %v286_v46 = vrot.slane %v285_v42, 2  ;;  %v299_v47 = vadd.f32 %v298_v43, %v296_v41  ;;  %v269_v48 = vpop.f32.mrf.mxu3  ;;  %v232_v49 = vpop.f32.mrf.mxu0 }
  0xa9   :  { %v270_v50 = vadd.f32 %v269_v48, %v256_v45  ;;  %v245_v51 = vpop.f32.mrf.mxu1 }
  0xaa   :  { %v287_v52 = vadd.f32 %v286_v46, %v285_v42  ;;  %v300_v53 = vrot.slane %v299_v47, 2 }
  0xab   :  { %283 = vst [vmem:[%s719_s2 + $0x8] sm:$0xff] %v270_v50  ;;  %v290_v55 = vrot.slane %v270_v50, 4  ;;  %v297_v56 = vmul.f32 %v270_v50, %v270_v50 }
  0xac   :  { %v301_v57 = vadd.f32 %v300_v53, %v299_v47  ;;  %v288_v58 = vrot.slane %v287_v52, 1 }
  0xad   :  { %v291_v59 = vadd.f32 %v290_v55, %v270_v50  ;;  %v304_v60 = vrot.slane %v297_v56, 4 }
  0xae   :  { %v302_v61 = vrot.slane %v301_v57, 1  ;;  %v289_v3 = vadd.f32 %v288_v58, %v287_v52 }
  0xaf   :  { %v292_v62 = vrot.slane %v291_v59, 2  ;;  %v305_v63 = vadd.f32 %v304_v60, %v297_v56  ;;  %v258_v0 = vpop.f32.mrf.mxu2 }
  0xb0   :  { %v303_v1 = vadd.f32 %v302_v61, %v301_v57  ;;  %v271_v2 = vpop.f32.mrf.mxu3 }
  0xb1   :  { %v293_v4 = vadd.f32 %v292_v62, %v291_v59  ;;  %v306_v5 = vrot.slane %v305_v63, 2 }
  0xb2   :  { %v314_v6 = vsel %vm313_vm0, %v303_v1, 0.0 }
  0xb3   :  { %v316_v7 = vsel %vm312_vm1, %v289_v3, %v314_v6  ;;  %v307_v8 = vadd.f32 %v306_v5, %v305_v63  ;;  %v294_v9 = vrot.slane %v293_v4, 1 }
  0xb4   :  { %318 = vst [vmem:[%s720_s3] sm:$0xff] %v316_v7 }
  0xb5   :  { %v308_v10 = vrot.slane %v307_v8, 1  ;;  %v295_v12 = vadd.f32 %v294_v9, %v293_v4 }
  0xb7   :  { %v309_v11 = vadd.f32 %v308_v10, %v307_v8 }
  0xb9   :  { %v315_v13 = vsel %vm313_vm0, %v309_v11, 0.0 }
  0xba   :  { %v317_v14 = vsel %vm312_vm1, %v295_v12, %v315_v13 }
  0xbb   :  { %319 = vst [vmem:[%s720_s3 + $0x8] sm:$0xff] %v317_v14 }

// kernel: resnet_backbone_forward.64
= control target key start
LH: loop header
LB: loop body
LE: loop exit
PB: predicated region body
PF: predicated region fallthrough
CT: control target
= control target key end

     0   :  { %s78_s0 = inlined_call_operand.vmem [shape: f32[8,256], index: 0, kind: input, shape index: {}]   ;;  %s79_s1 = inlined_call_operand.vmem [shape: f32[1,256], index: 1, kind: input, shape index: {}]   ;;  %s80_s2 = inlined_call_operand.vmem [shape: f32[1,256], index: 2, kind: input, shape index: {}]   ;;  %s81_s3 = inlined_call_operand.vmem [shape: f32[8,256], index: 3, kind: output, shape index: {}]  }
   0x1   :  { %v14_v0 = vld [vmem:[%s78_s0] sm:$0xff]  ;;  %v15_v5 = vld [vmem:[%s78_s0 + $0x8] sm:$0xff] }
   0x2   :  { %v16_v1 = vld [vmem:[%s79_s1] sm:$0x3] }
   0x3   :  { %v24_v2 = vld [vmem:[%s80_s2] sm:$0x3]  ;;  %v18_v3 = vperm.slane %v16_v1, 0  ;;  %v19_v6 = vperm.slane %v16_v1, 1 }
   0x4   :  { %v26_v4 = vperm.slane %v24_v2, 0  ;;  %v27_v7 = vperm.slane %v24_v2, 1 }
   0x5   :  { %v22_v8 = vmul.f32 %v18_v3, %v14_v0  ;;  %v23_v9 = vmul.f32 %v19_v6, %v15_v5 }
   0x7   :  { %v30_v10 = vadd.f32 %v26_v4, %v22_v8  ;;  %v31_v11 = vadd.f32 %v27_v7, %v23_v9 }
   0x9   :  { %v32_v12 = vmax.f32 %v30_v10, 0.0  ;;  %v33_v13 = vmax.f32 %v31_v11, 0.0 }
   0xb   :  { %34 = vst [vmem:[%s81_s3] sm:$0xff] %v32_v12 }
   0xc   :  { %35 = vst [vmem:[%s81_s3 + $0x8] sm:$0xff] %v33_v13 }

// kernel: resnet_backbone_forward.63
= control target key start
LH: loop header
LB: loop body
LE: loop exit
PB: predicated region body
PF: predicated region fallthrough
CT: control target
= control target key end

     0   :  { %s900_s12 = smov 0   ;;  %s902_s13 = smov 0   ;;  %s1020_s0 = inlined_call_operand.vmem [shape: bf16[8,1280], index: 0, kind: input, shape index: {}]   ;;  %s1021_s1 = inlined_call_operand.vmem [shape: bf16[1280,256], index: 1, kind: input, shape index: {}]   ;;  %s1022_s2 = inlined_call_operand.vmem [shape: f32[8,256], index: 2, kind: output, shape index: {0}]   ;;  %s1023_s3 = inlined_call_operand.vmem [shape: f32[8,256], index: 3, kind: output, shape index: {1}]  }
   0x1   :  { %s904_s14 = smov 0  }
   0x2 LB: > { %s23_s15 = sadd.s32 1, %s873_s13  ;;  %p657_p0 = scmp.ge.s32.totalorder %s877_s14, 1  ;;  %s877_s14 = sphi %s904_s14, %s14_s14   ;;  %s873_s13 = sphi %s902_s13, %s1025_s13   ;;  %s869_s12 = sphi %s900_s12, %s1024_s12  }
   0x3   : > { %p24_p1 = scmp.ge.s32.totalorder %s23_s15, 5  ;;  %p171_p2 = scmp.lt.s32.totalorder %s877_s14, 6 }
   0x5   : > { %s1027_s15 = smov (%p24_p1, %s23_s15), 0  ;;  %p172_p3 = pnand %p657_p0, %p171_p2 }
   0x6   : > { %s658_s16 = sshll.u32 (!%p172_p3), %s869_s12, 1  ;;  %s660_s17 = sshll.u32 (!%p172_p3), %s869_s12, 5 }
   0x7   : > { %175 = sbr.rel (%p172_p3) target bundleno = 220 (0xdc), region = 28  ;;  %p213_p4 = scmp.lt.s32.totalorder (!%p172_p3), %s658_s16, 9 }
   0x8   : > { %p221_p5 = scmp.lt.s32.totalorder (!%p172_p3), %s660_s17, 159  ;;  %p663_p6 = scmp.ne.s32.totalorder (!%p172_p3), %s869_s12, 0 }
   0xc   : > { %s1029_s16 = smov (!%p213_p4, %s658_s16), 9  ;;  %s1031_s17 = smov (!%p221_p5, %s660_s17), 159 }
   0xd   : > { %s659_s18 = sshll.u32 %s1029_s16, 2  ;;  %s797_s22 = sshll.u32 %s1031_s17, 3 }
   0xe   : > { %s925_s21 = scalar_lea.vmem %s1020_s0, %s659_s18  ;;  %s930_s25 = scalar_lea.vmem %s1021_s1, %s797_s22 }
   0xf   : > { %240 = sbr.rel (%p663_p6) target bundleno = 23 (0x17), region = 32 }
  0x14   : > { %v879_v0 = vmov 0.0  }
  0x15   : > { %241 = vst [vmem:[#allocation2] sm:$0xff] %v879_v0 }
  0x16   : > { %242 = vst [vmem:[#allocation2 + $0x8] sm:$0xff] %v879_v0 }
  0x17 PF: > { %v722_v1 = vld [vmem:[%s930_s25 + $0x70] sm:$0xf]  ;;  %v813_v2 = vld [vmem:[%s930_s25 + $0x74] sm:$0xf0]  ;;  %v812_v6 = vld [vmem:[%s930_s25 + $0x74] sm:$0xf] }
  0x18   : > { %v786_v3 = vld [vmem:[%s930_s25 + $0xf0] sm:$0xf]  ;;  %v723_v4 = vor.u32 %v813_v2, %v722_v1  ;;  %v829_v5 = vld [vmem:[%s930_s25 + $0xf4] sm:$0xf0]  ;;  %v724_v7 = vld [vmem:[%s930_s25 + $0x78] sm:$0xf0] }
  0x19   : > { %v787_v8 = vor.u32 %v829_v5, %v786_v3  ;;  %v727_v9 = vor.u32 %v812_v6, %v724_v7  ;;  %v828_v10 = vld [vmem:[%s930_s25 + $0xf4] sm:$0xf]  ;;  %v788_v11 = vld [vmem:[%s930_s25 + $0xf8] sm:$0xf0]  ;;  %v714_v12 = vld [vmem:[%s930_s25 + $0x60] sm:$0xf] }
  0x1a   : > { %445 = vmatpush.bf16.msra.mxu0 %v723_v4  ;;  %v791_v13 = vor.u32 %v828_v10, %v788_v11  ;;  %v811_v14 = vld [vmem:[%s930_s25 + $0x64] sm:$0xf0]  ;;  %v778_v15 = vld [vmem:[%s930_s25 + $0xe0] sm:$0xf]  ;;  %v810_v19 = vld [vmem:[%s930_s25 + $0x64] sm:$0xf] }
  0x1b   : > { %v827_v16 = vld [vmem:[%s930_s25 + $0xe4] sm:$0xf0]  ;;  %458 = vmatpush.bf16.msra.mxu1 %v787_v8  ;;  %471 = vmatpush.bf16.msra.mxu2 %v727_v9  ;;  %v715_v17 = vor.u32 %v811_v14, %v714_v12  ;;  %v716_v20 = vld [vmem:[%s930_s25 + $0x68] sm:$0xf0]  ;;  %v826_v21 = vld [vmem:[%s930_s25 + $0xe4] sm:$0xf] }
  0x1c   : > { %v779_v18 = vor.u32 %v827_v16, %v778_v15  ;;  %484 = vmatpush.bf16.msra.mxu3 %v791_v13  ;;  %v719_v22 = vor.u32 %v810_v19, %v716_v20  ;;  %v780_v23 = vld [vmem:[%s930_s25 + $0xe8] sm:$0xf0]  ;;  %v706_v24 = vld [vmem:[%s930_s25 + $0x50] sm:$0xf]  ;;  %v809_v25 = vld [vmem:[%s930_s25 + $0x54] sm:$0xf0] }
  0x1d   : > { %v783_v26 = vor.u32 %v826_v21, %v780_v23  ;;  %v770_v27 = vld [vmem:[%s930_s25 + $0xd0] sm:$0xf]  ;;  %v825_v28 = vld [vmem:[%s930_s25 + $0xd4] sm:$0xf0]  ;;  %v808_v29 = vld [vmem:[%s930_s25 + $0x54] sm:$0xf]  ;;  %v707_v30 = vor.u32 %v809_v25, %v706_v24 }
  0x1e   : > { %446 = vmatpush.bf16.msra.mxu0 %v715_v17  ;;  %v708_v31 = vld [vmem:[%s930_s25 + $0x58] sm:$0xf0]  ;;  %v824_v32 = vld [vmem:[%s930_s25 + $0xd4] sm:$0xf]  ;;  %v771_v34 = vor.u32 %v825_v28, %v770_v27  ;;  %v698_v36 = vld [vmem:[%s930_s25 + $0x40] sm:$0xf] }
  0x1f   : > { %v772_v33 = vld [vmem:[%s930_s25 + $0xd8] sm:$0xf0]  ;;  %459 = vmatpush.bf16.msra.mxu1 %v779_v18  ;;  %472 = vmatpush.bf16.msra.mxu2 %v719_v22  ;;  %v711_v35 = vor.u32 %v808_v29, %v708_v31  ;;  %v807_v37 = vld [vmem:[%s930_s25 + $0x44] sm:$0xf0]  ;;  %v762_v38 = vld [vmem:[%s930_s25 + $0xc0] sm:$0xf] }
  0x20   : > { %485 = vmatpush.bf16.msra.mxu3 %v783_v26  ;;  %v775_v39 = vor.u32 %v824_v32, %v772_v33  ;;  %v823_v40 = vld [vmem:[%s930_s25 + $0xc4] sm:$0xf0]  ;;  %v806_v41 = vld [vmem:[%s930_s25 + $0x44] sm:$0xf]  ;;  %v700_v42 = vld [vmem:[%s930_s25 + $0x48] sm:$0xf0]  ;;  %v699_v45 = vor.u32 %v807_v37, %v698_v36 }
  0x21   : > { %v822_v43 = vld [vmem:[%s930_s25 + $0xc4] sm:$0xf]  ;;  %v764_v44 = vld [vmem:[%s930_s25 + $0xc8] sm:$0xf0]  ;;  %v763_v46 = vor.u32 %v823_v40, %v762_v38  ;;  %v703_v47 = vor.u32 %v806_v41, %v700_v42  ;;  %v690_v48 = vld [vmem:[%s930_s25 + $0x30] sm:$0xf] }
  0x22   : > { %447 = vmatpush.bf16.msra.mxu0 %v707_v30  ;;  %v805_v49 = vld [vmem:[%s930_s25 + $0x34] sm:$0xf0]  ;;  %v754_v50 = vld [vmem:[%s930_s25 + $0xb0] sm:$0xf]  ;;  %v767_v51 = vor.u32 %v822_v43, %v764_v44  ;;  %v804_v53 = vld [vmem:[%s930_s25 + $0x34] sm:$0xf] }
  0x23   : > { %460 = vmatpush.bf16.msra.mxu1 %v771_v34  ;;  %473 = vmatpush.bf16.msra.mxu2 %v711_v35  ;;  %v821_v52 = vld [vmem:[%s930_s25 + $0xb4] sm:$0xf0]  ;;  %v692_v54 = vld [vmem:[%s930_s25 + $0x38] sm:$0xf0]  ;;  %v820_v55 = vld [vmem:[%s930_s25 + $0xb4] sm:$0xf]  ;;  %v691_v57 = vor.u32 %v805_v49, %v690_v48 }
  0x24   : > { %486 = vmatpush.bf16.msra.mxu3 %v775_v39  ;;  %v756_v56 = vld [vmem:[%s930_s25 + $0xb8] sm:$0xf0]  ;;  %v755_v58 = vor.u32 %v821_v52, %v754_v50  ;;  %v695_v59 = vor.u32 %v804_v53, %v692_v54  ;;  %v682_v60 = vld [vmem:[%s930_s25 + $0x20] sm:$0xf]  ;;  %v803_v61 = vld [vmem:[%s930_s25 + $0x24] sm:$0xf0] }
  0x25   : > { %v746_v62 = vld [vmem:[%s930_s25 + $0xa0] sm:$0xf]  ;;  %v759_v63 = vor.u32 %v820_v55, %v756_v56  ;;  %v819_v0 = vld [vmem:[%s930_s25 + $0xa4] sm:$0xf0]  ;;  %v802_v1 = vld [vmem:[%s930_s25 + $0x24] sm:$0xf]  ;;  %v683_v5 = vor.u32 %v803_v61, %v682_v60 }
  0x26   : > { %448 = vmatpush.bf16.msra.mxu0 %v699_v45  ;;  %v684_v2 = vld [vmem:[%s930_s25 + $0x28] sm:$0xf0]  ;;  %v818_v3 = vld [vmem:[%s930_s25 + $0xa4] sm:$0xf]  ;;  %v747_v6 = vor.u32 %v819_v0, %v746_v62  ;;  %v674_v8 = vld [vmem:[%s930_s25 + $0x10] sm:$0xf] }
  0x27   : > { %461 = vmatpush.bf16.msra.mxu1 %v763_v46  ;;  %474 = vmatpush.bf16.msra.mxu2 %v703_v47  ;;  %v748_v4 = vld [vmem:[%s930_s25 + $0xa8] sm:$0xf0]  ;;  %v687_v7 = vor.u32 %v802_v1, %v684_v2  ;;  %v801_v9 = vld [vmem:[%s930_s25 + $0x14] sm:$0xf0]  ;;  %v738_v10 = vld [vmem:[%s930_s25 + $0x90] sm:$0xf] }
  0x28   : > { %487 = vmatpush.bf16.msra.mxu3 %v767_v51  ;;  %v751_v11 = vor.u32 %v818_v3, %v748_v4  ;;  %v817_v12 = vld [vmem:[%s930_s25 + $0x94] sm:$0xf0]  ;;  %v800_v13 = vld [vmem:[%s930_s25 + $0x14] sm:$0xf]  ;;  %v676_v14 = vld [vmem:[%s930_s25 + $0x18] sm:$0xf0]  ;;  %v675_v17 = vor.u32 %v801_v9, %v674_v8 }
  0x29   : > { %v816_v15 = vld [vmem:[%s930_s25 + $0x94] sm:$0xf]  ;;  %v740_v16 = vld [vmem:[%s930_s25 + $0x98] sm:$0xf0]  ;;  %v245_v18 = vld [vmem:[%s925_s21] sm:$0xff]  ;;  %v739_v19 = vor.u32 %v817_v12, %v738_v10  ;;  %v679_v20 = vor.u32 %v800_v13, %v676_v14  ;;  %p792_p7 = scmp.ne.s32.totalorder %s869_s12, 4 }
  0x2a   : > { %449 = vmatpush.bf16.msra.mxu0 %v691_v57  ;;  %v666_v21 = vld [vmem:[%s930_s25] sm:$0xf]  ;;  %v799_v22 = vld [vmem:[%s930_s25 + $0x4] sm:$0xf0]  ;;  %v743_v24 = vor.u32 %v816_v15, %v740_v16  ;;  %v798_v26 = vld [vmem:[%s930_s25 + $0x4] sm:$0xf]  ;;  %v279_v30 = vunpack.c.l.b16 %v245_v18  ;;  %v280_v32 = vunpack.c.h.b16 %v245_v18 }
  0x2b   : > { %462 = vmatpush.bf16.msra.mxu1 %v755_v58  ;;  %475 = vmatpush.bf16.msra.mxu2 %v695_v59  ;;  %v730_v23 = vld [vmem:[%s930_s25 + $0x80] sm:$0xf]  ;;  %v815_v25 = vld [vmem:[%s930_s25 + $0x84] sm:$0xf0]  ;;  %v668_v27 = vld [vmem:[%s930_s25 + $0x8] sm:$0xf0]  ;;  %v667_v31 = vor.u32 %v799_v22, %v666_v21 }
  0x2c   : > { %488 = vmatpush.bf16.msra.mxu3 %v759_v63  ;;  %v814_v28 = vld [vmem:[%s930_s25 + $0x84] sm:$0xf]  ;;  %v732_v29 = vld [vmem:[%s930_s25 + $0x88] sm:$0xf0]  ;;  %v731_v33 = vor.u32 %v815_v25, %v730_v23  ;;  %v671_v34 = vor.u32 %v798_v26, %v668_v27  ;;  %v281_v36 = vpack.c.b16 %v279_v30, %v279_v30  ;;  %v282_v37 = vpack.c.b16 %v280_v32, %v280_v32 }
  0x2d   : > { %v735_v35 = vor.u32 %v814_v28, %v732_v29  ;;  %v243_v39 = vld [vmem:[#allocation2] sm:$0xff]  ;;  %v244_v44 = vld [vmem:[#allocation2 + $0x8] sm:$0xff] }
  0x2e   : > { %450 = vmatpush.bf16.msra.mxu0 %v683_v5 }
  0x2f   : > { %463 = vmatpush.bf16.msra.mxu1 %v747_v6  ;;  %476 = vmatpush.bf16.msra.mxu2 %v687_v7 }
  0x30   : > { %489 = vmatpush.bf16.msra.mxu3 %v751_v11 }
  0x32   : > { %451 = vmatpush.bf16.msra.mxu0 %v675_v17 }
  0x33   : > { %464 = vmatpush.bf16.msra.mxu1 %v739_v19  ;;  %477 = vmatpush.bf16.msra.mxu2 %v679_v20 }
  0x34   : > { %490 = vmatpush.bf16.msra.mxu3 %v743_v24 }
  0x36   : > { %452 = vmatpush.bf16.msra.mxu0 %v667_v31 }
  0x37   : > { %465 = vmatpush.bf16.msra.mxu1 %v731_v33  ;;  %478 = vmatpush.bf16.msra.mxu2 %v671_v34 }
  0x38   : > { %491 = vmatpush.bf16.msra.mxu3 %v735_v35 }
  0x39   : > { %453 = vmatmul.bf16.vlgmr.msra.gmra.mxu0 %v281_v36 }
  0x3a   : > { %466 = vmatmul.bf16.vlgmr.msra.gmra.mxu1 %v282_v37  ;;  %479 = vmatmul.bf16.vlgmr.msra.gmra.mxu2 %v281_v36 }
  0x3b   : > { %492 = vmatmul.bf16.vlgmr.msra.gmra.mxu3 %v282_v37 }
  0xb6   : > { %v454_v38 = vpop.f32.mrf.mxu0 }
  0xb7   : > { %v467_v40 = vpop.f32.mrf.mxu1 }
  0xb8   : > { %v468_v41 = vadd.f32 %v467_v40, %v454_v38 }
  0xba   : > { %v497_v42 = vadd.f32 %v468_v41, %v243_v39 }
  0xbc   : > { %499 = vst [vmem:[#allocation2] sm:$0xff] %v497_v42 }
  0xbd   : > { %v480_v43 = vpop.f32.mrf.mxu2 }
  0xbe   : > { %v493_v45 = vpop.f32.mrf.mxu3  ;;  %v456_v46 = vpop.f32.mrf.mxu0 }
  0xbf   : > { %v494_v47 = vadd.f32 %v493_v45, %v480_v43  ;;  %v469_v48 = vpop.f32.mrf.mxu1 }
  0xc1   : > { %v498_v49 = vadd.f32 %v494_v47, %v244_v44 }
  0xc2   : > { %504 = sbr.rel (%p792_p7) target bundleno = 220 (0xdc), region = 36 }
  0xc3   : > { %500 = vst [vmem:[#allocation2 + $0x8] sm:$0xff] %v498_v49 }
  0xc5   : > { %v482_v50 = vpop.f32.mrf.mxu2 }
  0xc6   : > { %v495_v51 = vpop.f32.mrf.mxu3 }
  0xc7   : > { %v505_v52 = vld [vmem:[#allocation2] sm:$0xff]  ;;  %v535_v62 = vlaneseq }
  0xc8   : > { %507 = vst [vmem:[%s1022_s2] sm:$0xff] %v505_v52  ;;  %v509_v54 = vrot.slane %v505_v52, 4  ;;  %v521_v55 = vmul.f32 %v505_v52, %v505_v52 }
  0xc9   : > { %v536_v7 = vshrl.u32 %v535_v62, 7 }
  0xca   : > { %v506_v53 = vld [vmem:[#allocation2 + $0x8] sm:$0xff]  ;;  %v510_v58 = vadd.f32 %v509_v54, %v505_v52  ;;  %v523_v59 = vrot.slane %v521_v55, 4 }
  0xcb   : > { %v515_v56 = vrot.slane %v506_v53, 4  ;;  %v522_v57 = vmul.f32 %v506_v53, %v506_v53  ;;  %508 = vst [vmem:[%s1022_s2 + $0x8] sm:$0xff] %v506_v53  ;;  %vm538_vm0 = vcmp.eq.s32.totalorder %v536_v7, 1  ;;  %vm537_vm1 = vcmp.eq.s32.totalorder %v536_v7, 0 }
  0xcc   : > { %v511_v63 = vrot.slane %v510_v58, 2  ;;  %v524_v0 = vadd.f32 %v523_v59, %v521_v55 }
  0xcd   : > { %v516_v60 = vadd.f32 %v515_v56, %v506_v53  ;;  %v529_v61 = vrot.slane %v522_v57, 4 }
  0xce   : > { %v512_v3 = vadd.f32 %v511_v63, %v510_v58  ;;  %v525_v4 = vrot.slane %v524_v0, 2 }
  0xcf   : > { %v517_v1 = vrot.slane %v516_v60, 2  ;;  %v530_v2 = vadd.f32 %v529_v61, %v522_v57 }
  0xd0   : > { %v513_v8 = vrot.slane %v512_v3, 1  ;;  %v526_v9 = vadd.f32 %v525_v4, %v524_v0 }
  0xd1   : > { %v518_v5 = vadd.f32 %v517_v1, %v516_v60  ;;  %v531_v6 = vrot.slane %v530_v2, 2 }
  0xd2   : > { %v527_v12 = vrot.slane %v526_v9, 1  ;;  %v514_v14 = vadd.f32 %v513_v8, %v512_v3 }
  0xd3   : > { %v519_v10 = vrot.slane %v518_v5, 1  ;;  %v532_v11 = vadd.f32 %v531_v6, %v530_v2 }
  0xd4   : > { %v528_v16 = vadd.f32 %v527_v12, %v526_v9 }
  0xd5   : > { %v533_v13 = vrot.slane %v532_v11, 1  ;;  %v520_v15 = vadd.f32 %v519_v10, %v518_v5 }
  0xd6   : > { %v539_v18 = vsel %vm538_vm0, %v528_v16, 0.0 }
  0xd7   : > { %v534_v17 = vadd.f32 %v533_v13, %v532_v11  ;;  %v541_v20 = vsel %vm537_vm1, %v514_v14, %v539_v18 }
  0xd8   : > { %543 = vst [vmem:[%s1023_s3] sm:$0xff] %v541_v20 }
  0xd9   : > { %v540_v19 = vsel %vm538_vm0, %v534_v17, 0.0 }
  0xda   : > { %v542_v21 = vsel %vm537_vm1, %v520_v15, %v540_v19 }
  0xdb   : > { %544 = vst [vmem:[%s1023_s3 + $0x8] sm:$0xff] %v542_v21 }
  0xdc PF: > { %s14_s14 = sadd.s32 1, %s877_s14   ;;  %s1024_s12 = smov %s873_s13 }
  0xdd   : > { %p11_p8 = scmp.ge.s32.totalorder %s14_s14, 7   ;;  %s1025_s13 = smov %s1027_s15 }
  0xdf   :  { %13 = sbr.rel (!%p11_p8) target bundleno = 2 (0x2), region = 81 }

// kernel: resnet_backbone_forward.68
= control target key start
LH: loop header
LB: loop body
LE: loop exit
PB: predicated region body
PF: predicated region fallthrough
CT: control target
= control target key end

     0   :  { %s96_s0 = inlined_call_operand.vmem [shape: f32[8,256], index: 0, kind: input, shape index: {}]   ;;  %s97_s1 = inlined_call_operand.vmem [shape: f32[1,256], index: 1, kind: input, shape index: {}]   ;;  %s98_s2 = inlined_call_operand.vmem [shape: f32[1,256], index: 2, kind: input, shape index: {}]   ;;  %s99_s3 = inlined_call_operand.vmem [shape: f32[8,256], index: 3, kind: input, shape index: {}]   ;;  %s100_s4 = inlined_call_operand.vmem [shape: f32[8,256], index: 4, kind: output, shape index: {}]  }
   0x1   :  { %v17_v0 = vld [vmem:[%s96_s0] sm:$0xff]  ;;  %v18_v5 = vld [vmem:[%s96_s0 + $0x8] sm:$0xff] }
   0x2   :  { %v19_v1 = vld [vmem:[%s97_s1] sm:$0x3]  ;;  %v36_v11 = vld [vmem:[%s99_s3 + $0x8] sm:$0xff] }
   0x3   :  { %v27_v2 = vld [vmem:[%s98_s2] sm:$0x3]  ;;  %v21_v3 = vperm.slane %v19_v1, 0  ;;  %v22_v6 = vperm.slane %v19_v1, 1 }
   0x4   :  { %v29_v4 = vperm.slane %v27_v2, 0  ;;  %v30_v7 = vperm.slane %v27_v2, 1  ;;  %v35_v10 = vld [vmem:[%s99_s3] sm:$0xff] }
   0x5   :  { %v25_v8 = vmul.f32 %v21_v3, %v17_v0  ;;  %v26_v9 = vmul.f32 %v22_v6, %v18_v5 }
   0x7   :  { %v33_v12 = vadd.f32 %v29_v4, %v25_v8  ;;  %v34_v13 = vadd.f32 %v30_v7, %v26_v9 }
   0x9   :  { %v37_v14 = vadd.f32 %v35_v10, %v33_v12  ;;  %v38_v15 = vadd.f32 %v36_v11, %v34_v13 }
   0xb   :  { %v39_v16 = vmax.f32 %v37_v14, 0.0  ;;  %v40_v17 = vmax.f32 %v38_v15, 0.0 }
   0xd   :  { %41 = vst [vmem:[%s100_s4] sm:$0xff] %v39_v16 }
   0xe   :  { %42 = vst [vmem:[%s100_s4 + $0x8] sm:$0xff] %v40_v17 }

// kernel: resnet_backbone_forward.67
= control target key start
LH: loop header
LB: loop body
LE: loop exit
PB: predicated region body
PF: predicated region fallthrough
CT: control target
= control target key end

     0   :  { %s900_s12 = smov 0   ;;  %s902_s13 = smov 0   ;;  %s1020_s0 = inlined_call_operand.vmem [shape: bf16[8,2304], index: 0, kind: input, shape index: {}]   ;;  %s1021_s1 = inlined_call_operand.vmem [shape: bf16[2304,256], index: 1, kind: input, shape index: {}]   ;;  %s1022_s2 = inlined_call_operand.vmem [shape: f32[8,256], index: 2, kind: output, shape index: {0}]   ;;  %s1023_s3 = inlined_call_operand.vmem [shape: f32[8,256], index: 3, kind: output, shape index: {1}]  }
   0x1   :  { %s904_s14 = smov 0  }
   0x2 LB: > { %s23_s15 = sadd.s32 1, %s873_s13  ;;  %p657_p0 = scmp.ge.s32.totalorder %s877_s14, 1  ;;  %s877_s14 = sphi %s904_s14, %s14_s14   ;;  %s873_s13 = sphi %s902_s13, %s1025_s13   ;;  %s869_s12 = sphi %s900_s12, %s1024_s12  }
   0x3   : > { %p24_p1 = scmp.ge.s32.totalorder %s23_s15, 9  ;;  %p171_p2 = scmp.lt.s32.totalorder %s877_s14, 10 }
   0x5   : > { %s1027_s15 = smov (%p24_p1, %s23_s15), 0  ;;  %p172_p3 = pnand %p657_p0, %p171_p2 }
   0x6   : > { %s658_s16 = sshll.u32 (!%p172_p3), %s869_s12, 1  ;;  %s660_s17 = sshll.u32 (!%p172_p3), %s869_s12, 5 }
   0x7   : > { %175 = sbr.rel (%p172_p3) target bundleno = 220 (0xdc), region = 28  ;;  %p213_p4 = scmp.lt.s32.totalorder (!%p172_p3), %s658_s16, 17 }
   0x8   : > { %p221_p5 = scmp.lt.s32.totalorder (!%p172_p3), %s660_s17, 287  ;;  %p663_p6 = scmp.ne.s32.totalorder (!%p172_p3), %s869_s12, 0 }
   0xc   : > { %s1029_s16 = smov (!%p213_p4, %s658_s16), 17  ;;  %s1031_s17 = smov (!%p221_p5, %s660_s17), 287 }
   0xd   : > { %s659_s18 = sshll.u32 %s1029_s16, 2  ;;  %s797_s22 = sshll.u32 %s1031_s17, 3 }
   0xe   : > { %s925_s21 = scalar_lea.vmem %s1020_s0, %s659_s18  ;;  %s930_s25 = scalar_lea.vmem %s1021_s1, %s797_s22 }
   0xf   : > { %240 = sbr.rel (%p663_p6) target bundleno = 23 (0x17), region = 32 }
  0x14   : > { %v879_v0 = vmov 0.0  }
  0x15   : > { %241 = vst [vmem:[#allocation2] sm:$0xff] %v879_v0 }
  0x16   : > { %242 = vst [vmem:[#allocation2 + $0x8] sm:$0xff] %v879_v0 }
  0x17 PF: > { %v722_v1 = vld [vmem:[%s930_s25 + $0x70] sm:$0xf]  ;;  %v813_v2 = vld [vmem:[%s930_s25 + $0x74] sm:$0xf0]  ;;  %v812_v6 = vld [vmem:[%s930_s25 + $0x74] sm:$0xf] }
  0x18   : > { %v786_v3 = vld [vmem:[%s930_s25 + $0xf0] sm:$0xf]  ;;  %v723_v4 = vor.u32 %v813_v2, %v722_v1  ;;  %v829_v5 = vld [vmem:[%s930_s25 + $0xf4] sm:$0xf0]  ;;  %v724_v7 = vld [vmem:[%s930_s25 + $0x78] sm:$0xf0] }
  0x19   : > { %v787_v8 = vor.u32 %v829_v5, %v786_v3  ;;  %v727_v9 = vor.u32 %v812_v6, %v724_v7  ;;  %v828_v10 = vld [vmem:[%s930_s25 + $0xf4] sm:$0xf]  ;;  %v788_v11 = vld [vmem:[%s930_s25 + $0xf8] sm:$0xf0]  ;;  %v714_v12 = vld [vmem:[%s930_s25 + $0x60] sm:$0xf] }
  0x1a   : > { %445 = vmatpush.bf16.msra.mxu0 %v723_v4  ;;  %v791_v13 = vor.u32 %v828_v10, %v788_v11  ;;  %v811_v14 = vld [vmem:[%s930_s25 + $0x64] sm:$0xf0]  ;;  %v778_v15 = vld [vmem:[%s930_s25 + $0xe0] sm:$0xf]  ;;  %v810_v19 = vld [vmem:[%s930_s25 + $0x64] sm:$0xf] }
  0x1b   : > { %v827_v16 = vld [vmem:[%s930_s25 + $0xe4] sm:$0xf0]  ;;  %458 = vmatpush.bf16.msra.mxu1 %v787_v8  ;;  %471 = vmatpush.bf16.msra.mxu2 %v727_v9  ;;  %v715_v17 = vor.u32 %v811_v14, %v714_v12  ;;  %v716_v20 = vld [vmem:[%s930_s25 + $0x68] sm:$0xf0]  ;;  %v826_v21 = vld [vmem:[%s930_s25 + $0xe4] sm:$0xf] }
  0x1c   : > { %v779_v18 = vor.u32 %v827_v16, %v778_v15  ;;  %484 = vmatpush.bf16.msra.mxu3 %v791_v13  ;;  %v719_v22 = vor.u32 %v810_v19, %v716_v20  ;;  %v780_v23 = vld [vmem:[%s930_s25 + $0xe8] sm:$0xf0]  ;;  %v706_v24 = vld [vmem:[%s930_s25 + $0x50] sm:$0xf]  ;;  %v809_v25 = vld [vmem:[%s930_s25 + $0x54] sm:$0xf0] }
  0x1d   : > { %v783_v26 = vor.u32 %v826_v21, %v780_v23  ;;  %v770_v27 = vld [vmem:[%s930_s25 + $0xd0] sm:$0xf]  ;;  %v825_v28 = vld [vmem:[%s930_s25 + $0xd4] sm:$0xf0]  ;;  %v808_v29 = vld [vmem:[%s930_s25 + $0x54] sm:$0xf]  ;;  %v707_v30 = vor.u32 %v809_v25, %v706_v24 }
  0x1e   : > { %446 = vmatpush.bf16.msra.mxu0 %v715_v17  ;;  %v708_v31 = vld [vmem:[%s930_s25 + $0x58] sm:$0xf0]  ;;  %v824_v32 = vld [vmem:[%s930_s25 + $0xd4] sm:$0xf]  ;;  %v771_v34 = vor.u32 %v825_v28, %v770_v27  ;;  %v698_v36 = vld [vmem:[%s930_s25 + $0x40] sm:$0xf] }
  0x1f   : > { %v772_v33 = vld [vmem:[%s930_s25 + $0xd8] sm:$0xf0]  ;;  %459 = vmatpush.bf16.msra.mxu1 %v779_v18  ;;  %472 = vmatpush.bf16.msra.mxu2 %v719_v22  ;;  %v711_v35 = vor.u32 %v808_v29, %v708_v31  ;;  %v807_v37 = vld [vmem:[%s930_s25 + $0x44] sm:$0xf0]  ;;  %v762_v38 = vld [vmem:[%s930_s25 + $0xc0] sm:$0xf] }
  0x20   : > { %485 = vmatpush.bf16.msra.mxu3 %v783_v26  ;;  %v775_v39 = vor.u32 %v824_v32, %v772_v33  ;;  %v823_v40 = vld [vmem:[%s930_s25 + $0xc4] sm:$0xf0]  ;;  %v806_v41 = vld [vmem:[%s930_s25 + $0x44] sm:$0xf]  ;;  %v700_v42 = vld [vmem:[%s930_s25 + $0x48] sm:$0xf0]  ;;  %v699_v45 = vor.u32 %v807_v37, %v698_v36 }
  0x21   : > { %v822_v43 = vld [vmem:[%s930_s25 + $0xc4] sm:$0xf]  ;;  %v764_v44 = vld [vmem:[%s930_s25 + $0xc8] sm:$0xf0]  ;;  %v763_v46 = vor.u32 %v823_v40, %v762_v38  ;;  %v703_v47 = vor.u32 %v806_v41, %v700_v42  ;;  %v690_v48 = vld [vmem:[%s930_s25 + $0x30] sm:$0xf] }
  0x22   : > { %447 = vmatpush.bf16.msra.mxu0 %v707_v30  ;;  %v805_v49 = vld [vmem:[%s930_s25 + $0x34] sm:$0xf0]  ;;  %v754_v50 = vld [vmem:[%s930_s25 + $0xb0] sm:$0xf]  ;;  %v767_v51 = vor.u32 %v822_v43, %v764_v44  ;;  %v804_v53 = vld [vmem:[%s930_s25 + $0x34] sm:$0xf] }
  0x23   : > { %460 = vmatpush.bf16.msra.mxu1 %v771_v34  ;;  %473 = vmatpush.bf16.msra.mxu2 %v711_v35  ;;  %v821_v52 = vld [vmem:[%s930_s25 + $0xb4] sm:$0xf0]  ;;  %v692_v54 = vld [vmem:[%s930_s25 + $0x38] sm:$0xf0]  ;;  %v820_v55 = vld [vmem:[%s930_s25 + $0xb4] sm:$0xf]  ;;  %v691_v57 = vor.u32 %v805_v49, %v690_v48 }
  0x24   : > { %486 = vmatpush.bf16.msra.mxu3 %v775_v39  ;;  %v756_v56 = vld [vmem:[%s930_s25 + $0xb8] sm:$0xf0]  ;;  %v755_v58 = vor.u32 %v821_v52, %v754_v50  ;;  %v695_v59 = vor.u32 %v804_v53, %v692_v54  ;;  %v682_v60 = vld [vmem:[%s930_s25 + $0x20] sm:$0xf]  ;;  %v803_v61 = vld [vmem:[%s930_s25 + $0x24] sm:$0xf0] }
  0x25   : > { %v746_v62 = vld [vmem:[%s930_s25 + $0xa0] sm:$0xf]  ;;  %v759_v63 = vor.u32 %v820_v55, %v756_v56  ;;  %v819_v0 = vld [vmem:[%s930_s25 + $0xa4] sm:$0xf0]  ;;  %v802_v1 = vld [vmem:[%s930_s25 + $0x24] sm:$0xf]  ;;  %v683_v5 = vor.u32 %v803_v61, %v682_v60 }
  0x26   : > { %448 = vmatpush.bf16.msra.mxu0 %v699_v45  ;;  %v684_v2 = vld [vmem:[%s930_s25 + $0x28] sm:$0xf0]  ;;  %v818_v3 = vld [vmem:[%s930_s25 + $0xa4] sm:$0xf]  ;;  %v747_v6 = vor.u32 %v819_v0, %v746_v62  ;;  %v674_v8 = vld [vmem:[%s930_s25 + $0x10] sm:$0xf] }
  0x27   : > { %461 = vmatpush.bf16.msra.mxu1 %v763_v46  ;;  %474 = vmatpush.bf16.msra.mxu2 %v703_v47  ;;  %v748_v4 = vld [vmem:[%s930_s25 + $0xa8] sm:$0xf0]  ;;  %v687_v7 = vor.u32 %v802_v1, %v684_v2  ;;  %v801_v9 = vld [vmem:[%s930_s25 + $0x14] sm:$0xf0]  ;;  %v738_v10 = vld [vmem:[%s930_s25 + $0x90] sm:$0xf] }
  0x28   : > { %487 = vmatpush.bf16.msra.mxu3 %v767_v51  ;;  %v751_v11 = vor.u32 %v818_v3, %v748_v4  ;;  %v817_v12 = vld [vmem:[%s930_s25 + $0x94] sm:$0xf0]  ;;  %v800_v13 = vld [vmem:[%s930_s25 + $0x14] sm:$0xf]  ;;  %v676_v14 = vld [vmem:[%s930_s25 + $0x18] sm:$0xf0]  ;;  %v675_v17 = vor.u32 %v801_v9, %v674_v8 }
  0x29   : > { %v816_v15 = vld [vmem:[%s930_s25 + $0x94] sm:$0xf]  ;;  %v740_v16 = vld [vmem:[%s930_s25 + $0x98] sm:$0xf0]  ;;  %v245_v18 = vld [vmem:[%s925_s21] sm:$0xff]  ;;  %v739_v19 = vor.u32 %v817_v12, %v738_v10  ;;  %v679_v20 = vor.u32 %v800_v13, %v676_v14  ;;  %p792_p7 = scmp.ne.s32.totalorder %s869_s12, 8 }
  0x2a   : > { %449 = vmatpush.bf16.msra.mxu0 %v691_v57  ;;  %v666_v21 = vld [vmem:[%s930_s25] sm:$0xf]  ;;  %v799_v22 = vld [vmem:[%s930_s25 + $0x4] sm:$0xf0]  ;;  %v743_v24 = vor.u32 %v816_v15, %v740_v16  ;;  %v798_v26 = vld [vmem:[%s930_s25 + $0x4] sm:$0xf]  ;;  %v279_v30 = vunpack.c.l.b16 %v245_v18  ;;  %v280_v32 = vunpack.c.h.b16 %v245_v18 }
  0x2b   : > { %462 = vmatpush.bf16.msra.mxu1 %v755_v58  ;;  %475 = vmatpush.bf16.msra.mxu2 %v695_v59  ;;  %v730_v23 = vld [vmem:[%s930_s25 + $0x80] sm:$0xf]  ;;  %v815_v25 = vld [vmem:[%s930_s25 + $0x84] sm:$0xf0]  ;;  %v668_v27 = vld [vmem:[%s930_s25 + $0x8] sm:$0xf0]  ;;  %v667_v31 = vor.u32 %v799_v22, %v666_v21 }
  0x2c   : > { %488 = vmatpush.bf16.msra.mxu3 %v759_v63  ;;  %v814_v28 = vld [vmem:[%s930_s25 + $0x84] sm:$0xf]  ;;  %v732_v29 = vld [vmem:[%s930_s25 + $0x88] sm:$0xf0]  ;;  %v731_v33 = vor.u32 %v815_v25, %v730_v23  ;;  %v671_v34 = vor.u32 %v798_v26, %v668_v27  ;;  %v281_v36 = vpack.c.b16 %v279_v30, %v279_v30  ;;  %v282_v37 = vpack.c.b16 %v280_v32, %v280_v32 }
  0x2d   : > { %v735_v35 = vor.u32 %v814_v28, %v732_v29  ;;  %v243_v39 = vld [vmem:[#allocation2] sm:$0xff]  ;;  %v244_v44 = vld [vmem:[#allocation2 + $0x8] sm:$0xff] }
  0x2e   : > { %450 = vmatpush.bf16.msra.mxu0 %v683_v5 }
  0x2f   : > { %463 = vmatpush.bf16.msra.mxu1 %v747_v6  ;;  %476 = vmatpush.bf16.msra.mxu2 %v687_v7 }
  0x30   : > { %489 = vmatpush.bf16.msra.mxu3 %v751_v11 }
  0x32   : > { %451 = vmatpush.bf16.msra.mxu0 %v675_v17 }
  0x33   : > { %464 = vmatpush.bf16.msra.mxu1 %v739_v19  ;;  %477 = vmatpush.bf16.msra.mxu2 %v679_v20 }
  0x34   : > { %490 = vmatpush.bf16.msra.mxu3 %v743_v24 }
  0x36   : > { %452 = vmatpush.bf16.msra.mxu0 %v667_v31 }
  0x37   : > { %465 = vmatpush.bf16.msra.mxu1 %v731_v33  ;;  %478 = vmatpush.bf16.msra.mxu2 %v671_v34 }
  0x38   : > { %491 = vmatpush.bf16.msra.mxu3 %v735_v35 }
  0x39   : > { %453 = vmatmul.bf16.vlgmr.msra.gmra.mxu0 %v281_v36 }
  0x3a   : > { %466 = vmatmul.bf16.vlgmr.msra.gmra.mxu1 %v282_v37  ;;  %479 = vmatmul.bf16.vlgmr.msra.gmra.mxu2 %v281_v36 }
  0x3b   : > { %492 = vmatmul.bf16.vlgmr.msra.gmra.mxu3 %v282_v37 }
  0xb6   : > { %v454_v38 = vpop.f32.mrf.mxu0 }
  0xb7   : > { %v467_v40 = vpop.f32.mrf.mxu1 }
  0xb8   : > { %v468_v41 = vadd.f32 %v467_v40, %v454_v38 }
  0xba   : > { %v497_v42 = vadd.f32 %v468_v41, %v243_v39 }
  0xbc   : > { %499 = vst [vmem:[#allocation2] sm:$0xff] %v497_v42 }
  0xbd   : > { %v480_v43 = vpop.f32.mrf.mxu2 }
  0xbe   : > { %v493_v45 = vpop.f32.mrf.mxu3  ;;  %v456_v46 = vpop.f32.mrf.mxu0 }
  0xbf   : > { %v494_v47 = vadd.f32 %v493_v45, %v480_v43  ;;  %v469_v48 = vpop.f32.mrf.mxu1 }
  0xc1   : > { %v498_v49 = vadd.f32 %v494_v47, %v244_v44 }
  0xc2   : > { %504 = sbr.rel (%p792_p7) target bundleno = 220 (0xdc), region = 36 }
  0xc3   : > { %500 = vst [vmem:[#allocation2 + $0x8] sm:$0xff] %v498_v49 }
  0xc5   : > { %v482_v50 = vpop.f32.mrf.mxu2 }
  0xc6   : > { %v495_v51 = vpop.f32.mrf.mxu3 }
  0xc7   : > { %v505_v52 = vld [vmem:[#allocation2] sm:$0xff]  ;;  %v535_v62 = vlaneseq }
  0xc8   : > { %507 = vst [vmem:[%s1022_s2] sm:$0xff] %v505_v52  ;;  %v509_v54 = vrot.slane %v505_v52, 4  ;;  %v521_v55 = vmul.f32 %v505_v52, %v505_v52 }
  0xc9   : > { %v536_v7 = vshrl.u32 %v535_v62, 7 }
  0xca   : > { %v506_v53 = vld [vmem:[#allocation2 + $0x8] sm:$0xff]  ;;  %v510_v58 = vadd.f32 %v509_v54, %v505_v52  ;;  %v523_v59 = vrot.slane %v521_v55, 4 }
  0xcb   : > { %v515_v56 = vrot.slane %v506_v53, 4  ;;  %v522_v57 = vmul.f32 %v506_v53, %v506_v53  ;;  %508 = vst [vmem:[%s1022_s2 + $0x8] sm:$0xff] %v506_v53  ;;  %vm538_vm0 = vcmp.eq.s32.totalorder %v536_v7, 1  ;;  %vm537_vm1 = vcmp.eq.s32.totalorder %v536_v7, 0 }
  0xcc   : > { %v511_v63 = vrot.slane %v510_v58, 2  ;;  %v524_v0 = vadd.f32 %v523_v59, %v521_v55 }
  0xcd   : > { %v516_v60 = vadd.f32 %v515_v56, %v506_v53  ;;  %v529_v61 = vrot.slane %v522_v57, 4 }
  0xce   : > { %v512_v3 = vadd.f32 %v511_v63, %v510_v58  ;;  %v525_v4 = vrot.slane %v524_v0, 2 }
  0xcf   : > { %v517_v1 = vrot.slane %v516_v60, 2  ;;  %v530_v2 = vadd.f32 %v529_v61, %v522_v57 }
  0xd0   : > { %v513_v8 = vrot.slane %v512_v3, 1  ;;  %v526_v9 = vadd.f32 %v525_v4, %v524_v0 }
  0xd1   : > { %v518_v5 = vadd.f32 %v517_v1, %v516_v60  ;;  %v531_v6 = vrot.slane %v530_v2, 2 }
  0xd2   : > { %v527_v12 = vrot.slane %v526_v9, 1  ;;  %v514_v14 = vadd.f32 %v513_v8, %v512_v3 }
  0xd3   : > { %v519_v10 = vrot.slane %v518_v5, 1  ;;  %v532_v11 = vadd.f32 %v531_v6, %v530_v2 }
  0xd4   : > { %v528_v16 = vadd.f32 %v527_v12, %v526_v9 }
  0xd5   : > { %v533_v13 = vrot.slane %v532_v11, 1  ;;  %v520_v15 = vadd.f32 %v519_v10, %v518_v5 }
  0xd6   : > { %v539_v18 = vsel %vm538_vm0, %v528_v16, 0.0 }
  0xd7   : > { %v534_v17 = vadd.f32 %v533_v13, %v532_v11  ;;  %v541_v20 = vsel %vm537_vm1, %v514_v14, %v539_v18 }
  0xd8   : > { %543 = vst [vmem:[%s1023_s3] sm:$0xff] %v541_v20 }
  0xd9   : > { %v540_v19 = vsel %vm538_vm0, %v534_v17, 0.0 }
  0xda   : > { %v542_v21 = vsel %vm537_vm1, %v520_v15, %v540_v19 }
  0xdb   : > { %544 = vst [vmem:[%s1023_s3 + $0x8] sm:$0xff] %v542_v21 }
  0xdc PF: > { %s14_s14 = sadd.s32 1, %s877_s14   ;;  %s1024_s12 = smov %s873_s13 }
  0xdd   : > { %p11_p8 = scmp.ge.s32.totalorder %s14_s14, 11   ;;  %s1025_s13 = smov %s1027_s15 }
  0xdf   :  { %13 = sbr.rel (!%p11_p8) target bundleno = 2 (0x2), region = 81 }

// kernel: resnet_backbone_forward.76
= control target key start
LH: loop header
LB: loop body
LE: loop exit
PB: predicated region body
PF: predicated region fallthrough
CT: control target
= control target key end

     0   :  { %s104_s0 = inlined_call_operand.vmem [shape: f32[8,512], index: 0, kind: input, shape index: {}]   ;;  %s105_s1 = inlined_call_operand.vmem [shape: f32[1,512], index: 1, kind: input, shape index: {}]   ;;  %s106_s2 = inlined_call_operand.vmem [shape: f32[1,512], index: 2, kind: input, shape index: {}]   ;;  %s107_s3 = inlined_call_operand.vmem [shape: f32[8,512], index: 3, kind: output, shape index: {}]  }
   0x1   :  { %v14_v0 = vld [vmem:[%s104_s0] sm:$0xff]  ;;  %v15_v5 = vld [vmem:[%s104_s0 + $0x8] sm:$0xff]  ;;  %v16_v8 = vld [vmem:[%s104_s0 + $0x10] sm:$0xff] }
   0x2   :  { %v18_v1 = vld [vmem:[%s105_s1] sm:$0xf]  ;;  %v17_v11 = vld [vmem:[%s104_s0 + $0x18] sm:$0xff] }
   0x3   :  { %v32_v2 = vld [vmem:[%s106_s2] sm:$0xf]  ;;  %v20_v3 = vperm.slane %v18_v1, 0  ;;  %v21_v6 = vperm.slane %v18_v1, 1  ;;  %v22_v9 = vperm.slane %v18_v1, 2  ;;  %v23_v12 = vperm.slane %v18_v1, 3 }
   0x4   :  { %v34_v4 = vperm.slane %v32_v2, 0  ;;  %v35_v7 = vperm.slane %v32_v2, 1  ;;  %v36_v10 = vperm.slane %v32_v2, 2  ;;  %v37_v13 = vperm.slane %v32_v2, 3 }
   0x5   :  { %v28_v14 = vmul.f32 %v20_v3, %v14_v0  ;;  %v29_v15 = vmul.f32 %v21_v6, %v15_v5  ;;  %v30_v16 = vmul.f32 %v22_v9, %v16_v8  ;;  %v31_v17 = vmul.f32 %v23_v12, %v17_v11 }
   0x7   :  { %v42_v18 = vadd.f32 %v34_v4, %v28_v14  ;;  %v43_v19 = vadd.f32 %v35_v7, %v29_v15  ;;  %v44_v20 = vadd.f32 %v36_v10, %v30_v16  ;;  %v45_v21 = vadd.f32 %v37_v13, %v31_v17 }
   0x9   :  { %46 = vst [vmem:[%s107_s3] sm:$0xff] %v42_v18 }
   0xa   :  { %47 = vst [vmem:[%s107_s3 + $0x8] sm:$0xff] %v43_v19 }
   0xb   :  { %48 = vst [vmem:[%s107_s3 + $0x10] sm:$0xff] %v44_v20 }
   0xc   :  { %49 = vst [vmem:[%s107_s3 + $0x18] sm:$0xff] %v45_v21 }

// kernel: resnet_backbone_forward.75
= control target key start
LH: loop header
LB: loop body
LE: loop exit
PB: predicated region body
PF: predicated region fallthrough
CT: control target
= control target key end

     0   :  { %s1399_s1 = inlined_call_operand.vmem [shape: bf16[256,512], index: 1, kind: input, shape index: {}]   ;;  %s1400_s0 = inlined_call_operand.vmem [shape: bf16[8,256], index: 0, kind: input, shape index: {}]   ;;  %s1401_s2 = inlined_call_operand.vmem [shape: f32[8,512], index: 2, kind: output, shape index: {0}]   ;;  %s1402_s3 = inlined_call_operand.vmem [shape: f32[8,512], index: 3, kind: output, shape index: {1}]  }
   0x1   :  { %v730_v0 = vld [vmem:[%s1399_s1 + $0xe0] sm:$0xf]  ;;  %v902_v1 = vld [vmem:[%s1399_s1 + $0xec] sm:$0xf0]  ;;  %v900_v5 = vld [vmem:[%s1399_s1 + $0xe4] sm:$0xf] }
   0x2   :  { %v858_v2 = vld [vmem:[%s1399_s1 + $0x1e0] sm:$0xf]  ;;  %v731_v3 = vor.u32 %v902_v1, %v730_v0  ;;  %v934_v4 = vld [vmem:[%s1399_s1 + $0x1ec] sm:$0xf0]  ;;  %v732_v6 = vld [vmem:[%s1399_s1 + $0xf0] sm:$0xf0] }
   0x3   :  { %v859_v7 = vor.u32 %v934_v4, %v858_v2  ;;  %v735_v8 = vor.u32 %v900_v5, %v732_v6  ;;  %v932_v9 = vld [vmem:[%s1399_s1 + $0x1e4] sm:$0xf]  ;;  %v860_v10 = vld [vmem:[%s1399_s1 + $0x1f0] sm:$0xf0]  ;;  %v714_v11 = vld [vmem:[%s1399_s1 + $0xc0] sm:$0xf] }
   0x4   :  { %417 = vmatpush.bf16.msra.mxu0 %v731_v3  ;;  %v863_v12 = vor.u32 %v932_v9, %v860_v10  ;;  %v898_v13 = vld [vmem:[%s1399_s1 + $0xcc] sm:$0xf0]  ;;  %v842_v14 = vld [vmem:[%s1399_s1 + $0x1c0] sm:$0xf]  ;;  %v896_v18 = vld [vmem:[%s1399_s1 + $0xc4] sm:$0xf] }
   0x5   :  { %v930_v15 = vld [vmem:[%s1399_s1 + $0x1cc] sm:$0xf0]  ;;  %430 = vmatpush.bf16.msra.mxu1 %v859_v7  ;;  %443 = vmatpush.bf16.msra.mxu2 %v735_v8  ;;  %v715_v16 = vor.u32 %v898_v13, %v714_v11  ;;  %v716_v19 = vld [vmem:[%s1399_s1 + $0xd0] sm:$0xf0]  ;;  %v928_v20 = vld [vmem:[%s1399_s1 + $0x1c4] sm:$0xf] }
   0x6   :  { %v843_v17 = vor.u32 %v930_v15, %v842_v14  ;;  %456 = vmatpush.bf16.msra.mxu3 %v863_v12  ;;  %v719_v21 = vor.u32 %v896_v18, %v716_v19  ;;  %v844_v22 = vld [vmem:[%s1399_s1 + $0x1d0] sm:$0xf0]  ;;  %v698_v23 = vld [vmem:[%s1399_s1 + $0xa0] sm:$0xf]  ;;  %v894_v24 = vld [vmem:[%s1399_s1 + $0xac] sm:$0xf0] }
   0x7   :  { %v847_v25 = vor.u32 %v928_v20, %v844_v22  ;;  %v826_v26 = vld [vmem:[%s1399_s1 + $0x1a0] sm:$0xf]  ;;  %v926_v27 = vld [vmem:[%s1399_s1 + $0x1ac] sm:$0xf0]  ;;  %v892_v28 = vld [vmem:[%s1399_s1 + $0xa4] sm:$0xf]  ;;  %v699_v29 = vor.u32 %v894_v24, %v698_v23 }
   0x8   :  { %418 = vmatpush.bf16.msra.mxu0 %v715_v16  ;;  %v700_v30 = vld [vmem:[%s1399_s1 + $0xb0] sm:$0xf0]  ;;  %v924_v31 = vld [vmem:[%s1399_s1 + $0x1a4] sm:$0xf]  ;;  %v827_v33 = vor.u32 %v926_v27, %v826_v26  ;;  %v682_v35 = vld [vmem:[%s1399_s1 + $0x80] sm:$0xf] }
   0x9   :  { %v828_v32 = vld [vmem:[%s1399_s1 + $0x1b0] sm:$0xf0]  ;;  %431 = vmatpush.bf16.msra.mxu1 %v843_v17  ;;  %444 = vmatpush.bf16.msra.mxu2 %v719_v21  ;;  %v703_v34 = vor.u32 %v892_v28, %v700_v30  ;;  %v890_v36 = vld [vmem:[%s1399_s1 + $0x8c] sm:$0xf0]  ;;  %v810_v37 = vld [vmem:[%s1399_s1 + $0x180] sm:$0xf] }
   0xa   :  { %457 = vmatpush.bf16.msra.mxu3 %v847_v25  ;;  %v831_v38 = vor.u32 %v924_v31, %v828_v32  ;;  %v922_v39 = vld [vmem:[%s1399_s1 + $0x18c] sm:$0xf0]  ;;  %v888_v40 = vld [vmem:[%s1399_s1 + $0x84] sm:$0xf]  ;;  %v684_v41 = vld [vmem:[%s1399_s1 + $0x90] sm:$0xf0]  ;;  %v683_v44 = vor.u32 %v890_v36, %v682_v35 }
   0xb   :  { %v920_v42 = vld [vmem:[%s1399_s1 + $0x184] sm:$0xf]  ;;  %v812_v43 = vld [vmem:[%s1399_s1 + $0x190] sm:$0xf0]  ;;  %v811_v45 = vor.u32 %v922_v39, %v810_v37  ;;  %v687_v46 = vor.u32 %v888_v40, %v684_v41  ;;  %v666_v47 = vld [vmem:[%s1399_s1 + $0x60] sm:$0xf] }
   0xc   :  { %419 = vmatpush.bf16.msra.mxu0 %v699_v29  ;;  %v886_v48 = vld [vmem:[%s1399_s1 + $0x6c] sm:$0xf0]  ;;  %v794_v49 = vld [vmem:[%s1399_s1 + $0x160] sm:$0xf]  ;;  %v815_v50 = vor.u32 %v920_v42, %v812_v43  ;;  %v884_v52 = vld [vmem:[%s1399_s1 + $0x64] sm:$0xf] }
   0xd   :  { %432 = vmatpush.bf16.msra.mxu1 %v827_v33  ;;  %445 = vmatpush.bf16.msra.mxu2 %v703_v34  ;;  %v918_v51 = vld [vmem:[%s1399_s1 + $0x16c] sm:$0xf0]  ;;  %v668_v53 = vld [vmem:[%s1399_s1 + $0x70] sm:$0xf0]  ;;  %v916_v54 = vld [vmem:[%s1399_s1 + $0x164] sm:$0xf]  ;;  %v667_v56 = vor.u32 %v886_v48, %v666_v47 }
   0xe   :  { %458 = vmatpush.bf16.msra.mxu3 %v831_v38  ;;  %v796_v55 = vld [vmem:[%s1399_s1 + $0x170] sm:$0xf0]  ;;  %v795_v57 = vor.u32 %v918_v51, %v794_v49  ;;  %v671_v58 = vor.u32 %v884_v52, %v668_v53  ;;  %v650_v59 = vld [vmem:[%s1399_s1 + $0x40] sm:$0xf]  ;;  %v882_v60 = vld [vmem:[%s1399_s1 + $0x4c] sm:$0xf0] }
   0xf   :  { %v778_v61 = vld [vmem:[%s1399_s1 + $0x140] sm:$0xf]  ;;  %v799_v62 = vor.u32 %v916_v54, %v796_v55  ;;  %v914_v63 = vld [vmem:[%s1399_s1 + $0x14c] sm:$0xf0]  ;;  %v880_v0 = vld [vmem:[%s1399_s1 + $0x44] sm:$0xf]  ;;  %v651_v4 = vor.u32 %v882_v60, %v650_v59 }
  0x10   :  { %420 = vmatpush.bf16.msra.mxu0 %v683_v44  ;;  %v652_v1 = vld [vmem:[%s1399_s1 + $0x50] sm:$0xf0]  ;;  %v912_v2 = vld [vmem:[%s1399_s1 + $0x144] sm:$0xf]  ;;  %v779_v5 = vor.u32 %v914_v63, %v778_v61  ;;  %v634_v7 = vld [vmem:[%s1399_s1 + $0x20] sm:$0xf] }
  0x11   :  { %433 = vmatpush.bf16.msra.mxu1 %v811_v45  ;;  %446 = vmatpush.bf16.msra.mxu2 %v687_v46  ;;  %v780_v3 = vld [vmem:[%s1399_s1 + $0x150] sm:$0xf0]  ;;  %v655_v6 = vor.u32 %v880_v0, %v652_v1  ;;  %v878_v8 = vld [vmem:[%s1399_s1 + $0x2c] sm:$0xf0]  ;;  %v762_v9 = vld [vmem:[%s1399_s1 + $0x120] sm:$0xf] }
  0x12   :  { %459 = vmatpush.bf16.msra.mxu3 %v815_v50  ;;  %v783_v10 = vor.u32 %v912_v2, %v780_v3  ;;  %v910_v11 = vld [vmem:[%s1399_s1 + $0x12c] sm:$0xf0]  ;;  %v876_v12 = vld [vmem:[%s1399_s1 + $0x24] sm:$0xf]  ;;  %v636_v13 = vld [vmem:[%s1399_s1 + $0x30] sm:$0xf0]  ;;  %v635_v16 = vor.u32 %v878_v8, %v634_v7 }
  0x13   :  { %v908_v14 = vld [vmem:[%s1399_s1 + $0x124] sm:$0xf]  ;;  %v764_v15 = vld [vmem:[%s1399_s1 + $0x130] sm:$0xf0]  ;;  %v618_v17 = vld [vmem:[%s1399_s1] sm:$0xf]  ;;  %v763_v20 = vor.u32 %v910_v11, %v762_v9  ;;  %v639_v21 = vor.u32 %v876_v12, %v636_v13 }
  0x14   :  { %421 = vmatpush.bf16.msra.mxu0 %v667_v56  ;;  %v874_v18 = vld [vmem:[%s1399_s1 + $0xc] sm:$0xf0]  ;;  %v746_v19 = vld [vmem:[%s1399_s1 + $0x100] sm:$0xf]  ;;  %v872_v23 = vld [vmem:[%s1399_s1 + $0x4] sm:$0xf]  ;;  %v767_v25 = vor.u32 %v908_v14, %v764_v15 }
  0x15   :  { %434 = vmatpush.bf16.msra.mxu1 %v795_v57  ;;  %447 = vmatpush.bf16.msra.mxu2 %v671_v58  ;;  %v906_v22 = vld [vmem:[%s1399_s1 + $0x10c] sm:$0xf0]  ;;  %v620_v24 = vld [vmem:[%s1399_s1 + $0x10] sm:$0xf0]  ;;  %v904_v26 = vld [vmem:[%s1399_s1 + $0x104] sm:$0xf]  ;;  %v619_v32 = vor.u32 %v874_v18, %v618_v17 }
  0x16   :  { %460 = vmatpush.bf16.msra.mxu3 %v799_v62  ;;  %v748_v27 = vld [vmem:[%s1399_s1 + $0x110] sm:$0xf0]  ;;  %v738_v28 = vld [vmem:[%s1399_s1 + $0xe8] sm:$0xf]  ;;  %v903_v29 = vld [vmem:[%s1399_s1 + $0xf4] sm:$0xf0]  ;;  %v747_v37 = vor.u32 %v906_v22, %v746_v19  ;;  %v623_v38 = vor.u32 %v872_v23, %v620_v24 }
  0x17   :  { %v866_v30 = vld [vmem:[%s1399_s1 + $0x1e8] sm:$0xf]  ;;  %v25_v31 = vld [vmem:[%s1400_s0] sm:$0xff]  ;;  %v935_v33 = vld [vmem:[%s1399_s1 + $0x1f4] sm:$0xf0]  ;;  %v751_v42 = vor.u32 %v904_v26, %v748_v27  ;;  %v739_v43 = vor.u32 %v903_v29, %v738_v28 }
  0x18   :  { %422 = vmatpush.bf16.msra.mxu0 %v651_v4  ;;  %v901_v34 = vld [vmem:[%s1399_s1 + $0xec] sm:$0xf]  ;;  %v740_v35 = vld [vmem:[%s1399_s1 + $0xf8] sm:$0xf0]  ;;  %v91_v36 = vunpack.c.l.b16 %v25_v31  ;;  %v92_v41 = vunpack.c.h.b16 %v25_v31  ;;  %v867_v44 = vor.u32 %v935_v33, %v866_v30  ;;  %v722_v46 = vld [vmem:[%s1399_s1 + $0xc8] sm:$0xf] }
  0x19   :  { %435 = vmatpush.bf16.msra.mxu1 %v779_v5  ;;  %448 = vmatpush.bf16.msra.mxu2 %v655_v6  ;;  %v933_v39 = vld [vmem:[%s1399_s1 + $0x1ec] sm:$0xf]  ;;  %v868_v40 = vld [vmem:[%s1399_s1 + $0x1f8] sm:$0xf0]  ;;  %v743_v45 = vor.u32 %v901_v34, %v740_v35  ;;  %v899_v47 = vld [vmem:[%s1399_s1 + $0xd4] sm:$0xf0] }
  0x1a   :  { %461 = vmatpush.bf16.msra.mxu3 %v783_v10  ;;  %v850_v48 = vld [vmem:[%s1399_s1 + $0x1c8] sm:$0xf]  ;;  %v871_v49 = vor.u32 %v933_v39, %v868_v40  ;;  %v931_v50 = vld [vmem:[%s1399_s1 + $0x1d4] sm:$0xf0]  ;;  %v897_v51 = vld [vmem:[%s1399_s1 + $0xcc] sm:$0xf]  ;;  %v1193_v53 = vpack.c.b16 %v91_v36, %v91_v36  ;;  %v1201_v56 = vpack.c.b16 %v92_v41, %v92_v41  ;;  %v723_v57 = vor.u32 %v899_v47, %v722_v46 }
  0x1b   :  { %v724_v52 = vld [vmem:[%s1399_s1 + $0xd8] sm:$0xf0]  ;;  %v929_v54 = vld [vmem:[%s1399_s1 + $0x1cc] sm:$0xf]  ;;  %v851_v58 = vor.u32 %v931_v50, %v850_v48  ;;  %v706_v60 = vld [vmem:[%s1399_s1 + $0xa8] sm:$0xf] }
  0x1c   :  { %423 = vmatpush.bf16.msra.mxu0 %v635_v16  ;;  %v852_v55 = vld [vmem:[%s1399_s1 + $0x1d8] sm:$0xf0]  ;;  %v727_v59 = vor.u32 %v897_v51, %v724_v52  ;;  %v895_v61 = vld [vmem:[%s1399_s1 + $0xb4] sm:$0xf0]  ;;  %v834_v62 = vld [vmem:[%s1399_s1 + $0x1a8] sm:$0xf] }
  0x1d   :  { %436 = vmatpush.bf16.msra.mxu1 %v763_v20  ;;  %449 = vmatpush.bf16.msra.mxu2 %v639_v21  ;;  %v855_v63 = vor.u32 %v929_v54, %v852_v55  ;;  %v927_v0 = vld [vmem:[%s1399_s1 + $0x1b4] sm:$0xf0]  ;;  %v893_v1 = vld [vmem:[%s1399_s1 + $0xac] sm:$0xf]  ;;  %v708_v2 = vld [vmem:[%s1399_s1 + $0xb8] sm:$0xf0]  ;;  %v707_v5 = vor.u32 %v895_v61, %v706_v60 }
  0x1e   :  { %462 = vmatpush.bf16.msra.mxu3 %v767_v25  ;;  %v925_v3 = vld [vmem:[%s1399_s1 + $0x1ac] sm:$0xf]  ;;  %v836_v4 = vld [vmem:[%s1399_s1 + $0x1b8] sm:$0xf0]  ;;  %v835_v6 = vor.u32 %v927_v0, %v834_v62  ;;  %v711_v7 = vor.u32 %v893_v1, %v708_v2  ;;  %v690_v8 = vld [vmem:[%s1399_s1 + $0x88] sm:$0xf] }
  0x1f   :  { %v891_v9 = vld [vmem:[%s1399_s1 + $0x94] sm:$0xf0]  ;;  %v818_v10 = vld [vmem:[%s1399_s1 + $0x188] sm:$0xf]  ;;  %v839_v11 = vor.u32 %v925_v3, %v836_v4  ;;  %v889_v13 = vld [vmem:[%s1399_s1 + $0x8c] sm:$0xf] }
  0x20   :  { %424 = vmatpush.bf16.msra.mxu0 %v619_v32  ;;  %v923_v12 = vld [vmem:[%s1399_s1 + $0x194] sm:$0xf0]  ;;  %v692_v14 = vld [vmem:[%s1399_s1 + $0x98] sm:$0xf0]  ;;  %v921_v15 = vld [vmem:[%s1399_s1 + $0x18c] sm:$0xf]  ;;  %v691_v17 = vor.u32 %v891_v9, %v690_v8 }
  0x21   :  { %437 = vmatpush.bf16.msra.mxu1 %v747_v37  ;;  %450 = vmatpush.bf16.msra.mxu2 %v623_v38  ;;  %v820_v16 = vld [vmem:[%s1399_s1 + $0x198] sm:$0xf0]  ;;  %v819_v18 = vor.u32 %v923_v12, %v818_v10  ;;  %v695_v19 = vor.u32 %v889_v13, %v692_v14  ;;  %v674_v20 = vld [vmem:[%s1399_s1 + $0x68] sm:$0xf]  ;;  %v887_v21 = vld [vmem:[%s1399_s1 + $0x74] sm:$0xf0] }
  0x22   :  { %463 = vmatpush.bf16.msra.mxu3 %v751_v42  ;;  %v802_v22 = vld [vmem:[%s1399_s1 + $0x168] sm:$0xf]  ;;  %v823_v23 = vor.u32 %v921_v15, %v820_v16  ;;  %v919_v24 = vld [vmem:[%s1399_s1 + $0x174] sm:$0xf0]  ;;  %v885_v25 = vld [vmem:[%s1399_s1 + $0x6c] sm:$0xf]  ;;  %v675_v29 = vor.u32 %v887_v21, %v674_v20  ;;  %v592_v16 = vlaneseq }
  0x23   :  { %425 = vmatmul.bf16.vlgmr.msra.gmra.mxu0 %v1193_v53  ;;  %v676_v26 = vld [vmem:[%s1399_s1 + $0x78] sm:$0xf0]  ;;  %v917_v27 = vld [vmem:[%s1399_s1 + $0x16c] sm:$0xf]  ;;  %v803_v30 = vor.u32 %v919_v24, %v802_v22  ;;  %v658_v32 = vld [vmem:[%s1399_s1 + $0x48] sm:$0xf] }
  0x24   :  { %469 = vmatpush.bf16.msrb.mxu0 %v739_v43  ;;  %451 = vmatmul.bf16.vlgmr.msra.gmra.mxu2 %v1193_v53  ;;  %v804_v28 = vld [vmem:[%s1399_s1 + $0x178] sm:$0xf0]  ;;  %v679_v31 = vor.u32 %v885_v25, %v676_v26  ;;  %v883_v33 = vld [vmem:[%s1399_s1 + $0x54] sm:$0xf0]  ;;  %v786_v34 = vld [vmem:[%s1399_s1 + $0x148] sm:$0xf] }
  0x25   :  { %482 = vmatpush.bf16.msrb.mxu1 %v867_v44  ;;  %495 = vmatpush.bf16.msrb.mxu2 %v743_v45  ;;  %v807_v35 = vor.u32 %v917_v27, %v804_v28  ;;  %v915_v36 = vld [vmem:[%s1399_s1 + $0x154] sm:$0xf0]  ;;  %v881_v37 = vld [vmem:[%s1399_s1 + $0x4c] sm:$0xf]  ;;  %v660_v38 = vld [vmem:[%s1399_s1 + $0x58] sm:$0xf0]  ;;  %v659_v41 = vor.u32 %v883_v33, %v658_v32 }
  0x26   :  { %508 = vmatpush.bf16.msrb.mxu3 %v871_v49  ;;  %438 = vmatmul.bf16.vlgmr.msra.gmra.mxu1 %v1201_v56  ;;  %v913_v39 = vld [vmem:[%s1399_s1 + $0x14c] sm:$0xf]  ;;  %v788_v40 = vld [vmem:[%s1399_s1 + $0x158] sm:$0xf0]  ;;  %v787_v42 = vor.u32 %v915_v36, %v786_v34  ;;  %v663_v43 = vor.u32 %v881_v37, %v660_v38  ;;  %v642_v44 = vld [vmem:[%s1399_s1 + $0x28] sm:$0xf] }
  0x27   :  { %464 = vmatmul.bf16.vlgmr.msra.gmra.mxu3 %v1201_v56  ;;  %v879_v45 = vld [vmem:[%s1399_s1 + $0x34] sm:$0xf0]  ;;  %v770_v46 = vld [vmem:[%s1399_s1 + $0x128] sm:$0xf]  ;;  %v791_v47 = vor.u32 %v913_v39, %v788_v40  ;;  %v877_v49 = vld [vmem:[%s1399_s1 + $0x2c] sm:$0xf] }
  0x28   :  { %470 = vmatpush.bf16.msrb.mxu0 %v723_v57  ;;  %v911_v48 = vld [vmem:[%s1399_s1 + $0x134] sm:$0xf0]  ;;  %v644_v50 = vld [vmem:[%s1399_s1 + $0x38] sm:$0xf0]  ;;  %v909_v51 = vld [vmem:[%s1399_s1 + $0x12c] sm:$0xf]  ;;  %v643_v54 = vor.u32 %v879_v45, %v642_v44 }
  0x29   :  { %483 = vmatpush.bf16.msrb.mxu1 %v851_v58  ;;  %496 = vmatpush.bf16.msrb.mxu2 %v727_v59  ;;  %v772_v52 = vld [vmem:[%s1399_s1 + $0x138] sm:$0xf0]  ;;  %v771_v55 = vor.u32 %v911_v48, %v770_v46  ;;  %v647_v57 = vor.u32 %v877_v49, %v644_v50  ;;  %v626_v58 = vld [vmem:[%s1399_s1 + $0x8] sm:$0xf]  ;;  %v875_v59 = vld [vmem:[%s1399_s1 + $0x14] sm:$0xf0] }
  0x2a   :  { %509 = vmatpush.bf16.msrb.mxu3 %v855_v63  ;;  %v754_v60 = vld [vmem:[%s1399_s1 + $0x108] sm:$0xf]  ;;  %v775_v61 = vor.u32 %v909_v51, %v772_v52  ;;  %v907_v62 = vld [vmem:[%s1399_s1 + $0x114] sm:$0xf0]  ;;  %v873_v63 = vld [vmem:[%s1399_s1 + $0xc] sm:$0xf]  ;;  %v627_v3 = vor.u32 %v875_v59, %v626_v58 }
  0x2b   :  { %v628_v0 = vld [vmem:[%s1399_s1 + $0x18] sm:$0xf0]  ;;  %v905_v1 = vld [vmem:[%s1399_s1 + $0x10c] sm:$0xf]  ;;  %v755_v4 = vor.u32 %v907_v62, %v754_v60  ;;  %v1361_v24 = vshrl.u32 %v592_v16, 7 }
  0x2c   :  { %471 = vmatpush.bf16.msrb.mxu0 %v707_v5  ;;  %v756_v2 = vld [vmem:[%s1399_s1 + $0x118] sm:$0xf0]  ;;  %v631_v5 = vor.u32 %v873_v63, %v628_v0 }
  0x2d   :  { %484 = vmatpush.bf16.msrb.mxu1 %v835_v6  ;;  %497 = vmatpush.bf16.msrb.mxu2 %v711_v7  ;;  %v759_v6 = vor.u32 %v905_v1, %v756_v2  ;;  %vm595_vm0 = vcmp.eq.s32.totalorder %v1361_v24, 1  ;;  %vm594_vm1 = vcmp.eq.s32.totalorder %v1361_v24, 0 }
  0x2e   :  { %510 = vmatpush.bf16.msrb.mxu3 %v839_v11 }
  0x30   :  { %472 = vmatpush.bf16.msrb.mxu0 %v691_v17 }
  0x31   :  { %485 = vmatpush.bf16.msrb.mxu1 %v819_v18  ;;  %498 = vmatpush.bf16.msrb.mxu2 %v695_v19 }
  0x32   :  { %511 = vmatpush.bf16.msrb.mxu3 %v823_v23 }
  0x34   :  { %473 = vmatpush.bf16.msrb.mxu0 %v675_v29 }
  0x35   :  { %486 = vmatpush.bf16.msrb.mxu1 %v803_v30  ;;  %499 = vmatpush.bf16.msrb.mxu2 %v679_v31 }
  0x36   :  { %512 = vmatpush.bf16.msrb.mxu3 %v807_v35 }
  0x38   :  { %474 = vmatpush.bf16.msrb.mxu0 %v659_v41 }
  0x39   :  { %487 = vmatpush.bf16.msrb.mxu1 %v787_v42  ;;  %500 = vmatpush.bf16.msrb.mxu2 %v663_v43 }
  0x3a   :  { %513 = vmatpush.bf16.msrb.mxu3 %v791_v47 }
  0x3c   :  { %475 = vmatpush.bf16.msrb.mxu0 %v643_v54 }
  0x3d   :  { %488 = vmatpush.bf16.msrb.mxu1 %v771_v55  ;;  %501 = vmatpush.bf16.msrb.mxu2 %v647_v57 }
  0x3e   :  { %514 = vmatpush.bf16.msrb.mxu3 %v775_v61 }
  0x40   :  { %476 = vmatpush.bf16.msrb.mxu0 %v627_v3 }
  0x41   :  { %489 = vmatpush.bf16.msrb.mxu1 %v755_v4  ;;  %502 = vmatpush.bf16.msrb.mxu2 %v631_v5 }
  0x42   :  { %515 = vmatpush.bf16.msrb.mxu3 %v759_v6 }
  0x43   :  { %477 = vmatmul.bf16.vlgmr.msrb.gmra.mxu0 %v1193_v53 }
  0x44   :  { %490 = vmatmul.bf16.vlgmr.msrb.gmra.mxu1 %v1201_v56  ;;  %503 = vmatmul.bf16.vlgmr.msrb.gmra.mxu2 %v1193_v53 }
  0x45   :  { %516 = vmatmul.bf16.vlgmr.msrb.gmra.mxu3 %v1201_v56 }
  0xa0   :  { %v426_v7 = vpop.f32.mrf.mxu0 }
  0xa3   :  { %v439_v8 = vpop.f32.mrf.mxu1 }
  0xa4   :  { %v440_v9 = vadd.f32 %v439_v8, %v426_v7 }
  0xa6   :  { %536 = vst [vmem:[%s1401_s2] sm:$0xff] %v440_v9  ;;  %v540_v10 = vrot.slane %v440_v9, 4  ;;  %v564_v11 = vmul.f32 %v440_v9, %v440_v9 }
  0xa7   :  { %v452_v12 = vpop.f32.mrf.mxu2 }
  0xa8   :  { %v541_v13 = vadd.f32 %v540_v10, %v440_v9  ;;  %v568_v14 = vrot.slane %v564_v11, 4  ;;  %v428_v53 = vpop.f32.mrf.mxu0 }
  0xaa   :  { %v465_v15 = vpop.f32.mrf.mxu3  ;;  %v542_v18 = vrot.slane %v541_v13, 2  ;;  %v569_v19 = vadd.f32 %v568_v14, %v564_v11 }
  0xab   :  { %v466_v17 = vadd.f32 %v465_v15, %v452_v12  ;;  %v441_v21 = vpop.f32.mrf.mxu1 }
  0xac   :  { %v543_v22 = vadd.f32 %v542_v18, %v541_v13  ;;  %v570_v23 = vrot.slane %v569_v19, 2 }
  0xad   :  { %537 = vst [vmem:[%s1401_s2 + $0x8] sm:$0xff] %v466_v17  ;;  %v546_v56 = vrot.slane %v466_v17, 4  ;;  %v565_v20 = vmul.f32 %v466_v17, %v466_v17 }
  0xae   :  { %v544_v27 = vrot.slane %v543_v22, 1  ;;  %v571_v28 = vadd.f32 %v570_v23, %v569_v19 }
  0xaf   :  { %v547_v25 = vadd.f32 %v546_v56, %v466_v17  ;;  %v574_v26 = vrot.slane %v565_v20, 4  ;;  %v454_v31 = vpop.f32.mrf.mxu2 }
  0xb0   :  { %v572_v32 = vrot.slane %v571_v28, 1  ;;  %v545_v34 = vadd.f32 %v544_v27, %v543_v22 }
  0xb1   :  { %v548_v29 = vrot.slane %v547_v25, 2  ;;  %v575_v30 = vadd.f32 %v574_v26, %v565_v20 }
  0xb2   :  { %v467_v33 = vpop.f32.mrf.mxu3  ;;  %v573_v37 = vadd.f32 %v572_v32, %v571_v28 }
  0xb3   :  { %v549_v35 = vadd.f32 %v548_v29, %v547_v25  ;;  %v576_v36 = vrot.slane %v575_v30, 2 }
  0xb4   :  { %v596_v40 = vsel %vm595_vm0, %v573_v37, 0.0 }
  0xb5   :  { %v550_v38 = vrot.slane %v549_v35, 1  ;;  %v577_v39 = vadd.f32 %v576_v36, %v575_v30  ;;  %v600_v41 = vsel %vm594_vm1, %v545_v34, %v596_v40 }
  0xb6   :  { %604 = vst [vmem:[%s1402_s3] sm:$0xff] %v600_v41 }
  0xb7   :  { %v578_v42 = vrot.slane %v577_v39, 1  ;;  %v551_v43 = vadd.f32 %v550_v38, %v549_v35 }
  0xb9   :  { %v579_v44 = vadd.f32 %v578_v42, %v577_v39 }
  0xbb   :  { %v597_v45 = vsel %vm595_vm0, %v579_v44, 0.0 }
  0xbc   :  { %v601_v46 = vsel %vm594_vm1, %v551_v43, %v597_v45 }
  0xbd   :  { %605 = vst [vmem:[%s1402_s3 + $0x8] sm:$0xff] %v601_v46 }
  0xc0   :  { %v478_v47 = vpop.f32.mrf.mxu0 }
  0xc1   :  { %v491_v48 = vpop.f32.mrf.mxu1 }
  0xc2   :  { %v492_v49 = vadd.f32 %v491_v48, %v478_v47 }
  0xc4   :  { %538 = vst [vmem:[%s1401_s2 + $0x10] sm:$0xff] %v492_v49  ;;  %v552_v50 = vrot.slane %v492_v49, 4  ;;  %v566_v51 = vmul.f32 %v492_v49, %v492_v49 }
  0xc6   :  { %v553_v52 = vadd.f32 %v552_v50, %v492_v49  ;;  %v580_v54 = vrot.slane %v566_v51, 4 }
  0xc7   :  { %v504_v55 = vpop.f32.mrf.mxu2 }
  0xc8   :  { %v554_v57 = vrot.slane %v553_v52, 2  ;;  %v581_v58 = vadd.f32 %v580_v54, %v566_v51  ;;  %v517_v59 = vpop.f32.mrf.mxu3  ;;  %v480_v60 = vpop.f32.mrf.mxu0 }
  0xc9   :  { %v518_v61 = vadd.f32 %v517_v59, %v504_v55  ;;  %v493_v62 = vpop.f32.mrf.mxu1 }
  0xca   :  { %v555_v63 = vadd.f32 %v554_v57, %v553_v52  ;;  %v582_v0 = vrot.slane %v581_v58, 2 }
  0xcb   :  { %539 = vst [vmem:[%s1401_s2 + $0x18] sm:$0xff] %v518_v61  ;;  %v558_v1 = vrot.slane %v518_v61, 4  ;;  %v567_v2 = vmul.f32 %v518_v61, %v518_v61 }
  0xcc   :  { %v583_v3 = vadd.f32 %v582_v0, %v581_v58  ;;  %v556_v4 = vrot.slane %v555_v63, 1 }
  0xcd   :  { %v559_v5 = vadd.f32 %v558_v1, %v518_v61  ;;  %v586_v6 = vrot.slane %v567_v2, 4 }
  0xce   :  { %v584_v7 = vrot.slane %v583_v3, 1  ;;  %v557_v13 = vadd.f32 %v556_v4, %v555_v63 }
  0xcf   :  { %v560_v8 = vrot.slane %v559_v5, 2  ;;  %v587_v9 = vadd.f32 %v586_v6, %v567_v2  ;;  %v506_v10 = vpop.f32.mrf.mxu2 }
  0xd0   :  { %v585_v11 = vadd.f32 %v584_v7, %v583_v3  ;;  %v519_v12 = vpop.f32.mrf.mxu3 }
  0xd1   :  { %v561_v14 = vadd.f32 %v560_v8, %v559_v5  ;;  %v588_v15 = vrot.slane %v587_v9, 2 }
  0xd2   :  { %v598_v16 = vsel %vm595_vm0, %v585_v11, 0.0 }
  0xd3   :  { %v602_v17 = vsel %vm594_vm1, %v557_v13, %v598_v16  ;;  %v589_v18 = vadd.f32 %v588_v15, %v587_v9  ;;  %v562_v19 = vrot.slane %v561_v14, 1 }
  0xd4   :  { %606 = vst [vmem:[%s1402_s3 + $0x10] sm:$0xff] %v602_v17 }
  0xd5   :  { %v590_v53 = vrot.slane %v589_v18, 1  ;;  %v563_v20 = vadd.f32 %v562_v19, %v561_v14 }
  0xd7   :  { %v591_v56 = vadd.f32 %v590_v53, %v589_v18 }
  0xd9   :  { %v599_v21 = vsel %vm595_vm0, %v591_v56, 0.0 }
  0xda   :  { %v603_v22 = vsel %vm594_vm1, %v563_v20, %v599_v21 }
  0xdb   :  { %607 = vst [vmem:[%s1402_s3 + $0x18] sm:$0xff] %v603_v22 }

// kernel: resnet_backbone_forward.74
= control target key start
LH: loop header
LB: loop body
LE: loop exit
PB: predicated region body
PF: predicated region fallthrough
CT: control target
= control target key end

     0   :  { %s108_s0 = inlined_call_operand.vmem [shape: f32[8,512], index: 0, kind: input, shape index: {}]   ;;  %s109_s1 = inlined_call_operand.vmem [shape: f32[1,512], index: 1, kind: input, shape index: {}]   ;;  %s110_s2 = inlined_call_operand.vmem [shape: f32[1,512], index: 2, kind: input, shape index: {}]   ;;  %s111_s3 = inlined_call_operand.vmem [shape: f32[8,512], index: 3, kind: output, shape index: {}]  }
   0x1   :  { %v14_v0 = vld [vmem:[%s108_s0] sm:$0xff]  ;;  %v15_v5 = vld [vmem:[%s108_s0 + $0x8] sm:$0xff]  ;;  %v16_v8 = vld [vmem:[%s108_s0 + $0x10] sm:$0xff] }
   0x2   :  { %v18_v1 = vld [vmem:[%s109_s1] sm:$0xf]  ;;  %v17_v11 = vld [vmem:[%s108_s0 + $0x18] sm:$0xff] }
   0x3   :  { %v32_v2 = vld [vmem:[%s110_s2] sm:$0xf]  ;;  %v20_v3 = vperm.slane %v18_v1, 0  ;;  %v21_v6 = vperm.slane %v18_v1, 1  ;;  %v22_v9 = vperm.slane %v18_v1, 2  ;;  %v23_v12 = vperm.slane %v18_v1, 3 }
   0x4   :  { %v34_v4 = vperm.slane %v32_v2, 0  ;;  %v35_v7 = vperm.slane %v32_v2, 1  ;;  %v36_v10 = vperm.slane %v32_v2, 2  ;;  %v37_v13 = vperm.slane %v32_v2, 3 }
   0x5   :  { %v28_v14 = vmul.f32 %v20_v3, %v14_v0  ;;  %v29_v15 = vmul.f32 %v21_v6, %v15_v5  ;;  %v30_v16 = vmul.f32 %v22_v9, %v16_v8  ;;  %v31_v17 = vmul.f32 %v23_v12, %v17_v11 }
   0x7   :  { %v42_v18 = vadd.f32 %v34_v4, %v28_v14  ;;  %v43_v19 = vadd.f32 %v35_v7, %v29_v15  ;;  %v44_v20 = vadd.f32 %v36_v10, %v30_v16  ;;  %v45_v21 = vadd.f32 %v37_v13, %v31_v17 }
   0x9   :  { %v46_v22 = vmax.f32 %v42_v18, 0.0  ;;  %v47_v23 = vmax.f32 %v43_v19, 0.0  ;;  %v48_v24 = vmax.f32 %v44_v20, 0.0  ;;  %v49_v25 = vmax.f32 %v45_v21, 0.0 }
   0xb   :  { %50 = vst [vmem:[%s111_s3] sm:$0xff] %v46_v22 }
   0xc   :  { %51 = vst [vmem:[%s111_s3 + $0x8] sm:$0xff] %v47_v23 }
   0xd   :  { %52 = vst [vmem:[%s111_s3 + $0x10] sm:$0xff] %v48_v24 }
   0xe   :  { %53 = vst [vmem:[%s111_s3 + $0x18] sm:$0xff] %v49_v25 }

// kernel: resnet_backbone_forward.73
= control target key start
LH: loop header
LB: loop body
LE: loop exit
PB: predicated region body
PF: predicated region fallthrough
CT: control target
= control target key end

     0   :  { %s1348_s12 = smov 0   ;;  %s1350_s13 = smov 0   ;;  %s1564_s0 = inlined_call_operand.vmem [shape: bf16[8,2304], index: 0, kind: input, shape index: {}]   ;;  %s1565_s1 = inlined_call_operand.vmem [shape: bf16[2304,512], index: 1, kind: input, shape index: {}]   ;;  %s1566_s2 = inlined_call_operand.vmem [shape: f32[8,512], index: 2, kind: output, shape index: {0}]   ;;  %s1567_s3 = inlined_call_operand.vmem [shape: f32[8,512], index: 3, kind: output, shape index: {1}]  }
   0x1   :  { %s1352_s14 = smov 0  }
   0x2 LB: > { %s23_s15 = sadd.s32 1, %s1321_s13  ;;  %p945_p0 = scmp.ge.s32.totalorder %s1325_s14, 1  ;;  %s1325_s14 = sphi %s1352_s14, %s14_s14   ;;  %s1321_s13 = sphi %s1350_s13, %s1569_s13   ;;  %s1317_s12 = sphi %s1348_s12, %s1568_s12  }
   0x3   : > { %p24_p1 = scmp.ge.s32.totalorder %s23_s15, 9  ;;  %p171_p2 = scmp.lt.s32.totalorder %s1325_s14, 10 }
   0x5   : > { %s1571_s15 = smov (%p24_p1, %s23_s15), 0  ;;  %p172_p3 = pnand %p945_p0, %p171_p2 }
   0x6   : > { %s946_s16 = sshll.u32 (!%p172_p3), %s1317_s12, 1  ;;  %s948_s17 = sshll.u32 (!%p172_p3), %s1317_s12, 5 }
   0x7   : > { %175 = sbr.rel (%p172_p3) target bundleno = 255 (0xff), region = 28  ;;  %p213_p4 = scmp.lt.s32.totalorder (!%p172_p3), %s946_s16, 17 }
   0x8   : > { %p221_p5 = scmp.lt.s32.totalorder (!%p172_p3), %s948_s17, 287  ;;  %p951_p6 = scmp.ne.s32.totalorder (!%p172_p3), %s1317_s12, 0 }
   0xc   : > { %s1573_s16 = smov (!%p213_p4, %s946_s16), 17  ;;  %s1575_s17 = smov (!%p221_p5, %s948_s17), 287 }
   0xd   : > { %s947_s18 = sshll.u32 %s1573_s16, 2  ;;  %s1213_s22 = sshll.u32 %s1575_s17, 4 }
   0xe   : > { %s1373_s21 = scalar_lea.vmem %s1564_s0, %s947_s18  ;;  %s1378_s25 = scalar_lea.vmem %s1565_s1, %s1213_s22 }
   0xf   : > { %240 = sbr.rel (%p951_p6) target bundleno = 25 (0x19), region = 32 }
  0x14   : > { %v1327_v0 = vmov 0.0  }
  0x15   : > { %241 = vst [vmem:[#allocation2 + $0x10] sm:$0xff] %v1327_v0 }
  0x16   : > { %242 = vst [vmem:[#allocation2] sm:$0xff] %v1327_v0 }
  0x17   : > { %243 = vst [vmem:[#allocation2 + $0x18] sm:$0xff] %v1327_v0 }
  0x18   : > { %244 = vst [vmem:[#allocation2 + $0x8] sm:$0xff] %v1327_v0 }
  0x19 PF: > { %v1066_v1 = vld [vmem:[%s1378_s25 + $0xe0] sm:$0xf]  ;;  %v1244_v2 = vld [vmem:[%s1378_s25 + $0xec] sm:$0xf0]  ;;  %v1242_v6 = vld [vmem:[%s1378_s25 + $0xe4] sm:$0xf] }
  0x1a   : > { %v1194_v3 = vld [vmem:[%s1378_s25 + $0x1e0] sm:$0xf]  ;;  %v1067_v4 = vor.u32 %v1244_v2, %v1066_v1  ;;  %v1276_v5 = vld [vmem:[%s1378_s25 + $0x1ec] sm:$0xf0]  ;;  %v1068_v7 = vld [vmem:[%s1378_s25 + $0xf0] sm:$0xf0] }
  0x1b   : > { %v1195_v8 = vor.u32 %v1276_v5, %v1194_v3  ;;  %v1071_v9 = vor.u32 %v1242_v6, %v1068_v7  ;;  %v1274_v10 = vld [vmem:[%s1378_s25 + $0x1e4] sm:$0xf]  ;;  %v1196_v11 = vld [vmem:[%s1378_s25 + $0x1f0] sm:$0xf0]  ;;  %v1050_v12 = vld [vmem:[%s1378_s25 + $0xc0] sm:$0xf] }
  0x1c   : > { %641 = vmatpush.bf16.msra.mxu0 %v1067_v4  ;;  %v1199_v13 = vor.u32 %v1274_v10, %v1196_v11  ;;  %v1240_v14 = vld [vmem:[%s1378_s25 + $0xcc] sm:$0xf0]  ;;  %v1178_v15 = vld [vmem:[%s1378_s25 + $0x1c0] sm:$0xf]  ;;  %v1238_v19 = vld [vmem:[%s1378_s25 + $0xc4] sm:$0xf] }
  0x1d   : > { %v1272_v16 = vld [vmem:[%s1378_s25 + $0x1cc] sm:$0xf0]  ;;  %654 = vmatpush.bf16.msra.mxu1 %v1195_v8  ;;  %667 = vmatpush.bf16.msra.mxu2 %v1071_v9  ;;  %v1051_v17 = vor.u32 %v1240_v14, %v1050_v12  ;;  %v1052_v20 = vld [vmem:[%s1378_s25 + $0xd0] sm:$0xf0]  ;;  %v1270_v21 = vld [vmem:[%s1378_s25 + $0x1c4] sm:$0xf] }
  0x1e   : > { %v1179_v18 = vor.u32 %v1272_v16, %v1178_v15  ;;  %680 = vmatpush.bf16.msra.mxu3 %v1199_v13  ;;  %v1055_v22 = vor.u32 %v1238_v19, %v1052_v20  ;;  %v1180_v23 = vld [vmem:[%s1378_s25 + $0x1d0] sm:$0xf0]  ;;  %v1034_v24 = vld [vmem:[%s1378_s25 + $0xa0] sm:$0xf]  ;;  %v1236_v25 = vld [vmem:[%s1378_s25 + $0xac] sm:$0xf0] }
  0x1f   : > { %v1183_v26 = vor.u32 %v1270_v21, %v1180_v23  ;;  %v1162_v27 = vld [vmem:[%s1378_s25 + $0x1a0] sm:$0xf]  ;;  %v1268_v28 = vld [vmem:[%s1378_s25 + $0x1ac] sm:$0xf0]  ;;  %v1234_v29 = vld [vmem:[%s1378_s25 + $0xa4] sm:$0xf]  ;;  %v1035_v30 = vor.u32 %v1236_v25, %v1034_v24 }
  0x20   : > { %642 = vmatpush.bf16.msra.mxu0 %v1051_v17  ;;  %v1036_v31 = vld [vmem:[%s1378_s25 + $0xb0] sm:$0xf0]  ;;  %v1266_v32 = vld [vmem:[%s1378_s25 + $0x1a4] sm:$0xf]  ;;  %v1163_v34 = vor.u32 %v1268_v28, %v1162_v27  ;;  %v1018_v36 = vld [vmem:[%s1378_s25 + $0x80] sm:$0xf] }
  0x21   : > { %v1164_v33 = vld [vmem:[%s1378_s25 + $0x1b0] sm:$0xf0]  ;;  %655 = vmatpush.bf16.msra.mxu1 %v1179_v18  ;;  %668 = vmatpush.bf16.msra.mxu2 %v1055_v22  ;;  %v1039_v35 = vor.u32 %v1234_v29, %v1036_v31  ;;  %v1232_v37 = vld [vmem:[%s1378_s25 + $0x8c] sm:$0xf0]  ;;  %v1146_v38 = vld [vmem:[%s1378_s25 + $0x180] sm:$0xf] }
  0x22   : > { %681 = vmatpush.bf16.msra.mxu3 %v1183_v26  ;;  %v1167_v39 = vor.u32 %v1266_v32, %v1164_v33  ;;  %v1264_v40 = vld [vmem:[%s1378_s25 + $0x18c] sm:$0xf0]  ;;  %v1230_v41 = vld [vmem:[%s1378_s25 + $0x84] sm:$0xf]  ;;  %v1020_v42 = vld [vmem:[%s1378_s25 + $0x90] sm:$0xf0]  ;;  %v1019_v45 = vor.u32 %v1232_v37, %v1018_v36 }
  0x23   : > { %v1262_v43 = vld [vmem:[%s1378_s25 + $0x184] sm:$0xf]  ;;  %v1148_v44 = vld [vmem:[%s1378_s25 + $0x190] sm:$0xf0]  ;;  %v1147_v46 = vor.u32 %v1264_v40, %v1146_v38  ;;  %v1023_v47 = vor.u32 %v1230_v41, %v1020_v42  ;;  %v1002_v48 = vld [vmem:[%s1378_s25 + $0x60] sm:$0xf] }
  0x24   : > { %643 = vmatpush.bf16.msra.mxu0 %v1035_v30  ;;  %v1228_v49 = vld [vmem:[%s1378_s25 + $0x6c] sm:$0xf0]  ;;  %v1130_v50 = vld [vmem:[%s1378_s25 + $0x160] sm:$0xf]  ;;  %v1151_v51 = vor.u32 %v1262_v43, %v1148_v44  ;;  %v1226_v53 = vld [vmem:[%s1378_s25 + $0x64] sm:$0xf] }
  0x25   : > { %656 = vmatpush.bf16.msra.mxu1 %v1163_v34  ;;  %669 = vmatpush.bf16.msra.mxu2 %v1039_v35  ;;  %v1260_v52 = vld [vmem:[%s1378_s25 + $0x16c] sm:$0xf0]  ;;  %v1004_v54 = vld [vmem:[%s1378_s25 + $0x70] sm:$0xf0]  ;;  %v1258_v55 = vld [vmem:[%s1378_s25 + $0x164] sm:$0xf]  ;;  %v1003_v57 = vor.u32 %v1228_v49, %v1002_v48 }
  0x26   : > { %682 = vmatpush.bf16.msra.mxu3 %v1167_v39  ;;  %v1132_v56 = vld [vmem:[%s1378_s25 + $0x170] sm:$0xf0]  ;;  %v1131_v58 = vor.u32 %v1260_v52, %v1130_v50  ;;  %v1007_v59 = vor.u32 %v1226_v53, %v1004_v54  ;;  %v986_v60 = vld [vmem:[%s1378_s25 + $0x40] sm:$0xf]  ;;  %v1224_v61 = vld [vmem:[%s1378_s25 + $0x4c] sm:$0xf0] }
  0x27   : > { %v1114_v62 = vld [vmem:[%s1378_s25 + $0x140] sm:$0xf]  ;;  %v1135_v63 = vor.u32 %v1258_v55, %v1132_v56  ;;  %v1256_v0 = vld [vmem:[%s1378_s25 + $0x14c] sm:$0xf0]  ;;  %v1222_v1 = vld [vmem:[%s1378_s25 + $0x44] sm:$0xf]  ;;  %v987_v5 = vor.u32 %v1224_v61, %v986_v60 }
  0x28   : > { %644 = vmatpush.bf16.msra.mxu0 %v1019_v45  ;;  %v988_v2 = vld [vmem:[%s1378_s25 + $0x50] sm:$0xf0]  ;;  %v1254_v3 = vld [vmem:[%s1378_s25 + $0x144] sm:$0xf]  ;;  %v1115_v6 = vor.u32 %v1256_v0, %v1114_v62  ;;  %v970_v8 = vld [vmem:[%s1378_s25 + $0x20] sm:$0xf] }
  0x29   : > { %657 = vmatpush.bf16.msra.mxu1 %v1147_v46  ;;  %670 = vmatpush.bf16.msra.mxu2 %v1023_v47  ;;  %v1116_v4 = vld [vmem:[%s1378_s25 + $0x150] sm:$0xf0]  ;;  %v991_v7 = vor.u32 %v1222_v1, %v988_v2  ;;  %v1220_v9 = vld [vmem:[%s1378_s25 + $0x2c] sm:$0xf0]  ;;  %v1098_v10 = vld [vmem:[%s1378_s25 + $0x120] sm:$0xf] }
  0x2a   : > { %683 = vmatpush.bf16.msra.mxu3 %v1151_v51  ;;  %v1119_v11 = vor.u32 %v1254_v3, %v1116_v4  ;;  %v1252_v12 = vld [vmem:[%s1378_s25 + $0x12c] sm:$0xf0]  ;;  %v1218_v13 = vld [vmem:[%s1378_s25 + $0x24] sm:$0xf]  ;;  %v972_v14 = vld [vmem:[%s1378_s25 + $0x30] sm:$0xf0]  ;;  %v971_v17 = vor.u32 %v1220_v9, %v970_v8 }
  0x2b   : > { %v1250_v15 = vld [vmem:[%s1378_s25 + $0x124] sm:$0xf]  ;;  %v1100_v16 = vld [vmem:[%s1378_s25 + $0x130] sm:$0xf0]  ;;  %v954_v18 = vld [vmem:[%s1378_s25] sm:$0xf]  ;;  %v1099_v21 = vor.u32 %v1252_v12, %v1098_v10  ;;  %v975_v22 = vor.u32 %v1218_v13, %v972_v14 }
  0x2c   : > { %645 = vmatpush.bf16.msra.mxu0 %v1003_v57  ;;  %v1216_v19 = vld [vmem:[%s1378_s25 + $0xc] sm:$0xf0]  ;;  %v1082_v20 = vld [vmem:[%s1378_s25 + $0x100] sm:$0xf]  ;;  %v1214_v24 = vld [vmem:[%s1378_s25 + $0x4] sm:$0xf]  ;;  %v1103_v26 = vor.u32 %v1250_v15, %v1100_v16 }
  0x2d   : > { %658 = vmatpush.bf16.msra.mxu1 %v1131_v58  ;;  %671 = vmatpush.bf16.msra.mxu2 %v1007_v59  ;;  %v1248_v23 = vld [vmem:[%s1378_s25 + $0x10c] sm:$0xf0]  ;;  %v956_v25 = vld [vmem:[%s1378_s25 + $0x10] sm:$0xf0]  ;;  %v1246_v27 = vld [vmem:[%s1378_s25 + $0x104] sm:$0xf]  ;;  %v955_v33 = vor.u32 %v1216_v19, %v954_v18 }
  0x2e   : > { %684 = vmatpush.bf16.msra.mxu3 %v1135_v63  ;;  %v1084_v28 = vld [vmem:[%s1378_s25 + $0x110] sm:$0xf0]  ;;  %v1074_v29 = vld [vmem:[%s1378_s25 + $0xe8] sm:$0xf]  ;;  %v1245_v30 = vld [vmem:[%s1378_s25 + $0xf4] sm:$0xf0]  ;;  %v1083_v38 = vor.u32 %v1248_v23, %v1082_v20  ;;  %v959_v39 = vor.u32 %v1214_v24, %v956_v25 }
  0x2f   : > { %v1202_v31 = vld [vmem:[%s1378_s25 + $0x1e8] sm:$0xf]  ;;  %v249_v32 = vld [vmem:[%s1373_s21] sm:$0xff]  ;;  %v1277_v34 = vld [vmem:[%s1378_s25 + $0x1f4] sm:$0xf0]  ;;  %v1087_v43 = vor.u32 %v1246_v27, %v1084_v28  ;;  %v1075_v44 = vor.u32 %v1245_v30, %v1074_v29  ;;  %p1208_p7 = scmp.ne.s32.totalorder %s1317_s12, 8 }
  0x30   : > { %646 = vmatpush.bf16.msra.mxu0 %v987_v5  ;;  %v1243_v35 = vld [vmem:[%s1378_s25 + $0xec] sm:$0xf]  ;;  %v1076_v36 = vld [vmem:[%s1378_s25 + $0xf8] sm:$0xf0]  ;;  %v315_v37 = vunpack.c.l.b16 %v249_v32  ;;  %v316_v42 = vunpack.c.h.b16 %v249_v32  ;;  %v1203_v45 = vor.u32 %v1277_v34, %v1202_v31  ;;  %v1058_v47 = vld [vmem:[%s1378_s25 + $0xc8] sm:$0xf] }
  0x31   : > { %659 = vmatpush.bf16.msra.mxu1 %v1115_v6  ;;  %672 = vmatpush.bf16.msra.mxu2 %v991_v7  ;;  %v1275_v40 = vld [vmem:[%s1378_s25 + $0x1ec] sm:$0xf]  ;;  %v1204_v41 = vld [vmem:[%s1378_s25 + $0x1f8] sm:$0xf0]  ;;  %v1079_v46 = vor.u32 %v1243_v35, %v1076_v36  ;;  %v1241_v48 = vld [vmem:[%s1378_s25 + $0xd4] sm:$0xf0] }
  0x32   : > { %685 = vmatpush.bf16.msra.mxu3 %v1119_v11  ;;  %v1186_v49 = vld [vmem:[%s1378_s25 + $0x1c8] sm:$0xf]  ;;  %v1207_v50 = vor.u32 %v1275_v40, %v1204_v41  ;;  %v1273_v51 = vld [vmem:[%s1378_s25 + $0x1d4] sm:$0xf0]  ;;  %v1239_v52 = vld [vmem:[%s1378_s25 + $0xcc] sm:$0xf]  ;;  %v1460_v54 = vpack.c.b16 %v315_v37, %v315_v37  ;;  %v1464_v57 = vpack.c.b16 %v316_v42, %v316_v42  ;;  %v1059_v58 = vor.u32 %v1241_v48, %v1058_v47 }
  0x33   : > { %v1060_v53 = vld [vmem:[%s1378_s25 + $0xd8] sm:$0xf0]  ;;  %v1271_v55 = vld [vmem:[%s1378_s25 + $0x1cc] sm:$0xf]  ;;  %v1187_v59 = vor.u32 %v1273_v51, %v1186_v49  ;;  %v1042_v61 = vld [vmem:[%s1378_s25 + $0xa8] sm:$0xf] }
  0x34   : > { %647 = vmatpush.bf16.msra.mxu0 %v971_v17  ;;  %v1188_v56 = vld [vmem:[%s1378_s25 + $0x1d8] sm:$0xf0]  ;;  %v1063_v60 = vor.u32 %v1239_v52, %v1060_v53  ;;  %v1237_v62 = vld [vmem:[%s1378_s25 + $0xb4] sm:$0xf0]  ;;  %v1170_v63 = vld [vmem:[%s1378_s25 + $0x1a8] sm:$0xf] }
  0x35   : > { %660 = vmatpush.bf16.msra.mxu1 %v1099_v21  ;;  %673 = vmatpush.bf16.msra.mxu2 %v975_v22  ;;  %v1191_v0 = vor.u32 %v1271_v55, %v1188_v56  ;;  %v1269_v1 = vld [vmem:[%s1378_s25 + $0x1b4] sm:$0xf0]  ;;  %v1235_v2 = vld [vmem:[%s1378_s25 + $0xac] sm:$0xf]  ;;  %v1044_v3 = vld [vmem:[%s1378_s25 + $0xb8] sm:$0xf0]  ;;  %v1043_v6 = vor.u32 %v1237_v62, %v1042_v61 }
  0x36   : > { %686 = vmatpush.bf16.msra.mxu3 %v1103_v26  ;;  %v1267_v4 = vld [vmem:[%s1378_s25 + $0x1ac] sm:$0xf]  ;;  %v1172_v5 = vld [vmem:[%s1378_s25 + $0x1b8] sm:$0xf0]  ;;  %v1171_v7 = vor.u32 %v1269_v1, %v1170_v63  ;;  %v1047_v8 = vor.u32 %v1235_v2, %v1044_v3  ;;  %v1026_v9 = vld [vmem:[%s1378_s25 + $0x88] sm:$0xf] }
  0x37   : > { %v1233_v10 = vld [vmem:[%s1378_s25 + $0x94] sm:$0xf0]  ;;  %v1154_v11 = vld [vmem:[%s1378_s25 + $0x188] sm:$0xf]  ;;  %v1175_v12 = vor.u32 %v1267_v4, %v1172_v5  ;;  %v1231_v14 = vld [vmem:[%s1378_s25 + $0x8c] sm:$0xf] }
  0x38   : > { %648 = vmatpush.bf16.msra.mxu0 %v955_v33  ;;  %v1265_v13 = vld [vmem:[%s1378_s25 + $0x194] sm:$0xf0]  ;;  %v1028_v15 = vld [vmem:[%s1378_s25 + $0x98] sm:$0xf0]  ;;  %v1263_v16 = vld [vmem:[%s1378_s25 + $0x18c] sm:$0xf]  ;;  %v1027_v18 = vor.u32 %v1233_v10, %v1026_v9 }
  0x39   : > { %661 = vmatpush.bf16.msra.mxu1 %v1083_v38  ;;  %674 = vmatpush.bf16.msra.mxu2 %v959_v39  ;;  %v1156_v17 = vld [vmem:[%s1378_s25 + $0x198] sm:$0xf0]  ;;  %v1155_v19 = vor.u32 %v1265_v13, %v1154_v11  ;;  %v1031_v20 = vor.u32 %v1231_v14, %v1028_v15  ;;  %v1010_v21 = vld [vmem:[%s1378_s25 + $0x68] sm:$0xf]  ;;  %v1229_v22 = vld [vmem:[%s1378_s25 + $0x74] sm:$0xf0] }
  0x3a   : > { %687 = vmatpush.bf16.msra.mxu3 %v1087_v43  ;;  %v1138_v23 = vld [vmem:[%s1378_s25 + $0x168] sm:$0xf]  ;;  %v1159_v24 = vor.u32 %v1263_v16, %v1156_v17  ;;  %v1261_v25 = vld [vmem:[%s1378_s25 + $0x174] sm:$0xf0]  ;;  %v1227_v26 = vld [vmem:[%s1378_s25 + $0x6c] sm:$0xf]  ;;  %v1011_v30 = vor.u32 %v1229_v22, %v1010_v21 }
  0x3b   : > { %649 = vmatmul.bf16.vlgmr.msra.gmra.mxu0 %v1460_v54  ;;  %v1012_v27 = vld [vmem:[%s1378_s25 + $0x78] sm:$0xf0]  ;;  %v1259_v28 = vld [vmem:[%s1378_s25 + $0x16c] sm:$0xf]  ;;  %v1139_v31 = vor.u32 %v1261_v25, %v1138_v23  ;;  %v994_v33 = vld [vmem:[%s1378_s25 + $0x48] sm:$0xf] }
  0x3c   : > { %693 = vmatpush.bf16.msrb.mxu0 %v1075_v44  ;;  %675 = vmatmul.bf16.vlgmr.msra.gmra.mxu2 %v1460_v54  ;;  %v1140_v29 = vld [vmem:[%s1378_s25 + $0x178] sm:$0xf0]  ;;  %v1015_v32 = vor.u32 %v1227_v26, %v1012_v27  ;;  %v1225_v34 = vld [vmem:[%s1378_s25 + $0x54] sm:$0xf0]  ;;  %v1122_v35 = vld [vmem:[%s1378_s25 + $0x148] sm:$0xf] }
  0x3d   : > { %706 = vmatpush.bf16.msrb.mxu1 %v1203_v45  ;;  %719 = vmatpush.bf16.msrb.mxu2 %v1079_v46  ;;  %v1143_v36 = vor.u32 %v1259_v28, %v1140_v29  ;;  %v1257_v37 = vld [vmem:[%s1378_s25 + $0x154] sm:$0xf0]  ;;  %v1223_v38 = vld [vmem:[%s1378_s25 + $0x4c] sm:$0xf]  ;;  %v996_v39 = vld [vmem:[%s1378_s25 + $0x58] sm:$0xf0]  ;;  %v995_v42 = vor.u32 %v1225_v34, %v994_v33 }
  0x3e   : > { %732 = vmatpush.bf16.msrb.mxu3 %v1207_v50  ;;  %662 = vmatmul.bf16.vlgmr.msra.gmra.mxu1 %v1464_v57  ;;  %v1255_v40 = vld [vmem:[%s1378_s25 + $0x14c] sm:$0xf]  ;;  %v1124_v41 = vld [vmem:[%s1378_s25 + $0x158] sm:$0xf0]  ;;  %v1123_v43 = vor.u32 %v1257_v37, %v1122_v35  ;;  %v999_v44 = vor.u32 %v1223_v38, %v996_v39  ;;  %v978_v45 = vld [vmem:[%s1378_s25 + $0x28] sm:$0xf] }
  0x3f   : > { %688 = vmatmul.bf16.vlgmr.msra.gmra.mxu3 %v1464_v57  ;;  %v1221_v46 = vld [vmem:[%s1378_s25 + $0x34] sm:$0xf0]  ;;  %v1106_v47 = vld [vmem:[%s1378_s25 + $0x128] sm:$0xf]  ;;  %v1127_v48 = vor.u32 %v1255_v40, %v1124_v41  ;;  %v1219_v50 = vld [vmem:[%s1378_s25 + $0x2c] sm:$0xf] }
  0x40   : > { %694 = vmatpush.bf16.msrb.mxu0 %v1059_v58  ;;  %v1253_v49 = vld [vmem:[%s1378_s25 + $0x134] sm:$0xf0]  ;;  %v980_v51 = vld [vmem:[%s1378_s25 + $0x38] sm:$0xf0]  ;;  %v1251_v52 = vld [vmem:[%s1378_s25 + $0x12c] sm:$0xf]  ;;  %v979_v55 = vor.u32 %v1221_v46, %v978_v45 }
  0x41   : > { %707 = vmatpush.bf16.msrb.mxu1 %v1187_v59  ;;  %720 = vmatpush.bf16.msrb.mxu2 %v1063_v60  ;;  %v1108_v53 = vld [vmem:[%s1378_s25 + $0x138] sm:$0xf0]  ;;  %v1107_v56 = vor.u32 %v1253_v49, %v1106_v47  ;;  %v983_v58 = vor.u32 %v1219_v50, %v980_v51  ;;  %v962_v59 = vld [vmem:[%s1378_s25 + $0x8] sm:$0xf]  ;;  %v1217_v60 = vld [vmem:[%s1378_s25 + $0x14] sm:$0xf0] }
  0x42   : > { %733 = vmatpush.bf16.msrb.mxu3 %v1191_v0  ;;  %v1090_v61 = vld [vmem:[%s1378_s25 + $0x108] sm:$0xf]  ;;  %v1111_v62 = vor.u32 %v1251_v52, %v1108_v53  ;;  %v1249_v63 = vld [vmem:[%s1378_s25 + $0x114] sm:$0xf0]  ;;  %v1215_v0 = vld [vmem:[%s1378_s25 + $0xc] sm:$0xf]  ;;  %v963_v4 = vor.u32 %v1217_v60, %v962_v59 }
  0x43   : > { %v964_v1 = vld [vmem:[%s1378_s25 + $0x18] sm:$0xf0]  ;;  %v1247_v2 = vld [vmem:[%s1378_s25 + $0x10c] sm:$0xf]  ;;  %v1091_v5 = vor.u32 %v1249_v63, %v1090_v61  ;;  %v245_v9 = vld [vmem:[#allocation2 + $0x10] sm:$0xff] }
  0x44   : > { %695 = vmatpush.bf16.msrb.mxu0 %v1043_v6  ;;  %v1092_v3 = vld [vmem:[%s1378_s25 + $0x118] sm:$0xf0]  ;;  %v967_v6 = vor.u32 %v1215_v0, %v964_v1  ;;  %v246_v14 = vld [vmem:[#allocation2] sm:$0xff]  ;;  %v248_v26 = vld [vmem:[#allocation2 + $0x8] sm:$0xff] }
  0x45   : > { %708 = vmatpush.bf16.msrb.mxu1 %v1171_v7  ;;  %721 = vmatpush.bf16.msrb.mxu2 %v1047_v8  ;;  %v1095_v7 = vor.u32 %v1247_v2, %v1092_v3 }
  0x46   : > { %734 = vmatpush.bf16.msrb.mxu3 %v1175_v12 }
  0x48   : > { %696 = vmatpush.bf16.msrb.mxu0 %v1027_v18 }
  0x49   : > { %709 = vmatpush.bf16.msrb.mxu1 %v1155_v19  ;;  %722 = vmatpush.bf16.msrb.mxu2 %v1031_v20 }
  0x4a   : > { %735 = vmatpush.bf16.msrb.mxu3 %v1159_v24 }
  0x4c   : > { %697 = vmatpush.bf16.msrb.mxu0 %v1011_v30 }
  0x4d   : > { %710 = vmatpush.bf16.msrb.mxu1 %v1139_v31  ;;  %723 = vmatpush.bf16.msrb.mxu2 %v1015_v32 }
  0x4e   : > { %736 = vmatpush.bf16.msrb.mxu3 %v1143_v36 }
  0x50   : > { %698 = vmatpush.bf16.msrb.mxu0 %v995_v42 }
  0x51   : > { %711 = vmatpush.bf16.msrb.mxu1 %v1123_v43  ;;  %724 = vmatpush.bf16.msrb.mxu2 %v999_v44 }
  0x52   : > { %737 = vmatpush.bf16.msrb.mxu3 %v1127_v48 }
  0x54   : > { %699 = vmatpush.bf16.msrb.mxu0 %v979_v55 }
  0x55   : > { %712 = vmatpush.bf16.msrb.mxu1 %v1107_v56  ;;  %725 = vmatpush.bf16.msrb.mxu2 %v983_v58 }
  0x56   : > { %738 = vmatpush.bf16.msrb.mxu3 %v1111_v62 }
  0x58   : > { %700 = vmatpush.bf16.msrb.mxu0 %v963_v4 }
  0x59   : > { %713 = vmatpush.bf16.msrb.mxu1 %v1091_v5  ;;  %726 = vmatpush.bf16.msrb.mxu2 %v967_v6 }
  0x5a   : > { %739 = vmatpush.bf16.msrb.mxu3 %v1095_v7 }
  0x5b   : > { %701 = vmatmul.bf16.vlgmr.msrb.gmra.mxu0 %v1460_v54 }
  0x5c   : > { %714 = vmatmul.bf16.vlgmr.msrb.gmra.mxu1 %v1464_v57  ;;  %727 = vmatmul.bf16.vlgmr.msrb.gmra.mxu2 %v1460_v54  ;;  %v247_v54 = vld [vmem:[#allocation2 + $0x18] sm:$0xff] }
  0x5d   : > { %740 = vmatmul.bf16.vlgmr.msrb.gmra.mxu3 %v1464_v57 }
  0xb8   : > { %v650_v8 = vpop.f32.mrf.mxu0 }
  0xbb   : > { %v663_v10 = vpop.f32.mrf.mxu1 }
  0xbc   : > { %v664_v11 = vadd.f32 %v663_v10, %v650_v8 }
  0xbe   : > { %v745_v12 = vadd.f32 %v664_v11, %v245_v9 }
  0xbf   : > { %v676_v13 = vpop.f32.mrf.mxu2 }
  0xc0   : > { %749 = vst [vmem:[#allocation2 + $0x10] sm:$0xff] %v745_v12  ;;  %v652_v17 = vpop.f32.mrf.mxu0 }
  0xc2   : > { %v689_v15 = vpop.f32.mrf.mxu3 }
  0xc3   : > { %v690_v16 = vadd.f32 %v689_v15, %v676_v13  ;;  %v665_v19 = vpop.f32.mrf.mxu1 }
  0xc5   : > { %v746_v18 = vadd.f32 %v690_v16, %v246_v14 }
  0xc7   : > { %750 = vst [vmem:[#allocation2] sm:$0xff] %v746_v18  ;;  %v678_v20 = vpop.f32.mrf.mxu2 }
  0xca   : > { %v691_v21 = vpop.f32.mrf.mxu3 }
  0xd8   : > { %v702_v22 = vpop.f32.mrf.mxu0 }
  0xd9   : > { %v715_v23 = vpop.f32.mrf.mxu1 }
  0xda   : > { %v716_v57 = vadd.f32 %v715_v23, %v702_v22 }
  0xdc   : > { %v747_v24 = vadd.f32 %v716_v57, %v247_v54 }
  0xde   : > { %751 = vst [vmem:[#allocation2 + $0x18] sm:$0xff] %v747_v24 }
  0xdf   : > { %v728_v25 = vpop.f32.mrf.mxu2 }
  0xe0   : > { %v741_v27 = vpop.f32.mrf.mxu3  ;;  %v704_v28 = vpop.f32.mrf.mxu0 }
  0xe1   : > { %v742_v29 = vadd.f32 %v741_v27, %v728_v25  ;;  %v717_v30 = vpop.f32.mrf.mxu1 }
  0xe3   : > { %v748_v31 = vadd.f32 %v742_v29, %v248_v26 }
  0xe4   : > { %756 = sbr.rel (%p1208_p7) target bundleno = 255 (0xff), region = 36 }
  0xe5   : > { %752 = vst [vmem:[#allocation2 + $0x8] sm:$0xff] %v748_v31 }
  0xe7   : > { %v730_v32 = vpop.f32.mrf.mxu2 }
  0xe8   : > { %v743_v33 = vpop.f32.mrf.mxu3 }
  0xe9   : > { %v757_v34 = vld [vmem:[#allocation2 + $0x10] sm:$0xff]  ;;  %v758_v35 = vld [vmem:[#allocation2] sm:$0xff]  ;;  %v759_v36 = vld [vmem:[#allocation2 + $0x18] sm:$0xff]  ;;  %v817_v37 = vlaneseq }
  0xea   : > { %761 = vst [vmem:[%s1566_s2] sm:$0xff] %v757_v34  ;;  %v765_v38 = vrot.slane %v757_v34, 4  ;;  %v789_v39 = vmul.f32 %v757_v34, %v757_v34  ;;  %v771_v40 = vrot.slane %v758_v35, 4  ;;  %v790_v41 = vmul.f32 %v758_v35, %v758_v35 }
  0xeb   : > { %762 = vst [vmem:[%s1566_s2 + $0x8] sm:$0xff] %v758_v35  ;;  %v777_v43 = vrot.slane %v759_v36, 4  ;;  %v791_v44 = vmul.f32 %v759_v36, %v759_v36  ;;  %v818_v2 = vshrl.u32 %v817_v37, 7 }
  0xec   : > { %v760_v42 = vld [vmem:[#allocation2 + $0x8] sm:$0xff]  ;;  %v766_v47 = vadd.f32 %v765_v38, %v757_v34  ;;  %v793_v48 = vrot.slane %v789_v39, 4  ;;  %v772_v49 = vadd.f32 %v771_v40, %v758_v35  ;;  %v799_v50 = vrot.slane %v790_v41, 4  ;;  %763 = vst [vmem:[%s1566_s2 + $0x10] sm:$0xff] %v759_v36 }
  0xed   : > { %v783_v45 = vrot.slane %v760_v42, 4  ;;  %v792_v46 = vmul.f32 %v760_v42, %v760_v42  ;;  %v778_v51 = vadd.f32 %v777_v43, %v759_v36  ;;  %v805_v52 = vrot.slane %v791_v44, 4  ;;  %764 = vst [vmem:[%s1566_s2 + $0x18] sm:$0xff] %v760_v42 }
  0xee   : > { %v767_v56 = vrot.slane %v766_v47, 2  ;;  %v794_v58 = vadd.f32 %v793_v48, %v789_v39  ;;  %v773_v59 = vrot.slane %v772_v49, 2  ;;  %v800_v60 = vadd.f32 %v799_v50, %v790_v41 }
  0xef   : > { %v784_v53 = vadd.f32 %v783_v45, %v760_v42  ;;  %v811_v55 = vrot.slane %v792_v46, 4  ;;  %v779_v61 = vrot.slane %v778_v51, 2  ;;  %v806_v62 = vadd.f32 %v805_v52, %v791_v44 }
  0xf0   : > { %v768_v0 = vadd.f32 %v767_v56, %v766_v47  ;;  %v795_v1 = vrot.slane %v794_v58, 2  ;;  %v774_v3 = vadd.f32 %v773_v59, %v772_v49  ;;  %v801_v4 = vrot.slane %v800_v60, 2 }
  0xf1   : > { %v785_v63 = vrot.slane %v784_v53, 2  ;;  %v780_v5 = vadd.f32 %v779_v61, %v778_v51  ;;  %v807_v6 = vrot.slane %v806_v62, 2  ;;  %v812_v10 = vadd.f32 %v811_v55, %v792_v46 }
  0xf2   : > { %v769_v7 = vrot.slane %v768_v0, 1  ;;  %v796_v8 = vadd.f32 %v795_v1, %v794_v58  ;;  %v775_v11 = vrot.slane %v774_v3, 1  ;;  %v802_v12 = vadd.f32 %v801_v4, %v800_v60 }
  0xf3   : > { %v786_v9 = vadd.f32 %v785_v63, %v784_v53  ;;  %v781_v13 = vrot.slane %v780_v5, 1  ;;  %v808_v14 = vadd.f32 %v807_v6, %v806_v62  ;;  %vm819_vm0 = vcmp.eq.s32.totalorder %v818_v2, 0 }
  0xf4   : > { %v797_v15 = vrot.slane %v796_v8, 1  ;;  %vm820_vm1 = vcmp.eq.s32.totalorder %v818_v2, 1  ;;  %v813_v16 = vrot.slane %v812_v10, 2  ;;  %v770_v17 = vadd.f32 %v769_v7, %v768_v0 }
  0xf5   : > { %v803_v18 = vrot.slane %v802_v12, 1  ;;  %v809_v19 = vrot.slane %v808_v14, 1  ;;  %v787_v20 = vrot.slane %v786_v9, 1  ;;  %v776_v22 = vadd.f32 %v775_v11, %v774_v3 }
  0xf6   : > { %v798_v21 = vadd.f32 %v797_v15, %v796_v8  ;;  %v782_v54 = vadd.f32 %v781_v13, %v780_v5  ;;  %v814_v23 = vadd.f32 %v813_v16, %v812_v10 }
  0xf7   : > { %v804_v57 = vadd.f32 %v803_v18, %v802_v12  ;;  %v810_v24 = vadd.f32 %v809_v19, %v808_v14  ;;  %v788_v30 = vadd.f32 %v787_v20, %v786_v9 }
  0xf8   : > { %v821_v25 = vsel %vm820_vm1, %v798_v21, 0.0  ;;  %v815_v26 = vrot.slane %v814_v23, 1 }
  0xf9   : > { %v825_v27 = vsel %vm819_vm0, %v770_v17, %v821_v25  ;;  %v822_v28 = vsel %vm820_vm1, %v804_v57, 0.0  ;;  %v823_v29 = vsel %vm820_vm1, %v810_v24, 0.0 }
  0xfa   : > { %829 = vst [vmem:[%s1567_s3] sm:$0xff] %v825_v27  ;;  %v826_v31 = vsel %vm819_vm0, %v776_v22, %v822_v28  ;;  %v827_v32 = vsel %vm819_vm0, %v782_v54, %v823_v29  ;;  %v816_v33 = vadd.f32 %v815_v26, %v814_v23 }
  0xfb   : > { %830 = vst [vmem:[%s1567_s3 + $0x8] sm:$0xff] %v826_v31 }
  0xfc   : > { %831 = vst [vmem:[%s1567_s3 + $0x10] sm:$0xff] %v827_v32  ;;  %v824_v34 = vsel %vm820_vm1, %v816_v33, 0.0 }
  0xfd   : > { %v828_v35 = vsel %vm819_vm0, %v788_v30, %v824_v34 }
  0xfe   : > { %832 = vst [vmem:[%s1567_s3 + $0x18] sm:$0xff] %v828_v35 }
  0xff PF: > { %s14_s14 = sadd.s32 1, %s1325_s14   ;;  %s1568_s12 = smov %s1321_s13 }
 0x100   : > { %p11_p8 = scmp.ge.s32.totalorder %s14_s14, 11   ;;  %s1569_s13 = smov %s1571_s15 }
 0x102   :  { %13 = sbr.rel (!%p11_p8) target bundleno = 2 (0x2), region = 81 }

// kernel: resnet_backbone_forward.78
= control target key start
LH: loop header
LB: loop body
LE: loop exit
PB: predicated region body
PF: predicated region fallthrough
CT: control target
= control target key end

     0   :  { %s136_s0 = inlined_call_operand.vmem [shape: f32[8,512], index: 0, kind: input, shape index: {}]   ;;  %s137_s1 = inlined_call_operand.vmem [shape: f32[1,512], index: 1, kind: input, shape index: {}]   ;;  %s138_s2 = inlined_call_operand.vmem [shape: f32[1,512], index: 2, kind: input, shape index: {}]   ;;  %s139_s3 = inlined_call_operand.vmem [shape: f32[8,512], index: 3, kind: input, shape index: {}]   ;;  %s140_s4 = inlined_call_operand.vmem [shape: f32[8,512], index: 4, kind: output, shape index: {}]  }
   0x1   :  { %v17_v0 = vld [vmem:[%s136_s0] sm:$0xff]  ;;  %v18_v5 = vld [vmem:[%s136_s0 + $0x8] sm:$0xff]  ;;  %v19_v8 = vld [vmem:[%s136_s0 + $0x10] sm:$0xff] }
   0x2   :  { %v21_v1 = vld [vmem:[%s137_s1] sm:$0xf]  ;;  %v20_v14 = vld [vmem:[%s136_s0 + $0x18] sm:$0xff]  ;;  %v50_v17 = vld [vmem:[%s139_s3 + $0x8] sm:$0xff] }
   0x3   :  { %v35_v2 = vld [vmem:[%s138_s2] sm:$0xf]  ;;  %v23_v3 = vperm.slane %v21_v1, 0  ;;  %v24_v6 = vperm.slane %v21_v1, 1  ;;  %v25_v9 = vperm.slane %v21_v1, 2  ;;  %v26_v11 = vperm.slane %v21_v1, 3 }
   0x4   :  { %v37_v4 = vperm.slane %v35_v2, 0  ;;  %v38_v7 = vperm.slane %v35_v2, 1  ;;  %v39_v10 = vperm.slane %v35_v2, 2  ;;  %v40_v15 = vperm.slane %v35_v2, 3  ;;  %v49_v16 = vld [vmem:[%s139_s3] sm:$0xff]  ;;  %v51_v22 = vld [vmem:[%s139_s3 + $0x10] sm:$0xff] }
   0x5   :  { %v31_v12 = vmul.f32 %v23_v3, %v17_v0  ;;  %v32_v13 = vmul.f32 %v24_v6, %v18_v5  ;;  %v33_v18 = vmul.f32 %v25_v9, %v19_v8  ;;  %v34_v19 = vmul.f32 %v26_v11, %v20_v14  ;;  %v52_v23 = vld [vmem:[%s139_s3 + $0x18] sm:$0xff] }
   0x7   :  { %v45_v20 = vadd.f32 %v37_v4, %v31_v12  ;;  %v46_v21 = vadd.f32 %v38_v7, %v32_v13  ;;  %v47_v24 = vadd.f32 %v39_v10, %v33_v18  ;;  %v48_v25 = vadd.f32 %v40_v15, %v34_v19 }
   0x9   :  { %v53_v26 = vadd.f32 %v49_v16, %v45_v20  ;;  %v54_v27 = vadd.f32 %v50_v17, %v46_v21  ;;  %v55_v28 = vadd.f32 %v51_v22, %v47_v24  ;;  %v56_v29 = vadd.f32 %v52_v23, %v48_v25 }
   0xb   :  { %v57_v30 = vmax.f32 %v53_v26, 0.0  ;;  %v58_v31 = vmax.f32 %v54_v27, 0.0  ;;  %v59_v32 = vmax.f32 %v55_v28, 0.0  ;;  %v60_v33 = vmax.f32 %v56_v29, 0.0 }
   0xd   :  { %61 = vst [vmem:[%s140_s4] sm:$0xff] %v57_v30 }
   0xe   :  { %62 = vst [vmem:[%s140_s4 + $0x8] sm:$0xff] %v58_v31 }
   0xf   :  { %63 = vst [vmem:[%s140_s4 + $0x10] sm:$0xff] %v59_v32 }
  0x10   :  { %64 = vst [vmem:[%s140_s4 + $0x18] sm:$0xff] %v60_v33 }

// kernel: resnet_backbone_forward.83
= control target key start
LH: loop header
LB: loop body
LE: loop exit
PB: predicated region body
PF: predicated region fallthrough
CT: control target
= control target key end

     0   :  { %s84_s0 = inlined_call_operand.vmem [shape: f32[2,1,512], index: 0, kind: input, shape index: {}]   ;;  %s85_s1 = inlined_call_operand.hbm [shape: f32[2,512], index: 1, kind: output, shape index: {}]  }
   0x1   :  { %v9_v0 = vld [vmem:[%s84_s0] sm:$0xf]  ;;  %v10_v1 = vld [vmem:[%s84_s0 + $0x4] sm:$0xf] }
   0x2   :  { %6 = vsyncpa [#allocation3], 0  ;;  %15 = vst [vmem:[#allocation1] ss:$2 sm:$0xff] %v9_v0  ;;  %s64_s10 = smov [#allocation2]   ;;  %s28_s14 = sshll.u32 %s85_s1, 4  ;;  %s29_s14 = int_to_ptr.hbm [resolvable:$true] %s28_s14 }
   0x3   :  { %17 = vst [vmem:[#allocation1 + $0x1] ss:$2 sm:$0xff] %v10_v1  ;;  %s26_s11 = sshll.u32 %s64_s10, 4  ;;  %s27_s11 = int_to_ptr.vmem [resolvable:$true] %s26_s11 }
   0xa   :  { %v18_v2 = vld [vmem:[#allocation1] sm:$0xff] }
   0xb   :  { %20 = vst [vmem:[#allocation2] sm:$0xff] %v18_v2 }
   0xc   :  { %31 = dma.vmem_to_hbm [thread:$0]  %s27_s11, 128, %s29_s14, [#allocation3]  }
   0xd   :  { %62 = dma.done.wait [#allocation3], 128  }
   0xe   :  { %63 = vsyncadd [#allocation3], 4294967168 }
   0xf   :  { %36 = vsyncpa [#allocation3], 1 }

// kernel: resnet_backbone_forward.77
= control target key start
LH: loop header
LB: loop body
LE: loop exit
PB: predicated region body
PF: predicated region fallthrough
CT: control target
= control target key end

     0   :  { %s1348_s12 = smov 0   ;;  %s1350_s13 = smov 0   ;;  %s1564_s0 = inlined_call_operand.vmem [shape: bf16[8,4608], index: 0, kind: input, shape index: {}]   ;;  %s1565_s1 = inlined_call_operand.vmem [shape: bf16[4608,512], index: 1, kind: input, shape index: {}]   ;;  %s1566_s2 = inlined_call_operand.vmem [shape: f32[8,512], index: 2, kind: output, shape index: {0}]   ;;  %s1567_s3 = inlined_call_operand.vmem [shape: f32[8,512], index: 3, kind: output, shape index: {1}]  }
   0x1   :  { %s1352_s14 = smov 0  }
   0x2 LB: > { %s23_s15 = sadd.s32 1, %s1321_s13  ;;  %p945_p0 = scmp.ge.s32.totalorder %s1325_s14, 1  ;;  %s1325_s14 = sphi %s1352_s14, %s14_s14   ;;  %s1321_s13 = sphi %s1350_s13, %s1569_s13   ;;  %s1317_s12 = sphi %s1348_s12, %s1568_s12  }
   0x3   : > { %p24_p1 = scmp.ge.s32.totalorder %s23_s15, 18  ;;  %p171_p2 = scmp.lt.s32.totalorder %s1325_s14, 19 }
   0x5   : > { %s1571_s15 = smov (%p24_p1, %s23_s15), 0  ;;  %p172_p3 = pnand %p945_p0, %p171_p2 }
   0x6   : > { %s946_s16 = sshll.u32 (!%p172_p3), %s1317_s12, 1  ;;  %s948_s17 = sshll.u32 (!%p172_p3), %s1317_s12, 5 }
   0x7   : > { %175 = sbr.rel (%p172_p3) target bundleno = 255 (0xff), region = 28  ;;  %p213_p4 = scmp.lt.s32.totalorder (!%p172_p3), %s946_s16, 35 }
   0x8   : > { %p221_p5 = scmp.lt.s32.totalorder (!%p172_p3), %s948_s17, 575  ;;  %p951_p6 = scmp.ne.s32.totalorder (!%p172_p3), %s1317_s12, 0 }
   0xc   : > { %s1573_s16 = smov (!%p213_p4, %s946_s16), 35  ;;  %s1575_s17 = smov (!%p221_p5, %s948_s17), 575 }
   0xd   : > { %s947_s18 = sshll.u32 %s1573_s16, 2  ;;  %s1213_s22 = sshll.u32 %s1575_s17, 4 }
   0xe   : > { %s1373_s21 = scalar_lea.vmem %s1564_s0, %s947_s18  ;;  %s1378_s25 = scalar_lea.vmem %s1565_s1, %s1213_s22 }
   0xf   : > { %240 = sbr.rel (%p951_p6) target bundleno = 25 (0x19), region = 32 }
  0x14   : > { %v1327_v0 = vmov 0.0  }
  0x15   : > { %241 = vst [vmem:[#allocation2 + $0x10] sm:$0xff] %v1327_v0 }
  0x16   : > { %242 = vst [vmem:[#allocation2] sm:$0xff] %v1327_v0 }
  0x17   : > { %243 = vst [vmem:[#allocation2 + $0x18] sm:$0xff] %v1327_v0 }
  0x18   : > { %244 = vst [vmem:[#allocation2 + $0x8] sm:$0xff] %v1327_v0 }
  0x19 PF: > { %v1066_v1 = vld [vmem:[%s1378_s25 + $0xe0] sm:$0xf]  ;;  %v1244_v2 = vld [vmem:[%s1378_s25 + $0xec] sm:$0xf0]  ;;  %v1242_v6 = vld [vmem:[%s1378_s25 + $0xe4] sm:$0xf] }
  0x1a   : > { %v1194_v3 = vld [vmem:[%s1378_s25 + $0x1e0] sm:$0xf]  ;;  %v1067_v4 = vor.u32 %v1244_v2, %v1066_v1  ;;  %v1276_v5 = vld [vmem:[%s1378_s25 + $0x1ec] sm:$0xf0]  ;;  %v1068_v7 = vld [vmem:[%s1378_s25 + $0xf0] sm:$0xf0] }
  0x1b   : > { %v1195_v8 = vor.u32 %v1276_v5, %v1194_v3  ;;  %v1071_v9 = vor.u32 %v1242_v6, %v1068_v7  ;;  %v1274_v10 = vld [vmem:[%s1378_s25 + $0x1e4] sm:$0xf]  ;;  %v1196_v11 = vld [vmem:[%s1378_s25 + $0x1f0] sm:$0xf0]  ;;  %v1050_v12 = vld [vmem:[%s1378_s25 + $0xc0] sm:$0xf] }
  0x1c   : > { %641 = vmatpush.bf16.msra.mxu0 %v1067_v4  ;;  %v1199_v13 = vor.u32 %v1274_v10, %v1196_v11  ;;  %v1240_v14 = vld [vmem:[%s1378_s25 + $0xcc] sm:$0xf0]  ;;  %v1178_v15 = vld [vmem:[%s1378_s25 + $0x1c0] sm:$0xf]  ;;  %v1238_v19 = vld [vmem:[%s1378_s25 + $0xc4] sm:$0xf] }
  0x1d   : > { %v1272_v16 = vld [vmem:[%s1378_s25 + $0x1cc] sm:$0xf0]  ;;  %654 = vmatpush.bf16.msra.mxu1 %v1195_v8  ;;  %667 = vmatpush.bf16.msra.mxu2 %v1071_v9  ;;  %v1051_v17 = vor.u32 %v1240_v14, %v1050_v12  ;;  %v1052_v20 = vld [vmem:[%s1378_s25 + $0xd0] sm:$0xf0]  ;;  %v1270_v21 = vld [vmem:[%s1378_s25 + $0x1c4] sm:$0xf] }
  0x1e   : > { %v1179_v18 = vor.u32 %v1272_v16, %v1178_v15  ;;  %680 = vmatpush.bf16.msra.mxu3 %v1199_v13  ;;  %v1055_v22 = vor.u32 %v1238_v19, %v1052_v20  ;;  %v1180_v23 = vld [vmem:[%s1378_s25 + $0x1d0] sm:$0xf0]  ;;  %v1034_v24 = vld [vmem:[%s1378_s25 + $0xa0] sm:$0xf]  ;;  %v1236_v25 = vld [vmem:[%s1378_s25 + $0xac] sm:$0xf0] }
  0x1f   : > { %v1183_v26 = vor.u32 %v1270_v21, %v1180_v23  ;;  %v1162_v27 = vld [vmem:[%s1378_s25 + $0x1a0] sm:$0xf]  ;;  %v1268_v28 = vld [vmem:[%s1378_s25 + $0x1ac] sm:$0xf0]  ;;  %v1234_v29 = vld [vmem:[%s1378_s25 + $0xa4] sm:$0xf]  ;;  %v1035_v30 = vor.u32 %v1236_v25, %v1034_v24 }
  0x20   : > { %642 = vmatpush.bf16.msra.mxu0 %v1051_v17  ;;  %v1036_v31 = vld [vmem:[%s1378_s25 + $0xb0] sm:$0xf0]  ;;  %v1266_v32 = vld [vmem:[%s1378_s25 + $0x1a4] sm:$0xf]  ;;  %v1163_v34 = vor.u32 %v1268_v28, %v1162_v27  ;;  %v1018_v36 = vld [vmem:[%s1378_s25 + $0x80] sm:$0xf] }
  0x21   : > { %v1164_v33 = vld [vmem:[%s1378_s25 + $0x1b0] sm:$0xf0]  ;;  %655 = vmatpush.bf16.msra.mxu1 %v1179_v18  ;;  %668 = vmatpush.bf16.msra.mxu2 %v1055_v22  ;;  %v1039_v35 = vor.u32 %v1234_v29, %v1036_v31  ;;  %v1232_v37 = vld [vmem:[%s1378_s25 + $0x8c] sm:$0xf0]  ;;  %v1146_v38 = vld [vmem:[%s1378_s25 + $0x180] sm:$0xf] }
  0x22   : > { %681 = vmatpush.bf16.msra.mxu3 %v1183_v26  ;;  %v1167_v39 = vor.u32 %v1266_v32, %v1164_v33  ;;  %v1264_v40 = vld [vmem:[%s1378_s25 + $0x18c] sm:$0xf0]  ;;  %v1230_v41 = vld [vmem:[%s1378_s25 + $0x84] sm:$0xf]  ;;  %v1020_v42 = vld [vmem:[%s1378_s25 + $0x90] sm:$0xf0]  ;;  %v1019_v45 = vor.u32 %v1232_v37, %v1018_v36 }
  0x23   : > { %v1262_v43 = vld [vmem:[%s1378_s25 + $0x184] sm:$0xf]  ;;  %v1148_v44 = vld [vmem:[%s1378_s25 + $0x190] sm:$0xf0]  ;;  %v1147_v46 = vor.u32 %v1264_v40, %v1146_v38  ;;  %v1023_v47 = vor.u32 %v1230_v41, %v1020_v42  ;;  %v1002_v48 = vld [vmem:[%s1378_s25 + $0x60] sm:$0xf] }
  0x24   : > { %643 = vmatpush.bf16.msra.mxu0 %v1035_v30  ;;  %v1228_v49 = vld [vmem:[%s1378_s25 + $0x6c] sm:$0xf0]  ;;  %v1130_v50 = vld [vmem:[%s1378_s25 + $0x160] sm:$0xf]  ;;  %v1151_v51 = vor.u32 %v1262_v43, %v1148_v44  ;;  %v1226_v53 = vld [vmem:[%s1378_s25 + $0x64] sm:$0xf] }
  0x25   : > { %656 = vmatpush.bf16.msra.mxu1 %v1163_v34  ;;  %669 = vmatpush.bf16.msra.mxu2 %v1039_v35  ;;  %v1260_v52 = vld [vmem:[%s1378_s25 + $0x16c] sm:$0xf0]  ;;  %v1004_v54 = vld [vmem:[%s1378_s25 + $0x70] sm:$0xf0]  ;;  %v1258_v55 = vld [vmem:[%s1378_s25 + $0x164] sm:$0xf]  ;;  %v1003_v57 = vor.u32 %v1228_v49, %v1002_v48 }
  0x26   : > { %682 = vmatpush.bf16.msra.mxu3 %v1167_v39  ;;  %v1132_v56 = vld [vmem:[%s1378_s25 + $0x170] sm:$0xf0]  ;;  %v1131_v58 = vor.u32 %v1260_v52, %v1130_v50  ;;  %v1007_v59 = vor.u32 %v1226_v53, %v1004_v54  ;;  %v986_v60 = vld [vmem:[%s1378_s25 + $0x40] sm:$0xf]  ;;  %v1224_v61 = vld [vmem:[%s1378_s25 + $0x4c] sm:$0xf0] }
  0x27   : > { %v1114_v62 = vld [vmem:[%s1378_s25 + $0x140] sm:$0xf]  ;;  %v1135_v63 = vor.u32 %v1258_v55, %v1132_v56  ;;  %v1256_v0 = vld [vmem:[%s1378_s25 + $0x14c] sm:$0xf0]  ;;  %v1222_v1 = vld [vmem:[%s1378_s25 + $0x44] sm:$0xf]  ;;  %v987_v5 = vor.u32 %v1224_v61, %v986_v60 }
  0x28   : > { %644 = vmatpush.bf16.msra.mxu0 %v1019_v45  ;;  %v988_v2 = vld [vmem:[%s1378_s25 + $0x50] sm:$0xf0]  ;;  %v1254_v3 = vld [vmem:[%s1378_s25 + $0x144] sm:$0xf]  ;;  %v1115_v6 = vor.u32 %v1256_v0, %v1114_v62  ;;  %v970_v8 = vld [vmem:[%s1378_s25 + $0x20] sm:$0xf] }
  0x29   : > { %657 = vmatpush.bf16.msra.mxu1 %v1147_v46  ;;  %670 = vmatpush.bf16.msra.mxu2 %v1023_v47  ;;  %v1116_v4 = vld [vmem:[%s1378_s25 + $0x150] sm:$0xf0]  ;;  %v991_v7 = vor.u32 %v1222_v1, %v988_v2  ;;  %v1220_v9 = vld [vmem:[%s1378_s25 + $0x2c] sm:$0xf0]  ;;  %v1098_v10 = vld [vmem:[%s1378_s25 + $0x120] sm:$0xf] }
  0x2a   : > { %683 = vmatpush.bf16.msra.mxu3 %v1151_v51  ;;  %v1119_v11 = vor.u32 %v1254_v3, %v1116_v4  ;;  %v1252_v12 = vld [vmem:[%s1378_s25 + $0x12c] sm:$0xf0]  ;;  %v1218_v13 = vld [vmem:[%s1378_s25 + $0x24] sm:$0xf]  ;;  %v972_v14 = vld [vmem:[%s1378_s25 + $0x30] sm:$0xf0]  ;;  %v971_v17 = vor.u32 %v1220_v9, %v970_v8 }
  0x2b   : > { %v1250_v15 = vld [vmem:[%s1378_s25 + $0x124] sm:$0xf]  ;;  %v1100_v16 = vld [vmem:[%s1378_s25 + $0x130] sm:$0xf0]  ;;  %v954_v18 = vld [vmem:[%s1378_s25] sm:$0xf]  ;;  %v1099_v21 = vor.u32 %v1252_v12, %v1098_v10  ;;  %v975_v22 = vor.u32 %v1218_v13, %v972_v14 }
  0x2c   : > { %645 = vmatpush.bf16.msra.mxu0 %v1003_v57  ;;  %v1216_v19 = vld [vmem:[%s1378_s25 + $0xc] sm:$0xf0]  ;;  %v1082_v20 = vld [vmem:[%s1378_s25 + $0x100] sm:$0xf]  ;;  %v1214_v24 = vld [vmem:[%s1378_s25 + $0x4] sm:$0xf]  ;;  %v1103_v26 = vor.u32 %v1250_v15, %v1100_v16 }
  0x2d   : > { %658 = vmatpush.bf16.msra.mxu1 %v1131_v58  ;;  %671 = vmatpush.bf16.msra.mxu2 %v1007_v59  ;;  %v1248_v23 = vld [vmem:[%s1378_s25 + $0x10c] sm:$0xf0]  ;;  %v956_v25 = vld [vmem:[%s1378_s25 + $0x10] sm:$0xf0]  ;;  %v1246_v27 = vld [vmem:[%s1378_s25 + $0x104] sm:$0xf]  ;;  %v955_v33 = vor.u32 %v1216_v19, %v954_v18 }
  0x2e   : > { %684 = vmatpush.bf16.msra.mxu3 %v1135_v63  ;;  %v1084_v28 = vld [vmem:[%s1378_s25 + $0x110] sm:$0xf0]  ;;  %v1074_v29 = vld [vmem:[%s1378_s25 + $0xe8] sm:$0xf]  ;;  %v1245_v30 = vld [vmem:[%s1378_s25 + $0xf4] sm:$0xf0]  ;;  %v1083_v38 = vor.u32 %v1248_v23, %v1082_v20  ;;  %v959_v39 = vor.u32 %v1214_v24, %v956_v25 }
  0x2f   : > { %v1202_v31 = vld [vmem:[%s1378_s25 + $0x1e8] sm:$0xf]  ;;  %v249_v32 = vld [vmem:[%s1373_s21] sm:$0xff]  ;;  %v1277_v34 = vld [vmem:[%s1378_s25 + $0x1f4] sm:$0xf0]  ;;  %v1087_v43 = vor.u32 %v1246_v27, %v1084_v28  ;;  %v1075_v44 = vor.u32 %v1245_v30, %v1074_v29  ;;  %p1208_p7 = scmp.ne.s32.totalorder %s1317_s12, 17 }
  0x30   : > { %646 = vmatpush.bf16.msra.mxu0 %v987_v5  ;;  %v1243_v35 = vld [vmem:[%s1378_s25 + $0xec] sm:$0xf]  ;;  %v1076_v36 = vld [vmem:[%s1378_s25 + $0xf8] sm:$0xf0]  ;;  %v315_v37 = vunpack.c.l.b16 %v249_v32  ;;  %v316_v42 = vunpack.c.h.b16 %v249_v32  ;;  %v1203_v45 = vor.u32 %v1277_v34, %v1202_v31  ;;  %v1058_v47 = vld [vmem:[%s1378_s25 + $0xc8] sm:$0xf] }
  0x31   : > { %659 = vmatpush.bf16.msra.mxu1 %v1115_v6  ;;  %672 = vmatpush.bf16.msra.mxu2 %v991_v7  ;;  %v1275_v40 = vld [vmem:[%s1378_s25 + $0x1ec] sm:$0xf]  ;;  %v1204_v41 = vld [vmem:[%s1378_s25 + $0x1f8] sm:$0xf0]  ;;  %v1079_v46 = vor.u32 %v1243_v35, %v1076_v36  ;;  %v1241_v48 = vld [vmem:[%s1378_s25 + $0xd4] sm:$0xf0] }
  0x32   : > { %685 = vmatpush.bf16.msra.mxu3 %v1119_v11  ;;  %v1186_v49 = vld [vmem:[%s1378_s25 + $0x1c8] sm:$0xf]  ;;  %v1207_v50 = vor.u32 %v1275_v40, %v1204_v41  ;;  %v1273_v51 = vld [vmem:[%s1378_s25 + $0x1d4] sm:$0xf0]  ;;  %v1239_v52 = vld [vmem:[%s1378_s25 + $0xcc] sm:$0xf]  ;;  %v1460_v54 = vpack.c.b16 %v315_v37, %v315_v37  ;;  %v1464_v57 = vpack.c.b16 %v316_v42, %v316_v42  ;;  %v1059_v58 = vor.u32 %v1241_v48, %v1058_v47 }
  0x33   : > { %v1060_v53 = vld [vmem:[%s1378_s25 + $0xd8] sm:$0xf0]  ;;  %v1271_v55 = vld [vmem:[%s1378_s25 + $0x1cc] sm:$0xf]  ;;  %v1187_v59 = vor.u32 %v1273_v51, %v1186_v49  ;;  %v1042_v61 = vld [vmem:[%s1378_s25 + $0xa8] sm:$0xf] }
  0x34   : > { %647 = vmatpush.bf16.msra.mxu0 %v971_v17  ;;  %v1188_v56 = vld [vmem:[%s1378_s25 + $0x1d8] sm:$0xf0]  ;;  %v1063_v60 = vor.u32 %v1239_v52, %v1060_v53  ;;  %v1237_v62 = vld [vmem:[%s1378_s25 + $0xb4] sm:$0xf0]  ;;  %v1170_v63 = vld [vmem:[%s1378_s25 + $0x1a8] sm:$0xf] }
  0x35   : > { %660 = vmatpush.bf16.msra.mxu1 %v1099_v21  ;;  %673 = vmatpush.bf16.msra.mxu2 %v975_v22  ;;  %v1191_v0 = vor.u32 %v1271_v55, %v1188_v56  ;;  %v1269_v1 = vld [vmem:[%s1378_s25 + $0x1b4] sm:$0xf0]  ;;  %v1235_v2 = vld [vmem:[%s1378_s25 + $0xac] sm:$0xf]  ;;  %v1044_v3 = vld [vmem:[%s1378_s25 + $0xb8] sm:$0xf0]  ;;  %v1043_v6 = vor.u32 %v1237_v62, %v1042_v61 }
  0x36   : > { %686 = vmatpush.bf16.msra.mxu3 %v1103_v26  ;;  %v1267_v4 = vld [vmem:[%s1378_s25 + $0x1ac] sm:$0xf]  ;;  %v1172_v5 = vld [vmem:[%s1378_s25 + $0x1b8] sm:$0xf0]  ;;  %v1171_v7 = vor.u32 %v1269_v1, %v1170_v63  ;;  %v1047_v8 = vor.u32 %v1235_v2, %v1044_v3  ;;  %v1026_v9 = vld [vmem:[%s1378_s25 + $0x88] sm:$0xf] }
  0x37   : > { %v1233_v10 = vld [vmem:[%s1378_s25 + $0x94] sm:$0xf0]  ;;  %v1154_v11 = vld [vmem:[%s1378_s25 + $0x188] sm:$0xf]  ;;  %v1175_v12 = vor.u32 %v1267_v4, %v1172_v5  ;;  %v1231_v14 = vld [vmem:[%s1378_s25 + $0x8c] sm:$0xf] }
  0x38   : > { %648 = vmatpush.bf16.msra.mxu0 %v955_v33  ;;  %v1265_v13 = vld [vmem:[%s1378_s25 + $0x194] sm:$0xf0]  ;;  %v1028_v15 = vld [vmem:[%s1378_s25 + $0x98] sm:$0xf0]  ;;  %v1263_v16 = vld [vmem:[%s1378_s25 + $0x18c] sm:$0xf]  ;;  %v1027_v18 = vor.u32 %v1233_v10, %v1026_v9 }
  0x39   : > { %661 = vmatpush.bf16.msra.mxu1 %v1083_v38  ;;  %674 = vmatpush.bf16.msra.mxu2 %v959_v39  ;;  %v1156_v17 = vld [vmem:[%s1378_s25 + $0x198] sm:$0xf0]  ;;  %v1155_v19 = vor.u32 %v1265_v13, %v1154_v11  ;;  %v1031_v20 = vor.u32 %v1231_v14, %v1028_v15  ;;  %v1010_v21 = vld [vmem:[%s1378_s25 + $0x68] sm:$0xf]  ;;  %v1229_v22 = vld [vmem:[%s1378_s25 + $0x74] sm:$0xf0] }
  0x3a   : > { %687 = vmatpush.bf16.msra.mxu3 %v1087_v43  ;;  %v1138_v23 = vld [vmem:[%s1378_s25 + $0x168] sm:$0xf]  ;;  %v1159_v24 = vor.u32 %v1263_v16, %v1156_v17  ;;  %v1261_v25 = vld [vmem:[%s1378_s25 + $0x174] sm:$0xf0]  ;;  %v1227_v26 = vld [vmem:[%s1378_s25 + $0x6c] sm:$0xf]  ;;  %v1011_v30 = vor.u32 %v1229_v22, %v1010_v21 }
  0x3b   : > { %649 = vmatmul.bf16.vlgmr.msra.gmra.mxu0 %v1460_v54  ;;  %v1012_v27 = vld [vmem:[%s1378_s25 + $0x78] sm:$0xf0]  ;;  %v1259_v28 = vld [vmem:[%s1378_s25 + $0x16c] sm:$0xf]  ;;  %v1139_v31 = vor.u32 %v1261_v25, %v1138_v23  ;;  %v994_v33 = vld [vmem:[%s1378_s25 + $0x48] sm:$0xf] }
  0x3c   : > { %693 = vmatpush.bf16.msrb.mxu0 %v1075_v44  ;;  %675 = vmatmul.bf16.vlgmr.msra.gmra.mxu2 %v1460_v54  ;;  %v1140_v29 = vld [vmem:[%s1378_s25 + $0x178] sm:$0xf0]  ;;  %v1015_v32 = vor.u32 %v1227_v26, %v1012_v27  ;;  %v1225_v34 = vld [vmem:[%s1378_s25 + $0x54] sm:$0xf0]  ;;  %v1122_v35 = vld [vmem:[%s1378_s25 + $0x148] sm:$0xf] }
  0x3d   : > { %706 = vmatpush.bf16.msrb.mxu1 %v1203_v45  ;;  %719 = vmatpush.bf16.msrb.mxu2 %v1079_v46  ;;  %v1143_v36 = vor.u32 %v1259_v28, %v1140_v29  ;;  %v1257_v37 = vld [vmem:[%s1378_s25 + $0x154] sm:$0xf0]  ;;  %v1223_v38 = vld [vmem:[%s1378_s25 + $0x4c] sm:$0xf]  ;;  %v996_v39 = vld [vmem:[%s1378_s25 + $0x58] sm:$0xf0]  ;;  %v995_v42 = vor.u32 %v1225_v34, %v994_v33 }
  0x3e   : > { %732 = vmatpush.bf16.msrb.mxu3 %v1207_v50  ;;  %662 = vmatmul.bf16.vlgmr.msra.gmra.mxu1 %v1464_v57  ;;  %v1255_v40 = vld [vmem:[%s1378_s25 + $0x14c] sm:$0xf]  ;;  %v1124_v41 = vld [vmem:[%s1378_s25 + $0x158] sm:$0xf0]  ;;  %v1123_v43 = vor.u32 %v1257_v37, %v1122_v35  ;;  %v999_v44 = vor.u32 %v1223_v38, %v996_v39  ;;  %v978_v45 = vld [vmem:[%s1378_s25 + $0x28] sm:$0xf] }
  0x3f   : > { %688 = vmatmul.bf16.vlgmr.msra.gmra.mxu3 %v1464_v57  ;;  %v1221_v46 = vld [vmem:[%s1378_s25 + $0x34] sm:$0xf0]  ;;  %v1106_v47 = vld [vmem:[%s1378_s25 + $0x128] sm:$0xf]  ;;  %v1127_v48 = vor.u32 %v1255_v40, %v1124_v41  ;;  %v1219_v50 = vld [vmem:[%s1378_s25 + $0x2c] sm:$0xf] }
  0x40   : > { %694 = vmatpush.bf16.msrb.mxu0 %v1059_v58  ;;  %v1253_v49 = vld [vmem:[%s1378_s25 + $0x134] sm:$0xf0]  ;;  %v980_v51 = vld [vmem:[%s1378_s25 + $0x38] sm:$0xf0]  ;;  %v1251_v52 = vld [vmem:[%s1378_s25 + $0x12c] sm:$0xf]  ;;  %v979_v55 = vor.u32 %v1221_v46, %v978_v45 }
  0x41   : > { %707 = vmatpush.bf16.msrb.mxu1 %v1187_v59  ;;  %720 = vmatpush.bf16.msrb.mxu2 %v1063_v60  ;;  %v1108_v53 = vld [vmem:[%s1378_s25 + $0x138] sm:$0xf0]  ;;  %v1107_v56 = vor.u32 %v1253_v49, %v1106_v47  ;;  %v983_v58 = vor.u32 %v1219_v50, %v980_v51  ;;  %v962_v59 = vld [vmem:[%s1378_s25 + $0x8] sm:$0xf]  ;;  %v1217_v60 = vld [vmem:[%s1378_s25 + $0x14] sm:$0xf0] }
  0x42   : > { %733 = vmatpush.bf16.msrb.mxu3 %v1191_v0  ;;  %v1090_v61 = vld [vmem:[%s1378_s25 + $0x108] sm:$0xf]  ;;  %v1111_v62 = vor.u32 %v1251_v52, %v1108_v53  ;;  %v1249_v63 = vld [vmem:[%s1378_s25 + $0x114] sm:$0xf0]  ;;  %v1215_v0 = vld [vmem:[%s1378_s25 + $0xc] sm:$0xf]  ;;  %v963_v4 = vor.u32 %v1217_v60, %v962_v59 }
  0x43   : > { %v964_v1 = vld [vmem:[%s1378_s25 + $0x18] sm:$0xf0]  ;;  %v1247_v2 = vld [vmem:[%s1378_s25 + $0x10c] sm:$0xf]  ;;  %v1091_v5 = vor.u32 %v1249_v63, %v1090_v61  ;;  %v245_v9 = vld [vmem:[#allocation2 + $0x10] sm:$0xff] }
  0x44   : > { %695 = vmatpush.bf16.msrb.mxu0 %v1043_v6  ;;  %v1092_v3 = vld [vmem:[%s1378_s25 + $0x118] sm:$0xf0]  ;;  %v967_v6 = vor.u32 %v1215_v0, %v964_v1  ;;  %v246_v14 = vld [vmem:[#allocation2] sm:$0xff]  ;;  %v248_v26 = vld [vmem:[#allocation2 + $0x8] sm:$0xff] }
  0x45   : > { %708 = vmatpush.bf16.msrb.mxu1 %v1171_v7  ;;  %721 = vmatpush.bf16.msrb.mxu2 %v1047_v8  ;;  %v1095_v7 = vor.u32 %v1247_v2, %v1092_v3 }
  0x46   : > { %734 = vmatpush.bf16.msrb.mxu3 %v1175_v12 }
  0x48   : > { %696 = vmatpush.bf16.msrb.mxu0 %v1027_v18 }
  0x49   : > { %709 = vmatpush.bf16.msrb.mxu1 %v1155_v19  ;;  %722 = vmatpush.bf16.msrb.mxu2 %v1031_v20 }
  0x4a   : > { %735 = vmatpush.bf16.msrb.mxu3 %v1159_v24 }
  0x4c   : > { %697 = vmatpush.bf16.msrb.mxu0 %v1011_v30 }
  0x4d   : > { %710 = vmatpush.bf16.msrb.mxu1 %v1139_v31  ;;  %723 = vmatpush.bf16.msrb.mxu2 %v1015_v32 }
  0x4e   : > { %736 = vmatpush.bf16.msrb.mxu3 %v1143_v36 }
  0x50   : > { %698 = vmatpush.bf16.msrb.mxu0 %v995_v42 }
  0x51   : > { %711 = vmatpush.bf16.msrb.mxu1 %v1123_v43  ;;  %724 = vmatpush.bf16.msrb.mxu2 %v999_v44 }
  0x52   : > { %737 = vmatpush.bf16.msrb.mxu3 %v1127_v48 }
  0x54   : > { %699 = vmatpush.bf16.msrb.mxu0 %v979_v55 }
  0x55   : > { %712 = vmatpush.bf16.msrb.mxu1 %v1107_v56  ;;  %725 = vmatpush.bf16.msrb.mxu2 %v983_v58 }
  0x56   : > { %738 = vmatpush.bf16.msrb.mxu3 %v1111_v62 }
  0x58   : > { %700 = vmatpush.bf16.msrb.mxu0 %v963_v4 }
  0x59   : > { %713 = vmatpush.bf16.msrb.mxu1 %v1091_v5  ;;  %726 = vmatpush.bf16.msrb.mxu2 %v967_v6 }
  0x5a   : > { %739 = vmatpush.bf16.msrb.mxu3 %v1095_v7 }
  0x5b   : > { %701 = vmatmul.bf16.vlgmr.msrb.gmra.mxu0 %v1460_v54 }
  0x5c   : > { %714 = vmatmul.bf16.vlgmr.msrb.gmra.mxu1 %v1464_v57  ;;  %727 = vmatmul.bf16.vlgmr.msrb.gmra.mxu2 %v1460_v54  ;;  %v247_v54 = vld [vmem:[#allocation2 + $0x18] sm:$0xff] }
  0x5d   : > { %740 = vmatmul.bf16.vlgmr.msrb.gmra.mxu3 %v1464_v57 }
  0xb8   : > { %v650_v8 = vpop.f32.mrf.mxu0 }
  0xbb   : > { %v663_v10 = vpop.f32.mrf.mxu1 }
  0xbc   : > { %v664_v11 = vadd.f32 %v663_v10, %v650_v8 }
  0xbe   : > { %v745_v12 = vadd.f32 %v664_v11, %v245_v9 }
  0xbf   : > { %v676_v13 = vpop.f32.mrf.mxu2 }
  0xc0   : > { %749 = vst [vmem:[#allocation2 + $0x10] sm:$0xff] %v745_v12  ;;  %v652_v17 = vpop.f32.mrf.mxu0 }
  0xc2   : > { %v689_v15 = vpop.f32.mrf.mxu3 }
  0xc3   : > { %v690_v16 = vadd.f32 %v689_v15, %v676_v13  ;;  %v665_v19 = vpop.f32.mrf.mxu1 }
  0xc5   : > { %v746_v18 = vadd.f32 %v690_v16, %v246_v14 }
  0xc7   : > { %750 = vst [vmem:[#allocation2] sm:$0xff] %v746_v18  ;;  %v678_v20 = vpop.f32.mrf.mxu2 }
  0xca   : > { %v691_v21 = vpop.f32.mrf.mxu3 }
  0xd8   : > { %v702_v22 = vpop.f32.mrf.mxu0 }
  0xd9   : > { %v715_v23 = vpop.f32.mrf.mxu1 }
  0xda   : > { %v716_v57 = vadd.f32 %v715_v23, %v702_v22 }
  0xdc   : > { %v747_v24 = vadd.f32 %v716_v57, %v247_v54 }
  0xde   : > { %751 = vst [vmem:[#allocation2 + $0x18] sm:$0xff] %v747_v24 }
  0xdf   : > { %v728_v25 = vpop.f32.mrf.mxu2 }
  0xe0   : > { %v741_v27 = vpop.f32.mrf.mxu3  ;;  %v704_v28 = vpop.f32.mrf.mxu0 }
  0xe1   : > { %v742_v29 = vadd.f32 %v741_v27, %v728_v25  ;;  %v717_v30 = vpop.f32.mrf.mxu1 }
  0xe3   : > { %v748_v31 = vadd.f32 %v742_v29, %v248_v26 }
  0xe4   : > { %756 = sbr.rel (%p1208_p7) target bundleno = 255 (0xff), region = 36 }
  0xe5   : > { %752 = vst [vmem:[#allocation2 + $0x8] sm:$0xff] %v748_v31 }
  0xe7   : > { %v730_v32 = vpop.f32.mrf.mxu2 }
  0xe8   : > { %v743_v33 = vpop.f32.mrf.mxu3 }
  0xe9   : > { %v757_v34 = vld [vmem:[#allocation2 + $0x10] sm:$0xff]  ;;  %v758_v35 = vld [vmem:[#allocation2] sm:$0xff]  ;;  %v759_v36 = vld [vmem:[#allocation2 + $0x18] sm:$0xff]  ;;  %v817_v37 = vlaneseq }
  0xea   : > { %761 = vst [vmem:[%s1566_s2] sm:$0xff] %v757_v34  ;;  %v765_v38 = vrot.slane %v757_v34, 4  ;;  %v789_v39 = vmul.f32 %v757_v34, %v757_v34  ;;  %v771_v40 = vrot.slane %v758_v35, 4  ;;  %v790_v41 = vmul.f32 %v758_v35, %v758_v35 }
  0xeb   : > { %762 = vst [vmem:[%s1566_s2 + $0x8] sm:$0xff] %v758_v35  ;;  %v777_v43 = vrot.slane %v759_v36, 4  ;;  %v791_v44 = vmul.f32 %v759_v36, %v759_v36  ;;  %v818_v2 = vshrl.u32 %v817_v37, 7 }
  0xec   : > { %v760_v42 = vld [vmem:[#allocation2 + $0x8] sm:$0xff]  ;;  %v766_v47 = vadd.f32 %v765_v38, %v757_v34  ;;  %v793_v48 = vrot.slane %v789_v39, 4  ;;  %v772_v49 = vadd.f32 %v771_v40, %v758_v35  ;;  %v799_v50 = vrot.slane %v790_v41, 4  ;;  %763 = vst [vmem:[%s1566_s2 + $0x10] sm:$0xff] %v759_v36 }
  0xed   : > { %v783_v45 = vrot.slane %v760_v42, 4  ;;  %v792_v46 = vmul.f32 %v760_v42, %v760_v42  ;;  %v778_v51 = vadd.f32 %v777_v43, %v759_v36  ;;  %v805_v52 = vrot.slane %v791_v44, 4  ;;  %764 = vst [vmem:[%s1566_s2 + $0x18] sm:$0xff] %v760_v42 }
  0xee   : > { %v767_v56 = vrot.slane %v766_v47, 2  ;;  %v794_v58 = vadd.f32 %v793_v48, %v789_v39  ;;  %v773_v59 = vrot.slane %v772_v49, 2  ;;  %v800_v60 = vadd.f32 %v799_v50, %v790_v41 }
  0xef   : > { %v784_v53 = vadd.f32 %v783_v45, %v760_v42  ;;  %v811_v55 = vrot.slane %v792_v46, 4  ;;  %v779_v61 = vrot.slane %v778_v51, 2  ;;  %v806_v62 = vadd.f32 %v805_v52, %v791_v44 }
  0xf0   : > { %v768_v0 = vadd.f32 %v767_v56, %v766_v47  ;;  %v795_v1 = vrot.slane %v794_v58, 2  ;;  %v774_v3 = vadd.f32 %v773_v59, %v772_v49  ;;  %v801_v4 = vrot.slane %v800_v60, 2 }
  0xf1   : > { %v785_v63 = vrot.slane %v784_v53, 2  ;;  %v780_v5 = vadd.f32 %v779_v61, %v778_v51  ;;  %v807_v6 = vrot.slane %v806_v62, 2  ;;  %v812_v10 = vadd.f32 %v811_v55, %v792_v46 }
  0xf2   : > { %v769_v7 = vrot.slane %v768_v0, 1  ;;  %v796_v8 = vadd.f32 %v795_v1, %v794_v58  ;;  %v775_v11 = vrot.slane %v774_v3, 1  ;;  %v802_v12 = vadd.f32 %v801_v4, %v800_v60 }
  0xf3   : > { %v786_v9 = vadd.f32 %v785_v63, %v784_v53  ;;  %v781_v13 = vrot.slane %v780_v5, 1  ;;  %v808_v14 = vadd.f32 %v807_v6, %v806_v62  ;;  %vm819_vm0 = vcmp.eq.s32.totalorder %v818_v2, 0 }
  0xf4   : > { %v797_v15 = vrot.slane %v796_v8, 1  ;;  %vm820_vm1 = vcmp.eq.s32.totalorder %v818_v2, 1  ;;  %v813_v16 = vrot.slane %v812_v10, 2  ;;  %v770_v17 = vadd.f32 %v769_v7, %v768_v0 }
  0xf5   : > { %v803_v18 = vrot.slane %v802_v12, 1  ;;  %v809_v19 = vrot.slane %v808_v14, 1  ;;  %v787_v20 = vrot.slane %v786_v9, 1  ;;  %v776_v22 = vadd.f32 %v775_v11, %v774_v3 }
  0xf6   : > { %v798_v21 = vadd.f32 %v797_v15, %v796_v8  ;;  %v782_v54 = vadd.f32 %v781_v13, %v780_v5  ;;  %v814_v23 = vadd.f32 %v813_v16, %v812_v10 }
  0xf7   : > { %v804_v57 = vadd.f32 %v803_v18, %v802_v12  ;;  %v810_v24 = vadd.f32 %v809_v19, %v808_v14  ;;  %v788_v30 = vadd.f32 %v787_v20, %v786_v9 }
  0xf8   : > { %v821_v25 = vsel %vm820_vm1, %v798_v21, 0.0  ;;  %v815_v26 = vrot.slane %v814_v23, 1 }
  0xf9   : > { %v825_v27 = vsel %vm819_vm0, %v770_v17, %v821_v25  ;;  %v822_v28 = vsel %vm820_vm1, %v804_v57, 0.0  ;;  %v823_v29 = vsel %vm820_vm1, %v810_v24, 0.0 }
  0xfa   : > { %829 = vst [vmem:[%s1567_s3] sm:$0xff] %v825_v27  ;;  %v826_v31 = vsel %vm819_vm0, %v776_v22, %v822_v28  ;;  %v827_v32 = vsel %vm819_vm0, %v782_v54, %v823_v29  ;;  %v816_v33 = vadd.f32 %v815_v26, %v814_v23 }
  0xfb   : > { %830 = vst [vmem:[%s1567_s3 + $0x8] sm:$0xff] %v826_v31 }
  0xfc   : > { %831 = vst [vmem:[%s1567_s3 + $0x10] sm:$0xff] %v827_v32  ;;  %v824_v34 = vsel %vm820_vm1, %v816_v33, 0.0 }
  0xfd   : > { %v828_v35 = vsel %vm819_vm0, %v788_v30, %v824_v34 }
  0xfe   : > { %832 = vst [vmem:[%s1567_s3 + $0x18] sm:$0xff] %v828_v35 }
  0xff PF: > { %s14_s14 = sadd.s32 1, %s1325_s14   ;;  %s1568_s12 = smov %s1321_s13 }
 0x100   : > { %p11_p8 = scmp.ge.s32.totalorder %s14_s14, 20   ;;  %s1569_s13 = smov %s1571_s15 }
 0x102   :  { %13 = sbr.rel (!%p11_p8) target bundleno = 2 (0x2), region = 81 }

</bundles_post_ra>
